<compile_context>
chip_gen: v7x
topology: tpu7x:2x2x1
jax: 0.10.0
libtpu: 0.0.40
codegen_flags: <defaults>
</compile_context>

<pallas_src>
import functools

import jax
import jax.numpy as jnp
from jax.experimental import pallas as pl
from jax.experimental.pallas import tpu as pltpu


def _round_up(x, m):
    return ((x + m - 1) // m) * m


def _vq_kernel(flat_ref, wd_ref, emb_ref, e2h_ref,
               q_ref, idx_ref, cnt_ref, err_ref,
               *, n_valid, n_inner, dist_precision):
    """One grid step = one (parallel chunk p, inner N tile n); all codebooks.

    flat_ref: (tn, C)        NHWC-flat activations, C = ncb * D
    wd_ref:   (C, ncb*Kp)    block-diagonal stacked codebooks (e_i^T blocks)
    emb_ref:  (ncb, Kp, D)   zero-padded codebooks (for the one-hot lookup)
    e2h_ref:  (1, ncb*Kp)    0.5*||e||^2, +inf on padded codes
    q_ref:    (tn, C)        quantized output, fused channel layout
    idx_ref:  (ncb, tn)      nearest-code indices (lane-dense layout)
    cnt_ref:  (1, ncb, Kp)   per-chunk code-usage counts (accumulated over n)
    err_ref:  (1, 1, 1)      per-chunk sum of squared error (accumulated over n)
    """
    p = pl.program_id(0)
    n = pl.program_id(1)

    # init per-chunk accumulators
    @pl.when(n == 0)
    def _():
        cnt_ref[...] = jnp.zeros_like(cnt_ref)
        err_ref[...] = jnp.zeros_like(err_ref)

    ncb, Kp, D = emb_ref.shape
    tn, C = flat_ref.shape

    x_all = flat_ref[...]                                       # (tn, C)

    # Distance cross-terms for ALL codebooks in one MXU pass over the fused
    # block-diagonal weight.  The per-row ||x||^2 term is dropped (argmin is
    # invariant to it) and ||e||^2 is pre-halved in the wrapper, so
    # dist = 0.5*||e||^2 - x.e has the same argmin as the true distance.
    xe = jnp.dot(x_all, wd_ref[...], preferred_element_type=jnp.float32,
                 precision=dist_precision)                      # (tn, ncb*Kp)
    dist = e2h_ref[...] - xe                                    # (tn, ncb*Kp)

    # Validity mask for rows added by N padding (affects counts/error only;
    # padded output rows are sliced away by the wrapper).
    row0 = (p * n_inner + n) * tn
    rows = row0 + jax.lax.broadcasted_iota(jnp.int32, (tn, 1), 0)
    validf = (rows < n_valid).astype(jnp.float32)               # (tn, 1)

    # Hoisted once per grid step (JAX does not CSE broadcast_in_dim).
    iota_k = jax.lax.broadcasted_iota(jnp.int32, (tn, Kp), 1)   # (tn, Kp)

    direct_q_store = (D % 128 == 0)                             # lane-aligned slices
    q_parts, idx_rows, cnt_rows = [], [], []
    row_err = jnp.zeros((tn, 1), jnp.float32)

    for i in range(ncb):                                        # static unroll
        d_i = dist[:, i * Kp:(i + 1) * Kp]                      # (tn, Kp)
        idx = jnp.argmin(d_i, axis=1).astype(jnp.int32)         # (tn,)
        onehot = (iota_k == idx[:, None]).astype(jnp.float32)   # (tn, Kp)

        # Exact embedding lookup as a one-hot matmul (HIGHEST keeps it exact;
        # equivalent to F.embedding).
        e_i = emb_ref[i]                                        # (Kp, D)
        q = jnp.dot(onehot, e_i, preferred_element_type=jnp.float32,
                    precision=jax.lax.Precision.HIGHEST)        # (tn, D)

        x_i = x_all[:, i * D:(i + 1) * D]                       # (tn, D)
        row_err = row_err + jnp.sum((x_i - q) ** 2, axis=1, keepdims=True)
        cnt_rows.append(jnp.sum(onehot * validf, axis=0)[None, :])   # (1, Kp)
        idx_rows.append(idx[None, :])                                 # (1, tn)

        if direct_q_store:
            q_ref[:, i * D:(i + 1) * D] = q.astype(q_ref.dtype)
        else:
            q_parts.append(q)

    if not direct_q_store:
        q_ref[...] = jnp.concatenate(q_parts, axis=1).astype(q_ref.dtype)
    idx_ref[...] = jnp.concatenate(idx_rows, axis=0)            # (ncb, tn)
    cnt_ref[...] += jnp.concatenate(cnt_rows, axis=0)[None]     # (1, ncb, Kp)
    err_ref[...] += jnp.sum(row_err * validf).reshape(1, 1, 1)


def _select_tiles(N, C, ncb, Kp, D, tile_n):
    """Generation-aware N-tile and VMEM-limit selection (static, trace-time)."""
    try:
        vmem_cap = int(pltpu.get_tpu_info().vmem_capacity_bytes)
    except Exception:  # pragma: no cover - conservative fallback (v7x-sized)
        vmem_cap = 64 * 1024 * 1024
    # headroom below physical capacity; ~96 MiB on 128 MiB parts, ~48 MiB on v7x
    vmem_limit = min((vmem_cap * 3) // 4, 96 * 1024 * 1024)

    def fits(t):
        blocks = 2 * 4 * (2 * t * C + ncb * t)                      # flat+q+idx, 2 bufs
        consts = 2 * 4 * (C * ncb * Kp + ncb * Kp * D + ncb * Kp)   # wd+emb+e2h, 2 bufs
        temps = 4 * t * (2 * ncb * Kp + 2 * Kp + 2 * C)             # xe/dist, iota/onehot, x/q
        return blocks + consts + temps <= vmem_limit // 2

    if tile_n is not None:
        tn = max(128, _round_up(int(tile_n), 128))
    else:
        tn = 128
        for cand in (256, 512, 1024, 2048):
            if cand <= _round_up(N, 128) and fits(cand):
                tn = cand

    n_tiles = -(-N // tn)
    n_par = 2 if (n_tiles >= 2 and n_tiles % 2 == 0) else 1
    n_inner = n_tiles // n_par
    return tn, n_par, n_inner, n_tiles * tn, vmem_limit


@functools.partial(jax.jit,
                   static_argnames=("commitment_cost", "tile_n", "fast_distance"))
def quantize_forward(z, embeddings, commitment_cost=0.25, tile_n=None,
                     fast_distance=True):
    """Forward pass of videogpt Quantize (eval mode, no_flatten=False).

    z:           (B, C, H, W) float, C = n_codebooks * embedding_dim (NCHW)
    embeddings:  (n_codebooks, codes_per_book, embedding_dim) float
    tile_n:      optional N-tile override (rounded up to a multiple of 128);
                 by default it is chosen from the TPU generation's VMEM size.
    fast_distance: use Precision.DEFAULT for the distance matmul (argmin only
                 needs ordering); set False for exact f32 argmin.
    """
    B, C, H, W = z.shape
    ncb, K, D = embeddings.shape
    assert C == ncb * D, "channels must equal n_codebooks * embedding_dim"
    N = B * H * W
    Kp = _round_up(K, 128)

    tn, n_par, n_inner, N_pad, vmem_limit = _select_tiles(N, C, ncb, Kp, D, tile_n)

    f32 = jnp.float32
    emb = embeddings.astype(f32)

    # shift_dim(z, 1, -1) -> NHWC, flattened to (N, C).  This is the only
    # input-side HBM layout pass; the kernel consumes/produces it directly.
    flat = z.transpose(0, 2, 3, 1).reshape(N, C).astype(f32)
    if N_pad > N:
        flat = jnp.pad(flat, ((0, N_pad - N), (0, 0)))

    # Zero-padded codebooks (codes_per_book padded up to a lane multiple).
    emb_p = jnp.zeros((ncb, Kp, D), f32).at[:, :K, :].set(emb)
    # Block-diagonal fused codebook: wd[i*D:(i+1)*D, i*Kp:i*Kp+K] = e_i^T.
    # TODO(synk): for ncb*D > 256 a per-codebook distance matmul would avoid
    # the ncb-fold FLOP overhead of the dense block-diagonal form.
    wd = jnp.zeros((C, ncb * Kp), f32)
    for i in range(ncb):
        wd = wd.at[i * D:(i + 1) * D, i * Kp:i * Kp + K].set(emb[i].T)
    # 0.5*||e||^2 (argmin-equivalent); +inf on padded codes so they never win.
    e2h = jnp.full((ncb, Kp), jnp.inf, f32).at[:, :K].set(
        0.5 * jnp.sum(emb * emb, axis=-1))
    e2h = e2h.reshape(1, ncb * Kp)

    dist_prec = (jax.lax.Precision.DEFAULT if fast_distance
                 else jax.lax.Precision.HIGHEST)
    kernel = functools.partial(_vq_kernel, n_valid=N, n_inner=n_inner,
                               dist_precision=dist_prec)

    out_shapes = (
        jax.ShapeDtypeStruct((N_pad, C), f32),            # quantized (flat, fused)
        jax.ShapeDtypeStruct((ncb, N_pad), jnp.int32),    # indices (lane-dense)
        jax.ShapeDtypeStruct((n_par, ncb, Kp), f32),      # per-chunk counts
        jax.ShapeDtypeStruct((n_par, 1, 1), f32),         # per-chunk sq. error
    )

    q_flat, idx, counts, sq_err = pl.pallas_call(
        kernel,
        out_shape=out_shapes,
        grid_spec=pltpu.PrefetchScalarGridSpec(
            num_scalar_prefetch=0,
            grid=(n_par, n_inner),
            in_specs=[
                pl.BlockSpec((tn, C), lambda p, n: (p * n_inner + n, 0)),
                pl.BlockSpec((C, ncb * Kp), lambda p, n: (0, 0)),       # fused codebook
                pl.BlockSpec((ncb, Kp, D), lambda p, n: (0, 0, 0)),     # codebooks
                pl.BlockSpec((1, ncb * Kp), lambda p, n: (0, 0)),       # 0.5*||e||^2
            ],
            out_specs=[
                pl.BlockSpec((tn, C), lambda p, n: (p * n_inner + n, 0)),
                pl.BlockSpec((ncb, tn), lambda p, n: (0, p * n_inner + n)),
                pl.BlockSpec((1, ncb, Kp), lambda p, n: (p, 0, 0)),     # accumulator
                pl.BlockSpec((1, 1, 1), lambda p, n: (p, 0, 0)),        # accumulator
            ],
        ),
        compiler_params=pltpu.CompilerParams(
            dimension_semantics=("parallel", "arbitrary"),
            vmem_limit_bytes=int(vmem_limit),
        ),
    )(flat, wd, emb_p, e2h)

    # quantized: (N, C) NHWC-flat -> (B, H, W, C) -> NCHW
    quantized = (q_flat[:N].reshape(B, H, W, C)
                 .transpose(0, 3, 1, 2)).astype(z.dtype)
    # encodings: (ncb, N) -> (B, H, W, ncb)
    encodings = idx[:, :N].reshape(ncb, B, H, W).transpose(1, 2, 3, 0)

    # perplexity from code-usage counts (sum per-chunk partials, drop K padding)
    avg_probs = jnp.sum(counts, axis=0)[:, :K] / N
    perplexity = jnp.mean(
        jnp.exp(-jnp.sum(avg_probs * jnp.log(avg_probs + 1e-10), axis=1)))

    # commitment loss = commitment_cost * MSE(z, quantized)
    commitment_loss = commitment_cost * jnp.sum(sq_err) / (N * C)

    # straight-through estimator: forward value equals quantized (eval only)
    quantized_st = quantized

    return dict(quantized=quantized_st,
                encodings=encodings,
                commitment_loss=commitment_loss,
                perplexity=perplexity,
                loss=commitment_loss)


# ----------------------------- self-test helpers -----------------------------

def _reference_encodings(z, embeddings, precision):
    """Module-equivalent argmin using the same reduced distance."""
    B, C, H, W = z.shape
    ncb, K, D = embeddings.shape
    N = B * H * W
    flat = (z.transpose(0, 2, 3, 1).reshape(N, ncb, D)
            .transpose(1, 0, 2).astype(jnp.float32))
    emb = embeddings.astype(jnp.float32)
    xe = jnp.einsum("bnd,bkd->bnk", flat, emb, precision=precision)
    e2h = 0.5 * jnp.sum(emb * emb, axis=2)[:, None, :]
    idx = jnp.argmin(e2h - xe, axis=2).astype(jnp.int32)        # (ncb, N)
    return idx.reshape(ncb, B, H, W).transpose(1, 2, 3, 0)      # (B, H, W, ncb)


def _check_outputs(out, z, embeddings, commitment_cost):
    """Precision-robust consistency checks of the kernel outputs."""
    B, C, H, W = z.shape
    ncb, K, D = embeddings.shape
    zf = z.astype(jnp.float32)
    emb = embeddings.astype(jnp.float32)
    enc = out["encodings"]
    assert enc.shape == (B, H, W, ncb)
    assert int(enc.min()) >= 0 and int(enc.max()) < K

    # quantized must equal the embedding rows selected by the returned indices
    q_lookup = jnp.stack([emb[i][enc[..., i]] for i in range(ncb)], axis=-2)
    q_lookup = q_lookup.reshape(B, H, W, C).transpose(0, 3, 1, 2)
    assert out["quantized"].shape == (B, C, H, W)
    assert jnp.allclose(out["quantized"].astype(jnp.float32), q_lookup,
                        atol=1e-5, rtol=1e-5)

    # commitment loss consistency with the kernel's own quantization
    cl = commitment_cost * jnp.mean((zf - q_lookup) ** 2)
    assert jnp.allclose(out["commitment_loss"], cl, atol=1e-6, rtol=1e-4)

    # perplexity consistency with the kernel's own encodings
    onehot = jax.nn.one_hot(enc.reshape(-1, ncb).T, K, dtype=jnp.float32)
    avg = onehot.mean(axis=1)
    ppl = jnp.mean(jnp.exp(-jnp.sum(avg * jnp.log(avg + 1e-10), axis=1)))
    assert jnp.allclose(out["perplexity"], ppl, atol=1e-3, rtol=1e-3)


if __name__ == "__main__":
    key = jax.random.PRNGKey(0)
    n_codebooks, codes_per_book, embedding_dim = 2, 64, 16
    commitment_cost = 0.25
    B, H, W = 2, 16, 16
    C = n_codebooks * embedding_dim

    k_emb, k_z = jax.random.split(key)
    # deterministic stand-in for torch.randn(...) buffer init
    embeddings = jax.random.normal(
        k_emb, (n_codebooks, codes_per_book, embedding_dim), dtype=jnp.float32)
    z = jax.random.normal(k_z, (B, C, H, W), dtype=jnp.float32)

    # --- Run A: production defaults (auto tile, fast distance matmul) -------
    out = quantize_forward(z, embeddings, commitment_cost=commitment_cost,
                           tile_n=None, fast_distance=True)
    out = jax.tree_util.tree_map(jax.block_until_ready, out)
    _check_outputs(out, z, embeddings, commitment_cost)
    enc_ref = _reference_encodings(z, embeddings, jax.lax.Precision.DEFAULT)
    frac = float(jnp.mean((out["encodings"] == enc_ref).astype(jnp.float32)))
    assert frac >= 0.97, f"too many encoding mismatches: {1.0 - frac:.4f}"

    # --- Run B: exact f32 argmin, multi-tile grid, padded/masked rows -------
    z2 = z[:, :, :, :13]                      # N = 416 -> padded to 512 rows
    out2 = quantize_forward(z2, embeddings, commitment_cost=commitment_cost,
                            tile_n=128, fast_distance=False)
    out2 = jax.tree_util.tree_map(jax.block_until_ready, out2)
    _check_outputs(out2, z2, embeddings, commitment_cost)
    enc_ref2 = _reference_encodings(z2, embeddings, jax.lax.Precision.HIGHEST)
    frac2 = float(jnp.mean((out2["encodings"] == enc_ref2).astype(jnp.float32)))
    assert frac2 >= 0.995, f"too many encoding mismatches: {1.0 - frac2:.4f}"

    print("KERNEL_OK")
</pallas_src>

<mosaic_0001>
module attributes {stable_mosaic.version = 11 : i64} {
  func.func @_vq_kernel(%arg0: i32, %arg1: i32, %arg2: memref<512x32xf32, #tpu.memory_space<vmem>>, %arg3: memref<32x256xf32, #tpu.memory_space<vmem>>, %arg4: memref<2x128x16xf32, #tpu.memory_space<vmem>>, %arg5: memref<1x256xf32, #tpu.memory_space<vmem>>, %arg6: memref<512x32xf32, #tpu.memory_space<vmem>>, %arg7: memref<2x512xi32, #tpu.memory_space<vmem>>, %arg8: memref<1x2x128xf32, #tpu.memory_space<vmem>>, %arg9: memref<1x1x1xf32, #tpu.memory_space<vmem>>) attributes {dimension_semantics = [#tpu.dimension_semantics<parallel>, #tpu.dimension_semantics<arbitrary>], iteration_bounds = array<i64: 1, 1>, scalar_prefetch = 0 : i64, scratch_operands = 0 : i64, tpu.core_type = #tpu.core_type<tc>, window_params = [{transform_indices = @transform_0, window_bounds = array<i64: 512, 32>}, {pipeline_mode = #tpu.pipeline_mode<synchronous>, transform_indices = @transform_1, window_bounds = array<i64: 32, 256>}, {pipeline_mode = #tpu.pipeline_mode<synchronous>, transform_indices = @transform_2, window_bounds = array<i64: 2, 128, 16>}, {pipeline_mode = #tpu.pipeline_mode<synchronous>, transform_indices = @transform_3, window_bounds = array<i64: 1, 256>}, {transform_indices = @transform_4, window_bounds = array<i64: 512, 32>}, {transform_indices = @transform_5, window_bounds = array<i64: 2, 512>}, {transform_indices = @transform_6, window_bounds = array<i64: 1, 2, 128>}, {transform_indices = @transform_7, window_bounds = array<i64: 1, 1, 1>}]} {
    %c0_i32 = arith.constant 0 : i32
    %0 = arith.cmpi eq, %arg1, %c0_i32 : i32
    %1 = arith.extui %0 : i1 to i32
    %c0_i32_0 = arith.constant 0 : i32
    %2 = arith.cmpi ne, %1, %c0_i32_0 : i32
    scf.if %2 {
      %cst_36 = arith.constant 0.000000e+00 : f32
      %81 = vector.broadcast %cst_36 : f32 to vector<1x2x128xf32>
      %c0_37 = arith.constant 0 : index
      %c0_38 = arith.constant 0 : index
      %c0_39 = arith.constant 0 : index
      %82 = vector.load %arg8[%c0_37, %c0_38, %c0_39] : memref<1x2x128xf32, #tpu.memory_space<vmem>>, vector<1x2x128xf32>
      tpu.vector_store %arg8[%c0_37, %c0_38, %c0_39], %81 {strides = array<i32>} : memref<1x2x128xf32, #tpu.memory_space<vmem>>, vector<1x2x128xf32>,
      %cst_40 = arith.constant 0.000000e+00 : f32
      %83 = vector.broadcast %cst_40 : f32 to vector<1x1x1xf32>
      %c0_41 = arith.constant 0 : index
      %c0_42 = arith.constant 0 : index
      %c0_43 = arith.constant 0 : index
      %84 = vector.load %arg9[%c0_41, %c0_42, %c0_43] : memref<1x1x1xf32, #tpu.memory_space<vmem>>, vector<1x1x1xf32>
      tpu.vector_store %arg9[%c0_41, %c0_42, %c0_43], %83 {strides = array<i32>} : memref<1x1x1xf32, #tpu.memory_space<vmem>>, vector<1x1x1xf32>,
    } else {
    }
    %c0 = arith.constant 0 : index
    %c0_1 = arith.constant 0 : index
    %3 = vector.load %arg2[%c0, %c0_1] : memref<512x32xf32, #tpu.memory_space<vmem>>, vector<512x32xf32>
    %c0_2 = arith.constant 0 : index
    %c0_3 = arith.constant 0 : index
    %4 = vector.load %arg3[%c0_2, %c0_3] : memref<32x256xf32, #tpu.memory_space<vmem>>, vector<32x256xf32>
    %cst = arith.constant dense<0.000000e+00> : vector<512x256xf32>
    %5 = tpu.matmul %3, %4, %cst {dimension_numbers = #tpu.dot_dimension_numbers<[1], [0], [0], [1], [0, 0, 1, 1], [], []>} : vector<512x32xf32>, vector<32x256xf32>, vector<512x256xf32> -> vector<512x256xf32>
    %c0_4 = arith.constant 0 : index
    %c0_5 = arith.constant 0 : index
    %6 = vector.load %arg5[%c0_4, %c0_5] : memref<1x256xf32, #tpu.memory_space<vmem>>, vector<1x256xf32>
    %7 = vector.broadcast %6 : vector<1x256xf32> to vector<512x256xf32>
    %8 = arith.subf %7, %5 : vector<512x256xf32>
    %c1_i32 = arith.constant 1 : i32
    %9 = arith.muli %arg0, %c1_i32 : i32
    %10 = arith.addi %9, %arg1 : i32
    %c512_i32 = arith.constant 512 : i32
    %11 = arith.muli %10, %c512_i32 : i32
    %12 = tpu.iota {dimensions = array<i32: 0>} : vector<512x1xi32>
    %13 = vector.broadcast %11 : i32 to vector<512x1xi32>
    %14 = arith.addi %13, %12 : vector<512x1xi32>
    %c512_i32_6 = arith.constant 512 : i32
    %15 = vector.broadcast %c512_i32_6 : i32 to vector<512x1xi32>
    %16 = arith.cmpi slt, %14, %15 : vector<512x1xi32>
    %17 = arith.extui %16 : vector<512x1xi1> to vector<512x1xi32>
    %18 = arith.sitofp %17 : vector<512x1xi32> to vector<512x1xf32>
    %19 = tpu.iota {dimensions = array<i32: 1>} : vector<512x128xi32>
    %cst_7 = arith.constant 0.000000e+00 : f32
    %20 = vector.broadcast %cst_7 : f32 to vector<512x1xf32>
    %21 = vector.extract_strided_slice %8 {offsets = [0, 0], sizes = [512, 128], strides = [1, 1]} : vector<512x256xf32> to vector<512x128xf32>
    %22 = tpu.reduce_index %21 {axis = 1 : i32, kind = #tpu.reduction_kind<arg_min>} : vector<512x128xf32> -> vector<512xi32>
    %23 = vector.shape_cast %22 : vector<512xi32> to vector<512x1xi32>
    %24 = vector.broadcast %23 : vector<512x1xi32> to vector<512x128xi32>
    %25 = arith.cmpi eq, %19, %24 : vector<512x128xi32>
    %26 = arith.extui %25 : vector<512x128xi1> to vector<512x128xi32>
    %27 = arith.sitofp %26 : vector<512x128xi32> to vector<512x128xf32>
    %c0_8 = arith.constant 0 : index
    %c0_9 = arith.constant 0 : index
    %c0_10 = arith.constant 0 : index
    %28 = vector.load %arg4[%c0_8, %c0_9, %c0_10] : memref<2x128x16xf32, #tpu.memory_space<vmem>>, vector<1x128x16xf32>
    %29 = vector.shape_cast %28 : vector<1x128x16xf32> to vector<128x16xf32>
    %cst_11 = arith.constant dense<0.000000e+00> : vector<512x16xf32>
    %30 = tpu.matmul %27, %29, %cst_11 {dimension_numbers = #tpu.dot_dimension_numbers<[1], [0], [0], [1], [0, 0, 1, 1], [], []>, precision = #tpu.contract_precision<fp32>} : vector<512x128xf32>, vector<128x16xf32>, vector<512x16xf32> -> vector<512x16xf32>
    %31 = vector.extract_strided_slice %3 {offsets = [0, 0], sizes = [512, 16], strides = [1, 1]} : vector<512x32xf32> to vector<512x16xf32>
    %32 = arith.subf %31, %30 : vector<512x16xf32>
    %33 = arith.mulf %32, %32 : vector<512x16xf32>
    %cst_12 = arith.constant dense<0.000000e+00> : vector<512xf32>
    %34 = vector.multi_reduction <add>, %33, %cst_12 [1] : vector<512x16xf32> to vector<512xf32>
    %35 = vector.shape_cast %34 : vector<512xf32> to vector<512x1xf32>
    %36 = arith.addf %20, %35 : vector<512x1xf32>
    %37 = vector.broadcast %18 : vector<512x1xf32> to vector<512x128xf32>
    %38 = arith.mulf %27, %37 : vector<512x128xf32>
    %cst_13 = arith.constant dense<0.000000e+00> : vector<128xf32>
    %39 = vector.multi_reduction <add>, %38, %cst_13 [0] : vector<512x128xf32> to vector<128xf32>
    %40 = vector.shape_cast %39 : vector<128xf32> to vector<1x128xf32>
    %41 = vector.shape_cast %22 : vector<512xi32> to vector<1x512xi32>
    %42 = vector.extract_strided_slice %8 {offsets = [0, 128], sizes = [512, 128], strides = [1, 1]} : vector<512x256xf32> to vector<512x128xf32>
    %43 = tpu.reduce_index %42 {axis = 1 : i32, kind = #tpu.reduction_kind<arg_min>} : vector<512x128xf32> -> vector<512xi32>
    %44 = vector.shape_cast %43 : vector<512xi32> to vector<512x1xi32>
    %45 = vector.broadcast %44 : vector<512x1xi32> to vector<512x128xi32>
    %46 = arith.cmpi eq, %19, %45 : vector<512x128xi32>
    %47 = arith.extui %46 : vector<512x128xi1> to vector<512x128xi32>
    %48 = arith.sitofp %47 : vector<512x128xi32> to vector<512x128xf32>
    %c1 = arith.constant 1 : index
    %c0_14 = arith.constant 0 : index
    %c0_15 = arith.constant 0 : index
    %49 = vector.load %arg4[%c1, %c0_14, %c0_15] : memref<2x128x16xf32, #tpu.memory_space<vmem>>, vector<1x128x16xf32>
    %50 = vector.shape_cast %49 : vector<1x128x16xf32> to vector<128x16xf32>
    %cst_16 = arith.constant dense<0.000000e+00> : vector<512x16xf32>
    %51 = tpu.matmul %48, %50, %cst_16 {dimension_numbers = #tpu.dot_dimension_numbers<[1], [0], [0], [1], [0, 0, 1, 1], [], []>, precision = #tpu.contract_precision<fp32>} : vector<512x128xf32>, vector<128x16xf32>, vector<512x16xf32> -> vector<512x16xf32>
    %52 = vector.extract_strided_slice %3 {offsets = [0, 16], sizes = [512, 16], strides = [1, 1]} : vector<512x32xf32> to vector<512x16xf32>
    %53 = arith.subf %52, %51 : vector<512x16xf32>
    %54 = arith.mulf %53, %53 : vector<512x16xf32>
    %cst_17 = arith.constant dense<0.000000e+00> : vector<512xf32>
    %55 = vector.multi_reduction <add>, %54, %cst_17 [1] : vector<512x16xf32> to vector<512xf32>
    %56 = vector.shape_cast %55 : vector<512xf32> to vector<512x1xf32>
    %57 = arith.addf %36, %56 : vector<512x1xf32>
    %58 = vector.broadcast %18 : vector<512x1xf32> to vector<512x128xf32>
    %59 = arith.mulf %48, %58 : vector<512x128xf32>
    %cst_18 = arith.constant dense<0.000000e+00> : vector<128xf32>
    %60 = vector.multi_reduction <add>, %59, %cst_18 [0] : vector<512x128xf32> to vector<128xf32>
    %61 = vector.shape_cast %60 : vector<128xf32> to vector<1x128xf32>
    %62 = vector.shape_cast %43 : vector<512xi32> to vector<1x512xi32>
    %63 = tpu.concatenate %30, %51 in 1 : vector<512x16xf32>, vector<512x16xf32> -> vector<512x32xf32>
    %c0_19 = arith.constant 0 : index
    %c0_20 = arith.constant 0 : index
    %64 = vector.load %arg6[%c0_19, %c0_20] : memref<512x32xf32, #tpu.memory_space<vmem>>, vector<512x32xf32>
    tpu.vector_store %arg6[%c0_19, %c0_20], %63 {strides = array<i32>} : memref<512x32xf32, #tpu.memory_space<vmem>>, vector<512x32xf32>,
    %65 = tpu.concatenate %41, %62 in 0 : vector<1x512xi32>, vector<1x512xi32> -> vector<2x512xi32>
    %c0_21 = arith.constant 0 : index
    %c0_22 = arith.constant 0 : index
    %66 = vector.load %arg7[%c0_21, %c0_22] : memref<2x512xi32, #tpu.memory_space<vmem>>, vector<2x512xi32>
    tpu.vector_store %arg7[%c0_21, %c0_22], %65 {strides = array<i32>} : memref<2x512xi32, #tpu.memory_space<vmem>>, vector<2x512xi32>,
    %c0_23 = arith.constant 0 : index
    %c0_24 = arith.constant 0 : index
    %c0_25 = arith.constant 0 : index
    %67 = vector.load %arg8[%c0_23, %c0_24, %c0_25] : memref<1x2x128xf32, #tpu.memory_space<vmem>>, vector<1x2x128xf32>
    %68 = tpu.concatenate %40, %61 in 0 : vector<1x128xf32>, vector<1x128xf32> -> vector<2x128xf32>
    %69 = vector.shape_cast %68 : vector<2x128xf32> to vector<1x2x128xf32>
    %70 = arith.addf %67, %69 : vector<1x2x128xf32>
    %c0_26 = arith.constant 0 : index
    %c0_27 = arith.constant 0 : index
    %c0_28 = arith.constant 0 : index
    %71 = vector.load %arg8[%c0_26, %c0_27, %c0_28] : memref<1x2x128xf32, #tpu.memory_space<vmem>>, vector<1x2x128xf32>
    tpu.vector_store %arg8[%c0_26, %c0_27, %c0_28], %70 {strides = array<i32>} : memref<1x2x128xf32, #tpu.memory_space<vmem>>, vector<1x2x128xf32>,
    %c0_29 = arith.constant 0 : index
    %c0_30 = arith.constant 0 : index
    %c0_31 = arith.constant 0 : index
    %72 = vector.load %arg9[%c0_29, %c0_30, %c0_31] : memref<1x1x1xf32, #tpu.memory_space<vmem>>, vector<1x1x1xf32>
    %73 = arith.mulf %57, %18 : vector<512x1xf32>
    %74 = vector.shape_cast %73 : vector<512x1xf32> to vector<1x512x1xf32>
    %cst_32 = arith.constant dense<0.000000e+00> : vector<1xf32>
    %75 = vector.multi_reduction <add>, %74, %cst_32 [1, 2] : vector<1x512x1xf32> to vector<1xf32>
    %76 = vector.shape_cast %75 : vector<1xf32> to vector<1x1x1xf32>
    %77 = vector.extract %76[0, 0, 0] : f32 from vector<1x1x1xf32>
    %78 = vector.broadcast %77 : f32 to vector<1x1x1xf32>
    %79 = arith.addf %72, %78 : vector<1x1x1xf32>
    %c0_33 = arith.constant 0 : index
    %c0_34 = arith.constant 0 : index
    %c0_35 = arith.constant 0 : index
    %80 = vector.load %arg9[%c0_33, %c0_34, %c0_35] : memref<1x1x1xf32, #tpu.memory_space<vmem>>, vector<1x1x1xf32>
    tpu.vector_store %arg9[%c0_33, %c0_34, %c0_35], %79 {strides = array<i32>} : memref<1x1x1xf32, #tpu.memory_space<vmem>>, vector<1x1x1xf32>,
    return
  }
  func.func @transform_0(%arg0: i32, %arg1: i32) -> (i32, i32) {
    %c1_i32 = arith.constant 1 : i32
    %0 = arith.muli %arg0, %c1_i32 : i32
    %1 = arith.addi %0, %arg1 : i32
    %c0_i32 = arith.constant 0 : i32
    %c0_i32_0 = arith.constant 0 : i32
    return %1, %c0_i32 : i32, i32
  }
  func.func @transform_1(%arg0: i32, %arg1: i32) -> (i32, i32) {
    %c0_i32 = arith.constant 0 : i32
    %c0_i32_0 = arith.constant 0 : i32
    %c0_i32_1 = arith.constant 0 : i32
    return %c0_i32, %c0_i32_0 : i32, i32
  }
  func.func @transform_2(%arg0: i32, %arg1: i32) -> (i32, i32, i32) {
    %c0_i32 = arith.constant 0 : i32
    %c0_i32_0 = arith.constant 0 : i32
    %c0_i32_1 = arith.constant 0 : i32
    %c0_i32_2 = arith.constant 0 : i32
    return %c0_i32, %c0_i32_0, %c0_i32_1 : i32, i32, i32
  }
  func.func @transform_3(%arg0: i32, %arg1: i32) -> (i32, i32) {
    %c0_i32 = arith.constant 0 : i32
    %c0_i32_0 = arith.constant 0 : i32
    %c0_i32_1 = arith.constant 0 : i32
    return %c0_i32, %c0_i32_0 : i32, i32
  }
  func.func @transform_4(%arg0: i32, %arg1: i32) -> (i32, i32) {
    %c1_i32 = arith.constant 1 : i32
    %0 = arith.muli %arg0, %c1_i32 : i32
    %1 = arith.addi %0, %arg1 : i32
    %c0_i32 = arith.constant 0 : i32
    %c0_i32_0 = arith.constant 0 : i32
    return %1, %c0_i32 : i32, i32
  }
  func.func @transform_5(%arg0: i32, %arg1: i32) -> (i32, i32) {
    %c1_i32 = arith.constant 1 : i32
    %0 = arith.muli %arg0, %c1_i32 : i32
    %1 = arith.addi %0, %arg1 : i32
    %c0_i32 = arith.constant 0 : i32
    %c0_i32_0 = arith.constant 0 : i32
    return %c0_i32, %1 : i32, i32
  }
  func.func @transform_6(%arg0: i32, %arg1: i32) -> (i32, i32, i32) {
    %c0_i32 = arith.constant 0 : i32
    %c0_i32_0 = arith.constant 0 : i32
    %c0_i32_1 = arith.constant 0 : i32
    return %arg0, %c0_i32, %c0_i32_0 : i32, i32, i32
  }
  func.func @transform_7(%arg0: i32, %arg1: i32) -> (i32, i32, i32) {
    %c0_i32 = arith.constant 0 : i32
    %c0_i32_0 = arith.constant 0 : i32
    %c0_i32_1 = arith.constant 0 : i32
    return %arg0, %c0_i32, %c0_i32_0 : i32, i32, i32
  }
}

</mosaic_0001>

<bundles_post_ra>
// kernel: quantize_forward.1
= control target key start
LH: loop header
LB: loop body
LE: loop exit
PB: predicated region body
PF: predicated region fallthrough
CT: control target
= control target key end

     0   :  { %13 = vsyncpa [#allocation3], 0  ;;  %v24493_v7 = vmov 0.0   ;;  %vm24642_vm0 = vcmask 261120   ;;  %s24463_s0 = inlined_call_operand.vmem [shape: f32[512,32], index: 0, kind: input, shape index: {}]   ;;  %s24464_s1 = inlined_call_operand.vmem [shape: f32[32,256], index: 1, kind: input, shape index: {}]   ;;  %s24465_s2 = inlined_call_operand.vmem [shape: f32[2,128,16], index: 2, kind: input, shape index: {}]   ;;  %s24466_s3 = inlined_call_operand.vmem [shape: f32[1,256], index: 3, kind: input, shape index: {}]   ;;  %s24467_s4 = inlined_call_operand.hbm [shape: f32[512,32], index: 4, kind: output, shape index: {0}]   ;;  %s24468_s5 = inlined_call_operand.vmem [shape: s32[2,512], index: 5, kind: output, shape index: {1}]   ;;  %s24469_s6 = inlined_call_operand.vmem [shape: f32[1,2,128], index: 6, kind: output, shape index: {2}]   ;;  %s24470_s7 = inlined_call_operand.hbm [shape: f32[1,1,1], index: 7, kind: output, shape index: {3}]  }
   0x1   :  { %v133_v0 = vld [vmem:[%s24464_s1 + $0x8] sm:$0xff]  ;;  %v135_v1 = vld [vmem:[%s24464_s1 + $0x18] sm:$0xff]  ;;  %v132_v2 = vld [vmem:[%s24464_s1] sm:$0xff]  ;;  %397 = vmatprep.mubr.f32.mxu0 %v24493_v7  ;;  %65 = vst [vmem:[%s24469_s6] sm:$0x3] %v24493_v7  ;;  %589 = vmatprep.mubr.f32.mxu1 %v24493_v7 }
   0x2   :  { %v14349_v3 = vpack.c.bf16 %v135_v1, %v133_v0  ;;  %v134_v4 = vld [vmem:[%s24464_s1 + $0x10] sm:$0xff]  ;;  %v137_v5 = vld [vmem:[%s24464_s1 + $0x28] sm:$0xff]  ;;  %v139_v6 = vld [vmem:[%s24464_s1 + $0x38] sm:$0xff] }
   0x3   :  { %v14351_v8 = vpack.c.bf16 %v134_v4, %v132_v2  ;;  %v14353_v9 = vpack.c.bf16 %v139_v6, %v137_v5  ;;  %v136_v10 = vld [vmem:[%s24464_s1 + $0x20] sm:$0xff]  ;;  %v138_v11 = vld [vmem:[%s24464_s1 + $0x30] sm:$0xff]  ;;  %v101_v15 = vld [vmem:[%s24463_s0 + $0x108] sm:$0xff] }
   0x4   :  { %14350 = vmatprep.subr.bf16.mxu0 %v14349_v3  ;;  %14741 = vmatprep.subr.bf16.mxu1 %v14349_v3  ;;  %v14355_v12 = vpack.c.bf16 %v138_v11, %v136_v10  ;;  %v68_v13 = vld [vmem:[%s24463_s0] sm:$0xff]  ;;  %v69_v16 = vld [vmem:[%s24463_s0 + $0x8] sm:$0xff]  ;;  %v70_v17 = vld [vmem:[%s24463_s0 + $0x10] sm:$0xff] }
   0x5   :  { %14352 = vmatpush1.bf16.msra.mxu0 %v14351_v8  ;;  %14743 = vmatpush1.bf16.msra.mxu1 %v14351_v8  ;;  %v100_v14 = vld [vmem:[%s24463_s0 + $0x100] sm:$0xff]  ;;  %v102_v18 = vld [vmem:[%s24463_s0 + $0x110] sm:$0xff]  ;;  %v103_v19 = vld [vmem:[%s24463_s0 + $0x118] sm:$0xff] }
   0x6   :  { %14354 = vmatprep.subr.bf16.mxu0 %v14353_v9  ;;  %14742 = vmatprep.subr.bf16.mxu1 %v14353_v9  ;;  %v71_v20 = vld [vmem:[%s24463_s0 + $0x18] sm:$0xff] }
   0x9   :  { %14356 = vmatpush1.bf16.msra.mxu0 %v14355_v12  ;;  %14744 = vmatpush1.bf16.msra.mxu1 %v14355_v12 }
   0xc   :  { %11261 = vmatmul.mubr.msk.f32.vlgmr.msra.gmra.mrb[0].mxu0 %vm24642_vm0, %v68_v13  ;;  %11293 = vmatmul.mubr.msk.f32.vlgmr.msra.gmra.mrb[0].mxu1 %vm24642_vm0, %v100_v14 }
   0xd   :  { %595 = vmatprep.mubr.f32.mxu1 %v24493_v7  ;;  %403 = vmatprep.mubr.f32.mxu0 %v24493_v7 }
  0x10   :  { %11294 = vmatmul.mubr.msk.f32.gmra.mrb[2].mxu1 %vm24642_vm0, %v101_v15  ;;  %11262 = vmatmul.mubr.msk.f32.gmra.mrb[2].mxu0 %vm24642_vm0, %v69_v16 }
  0x11   :  { %409 = vmatprep.mubr.f32.mxu0 %v24493_v7  ;;  %601 = vmatprep.mubr.f32.mxu1 %v24493_v7 }
  0x14   :  { %11263 = vmatmul.mubr.msk.f32.gmra.mrb[4].mxu0 %vm24642_vm0, %v70_v17  ;;  %11295 = vmatmul.mubr.msk.f32.gmra.mrb[4].mxu1 %vm24642_vm0, %v102_v18 }
  0x15   :  { %607 = vmatprep.mubr.f32.mxu1 %v24493_v7  ;;  %415 = vmatprep.mubr.f32.mxu0 %v24493_v7 }
  0x16   :  { %14 = vsyncpa [#allocation5], 0  ;;  %v104_v21 = vld [vmem:[%s24463_s0 + $0x120] sm:$0xff]  ;;  %v105_v23 = vld [vmem:[%s24463_s0 + $0x128] sm:$0xff]  ;;  %v24495_v14 = vlaneseq  ;;  %vm10305_vm2 = vcmask 130112   ;;  %vm10312_vm9 = vcmask 195712  }
  0x17   :  { %v72_v22 = vld [vmem:[%s24463_s0 + $0x20] sm:$0xff]  ;;  %v73_v24 = vld [vmem:[%s24463_s0 + $0x28] sm:$0xff]  ;;  %v74_v25 = vld [vmem:[%s24463_s0 + $0x30] sm:$0xff]  ;;  %vm10319_vm10 = vcmask 261312   ;;  %s15545_s27 = smov 112  }
  0x18   :  { %11296 = vmatmul.mubr.msk.f32.gmra.mrb[6].mxu1 %vm24642_vm0, %v103_v19  ;;  %11264 = vmatmul.mubr.msk.f32.gmra.mrb[6].mxu0 %vm24642_vm0, %v71_v20  ;;  %v106_v26 = vld [vmem:[%s24463_s0 + $0x130] sm:$0xff]  ;;  %v75_v27 = vld [vmem:[%s24463_s0 + $0x38] sm:$0xff]  ;;  %v76_v29 = vld [vmem:[%s24463_s0 + $0x40] sm:$0xff]  ;;  %v15939_v15 = vshrl.u32 %v24495_v14, 7 }
  0x19   :  { %613 = vmatprep.mubr.f32.mxu1 %v24493_v7  ;;  %421 = vmatprep.mubr.f32.mxu0 %v24493_v7  ;;  %v107_v28 = vld [vmem:[%s24463_s0 + $0x138] sm:$0xff]  ;;  %v108_v30 = vld [vmem:[%s24463_s0 + $0x140] sm:$0xff]  ;;  %v77_v31 = vld [vmem:[%s24463_s0 + $0x48] sm:$0xff] }
  0x1a   :  { %v109_v32 = vld [vmem:[%s24463_s0 + $0x148] sm:$0xff]  ;;  %v78_v33 = vld [vmem:[%s24463_s0 + $0x50] sm:$0xff]  ;;  %v79_v35 = vld [vmem:[%s24463_s0 + $0x58] sm:$0xff]  ;;  %25468 = vst [vmem:[#allocation8_spill] sm:$0xff] %v15939_v15  ;;  %v786_v16 = vsub.s32 0, %v15939_v15 }
  0x1b   :  { %v110_v34 = vld [vmem:[%s24463_s0 + $0x150] sm:$0xff]  ;;  %v111_v36 = vld [vmem:[%s24463_s0 + $0x158] sm:$0xff]  ;;  %v80_v37 = vld [vmem:[%s24463_s0 + $0x60] sm:$0xff] }
  0x1c   :  { %11297 = vmatmul.mubr.msk.f32.gmra.mrb[8].mxu1 %vm24642_vm0, %v104_v21  ;;  %11265 = vmatmul.mubr.msk.f32.gmra.mrb[8].mxu0 %vm24642_vm0, %v72_v22  ;;  %v112_v38 = vld [vmem:[%s24463_s0 + $0x160] sm:$0xff]  ;;  %v81_v39 = vld [vmem:[%s24463_s0 + $0x68] sm:$0xff]  ;;  %v82_v41 = vld [vmem:[%s24463_s0 + $0x70] sm:$0xff]  ;;  %v790_v22 = vsub.s32 1, %v15939_v15 }
  0x1d   :  { %619 = vmatprep.mubr.f32.mxu1 %v24493_v7  ;;  %427 = vmatprep.mubr.f32.mxu0 %v24493_v7  ;;  %v113_v40 = vld [vmem:[%s24463_s0 + $0x168] sm:$0xff]  ;;  %v114_v42 = vld [vmem:[%s24463_s0 + $0x170] sm:$0xff]  ;;  %v83_v43 = vld [vmem:[%s24463_s0 + $0x78] sm:$0xff] }
  0x1e   :  { %v115_v44 = vld [vmem:[%s24463_s0 + $0x178] sm:$0xff]  ;;  %v84_v45 = vld [vmem:[%s24463_s0 + $0x80] sm:$0xff]  ;;  %v85_v47 = vld [vmem:[%s24463_s0 + $0x88] sm:$0xff] }
  0x1f   :  { %v116_v46 = vld [vmem:[%s24463_s0 + $0x180] sm:$0xff]  ;;  %v117_v48 = vld [vmem:[%s24463_s0 + $0x188] sm:$0xff]  ;;  %v86_v49 = vld [vmem:[%s24463_s0 + $0x90] sm:$0xff] }
  0x20   :  { %11298 = vmatmul.mubr.msk.f32.gmra.mrb[10].mxu1 %vm24642_vm0, %v105_v23  ;;  %11266 = vmatmul.mubr.msk.f32.gmra.mrb[10].mxu0 %vm24642_vm0, %v73_v24  ;;  %v118_v50 = vld [vmem:[%s24463_s0 + $0x190] sm:$0xff]  ;;  %v87_v51 = vld [vmem:[%s24463_s0 + $0x98] sm:$0xff]  ;;  %v88_v53 = vld [vmem:[%s24463_s0 + $0xa0] sm:$0xff] }
  0x21   :  { %433 = vmatprep.mubr.f32.mxu0 %v24493_v7  ;;  %625 = vmatprep.mubr.f32.mxu1 %v24493_v7  ;;  %v119_v52 = vld [vmem:[%s24463_s0 + $0x198] sm:$0xff]  ;;  %v120_v54 = vld [vmem:[%s24463_s0 + $0x1a0] sm:$0xff]  ;;  %v89_v55 = vld [vmem:[%s24463_s0 + $0xa8] sm:$0xff] }
  0x22   :  { %v121_v56 = vld [vmem:[%s24463_s0 + $0x1a8] sm:$0xff]  ;;  %v90_v57 = vld [vmem:[%s24463_s0 + $0xb0] sm:$0xff]  ;;  %v91_v59 = vld [vmem:[%s24463_s0 + $0xb8] sm:$0xff] }
  0x23   :  { %v122_v58 = vld [vmem:[%s24463_s0 + $0x1b0] sm:$0xff]  ;;  %v123_v60 = vld [vmem:[%s24463_s0 + $0x1b8] sm:$0xff]  ;;  %v92_v61 = vld [vmem:[%s24463_s0 + $0xc0] sm:$0xff] }
  0x24   :  { %11267 = vmatmul.mubr.msk.f32.gmra.mrb[12].mxu0 %vm24642_vm0, %v74_v25  ;;  %11299 = vmatmul.mubr.msk.f32.gmra.mrb[12].mxu1 %vm24642_vm0, %v106_v26  ;;  %v124_v62 = vld [vmem:[%s24463_s0 + $0x1c0] sm:$0xff]  ;;  %v93_v63 = vld [vmem:[%s24463_s0 + $0xc8] sm:$0xff]  ;;  %v126_v1 = vld [vmem:[%s24463_s0 + $0x1d0] sm:$0xff] }
  0x25   :  { %439 = vmatprep.mubr.f32.mxu0 %v24493_v7  ;;  %631 = vmatprep.mubr.f32.mxu1 %v24493_v7  ;;  %v125_v0 = vld [vmem:[%s24463_s0 + $0x1c8] sm:$0xff]  ;;  %v94_v2 = vld [vmem:[%s24463_s0 + $0xd0] sm:$0xff]  ;;  %v95_v3 = vld [vmem:[%s24463_s0 + $0xd8] sm:$0xff] }
  0x26   :  { %v127_v4 = vld [vmem:[%s24463_s0 + $0x1d8] sm:$0xff]  ;;  %v128_v5 = vld [vmem:[%s24463_s0 + $0x1e0] sm:$0xff]  ;;  %v97_v8 = vld [vmem:[%s24463_s0 + $0xe8] sm:$0xff] }
  0x27   :  { %v96_v6 = vld [vmem:[%s24463_s0 + $0xe0] sm:$0xff]  ;;  %v129_v9 = vld [vmem:[%s24463_s0 + $0x1e8] sm:$0xff]  ;;  %v130_v10 = vld [vmem:[%s24463_s0 + $0x1f0] sm:$0xff] }
  0x28   :  { %11268 = vmatmul.mubr.msk.f32.gmra.mrb[14].mxu0 %vm24642_vm0, %v75_v27  ;;  %11300 = vmatmul.mubr.msk.f32.gmra.mrb[14].mxu1 %vm24642_vm0, %v107_v28  ;;  %v98_v11 = vld [vmem:[%s24463_s0 + $0xf0] sm:$0xff]  ;;  %v99_v12 = vld [vmem:[%s24463_s0 + $0xf8] sm:$0xff]  ;;  %v782_v17 = vld [vmem:[%s24466_s3] sm:$0x3] }
  0x29   :  { %445 = vmatprep.mubr.f32.mxu0 %v24493_v7  ;;  %637 = vmatprep.mubr.f32.mxu1 %v24493_v7  ;;  %v131_v13 = vld [vmem:[%s24463_s0 + $0x1f8] sm:$0xff]  ;;  %v15945_v18 = vrot.slane %v782_v17, %v786_v16  ;;  %v15952_v28 = vrot.slane %v782_v17, %v790_v22  ;;  %v16091_v16 = vld [vmem:[%s24465_s2 + $0xa0] sm:$0xff] }
  0x2a   :  { %25486 = vst [vmem:[#allocation26_spill] sm:$0xff] %v16091_v16  ;;  %v24482_v22 = vand.u32 4294901760, %v16091_v16 }
  0x2c   :  { %11269 = vmatmul.mubr.msk.f32.gmra.mrb[16].mxu0 %vm24642_vm0, %v76_v29  ;;  %11301 = vmatmul.mubr.msk.f32.gmra.mrb[16].mxu1 %vm24642_vm0, %v108_v30 }
  0x2d   :  { %451 = vmatprep.mubr.f32.mxu0 %v24493_v7  ;;  %643 = vmatprep.mubr.f32.mxu1 %v24493_v7 }
  0x30   :  { %11270 = vmatmul.mubr.msk.f32.gmra.mrb[18].mxu0 %vm24642_vm0, %v77_v31  ;;  %11302 = vmatmul.mubr.msk.f32.gmra.mrb[18].mxu1 %vm24642_vm0, %v109_v32  ;;  %v15960_v32 = vld [vmem:[%s24465_s2] sm:$0xff] }
  0x31   :  { %457 = vmatprep.mubr.f32.mxu0 %v24493_v7  ;;  %649 = vmatprep.mubr.f32.mxu1 %v24493_v7  ;;  %25469 = vst [vmem:[#allocation9_spill] sm:$0xff] %v15960_v32 }
  0x34   :  { %11271 = vmatmul.mubr.msk.f32.gmra.mrb[20].mxu0 %vm24642_vm0, %v78_v33  ;;  %11303 = vmatmul.mubr.msk.f32.gmra.mrb[20].mxu1 %vm24642_vm0, %v110_v34  ;;  %v15965_v33 = vld [vmem:[%s24465_s2 + $0x8] sm:$0xff]  ;;  %v24484_v34 = vand.u32 4294901760, %v15960_v32 }
  0x35   :  { %463 = vmatprep.mubr.f32.mxu0 %v24493_v7  ;;  %655 = vmatprep.mubr.f32.mxu1 %v24493_v7  ;;  %25470 = vst [vmem:[#allocation10_spill] sm:$0xff] %v15965_v33 }
  0x38   :  { %11272 = vmatmul.mubr.msk.f32.gmra.mrb[22].mxu0 %vm24642_vm0, %v79_v35  ;;  %11304 = vmatmul.mubr.msk.f32.gmra.mrb[22].mxu1 %vm24642_vm0, %v111_v36  ;;  %v24483_v35 = vand.u32 4294901760, %v15965_v33 }
  0x39   :  { %469 = vmatprep.mubr.f32.mxu0 %v24493_v7  ;;  %661 = vmatprep.mubr.f32.mxu1 %v24493_v7 }
  0x3c   :  { %11273 = vmatmul.mubr.msk.f32.gmra.mrb[24].mxu0 %vm24642_vm0, %v80_v37  ;;  %11305 = vmatmul.mubr.msk.f32.gmra.mrb[24].mxu1 %vm24642_vm0, %v112_v38 }
  0x3d   :  { %475 = vmatprep.mubr.f32.mxu0 %v24493_v7  ;;  %667 = vmatprep.mubr.f32.mxu1 %v24493_v7 }
  0x40   :  { %11274 = vmatmul.mubr.msk.f32.gmra.mrb[26].mxu0 %vm24642_vm0, %v81_v39  ;;  %11306 = vmatmul.mubr.msk.f32.gmra.mrb[26].mxu1 %vm24642_vm0, %v113_v40 }
  0x41   :  { %481 = vmatprep.mubr.f32.mxu0 %v24493_v7  ;;  %673 = vmatprep.mubr.f32.mxu1 %v24493_v7 }
  0x44   :  { %11275 = vmatmul.mubr.msk.f32.gmra.mrb[28].mxu0 %vm24642_vm0, %v82_v41  ;;  %11307 = vmatmul.mubr.msk.f32.gmra.mrb[28].mxu1 %vm24642_vm0, %v114_v42  ;;  %v15981_v42 = vpack.c.bf16 %v24483_v35, %v24484_v34 }
  0x45   :  { %487 = vmatprep.mubr.f32.mxu0 %v24493_v7  ;;  %679 = vmatprep.mubr.f32.mxu1 %v24493_v7 }
  0x46   :  { %25471 = vst [vmem:[#allocation11_spill] sm:$0xff] %v15981_v42  ;;  %14358 = vmatprep.subr.bf16.mxu1 %v15981_v42 }
  0x47   :  { %14360 = vmatpush3.bf16.msra.mxu1 %v15981_v42 }
  0x48   :  { %11276 = vmatmul.mubr.msk.f32.gmra.mrb[30].mxu0 %vm24642_vm0, %v83_v43  ;;  %11308 = vmatmul.mubr.msk.f32.gmra.mrb[30].mxu1 %vm24642_vm0, %v115_v44  ;;  %v15986_v43 = vld [vmem:[%s24465_s2 + $0x10] sm:$0xff]  ;;  %v15991_v44 = vld [vmem:[%s24465_s2 + $0x18] sm:$0xff] }
  0x49   :  { %493 = vmatprep.mubr.f32.mxu0 %v24493_v7  ;;  %685 = vmatprep.mubr.f32.mxu1 %v24493_v7  ;;  %25472 = vst [vmem:[#allocation12_spill] sm:$0xff] %v15986_v43  ;;  %25473 = vst [vmem:[#allocation13_spill] sm:$0xff] %v15991_v44 }
  0x4c   :  { %11277 = vmatmul.mubr.msk.f32.gmra.mrb[32].mxu0 %vm24642_vm0, %v84_v45  ;;  %11309 = vmatmul.mubr.msk.f32.gmra.mrb[32].mxu1 %vm24642_vm0, %v116_v46  ;;  %v15996_v45 = vld [vmem:[%s24465_s2 + $0x80] sm:$0xff] }
  0x4d   :  { %499 = vmatprep.mubr.f32.mxu0 %v24493_v7  ;;  %691 = vmatprep.mubr.f32.mxu1 %v24493_v7  ;;  %25474 = vst [vmem:[#allocation14_spill] sm:$0xff] %v15996_v45 }
  0x50   :  { %11278 = vmatmul.mubr.msk.f32.gmra.mrb[34].mxu0 %vm24642_vm0, %v85_v47  ;;  %11310 = vmatmul.mubr.msk.f32.gmra.mrb[34].mxu1 %vm24642_vm0, %v117_v48  ;;  %v24480_v47 = vand.u32 4294901760, %v15986_v43  ;;  %v24475_v48 = vand.u32 4294901760, %v15991_v44 }
  0x51   :  { %505 = vmatprep.mubr.f32.mxu0 %v24493_v7  ;;  %697 = vmatprep.mubr.f32.mxu1 %v24493_v7 }
  0x54   :  { %11279 = vmatmul.mubr.msk.f32.gmra.mrb[36].mxu0 %vm24642_vm0, %v86_v49  ;;  %11311 = vmatmul.mubr.msk.f32.gmra.mrb[36].mxu1 %vm24642_vm0, %v118_v50  ;;  %v16004_v49 = vld [vmem:[%s24465_s2 + $0x88] sm:$0xff]  ;;  %v24492_v50 = vand.u32 4294901760, %v15996_v45 }
  0x55   :  { %511 = vmatprep.mubr.f32.mxu0 %v24493_v7  ;;  %703 = vmatprep.mubr.f32.mxu1 %v24493_v7  ;;  %25475 = vst [vmem:[#allocation15_spill] sm:$0xff] %v16004_v49 }
  0x58   :  { %11280 = vmatmul.mubr.msk.f32.gmra.mrb[38].mxu0 %vm24642_vm0, %v87_v51  ;;  %11312 = vmatmul.mubr.msk.f32.gmra.mrb[38].mxu1 %vm24642_vm0, %v119_v52 }
  0x59   :  { %517 = vmatprep.mubr.f32.mxu0 %v24493_v7  ;;  %709 = vmatprep.mubr.f32.mxu1 %v24493_v7 }
  0x5c   :  { %11281 = vmatmul.mubr.msk.f32.gmra.mrb[40].mxu0 %vm24642_vm0, %v88_v53  ;;  %11313 = vmatmul.mubr.msk.f32.gmra.mrb[40].mxu1 %vm24642_vm0, %v120_v54  ;;  %v24487_v53 = vand.u32 4294901760, %v16004_v49 }
  0x5d   :  { %523 = vmatprep.mubr.f32.mxu0 %v24493_v7  ;;  %715 = vmatprep.mubr.f32.mxu1 %v24493_v7 }
  0x60   :  { %11282 = vmatmul.mubr.msk.f32.gmra.mrb[42].mxu0 %vm24642_vm0, %v89_v55  ;;  %11314 = vmatmul.mubr.msk.f32.gmra.mrb[42].mxu1 %vm24642_vm0, %v121_v56 }
  0x61   :  { %529 = vmatprep.mubr.f32.mxu0 %v24493_v7  ;;  %721 = vmatprep.mubr.f32.mxu1 %v24493_v7 }
  0x64   :  { %11283 = vmatmul.mubr.msk.f32.gmra.mrb[44].mxu0 %vm24642_vm0, %v90_v57  ;;  %11315 = vmatmul.mubr.msk.f32.gmra.mrb[44].mxu1 %vm24642_vm0, %v122_v58  ;;  %v16019_v57 = vpack.c.bf16 %v24475_v48, %v24480_v47  ;;  %v16025_v58 = vpack.c.bf16 %v24487_v53, %v24492_v50  ;;  %v16183_v48 = vld [vmem:[%s24465_s2 + $0x50] sm:$0xff]  ;;  %v16235_v53 = vld [vmem:[%s24465_s2 + $0x60] sm:$0xff] }
  0x65   :  { %535 = vmatprep.mubr.f32.mxu0 %v24493_v7  ;;  %727 = vmatprep.mubr.f32.mxu1 %v24493_v7  ;;  %25496 = vst [vmem:[#allocation36_spill] sm:$0xff] %v16183_v48  ;;  %25502 = vst [vmem:[#allocation42_spill] sm:$0xff] %v16235_v53 }
  0x66   :  { %25476 = vst [vmem:[#allocation16_spill] sm:$0xff] %v16019_v57  ;;  %25477 = vst [vmem:[#allocation17_spill] sm:$0xff] %v16025_v58  ;;  %14362 = vmatprep.subr.bf16.mxu1 %v16019_v57  ;;  %14550 = vmatprep.subr.bf16.mxu0 %v16025_v58 }
  0x67   :  { %14364 = vmatpush3.bf16.msra.mxu1 %v16019_v57  ;;  %14552 = vmatpush3.bf16.msra.mxu0 %v16025_v58 }
  0x68   :  { %11284 = vmatmul.mubr.msk.f32.gmra.mrb[46].mxu0 %vm24642_vm0, %v91_v59  ;;  %11316 = vmatmul.mubr.msk.f32.gmra.mrb[46].mxu1 %vm24642_vm0, %v123_v60  ;;  %v16030_v59 = vld [vmem:[%s24465_s2 + $0x20] sm:$0xff]  ;;  %v16035_v60 = vld [vmem:[%s24465_s2 + $0x28] sm:$0xff] }
  0x69   :  { %541 = vmatprep.mubr.f32.mxu0 %v24493_v7  ;;  %733 = vmatprep.mubr.f32.mxu1 %v24493_v7  ;;  %25478 = vst [vmem:[#allocation18_spill] sm:$0xff] %v16030_v59  ;;  %25479 = vst [vmem:[#allocation19_spill] sm:$0xff] %v16035_v60 }
  0x6c   :  { %11285 = vmatmul.mubr.msk.f32.gmra.mrb[48].mxu0 %vm24642_vm0, %v92_v61  ;;  %11317 = vmatmul.mubr.msk.f32.gmra.mrb[48].mxu1 %vm24642_vm0, %v124_v62  ;;  %v16040_v61 = vld [vmem:[%s24465_s2 + $0x90] sm:$0xff] }
  0x6d   :  { %547 = vmatprep.mubr.f32.mxu0 %v24493_v7  ;;  %739 = vmatprep.mubr.f32.mxu1 %v24493_v7  ;;  %25480 = vst [vmem:[#allocation20_spill] sm:$0xff] %v16040_v61 }
  0x70   :  { %11286 = vmatmul.mubr.msk.f32.gmra.mrb[50].mxu0 %vm24642_vm0, %v93_v63  ;;  %11318 = vmatmul.mubr.msk.f32.gmra.mrb[50].mxu1 %vm24642_vm0, %v125_v0  ;;  %v24474_v63 = vand.u32 4294901760, %v16030_v59  ;;  %v24473_v0 = vand.u32 4294901760, %v16035_v60 }
  0x71   :  { %745 = vmatprep.mubr.f32.mxu1 %v24493_v7  ;;  %553 = vmatprep.mubr.f32.mxu0 %v24493_v7 }
  0x74   :  { %11319 = vmatmul.mubr.msk.f32.gmra.mrb[52].mxu1 %vm24642_vm0, %v126_v1  ;;  %11287 = vmatmul.mubr.msk.f32.gmra.mrb[52].mxu0 %vm24642_vm0, %v94_v2  ;;  %v16048_v1 = vld [vmem:[%s24465_s2 + $0x98] sm:$0xff]  ;;  %v24486_v2 = vand.u32 4294901760, %v16040_v61 }
  0x75   :  { %559 = vmatprep.mubr.f32.mxu0 %v24493_v7  ;;  %751 = vmatprep.mubr.f32.mxu1 %v24493_v7  ;;  %25481 = vst [vmem:[#allocation21_spill] sm:$0xff] %v16048_v1 }
  0x78   :  { %11288 = vmatmul.mubr.msk.f32.gmra.mrb[54].mxu0 %vm24642_vm0, %v95_v3  ;;  %11320 = vmatmul.mubr.msk.f32.gmra.mrb[54].mxu1 %vm24642_vm0, %v127_v4 }
  0x79   :  { %757 = vmatprep.mubr.f32.mxu1 %v24493_v7  ;;  %565 = vmatprep.mubr.f32.mxu0 %v24493_v7 }
  0x7c   :  { %11321 = vmatmul.mubr.msk.f32.gmra.mrb[56].mxu1 %vm24642_vm0, %v128_v5  ;;  %11289 = vmatmul.mubr.msk.f32.gmra.mrb[56].mxu0 %vm24642_vm0, %v96_v6  ;;  %v24485_v5 = vand.u32 4294901760, %v16048_v1 }
  0x7d   :  { %571 = vmatprep.mubr.f32.mxu0 %v24493_v7  ;;  %763 = vmatprep.mubr.f32.mxu1 %v24493_v7 }
  0x80   :  { %11290 = vmatmul.mubr.msk.f32.gmra.mrb[58].mxu0 %vm24642_vm0, %v97_v8  ;;  %11322 = vmatmul.mubr.msk.f32.gmra.mrb[58].mxu1 %vm24642_vm0, %v129_v9 }
  0x81   :  { %769 = vmatprep.mubr.f32.mxu1 %v24493_v7  ;;  %577 = vmatprep.mubr.f32.mxu0 %v24493_v7 }
  0x84   :  { %11323 = vmatmul.mubr.msk.f32.gmra.mrb[60].mxu1 %vm24642_vm0, %v130_v10  ;;  %11291 = vmatmul.mubr.msk.f32.gmra.mrb[60].mxu0 %vm24642_vm0, %v98_v11  ;;  %v16070_v10 = vpack.c.bf16 %v24473_v0, %v24474_v63  ;;  %v16076_v11 = vpack.c.bf16 %v24485_v5, %v24486_v2 }
  0x85   :  { %583 = vmatprep.mubr.f32.mxu0 %v24493_v7  ;;  %775 = vmatprep.mubr.f32.mxu1 %v24493_v7 }
  0x86   :  { %25482 = vst [vmem:[#allocation22_spill] sm:$0xff] %v16070_v10  ;;  %25483 = vst [vmem:[#allocation23_spill] sm:$0xff] %v16076_v11  ;;  %14366 = vmatprep.subr.bf16.mxu1 %v16070_v10  ;;  %14554 = vmatprep.subr.bf16.mxu0 %v16076_v11 }
  0x87   :  { %14368 = vmatpush3.bf16.msra.mxu1 %v16070_v10  ;;  %14556 = vmatpush3.bf16.msra.mxu0 %v16076_v11 }
  0x88   :  { %11292 = vmatmul.mubr.msk.f32.gmra.mrb[62].mxu0 %vm24642_vm0, %v99_v12  ;;  %11324 = vmatmul.mubr.msk.f32.gmra.mrb[62].mxu1 %vm24642_vm0, %v131_v13  ;;  %v16081_v12 = vld [vmem:[%s24465_s2 + $0x30] sm:$0xff]  ;;  %v16086_v13 = vld [vmem:[%s24465_s2 + $0x38] sm:$0xff] }
  0x89   :  { %25484 = vst [vmem:[#allocation24_spill] sm:$0xff] %v16081_v12  ;;  %25485 = vst [vmem:[#allocation25_spill] sm:$0xff] %v16086_v13 }
  0xdf   :  { %v399_v19 = vpop.f32.mrb[0].mxu0  ;;  %v591_v20 = vpop.f32.mrb[0].mxu1 }
  0xe0   :  { %v401_v21 = vpop.f32.mrb[1].mxu0  ;;  %v593_v23 = vpop.f32.mrb[1].mxu1  ;;  %v794_v24 = vsub.f32 %v15945_v18, %v399_v19  ;;  %v858_v27 = vsub.f32 %v15945_v18, %v591_v20  ;;  %v24472_v19 = vand.u32 4294901760, %v16081_v12  ;;  %v24471_v20 = vand.u32 4294901760, %v16086_v13 }
  0xe1   :  { %v795_v38 = vsub.f32 %v15952_v28, %v401_v21  ;;  %v859_v54 = vsub.f32 %v15952_v28, %v593_v23  ;;  %v16099_v21 = vld [vmem:[%s24465_s2 + $0xa8] sm:$0xff] }
  0xe2   :  { %1248 = vmin.index.xlane.f32.xlu0 %v794_v24  ;;  %25487 = vst [vmem:[#allocation27_spill] sm:$0xff] %v16099_v21 }
  0xe3   :  { %v597_v25 = vpop.f32.mrb[2].mxu1  ;;  %v15949_v26 = vpop.f32.mrb[2].mxu0 }
  0xe4   :  { %v599_v29 = vpop.f32.mrb[3].mxu1  ;;  %v860_v30 = vsub.f32 %v15945_v18, %v597_v25  ;;  %v15955_v31 = vpop.f32.mrb[3].mxu0  ;;  %v796_v6 = vsub.f32 %v15945_v18, %v15949_v26  ;;  %v24481_v25 = vand.u32 4294901760, %v16099_v21 }
  0xe5   :  { %v861_v39 = vsub.f32 %v15952_v28, %v599_v29  ;;  %v797_v26 = vsub.f32 %v15952_v28, %v15955_v31  ;;  %v16130_v31 = vld [vmem:[%s24465_s2 + $0x40] sm:$0xff] }
  0xe6   :  { %1314 = vmin.index.xlane.f32.xlu1 %v860_v30  ;;  %1312 = vmin.index.xlane.f32.xlu0 %v858_v27  ;;  %v16119_v30 = vpack.c.bf16 %v24471_v20, %v24472_v19  ;;  %25490 = vst [vmem:[#allocation30_spill] sm:$0xff] %v16130_v31 }
  0xe7   :  { %v15969_v36 = vpop.f32.mrb[4].mxu0  ;;  %v15971_v37 = vpop.f32.mrb[4].mxu1 }
  0xe8   :  { %v413_v40 = vpop.f32.mrb[5].mxu0  ;;  %v15975_v41 = vpop.f32.mrb[5].mxu1  ;;  %25488 = vst [vmem:[#allocation28_spill] sm:$0xff] %v16119_v30  ;;  %14370 = vmatprep.subr.bf16.mxu1 %v16119_v30 }
  0xe9   :  { %v799_v46 = vsub.f32 %v15952_v28, %v413_v40  ;;  %v24477_v40 = vand.u32 4294901760, %v16130_v31  ;;  %14372 = vmatpush3.bf16.msra.mxu1 %v16119_v30  ;;  %v863_v7 = vsub.f32 %v15952_v28, %v15975_v41 }
  0xea   :  { %5518 = vmin.index.xlane.f32.xlu1 %v861_v39  ;;  %5452 = vmin.index.xlane.f32.xlu0 %v795_v38  ;;  %v16125_v38 = vpack.c.bf16 %v24481_v25, %v24482_v22  ;;  %v16135_v39 = vld [vmem:[%s24465_s2 + $0x48] sm:$0xff]  ;;  %v862_v25 = vsub.f32 %v15945_v18, %v15971_v37 }
  0xeb   :  { %v609_v51 = vpop.f32.mrb[6].mxu1  ;;  %v16007_v52 = vpop.f32.mrb[6].mxu0  ;;  %25491 = vst [vmem:[#allocation31_spill] sm:$0xff] %v16135_v39 }
  0xec   :  { %v16012_v55 = vpop.f32.mrb[7].mxu1  ;;  %v419_v56 = vpop.f32.mrb[7].mxu0  ;;  %v864_v62 = vsub.f32 %v15945_v18, %v609_v51  ;;  %25489 = vst [vmem:[#allocation29_spill] sm:$0xff] %v16125_v38  ;;  %v16142_v51 = vld [vmem:[%s24465_s2 + $0xb0] sm:$0xff]  ;;  %14558 = vmatprep.subr.bf16.mxu0 %v16125_v38  ;;  %v800_v10 = vsub.f32 %v15945_v18, %v16007_v52 }
  0xed   :  { %v801_v17 = vsub.f32 %v15952_v28, %v419_v56  ;;  %25492 = vst [vmem:[#allocation32_spill] sm:$0xff] %v16142_v51  ;;  %v865_v20 = vsub.f32 %v15952_v28, %v16012_v55  ;;  %14560 = vmatpush3.bf16.msra.mxu0 %v16125_v38 }
  0xee   :  { %5516 = vmin.index.xlane.f32.xlu0 %v859_v54  ;;  %5456 = vmin.index.xlane.f32.xlu1 %v799_v46  ;;  %v24476_v46 = vand.u32 4294901760, %v16135_v39  ;;  %v16147_v54 = vld [vmem:[%s24465_s2 + $0xb8] sm:$0xff] }
  0xef   :  { %v16051_v3 = vpop.f32.mrb[8].mxu1  ;;  %v16053_v4 = vpop.f32.mrb[8].mxu0  ;;  %25493 = vst [vmem:[#allocation33_spill] sm:$0xff] %v16147_v54 }
  0xf0   :  { %v16060_v8 = vpop.f32.mrb[9].mxu1  ;;  %v16062_v9 = vpop.f32.mrb[9].mxu0  ;;  %v16171_v63 = vpack.c.bf16 %v24476_v46, %v24477_v40  ;;  %v16188_v46 = vld [vmem:[%s24465_s2 + $0x58] sm:$0xff]  ;;  %v16193_v40 = vld [vmem:[%s24465_s2 + $0xc0] sm:$0xff] }
  0xf1   :  { %25497 = vst [vmem:[#allocation37_spill] sm:$0xff] %v16188_v46  ;;  %25498 = vst [vmem:[#allocation38_spill] sm:$0xff] %v16193_v40  ;;  %v24491_v47 = vand.u32 4294901760, %v16193_v40 }
  0xf2   :  { %1250 = vmin.index.xlane.f32.xlu0 %v796_v6  ;;  %1318 = vmin.index.xlane.f32.xlu1 %v864_v62  ;;  %v24479_v6 = vand.u32 4294901760, %v16142_v51  ;;  %25494 = vst [vmem:[#allocation34_spill] sm:$0xff] %v16171_v63 }
  0xf3   :  { %v621_v23 = vpop.f32.mrb[10].mxu1  ;;  %v16102_v24 = vpop.f32.mrb[10].mxu0  ;;  %14374 = vmatprep.subr.bf16.mxu1 %v16171_v63 }
  0xf4   :  { %v16109_v27 = vpop.f32.mrb[11].mxu1  ;;  %v16111_v29 = vpop.f32.mrb[11].mxu0  ;;  %v868_v55 = vsub.f32 %v15945_v18, %v621_v23  ;;  %v24489_v23 = vand.u32 4294901760, %v16183_v48  ;;  %14376 = vmatpush3.bf16.msra.mxu1 %v16171_v63  ;;  %v804_v48 = vsub.f32 %v15945_v18, %v16102_v24 }
  0xf5   :  { %v805_v37 = vsub.f32 %v15952_v28, %v16111_v29  ;;  %v869_v11 = vsub.f32 %v15952_v28, %v16109_v27 }
  0xf6   :  { %5454 = vmin.index.xlane.f32.xlu0 %v797_v26  ;;  %5458 = vmin.index.xlane.f32.xlu1 %v801_v17  ;;  %v24478_v17 = vand.u32 4294901760, %v16147_v54  ;;  %v798_v26 = vsub.f32 %v15945_v18, %v15969_v36 }
  0xf7   :  { %v16149_v56 = vpop.f32.mrb[12].mxu0  ;;  %v16151_v62 = vpop.f32.mrb[12].mxu1 }
  0xf8   :  { %v16161_v19 = vpop.f32.mrb[13].mxu0  ;;  %v16163_v0 = vpop.f32.mrb[13].mxu1  ;;  %v16177_v36 = vpack.c.bf16 %v24478_v17, %v24479_v6  ;;  %v16206_v6 = vld [vmem:[%s24465_s2 + $0xc8] sm:$0xff] }
  0xf9   :  { %25499 = vst [vmem:[#allocation39_spill] sm:$0xff] %v16206_v6  ;;  %v24490_v34 = vand.u32 4294901760, %v16206_v6  ;;  %v871_v12 = vsub.f32 %v15952_v28, %v16163_v0 }
  0xfa   :  { %25495 = vst [vmem:[#allocation35_spill] sm:$0xff] %v16177_v36  ;;  %1252 = vmin.index.xlane.f32.xlu0 %v798_v26  ;;  %5522 = vmin.index.xlane.f32.xlu1 %v865_v20  ;;  %v24488_v26 = vand.u32 4294901760, %v16188_v46 }
  0xfb   :  { %v16195_v17 = vpop.f32.mrb[14].mxu0  ;;  %v16197_v20 = vpop.f32.mrb[14].mxu1  ;;  %14562 = vmatprep.subr.bf16.mxu0 %v16177_v36  ;;  %v16230_v2 = vpack.c.bf16 %v24490_v34, %v24491_v47  ;;  %v16257_v47 = vld [vmem:[%s24465_s2 + $0xd8] sm:$0xff] }
  0xfc   :  { %v16211_v22 = vpop.f32.mrb[15].mxu0  ;;  %v16213_v35 = vpop.f32.mrb[15].mxu1  ;;  %14564 = vmatpush3.bf16.msra.mxu0 %v16177_v36  ;;  %v16222_v5 = vpack.c.bf16 %v24488_v26, %v24489_v23  ;;  %v16240_v26 = vld [vmem:[%s24465_s2 + $0x68] sm:$0xff]  ;;  %v24506_v23 = vand.u32 4294901760, %v16235_v53  ;;  %25505 = vst [vmem:[#allocation45_spill] sm:$0xff] %v16257_v47  ;;  %v24507_v34 = vand.u32 4294901760, %v16257_v47  ;;  %v808_v27 = vsub.f32 %v15945_v18, %v16195_v17 }
  0xfd   :  { %25501 = vst [vmem:[#allocation41_spill] sm:$0xff] %v16230_v2  ;;  %25503 = vst [vmem:[#allocation43_spill] sm:$0xff] %v16240_v26  ;;  %14566 = vmatprep.subr.bf16.mxu0 %v16230_v2  ;;  %v25506_v36 = vand.u32 4294901760, %v16240_v26  ;;  %v16357_v17 = vld [vmem:[%s24465_s2 + $0xf8] sm:$0xff] }
  0xfe   :  { %25500 = vst [vmem:[#allocation40_spill] sm:$0xff] %v16222_v5  ;;  %1316 = vmin.index.xlane.f32.xlu0 %v862_v25  ;;  %1322 = vmin.index.xlane.f32.xlu1 %v868_v55  ;;  %v16245_v25 = vld [vmem:[%s24465_s2 + $0xd0] sm:$0xff]  ;;  %25519 = vst [vmem:[#allocation55_spill] sm:$0xff] %v16357_v17 }
  0xff   :  { %25504 = vst [vmem:[#allocation44_spill] sm:$0xff] %v16245_v25  ;;  %v16247_v29 = vpop.f32.mrb[16].mxu0  ;;  %v16249_v55 = vpop.f32.mrb[16].mxu1  ;;  %14378 = vmatprep.subr.bf16.mxu1 %v16222_v5  ;;  %v16274_v50 = vpack.c.bf16 %v25506_v36, %v24506_v23  ;;  %v25508_v41 = vand.u32 4294901760, %v16245_v25 }
 0x100   :  { %v16262_v14 = vpop.f32.mrb[17].mxu0  ;;  %v16264_v63 = vpop.f32.mrb[17].mxu1  ;;  %14380 = vmatpush3.bf16.msra.mxu1 %v16222_v5  ;;  %14568 = vmatpush3.bf16.msra.mxu0 %v16230_v2  ;;  %v16285_v5 = vld [vmem:[%s24465_s2 + $0x70] sm:$0xff]  ;;  %v16290_v2 = vld [vmem:[%s24465_s2 + $0x78] sm:$0xff] }
 0x101   :  { %25507 = vst [vmem:[#allocation46_spill] sm:$0xff] %v16274_v50  ;;  %v16280_v30 = vpack.c.bf16 %v24507_v34, %v25508_v41  ;;  %25510 = vst [vmem:[#allocation48_spill] sm:$0xff] %v16285_v5  ;;  %14382 = vmatprep.subr.bf16.mxu1 %v16274_v50  ;;  %v24525_v41 = vand.u32 4294901760, %v16285_v5  ;;  %v16307_v34 = vld [vmem:[%s24465_s2 + $0xe8] sm:$0xff]  ;;  %v25514_v38 = vand.u32 4294901760, %v16290_v2  ;;  %v875_v43 = vsub.f32 %v15952_v28, %v16264_v63 }
 0x102   :  { %5520 = vmin.index.xlane.f32.xlu0 %v863_v7  ;;  %5462 = vmin.index.xlane.f32.xlu1 %v805_v37  ;;  %25511 = vst [vmem:[#allocation49_spill] sm:$0xff] %v16290_v2  ;;  %v16295_v7 = vld [vmem:[%s24465_s2 + $0xe0] sm:$0xff]  ;;  %25513 = vst [vmem:[#allocation51_spill] sm:$0xff] %v16307_v34  ;;  %v24526_v23 = vand.u32 4294901760, %v16307_v34 }
 0x103   :  { %25509 = vst [vmem:[#allocation47_spill] sm:$0xff] %v16280_v30  ;;  %25512 = vst [vmem:[#allocation50_spill] sm:$0xff] %v16295_v7  ;;  %v16297_v36 = vpop.f32.mrb[18].mxu0  ;;  %v16299_v37 = vpop.f32.mrb[18].mxu1  ;;  %14570 = vmatprep.subr.bf16.mxu0 %v16280_v30  ;;  %v16326_v52 = vpack.c.bf16 %v25514_v38, %v24525_v41  ;;  %v25516_v42 = vand.u32 4294901760, %v16295_v7  ;;  %v802_v38 = vsub.f32 %v15945_v18, %v16053_v4  ;;  %v24534_v41 = vand.u32 4294901760, %v16357_v17 }
 0x104   :  { %v16314_v57 = vpop.f32.mrb[19].mxu0  ;;  %v16316_v58 = vpop.f32.mrb[19].mxu1  ;;  %14384 = vmatpush3.bf16.msra.mxu1 %v16274_v50  ;;  %14572 = vmatpush3.bf16.msra.mxu0 %v16280_v30 }
 0x105   :  { %25515 = vst [vmem:[#allocation52_spill] sm:$0xff] %v16326_v52  ;;  %v16334_v50 = vpack.c.bf16 %v24526_v23, %v25516_v42  ;;  %14386 = vmatprep.subr.bf16.mxu1 %v16326_v52  ;;  %v16352_v42 = vld [vmem:[%s24465_s2 + $0xf0] sm:$0xff]  ;;  %v872_v23 = vsub.f32 %v15945_v18, %v16197_v20  ;;  %v877_v25 = vsub.f32 %v15952_v28, %v16316_v58 }
 0x106   :  { %1254 = vmin.index.xlane.f32.xlu0 %v800_v10  ;;  %5526 = vmin.index.xlane.f32.xlu1 %v869_v11  ;;  %25518 = vst [vmem:[#allocation54_spill] sm:$0xff] %v16352_v42  ;;  %v24535_v4 = vand.u32 4294901760, %v16352_v42  ;;  %v867_v42 = vsub.f32 %v15952_v28, %v16060_v8 }
 0x107   :  { %25517 = vst [vmem:[#allocation53_spill] sm:$0xff] %v16334_v50  ;;  %v16336_v26 = vpop.f32.mrb[20].mxu0  ;;  %v16338_v30 = vpop.f32.mrb[20].mxu1  ;;  %14574 = vmatprep.subr.bf16.mxu0 %v16334_v50 }
 0x108   :  { %v16343_v10 = vpop.f32.mrb[21].mxu0  ;;  %v16345_v11 = vpop.f32.mrb[21].mxu1  ;;  %14388 = vmatpush3.bf16.msra.mxu1 %v16326_v52  ;;  %14576 = vmatpush3.bf16.msra.mxu0 %v16334_v50  ;;  %v16372_v5 = vpack.c.bf16 %v24534_v41, %v24535_v4  ;;  %v866_v50 = vsub.f32 %v15945_v18, %v16051_v3  ;;  %v803_v41 = vsub.f32 %v15952_v28, %v16062_v9 }
 0x109   :  { %v809_v3 = vsub.f32 %v15952_v28, %v16211_v22  ;;  %v812_v22 = vsub.f32 %v15945_v18, %v16297_v36  ;;  %v806_v36 = vsub.f32 %v15945_v18, %v16149_v56  ;;  %v879_v45 = vsub.f32 %v15952_v28, %v16345_v11 }
 0x10a   :  { %1256 = vmin.index.xlane.f32.xlu0 %v802_v38  ;;  %1262 = vmin.index.xlane.f32.xlu1 %v808_v27  ;;  %25520 = vst [vmem:[#allocation56_spill] sm:$0xff] %v16372_v5 }
 0x10b   :  { %v16364_v52 = vpop.f32.mrb[22].mxu0  ;;  %v16366_v2 = vpop.f32.mrb[22].mxu1  ;;  %14578 = vmatprep.subr.bf16.mxu0 %v16372_v5 }
 0x10c   :  { %v16376_v53 = vpop.f32.mrb[23].mxu0  ;;  %v16378_v38 = vpop.f32.mrb[23].mxu1  ;;  %14580 = vmatpush3.bf16.msra.mxu0 %v16372_v5  ;;  %v873_v5 = vsub.f32 %v15952_v28, %v16213_v35  ;;  %v876_v35 = vsub.f32 %v15945_v18, %v16299_v37  ;;  %v870_v37 = vsub.f32 %v15945_v18, %v16151_v62  ;;  %v880_v58 = vsub.f32 %v15945_v18, %v16366_v2 }
 0x10d   :  { %v874_v2 = vsub.f32 %v15945_v18, %v16249_v55  ;;  %v881_v51 = vsub.f32 %v15952_v28, %v16378_v38 }
 0x10e   :  { %1320 = vmin.index.xlane.f32.xlu0 %v866_v50  ;;  %1326 = vmin.index.xlane.f32.xlu1 %v872_v23 }
 0x10f   :  { %v16381_v20 = vpop.f32.mrb[24].mxu0  ;;  %v16383_v27 = vpop.f32.mrb[24].mxu1 }
 0x110   :  { %v16390_v4 = vpop.f32.mrb[25].mxu0  ;;  %v16392_v17 = vpop.f32.mrb[25].mxu1 }
 0x112   :  { %5460 = vmin.index.xlane.f32.xlu0 %v803_v41  ;;  %5466 = vmin.index.xlane.f32.xlu1 %v809_v3 }
 0x113   :  { %v16394_v50 = vpop.f32.mrb[26].mxu0  ;;  %v16396_v23 = vpop.f32.mrb[26].mxu1 }
 0x114   :  { %v16402_v9 = vpop.f32.mrb[27].mxu0  ;;  %v16404_v46 = vpop.f32.mrb[27].mxu1  ;;  %v884_v38 = vsub.f32 %v15945_v18, %v16396_v23  ;;  %v878_v23 = vsub.f32 %v15945_v18, %v16338_v30 }
 0x115   :  { %v885_v61 = vsub.f32 %v15952_v28, %v16404_v46 }
 0x116   :  { %5524 = vmin.index.xlane.f32.xlu0 %v867_v42  ;;  %5530 = vmin.index.xlane.f32.xlu1 %v873_v5 }
 0x117   :  { %v16408_v41 = vpop.f32.mrb[28].mxu0  ;;  %v16410_v3 = vpop.f32.mrb[28].mxu1 }
 0x118   :  { %v16414_v8 = vpop.f32.mrb[29].mxu0  ;;  %v16416_v34 = vpop.f32.mrb[29].mxu1 }
 0x11a   :  { %1258 = vmin.index.xlane.f32.xlu0 %v804_v48  ;;  %1266 = vmin.index.xlane.f32.xlu1 %v812_v22  ;;  %v813_v22 = vsub.f32 %v15952_v28, %v16314_v57  ;;  %v816_v57 = vsub.f32 %v15945_v18, %v16364_v52  ;;  %v810_v52 = vsub.f32 %v15945_v18, %v16247_v29 }
 0x11b   :  { %v16420_v5 = vpop.f32.mrb[30].mxu0  ;;  %v16422_v42 = vpop.f32.mrb[30].mxu1 }
 0x11c   :  { %v16426_v7 = vpop.f32.mrb[31].mxu0  ;;  %v16428_v39 = vpop.f32.mrb[31].mxu1  ;;  %v888_v46 = vsub.f32 %v15945_v18, %v16422_v42  ;;  %v882_v42 = vsub.f32 %v15945_v18, %v16383_v27 }
 0x11e   :  { %1260 = vmin.index.xlane.f32.xlu0 %v806_v36  ;;  %1330 = vmin.index.xlane.f32.xlu1 %v876_v35  ;;  %v807_v35 = vsub.f32 %v15952_v28, %v16161_v19 }
 0x11f   :  { %v16430_v24 = vpop.f32.mrb[32].mxu0  ;;  %v16432_v48 = vpop.f32.mrb[32].mxu1 }
 0x120   :  { %v16438_v31 = vpop.f32.mrb[33].mxu0  ;;  %v16440_v47 = vpop.f32.mrb[33].mxu1 }
 0x122   :  { %1324 = vmin.index.xlane.f32.xlu0 %v870_v37  ;;  %5470 = vmin.index.xlane.f32.xlu1 %v813_v22 }
 0x123   :  { %v16442_v56 = vpop.f32.mrb[34].mxu0  ;;  %v16444_v36 = vpop.f32.mrb[34].mxu1 }
 0x124   :  { %v16450_v62 = vpop.f32.mrb[35].mxu0  ;;  %v16452_v13 = vpop.f32.mrb[35].mxu1 }
 0x126   :  { %5464 = vmin.index.xlane.f32.xlu0 %v807_v35  ;;  %5534 = vmin.index.xlane.f32.xlu1 %v877_v25 }
 0x127   :  { %v16456_v37 = vpop.f32.mrb[36].mxu0  ;;  %v16458_v22 = vpop.f32.mrb[36].mxu1 }
 0x128   :  { %v16462_v19 = vpop.f32.mrb[37].mxu0  ;;  %v16464_v6 = vpop.f32.mrb[37].mxu1 }
 0x12a   :  { %5528 = vmin.index.xlane.f32.xlu0 %v871_v12  ;;  %1270 = vmin.index.xlane.f32.xlu1 %v816_v57  ;;  %v817_v57 = vsub.f32 %v15952_v28, %v16376_v53  ;;  %v820_v53 = vsub.f32 %v15945_v18, %v16394_v50  ;;  %v814_v50 = vsub.f32 %v15945_v18, %v16336_v26 }
 0x12b   :  { %v16468_v25 = vpop.f32.mrb[38].mxu0  ;;  %v16470_v35 = vpop.f32.mrb[38].mxu1 }
 0x12c   :  { %v16474_v40 = vpop.f32.mrb[39].mxu0  ;;  %v16476_v60 = vpop.f32.mrb[39].mxu1 }
 0x12e   :  { %1264 = vmin.index.xlane.f32.xlu0 %v810_v52  ;;  %1334 = vmin.index.xlane.f32.xlu1 %v880_v58  ;;  %v811_v58 = vsub.f32 %v15952_v28, %v16262_v14 }
 0x12f   :  { %v16478_v0 = vpop.f32.mrb[40].mxu0  ;;  %v16480_v12 = vpop.f32.mrb[40].mxu1 }
 0x130   :  { %v16486_v59 = vpop.f32.mrb[41].mxu0  ;;  %v16488_v54 = vpop.f32.mrb[41].mxu1 }
 0x132   :  { %1328 = vmin.index.xlane.f32.xlu0 %v874_v2  ;;  %5474 = vmin.index.xlane.f32.xlu1 %v817_v57 }
 0x133   :  { %v16490_v29 = vpop.f32.mrb[42].mxu0  ;;  %v16492_v52 = vpop.f32.mrb[42].mxu1 }
 0x134   :  { %v16498_v55 = vpop.f32.mrb[43].mxu0  ;;  %v16500_v44 = vpop.f32.mrb[43].mxu1 }
 0x136   :  { %5468 = vmin.index.xlane.f32.xlu0 %v811_v58  ;;  %5538 = vmin.index.xlane.f32.xlu1 %v881_v51 }
 0x137   :  { %v16504_v2 = vpop.f32.mrb[44].mxu0  ;;  %v16506_v57 = vpop.f32.mrb[44].mxu1 }
 0x138   :  { %v16510_v14 = vpop.f32.mrb[45].mxu0  ;;  %v16512_v21 = vpop.f32.mrb[45].mxu1 }
 0x13a   :  { %5532 = vmin.index.xlane.f32.xlu0 %v875_v43  ;;  %1274 = vmin.index.xlane.f32.xlu1 %v820_v53  ;;  %v821_v53 = vsub.f32 %v15952_v28, %v16402_v9  ;;  %v824_v9 = vsub.f32 %v15945_v18, %v16420_v5  ;;  %v818_v5 = vsub.f32 %v15945_v18, %v16381_v20 }
 0x13b   :  { %v16516_v51 = vpop.f32.mrb[46].mxu0  ;;  %v16518_v58 = vpop.f32.mrb[46].mxu1 }
 0x13c   :  { %v16522_v16 = vpop.f32.mrb[47].mxu0  ;;  %v16524_v33 = vpop.f32.mrb[47].mxu1 }
 0x13e   :  { %1268 = vmin.index.xlane.f32.xlu0 %v814_v50  ;;  %1338 = vmin.index.xlane.f32.xlu1 %v884_v38  ;;  %v815_v38 = vsub.f32 %v15952_v28, %v16343_v10 }
 0x13f   :  { %v16526_v63 = vpop.f32.mrb[48].mxu0  ;;  %v16528_v43 = vpop.f32.mrb[48].mxu1 }
 0x140   :  { %v16534_v32 = vpop.f32.mrb[49].mxu0  ;;  %v16536_v1 = vpop.f32.mrb[49].mxu1 }
 0x141   :  { %25521 = vst [vmem:[#allocation57_spill] sm:$0xff] %v16534_v32  ;;  %25522 = vst [vmem:[#allocation58_spill] sm:$0xff] %v16536_v1 }
 0x142   :  { %1332 = vmin.index.xlane.f32.xlu0 %v878_v23  ;;  %5478 = vmin.index.xlane.f32.xlu1 %v821_v53 }
 0x143   :  { %v16538_v26 = vpop.f32.mrb[50].mxu0  ;;  %v16540_v50 = vpop.f32.mrb[50].mxu1 }
 0x144   :  { %25523 = vst [vmem:[#allocation59_spill] sm:$0xff] %v16540_v50  ;;  %v16546_v30 = vpop.f32.mrb[51].mxu0  ;;  %v16548_v49 = vpop.f32.mrb[51].mxu1 }
 0x146   :  { %5472 = vmin.index.xlane.f32.xlu0 %v815_v38  ;;  %5542 = vmin.index.xlane.f32.xlu1 %v885_v61 }
 0x147   :  { %v16552_v23 = vpop.f32.mrb[52].mxu1  ;;  %v16554_v53 = vpop.f32.mrb[52].mxu0 }
 0x148   :  { %25524 = vst [vmem:[#allocation60_spill] sm:$0xff] %v16552_v23  ;;  %25525 = vst [vmem:[#allocation61_spill] sm:$0xff] %v16554_v53  ;;  %v16558_v10 = vpop.f32.mrb[53].mxu1  ;;  %v16560_v50 = vpop.f32.mrb[53].mxu0 }
 0x149   :  { %25526 = vst [vmem:[#allocation62_spill] sm:$0xff] %v16560_v50 }
 0x14a   :  { %5536 = vmin.index.xlane.f32.xlu0 %v879_v45  ;;  %1278 = vmin.index.xlane.f32.xlu1 %v824_v9  ;;  %v825_v9 = vsub.f32 %v15952_v28, %v16426_v7  ;;  %v828_v7 = vsub.f32 %v15945_v18, %v16442_v56 }
 0x14b   :  { %v16564_v61 = vpop.f32.mrb[54].mxu0  ;;  %v16566_v38 = vpop.f32.mrb[54].mxu1 }
 0x14c   :  { %25527 = vst [vmem:[#allocation63_spill] sm:$0xff] %v16564_v61  ;;  %25528 = vst [vmem:[#allocation64_spill] sm:$0xff] %v16566_v38  ;;  %v16570_v53 = vpop.f32.mrb[55].mxu0  ;;  %v16572_v23 = vpop.f32.mrb[55].mxu1 }
 0x14d   :  { %25529 = vst [vmem:[#allocation65_spill] sm:$0xff] %v16572_v23 }
 0x14e   :  { %1272 = vmin.index.xlane.f32.xlu0 %v818_v5  ;;  %1342 = vmin.index.xlane.f32.xlu1 %v888_v46  ;;  %v819_v46 = vsub.f32 %v15952_v28, %v16390_v4  ;;  %v883_v4 = vsub.f32 %v15952_v28, %v16392_v17 }
 0x14f   :  { %v16574_v11 = vpop.f32.mrb[56].mxu1  ;;  %v16576_v45 = vpop.f32.mrb[56].mxu0 }
 0x150   :  { %25530 = vst [vmem:[#allocation66_spill] sm:$0xff] %v16574_v11  ;;  %25531 = vst [vmem:[#allocation67_spill] sm:$0xff] %v16576_v45  ;;  %v16582_v38 = vpop.f32.mrb[57].mxu1  ;;  %v16584_v61 = vpop.f32.mrb[57].mxu0  ;;  %v889_v45 = vsub.f32 %v15952_v28, %v16428_v39 }
 0x151   :  { %25532 = vst [vmem:[#allocation68_spill] sm:$0xff] %v16582_v38  ;;  %25533 = vst [vmem:[#allocation69_spill] sm:$0xff] %v16584_v61 }
 0x152   :  { %1336 = vmin.index.xlane.f32.xlu0 %v882_v42  ;;  %5482 = vmin.index.xlane.f32.xlu1 %v825_v9 }
 0x153   :  { %v16586_v20 = vpop.f32.mrb[58].mxu0  ;;  %v16588_v5 = vpop.f32.mrb[58].mxu1 }
 0x154   :  { %25534 = vst [vmem:[#allocation70_spill] sm:$0xff] %v16586_v20  ;;  %25535 = vst [vmem:[#allocation71_spill] sm:$0xff] %v16588_v5  ;;  %v16594_v27 = vpop.f32.mrb[59].mxu0  ;;  %v16596_v11 = vpop.f32.mrb[59].mxu1  ;;  %v25540_v5 = vlaneseq }
 0x155   :  { %25536 = vst [vmem:[#allocation72_spill] sm:$0xff] %v16594_v27  ;;  %25537 = vst [vmem:[#allocation73_spill] sm:$0xff] %v16596_v11 }
 0x156   :  { %5476 = vmin.index.xlane.f32.xlu0 %v819_v46  ;;  %5546 = vmin.index.xlane.f32.xlu1 %v889_v45  ;;  %v16605_v20 = vand.u32 127, %v25540_v5  ;;  %v892_v45 = vsub.f32 %v15945_v18, %v16444_v36 }
 0x157   :  { %v16600_v42 = vpop.f32.mrb[60].mxu1  ;;  %v16602_v9 = vpop.f32.mrb[60].mxu0 }
 0x158   :  { %25538 = vst [vmem:[#allocation74_spill] sm:$0xff] %v16600_v42  ;;  %25539 = vst [vmem:[#allocation75_spill] sm:$0xff] %v16602_v9  ;;  %v16609_v39 = vpop.f32.mrb[61].mxu1  ;;  %v16611_v27 = vpop.f32.mrb[61].mxu0  ;;  %v10300_v56 = vadd.s32 4294967288, %v16605_v20  ;;  %v10307_v46 = vadd.s32 4294967280, %v16605_v20  ;;  %v16633_v11 = vsub.s32 %v16605_v20, %v15939_v15 }
 0x159   :  { %25541 = vst [vmem:[#allocation76_spill] sm:$0xff] %v16605_v20  ;;  %25542 = vst [vmem:[#allocation77_spill] sm:$0xff] %v16609_v39  ;;  %v10314_v9 = vadd.s32 4294967272, %v16605_v20  ;;  %v10328_v5 = vadd.s32 4294967256, %v16605_v20  ;;  %v10342_v39 = vadd.s32 4294967240, %v16605_v20  ;;  %v10391_v61 = vadd.s32 4294967184, %v16605_v20 }
 0x15a   :  { %25543 = vst [vmem:[#allocation78_spill] sm:$0xff] %v16611_v27  ;;  %5540 = vmin.index.xlane.f32.xlu0 %v883_v4  ;;  %1282 = vmin.index.xlane.f32.xlu1 %v828_v7  ;;  %v822_v27 = vsub.f32 %v15945_v18, %v16408_v41  ;;  %v10321_v7 = vadd.s32 4294967264, %v16605_v20  ;;  %25548 = vst [vmem:[#allocation83_spill] sm:$0xff] %v16633_v11  ;;  %v823_v41 = vsub.f32 %v15952_v28, %v16414_v8 }
 0x15b   :  { %v16619_v42 = vpop.f32.mrb[62].mxu0  ;;  %v16621_v17 = vpop.f32.mrb[62].mxu1  ;;  %v10356_v8 = vadd.s32 4294967224, %v16605_v20 }
 0x15c   :  { %25544 = vst [vmem:[#allocation79_spill] sm:$0xff] %v16619_v42  ;;  %25545 = vst [vmem:[#allocation80_spill] sm:$0xff] %v16621_v17  ;;  %v16626_v4 = vpop.f32.mrb[63].mxu0  ;;  %v16628_v36 = vpop.f32.mrb[63].mxu1  ;;  %v16636_v42 = vsub.s32 %v10300_v56, %v15939_v15  ;;  %v16639_v17 = vsub.s32 %v10307_v46, %v15939_v15  ;;  %v829_v56 = vsub.f32 %v15952_v28, %v16450_v62 }
 0x15d   :  { %25546 = vst [vmem:[#allocation81_spill] sm:$0xff] %v16626_v4  ;;  %25547 = vst [vmem:[#allocation82_spill] sm:$0xff] %v16628_v36  ;;  %v886_v36 = vsub.f32 %v15945_v18, %v16410_v3  ;;  %v16646_v4 = vsub.s32 %v10314_v9, %v15939_v15  ;;  %v16656_v46 = vsub.s32 %v10321_v7, %v15939_v15  ;;  %v25553_v9 = vld [vmem:[#allocation59_spill] sm:$0xff] }
 0x15e   :  { %1276 = vmin.index.xlane.f32.xlu0 %v822_v27  ;;  %1346 = vmin.index.xlane.f32.xlu1 %v892_v45  ;;  %25549 = vst [vmem:[#allocation84_spill] sm:$0xff] %v16636_v42  ;;  %v16649_v27 = vsub.s32 %v10328_v5, %v15939_v15  ;;  %v887_v45 = vsub.f32 %v15952_v28, %v16416_v34 }
 0x15f   :  { %v826_v3 = vsub.f32 %v15945_v18, %v16430_v24  ;;  %v16664_v5 = vsub.s32 %v10342_v39, %v15939_v15  ;;  %v893_v7 = vsub.f32 %v15952_v28, %v16452_v13  ;;  %v832_v62 = vsub.f32 %v15945_v18, %v16468_v25 }
 0x160   :  { %25550 = vst [vmem:[#allocation85_spill] sm:$0xff] %v16649_v27  ;;  %v10335_v27 = vadd.s32 4294967248, %v16605_v20  ;;  %v833_v13 = vsub.f32 %v15952_v28, %v16474_v40  ;;  %v10370_v25 = vadd.s32 4294967208, %v16605_v20  ;;  %v10349_v24 = vadd.s32 4294967232, %v16605_v20 }
 0x162   :  { %1340 = vmin.index.xlane.f32.xlu0 %v886_v36  ;;  %5486 = vmin.index.xlane.f32.xlu1 %v829_v56  ;;  %v896_v36 = vsub.f32 %v15945_v18, %v16470_v35  ;;  %v16688_v56 = vsub.s32 %v10356_v8, %v15939_v15  ;;  %v16695_v34 = vsub.s32 %v10335_v27, %v15939_v15  ;;  %v10384_v27 = vadd.s32 4294967192, %v16605_v20 }
 0x163   :  { %v16728_v40 = vsub.s32 %v10370_v25, %v15939_v15  ;;  %v16735_v35 = vsub.s32 %v10349_v24, %v15939_v15  ;;  %v25556_v24 = vld [vmem:[#allocation63_spill] sm:$0xff] }
 0x164   :  { %v16766_v32 = vsub.s32 %v10384_v27, %v15939_v15  ;;  %v25581_v27 = vld [vmem:[#allocation79_spill] sm:$0xff] }
 0x165   :  { %25551 = vst [vmem:[#allocation86_spill] sm:$0xff] %v16728_v40  ;;  %25552 = vst [vmem:[#allocation87_spill] sm:$0xff] %v16735_v35  ;;  %v25557_v40 = vld [vmem:[#allocation64_spill] sm:$0xff] }
 0x166   :  { %5480 = vmin.index.xlane.f32.xlu0 %v823_v41  ;;  %5550 = vmin.index.xlane.f32.xlu1 %v893_v7  ;;  %25558 = vst [vmem:[#allocation59_spill] sm:$0xff] %v16766_v32  ;;  %v25563_v32 = vmov 0.0  }
 0x16a   :  { %5544 = vmin.index.xlane.f32.xlu0 %v887_v45  ;;  %1286 = vmin.index.xlane.f32.xlu1 %v832_v62  ;;  %v10363_v62 = vadd.s32 4294967216, %v16605_v20  ;;  %v25568_v45 = vsub.f32 %v15945_v18, %v16432_v48  ;;  %v10377_v48 = vadd.s32 4294967200, %v16605_v20 }
 0x16e   :  { %1280 = vmin.index.xlane.f32.xlu0 %v826_v3  ;;  %1350 = vmin.index.xlane.f32.xlu1 %v896_v36  ;;  %v16777_v36 = vsub.s32 %v10363_v62, %v15939_v15 }
 0x16f   :  { %v16768_v25 = vpop.xlane.xlu0 %1248 }
 0x170   :  { %25559 = vst [vmem:[#allocation63_spill] sm:$0xff] %v16768_v25  ;;  %25561 = vst [vmem:[#allocation64_spill] sm:$0xff] %v16777_v36  ;;  %vm24893_vm1 = vcmp.eq.s32.totalorder %v16605_v20, %v16768_v25 }
 0x171   :  { %v16791_v3 = vsel %vm24893_vm1, 1.0, %v25563_v32 }
 0x172   :  { %v16801_v7 = vsub.f32 %v16791_v3, %v16791_v3  ;;  %1344 = vmin.index.xlane.f32.xlu0 %v25568_v45  ;;  %5490 = vmin.index.xlane.f32.xlu1 %v833_v13  ;;  %v10398_v45 = vadd.s32 4294967176, %v16605_v20 }
 0x173   :  { %v16810_v36 = vpop.xlane.xlu1 %1314  ;;  %v16812_v8 = vpop.xlane.xlu0 %1312 }
 0x174   :  { %25567 = vst [vmem:[#allocation88_spill] sm:$0xff] %v16801_v7  ;;  %25571 = vst [vmem:[#allocation89_spill] sm:$0xff] %v16810_v36  ;;  %vm24671_vm3 = vcmp.eq.s32.totalorder %v16605_v20, %v16810_v36  ;;  %v10491_v62 = vrot.slane %v16810_v36, %v16636_v42  ;;  %vm24678_vm4 = vcmp.eq.s32.totalorder %v16605_v20, %v16812_v8 }
 0x175   :  { %25572 = vst [vmem:[#allocation90_spill] sm:$0xff] %v16812_v8  ;;  %v10487_v50 = vrot.slane %v16812_v8, %v16633_v11  ;;  %v16833_v38 = vsel %vm24671_vm3, 1.0, %v25563_v32  ;;  %v16839_v13 = vsel %vm24678_vm4, 1.0, %v25563_v32  ;;  %v25579_v36 = vsub.f32 %v15952_v28, %v16438_v31 }
 0x176   :  { %25576 = vst [vmem:[#allocation91_spill] sm:$0xff] %v16833_v38  ;;  %25577 = vst [vmem:[#allocation92_spill] sm:$0xff] %v16839_v13  ;;  %v16845_v1 = vsub.f32 %v16839_v13, %v16839_v13  ;;  %v25580_v8 = vsub.f32 %v15952_v28, %v16476_v60  ;;  %v16875_v41 = vsub.f32 %v16833_v38, %v16833_v38  ;;  %vm10333_vm3 = vcmask 392512  }
 0x177   :  { %v16848_v39 = vsel %vm10305_vm2, %v10491_v62, %v10487_v50  ;;  %5484 = vmin.index.xlane.f32.xlu0 %v25579_v36  ;;  %v16859_v35 = vpop.xlane.xlu1 %5518  ;;  %v16861_v13 = vpop.xlane.xlu0 %5452  ;;  %v25584_v50 = vand.u32 4294901760, %v16801_v7  ;;  %v16907_v36 = vsub.s32 %v10377_v48, %v15939_v15 }
 0x178   :  { %25578 = vst [vmem:[#allocation93_spill] sm:$0xff] %v16845_v1  ;;  %5554 = vmin.index.xlane.f32.xlu1 %v25580_v8  ;;  %25582 = vst [vmem:[#allocation79_spill] sm:$0xff] %v16859_v35  ;;  %v16871_v8 = vsub.s32 %v10398_v45, %v15939_v15  ;;  %vm24646_vm5 = vcmp.eq.s32.totalorder %v16605_v20, %v16859_v35  ;;  %vm24797_vm6 = vcmp.eq.s32.totalorder %v16605_v20, %v16861_v13 }
 0x179   :  { %25583 = vst [vmem:[#allocation94_spill] sm:$0xff] %v16861_v13  ;;  %v1668_v62 = vsub.f32 %v16801_v7, %v25584_v50  ;;  %25588 = vst [vmem:[#allocation96_spill] sm:$0xff] %v16875_v41  ;;  %v16887_v31 = vsel %vm24646_vm5, 1.0, %v25563_v32  ;;  %v16893_v45 = vsel %vm24797_vm6, 1.0, %v25563_v32  ;;  %v25592_v7 = vsub.f32 %v15952_v28, %v16440_v47 }
 0x17a   :  { %25587 = vst [vmem:[#allocation95_spill] sm:$0xff] %v16871_v8  ;;  %25590 = vst [vmem:[#allocation97_spill] sm:$0xff] %v16887_v31  ;;  %v16898_v23 = vsub.f32 %v16893_v45, %v16893_v45  ;;  %v25593_v50 = vsub.f32 %v15945_v18, %v16490_v29  ;;  %v16910_v8 = vsub.s32 %v10391_v61, %v15939_v15  ;;  %v25599_v48 = vand.u32 4294901760, %v16845_v1 }
 0x17b   :  { %v1669_v60 = vand.u32 4294901760, %v1668_v62  ;;  %5548 = vmin.index.xlane.f32.xlu0 %v25592_v7  ;;  %25594 = vst [vmem:[#allocation99_spill] sm:$0xff] %v16907_v36  ;;  %v10299_v62 = vrot.slane %v16768_v25, %v16633_v11  ;;  %v16916_v38 = vsub.f32 %v16887_v31, %v16887_v31  ;;  %v10807_v47 = vrot.slane %v16859_v35, %v16636_v42  ;;  %v16920_v7 = vpop.xlane.xlu0 %5516  ;;  %v16922_v29 = vpop.xlane.xlu1 %5456 }
 0x17c   :  { %25591 = vst [vmem:[#allocation98_spill] sm:$0xff] %v16898_v23  ;;  %1290 = vmin.index.xlane.f32.xlu1 %v25593_v50  ;;  %25595 = vst [vmem:[#allocation100_spill] sm:$0xff] %v16910_v8  ;;  %v16927_v61 = vsub.f32 %v16845_v1, %v25599_v48  ;;  %vm24657_vm7 = vcmp.eq.s32.totalorder %v16605_v20, %v16920_v7  ;;  %v10803_v50 = vrot.slane %v16920_v7, %v16633_v11  ;;  %vm24894_vm6 = vcmask 786112  }
 0x17d   :  { %25596 = vst [vmem:[#allocation101_spill] sm:$0xff] %v16916_v38  ;;  %12845 = vmatprep.mubr.f32.mxu1 %v1669_v60  ;;  %25597 = vst [vmem:[#allocation102_spill] sm:$0xff] %v16920_v7  ;;  %vm24713_vm8 = vcmp.eq.s32.totalorder %v16605_v20, %v16922_v29  ;;  %v10645_v35 = vrot.slane %v16861_v13, %v16633_v11  ;;  %v16942_v48 = vsel %vm24657_vm7, 1.0, %v25563_v32  ;;  %v25608_v11 = vand.u32 4294901760, %v16898_v23 }
 0x17e   :  { %25598 = vst [vmem:[#allocation103_spill] sm:$0xff] %v16922_v29  ;;  %25600 = vst [vmem:[#allocation104_spill] sm:$0xff] %v16927_v61  ;;  %v11583_v1 = vsel %vm24713_vm8, 1.0, %v25563_v32  ;;  %v16950_v31 = vsel %vm10305_vm2, %v10807_v47, %v10803_v50  ;;  %v10654_v13 = vrot.slane %v16922_v29, %v16639_v17  ;;  %v25603_v7 = vsub.f32 %v15945_v18, %v16456_v37 }
 0x17f   :  { %25601 = vst [vmem:[#allocation105_spill] sm:$0xff] %v16942_v48  ;;  %v16952_v60 = vsub.f32 %v11583_v1, %v11583_v1  ;;  %v25604_v15 = vsub.f32 %v15945_v18, %v16492_v52  ;;  %v16964_v25 = vsub.f32 %v16942_v48, %v16942_v48  ;;  %v16966_v47 = vpop.xlane.xlu0 %1250  ;;  %v16968_v50 = vpop.xlane.xlu1 %1318  ;;  %v5873_v29 = vsub.f32 %v16898_v23, %v25608_v11 }
 0x180   :  { %1284 = vmin.index.xlane.f32.xlu0 %v25603_v7  ;;  %25606 = vst [vmem:[#allocation108_spill] sm:$0xff] %v16966_v47  ;;  %25607 = vst [vmem:[#allocation109_spill] sm:$0xff] %v16968_v50  ;;  %vm24847_vm11 = vcmp.eq.s32.totalorder %v16605_v20, %v16966_v47  ;;  %vm24656_vm12 = vcmp.eq.s32.totalorder %v16605_v20, %v16968_v50  ;;  %v25609_v52 = vand.u32 4294901760, %v16875_v41  ;;  %vm10347_vm8 = vcmask 523712  }
 0x181   :  { %25602 = vst [vmem:[#allocation106_spill] sm:$0xff] %v16952_v60  ;;  %1354 = vmin.index.xlane.f32.xlu1 %v25604_v15  ;;  %25605 = vst [vmem:[#allocation107_spill] sm:$0xff] %v16964_v25  ;;  %v10304_v15 = vrot.slane %v16966_v47, %v16636_v42  ;;  %v11326_v11 = vsel %vm24847_vm11, 1.0, %v25563_v32  ;;  %v16994_v37 = vsel %vm24656_vm12, 1.0, %v25563_v32  ;;  %v5874_v7 = vand.u32 4294901760, %v5873_v29 }
 0x182   :  { %v16984_v48 = vsub.f32 %v16875_v41, %v25609_v52  ;;  %25611 = vst [vmem:[#allocation111_spill] sm:$0xff] %v16994_v37  ;;  %v16997_v61 = vsub.f32 %v11326_v11, %v11326_v11  ;;  %v5383_v8 = vadd.f32 %v11326_v11, %v16791_v3  ;;  %v25613_v47 = vsub.f32 %v15945_v18, %v16458_v22 }
 0x183   :  { %v10306_v52 = vsel %vm10305_vm2, %v10304_v15, %v10299_v62  ;;  %v17008_v36 = vsub.f32 %v16994_v37, %v16994_v37  ;;  %13613 = vmatprep.mubr.f32.mxu0 %v5874_v7  ;;  %v25615_v29 = vsub.f32 %v15952_v28, %v16498_v55  ;;  %v17013_v23 = vpop.xlane.xlu0 %5454  ;;  %v17015_v3 = vpop.xlane.xlu1 %5458  ;;  %v25618_v62 = vand.u32 4294901760, %v16952_v60 }
 0x184   :  { %25610 = vst [vmem:[#allocation110_spill] sm:$0xff] %v16984_v48  ;;  %25612 = vst [vmem:[#allocation112_spill] sm:$0xff] %v16997_v61  ;;  %1348 = vmin.index.xlane.f32.xlu0 %v25613_v47  ;;  %v25619_v47 = vand.u32 4294901760, %v16916_v38  ;;  %vm24752_vm13 = vcmp.eq.s32.totalorder %v16605_v20, %v17013_v23  ;;  %v10649_v55 = vrot.slane %v17013_v23, %v16636_v42  ;;  %vm10389_vm11 = vcmask 917312  }
 0x185   :  { %25614 = vst [vmem:[#allocation113_spill] sm:$0xff] %v17008_v36  ;;  %5494 = vmin.index.xlane.f32.xlu1 %v25615_v29  ;;  %25616 = vst [vmem:[#allocation114_spill] sm:$0xff] %v17013_v23  ;;  %v17020_v15 = vsub.f32 %v16952_v60, %v25618_v62  ;;  %vm24712_vm14 = vcmp.eq.s32.totalorder %v16605_v20, %v17015_v3  ;;  %v11582_v29 = vsel %vm24752_vm13, 1.0, %v25563_v32 }
 0x186   :  { %25617 = vst [vmem:[#allocation115_spill] sm:$0xff] %v17015_v3  ;;  %v17026_v11 = vsub.f32 %v16916_v38, %v25619_v47  ;;  %v11584_v62 = vsel %vm24712_vm14, 1.0, %v25563_v32  ;;  %v10659_v47 = vrot.slane %v17015_v3, %v16646_v4  ;;  %v17046_v22 = vsub.f32 %v11582_v29, %v11582_v29 }
 0x187   :  { %v5894_v41 = vand.u32 4294901760, %v17020_v15  ;;  %v10099_v7 = vadd.f32 %v11582_v29, %v16893_v45  ;;  %v10650_v38 = vsel %vm10305_vm2, %v10649_v55, %v10645_v35  ;;  %v17050_v60 = vsub.f32 %v11584_v62, %v11584_v62  ;;  %v17059_v3 = vpop.xlane.xlu0 %1252  ;;  %v17061_v15 = vpop.xlane.xlu1 %5522 }
 0x188   :  { %25620 = vst [vmem:[#allocation116_spill] sm:$0xff] %v17026_v11  ;;  %25621 = vst [vmem:[#allocation117_spill] sm:$0xff] %v17046_v22  ;;  %v25623_v23 = vsub.f32 %v15952_v28, %v16462_v19  ;;  %v10655_v37 = vsel %vm10312_vm9, %v10654_v13, %v10650_v38  ;;  %v25624_v42 = vsub.f32 %v15952_v28, %v16500_v44  ;;  %v25627_v45 = vand.u32 4294901760, %v16997_v61 }
 0x189   :  { %25622 = vst [vmem:[#allocation118_spill] sm:$0xff] %v17050_v60  ;;  %25625 = vst [vmem:[#allocation119_spill] sm:$0xff] %v17059_v3  ;;  %v25628_v29 = vand.u32 4294901760, %v16964_v25  ;;  %v10100_v38 = vadd.f32 %v11583_v1, %v10099_v7  ;;  %v17074_v44 = vsel %vm10319_vm10, %v10659_v47, %v10655_v37  ;;  %vm24846_vm15 = vcmp.eq.s32.totalorder %v16605_v20, %v17059_v3 }
 0x18a   :  { %5488 = vmin.index.xlane.f32.xlu0 %v25623_v23  ;;  %5558 = vmin.index.xlane.f32.xlu1 %v25624_v42  ;;  %25626 = vst [vmem:[#allocation120_spill] sm:$0xff] %v17061_v15  ;;  %v1678_v35 = vsub.f32 %v16997_v61, %v25627_v45  ;;  %v11327_v42 = vsel %vm24846_vm15, 1.0, %v25563_v32  ;;  %v10311_v13 = vrot.slane %v17059_v3, %v16639_v17 }
 0x18b   :  { %v17070_v19 = vsub.f32 %v16964_v25, %v25628_v29  ;;  %vm24645_vm0 = vcmp.eq.s32.totalorder %v16605_v20, %v17061_v15  ;;  %v10817_v1 = vrot.slane %v17061_v15, %v16646_v4  ;;  %v17088_v7 = vadd.f32 %v11584_v62, %v10100_v38  ;;  %v17115_v23 = vpop.xlane.xlu1 %1322 }
 0x18c   :  { %v17090_v37 = vsub.f32 %v11327_v42, %v11327_v42  ;;  %v17092_v47 = vadd.f32 %v11327_v42, %v5383_v8  ;;  %v17098_v45 = vsel %vm24645_vm0, 1.0, %v25563_v32  ;;  %v25632_v29 = vsub.f32 %v15952_v28, %v16464_v6  ;;  %v17113_v42 = vpop.xlane.xlu0 %1316  ;;  %25636 = vst [vmem:[#allocation126_spill] sm:$0xff] %v17115_v23 }
 0x18d   :  { %25629 = vst [vmem:[#allocation121_spill] sm:$0xff] %v17070_v19  ;;  %25631 = vst [vmem:[#allocation123_spill] sm:$0xff] %v17098_v45  ;;  %v17104_v55 = vsel %vm10312_vm9, %v10311_v13, %v10306_v52  ;;  %v17108_v62 = vsub.f32 %v17098_v45, %v17098_v45  ;;  %v1679_v38 = vand.u32 4294901760, %v1678_v35  ;;  %v25634_v8 = vsub.f32 %v15945_v18, %v16516_v51  ;;  %v25638_v35 = vld [vmem:[#allocation85_spill] sm:$0xff] }
 0x18e   :  { %25630 = vst [vmem:[#allocation122_spill] sm:$0xff] %v17090_v37  ;;  %5552 = vmin.index.xlane.f32.xlu0 %v25632_v29  ;;  %25635 = vst [vmem:[#allocation125_spill] sm:$0xff] %v17113_v42  ;;  %v25637_v25 = vand.u32 4294901760, %v17046_v22  ;;  %vm24670_vm0 = vcmp.eq.s32.totalorder %v16605_v20, %v17113_v42  ;;  %v10496_v52 = vrot.slane %v17113_v42, %v16639_v17  ;;  %v24666_v15 = vand.u32 4294901760, %v17050_v60 }
 0x18f   :  { %25633 = vst [vmem:[#allocation124_spill] sm:$0xff] %v17108_v62  ;;  %1294 = vmin.index.xlane.f32.xlu1 %v25634_v8  ;;  %vm24655_vm5 = vcmp.eq.s32.totalorder %v16605_v20, %v17115_v23  ;;  %12846 = vmatmul.mubr.f32.vlgmr.msra.gmra.mrb[64].mxu1 %v1679_v38  ;;  %v17132_v13 = vsel %vm24670_vm0, 1.0, %v25563_v32  ;;  %v25641_v61 = vsub.f32 %v15945_v18, %v16478_v0  ;;  %v17160_v42 = vpop.xlane.xlu1 %5462 }
 0x190   :  { %v5883_v6 = vsub.f32 %v17046_v22, %v25637_v25  ;;  %v17138_v25 = vsel %vm24655_vm5, 1.0, %v25563_v32  ;;  %v17143_v22 = vsub.f32 %v17132_v13, %v17132_v13  ;;  %v10497_v38 = vsel %vm10312_vm9, %v10496_v52, %v16848_v39  ;;  %v17158_v8 = vpop.xlane.xlu0 %5520  ;;  %25644 = vst [vmem:[#allocation129_spill] sm:$0xff] %v17160_v42 }
 0x191   :  { %v17149_v51 = vsub.f32 %v17138_v25, %v17138_v25  ;;  %25643 = vst [vmem:[#allocation128_spill] sm:$0xff] %v17158_v8  ;;  %v25645_v39 = vand.u32 4294901760, %v17090_v37  ;;  %vm10326_vm5 = vcmask 326912   ;;  %v25646_v0 = vrot.slane %v16968_v50, %v16646_v4 }
 0x192   :  { %v5884_v29 = vand.u32 4294901760, %v5883_v6  ;;  %25639 = vst [vmem:[#allocation85_spill] sm:$0xff] %v17143_v22  ;;  %1288 = vmin.index.xlane.f32.xlu0 %v25641_v61  ;;  %v25642_v6 = vsub.f32 %v15945_v18, %v16518_v58  ;;  %v25647_v58 = vand.u32 4294901760, %v17008_v36  ;;  %vm24669_vm12 = vcmp.eq.s32.totalorder %v16605_v20, %v17158_v8 }
 0x193   :  { %25640 = vst [vmem:[#allocation127_spill] sm:$0xff] %v17149_v51  ;;  %v1688_v52 = vsub.f32 %v17090_v37, %v25645_v39  ;;  %v17169_v61 = vsel %vm10319_vm10, %v25646_v0, %v10497_v38  ;;  %v10812_v39 = vrot.slane %v17158_v8, %v16639_v17  ;;  %vm24689_vm7 = vcmp.eq.s32.totalorder %v16605_v20, %v17160_v42 }
 0x194   :  { %13614 = vmatmul.mubr.f32.vlgmr.msra.gmra.mrb[64].mxu0 %v5884_v29  ;;  %1358 = vmin.index.xlane.f32.xlu1 %v25642_v6  ;;  %v17175_v6 = vsub.f32 %v17008_v36, %v25647_v58  ;;  %v17188_v0 = vsel %vm24669_vm12, 1.0, %v25563_v32  ;;  %v17194_v58 = vsel %vm24689_vm7, 1.0, %v25563_v32  ;;  %v25650_v8 = vsub.f32 %v15945_v18, %v16480_v12 }
 0x195   :  { %13616 = vmatprep.mubr.f32.mxu0 %v5894_v41  ;;  %v1689_v29 = vand.u32 4294901760, %v1688_v52  ;;  %v5903_v41 = vsub.f32 %v17050_v60, %v24666_v15  ;;  %v10813_v38 = vsel %vm10312_vm9, %v10812_v39, %v16950_v31  ;;  %v17203_v36 = vsub.f32 %v17194_v58, %v17194_v58  ;;  %v17218_v39 = vpop.xlane.xlu0 %1254  ;;  %v17220_v60 = vpop.xlane.xlu1 %5526 }
 0x196   :  { %25648 = vst [vmem:[#allocation130_spill] sm:$0xff] %v17175_v6  ;;  %1352 = vmin.index.xlane.f32.xlu0 %v25650_v8  ;;  %v24674_v52 = vand.u32 4294901760, %v17143_v22  ;;  %v17213_v50 = vsub.f32 %v17188_v0, %v17188_v0  ;;  %v25652_v31 = vsub.f32 %v15952_v28, %v16522_v16  ;;  %25653 = vst [vmem:[#allocation133_spill] sm:$0xff] %v17218_v39 }
 0x197   :  { %25649 = vst [vmem:[#allocation131_spill] sm:$0xff] %v17203_v36  ;;  %12848 = vmatprep.mubr.f32.mxu1 %v1689_v29  ;;  %v5904_v15 = vand.u32 4294901760, %v5903_v41  ;;  %25654 = vst [vmem:[#allocation134_spill] sm:$0xff] %v17220_v60  ;;  %v17223_v37 = vsel %vm10319_vm10, %v10817_v1, %v10813_v38  ;;  %vm24796_vm12 = vcmp.eq.s32.totalorder %v16605_v20, %v17218_v39 }
 0x198   :  { %25651 = vst [vmem:[#allocation132_spill] sm:$0xff] %v17213_v50  ;;  %5498 = vmin.index.xlane.f32.xlu1 %v25652_v31  ;;  %v10318_v8 = vrot.slane %v17218_v39, %v16646_v4  ;;  %vm24677_vm0 = vcmp.eq.s32.totalorder %v16605_v20, %v17220_v60  ;;  %v11328_v1 = vsel %vm24796_vm12, 1.0, %v25563_v32  ;;  %v17247_v41 = vsub.f32 %v17143_v22, %v24674_v52 }
 0x199   :  { %13617 = vmatmul.mubr.f32.gmra.mrb[66].mxu0 %v5904_v15  ;;  %v17241_v29 = vsel %vm24677_vm0, 1.0, %v25563_v32  ;;  %v17249_v31 = vsub.f32 %v11328_v1, %v11328_v1  ;;  %v5385_v15 = vadd.f32 %v11328_v1, %v17092_v47  ;;  %v25658_v39 = vsub.f32 %v15952_v28, %v16486_v59  ;;  %v17266_v22 = vpop.xlane.xlu0 %1256  ;;  %v17268_v47 = vpop.xlane.xlu1 %1262 }
 0x19a   :  { %25655 = vst [vmem:[#allocation135_spill] sm:$0xff] %v17241_v29  ;;  %25656 = vst [vmem:[#allocation136_spill] sm:$0xff] %v17247_v41  ;;  %v10320_v16 = vsel %vm10319_vm10, %v10318_v8, %v17104_v55  ;;  %v17261_v38 = vsub.f32 %v17241_v29, %v17241_v29  ;;  %v25660_v52 = vsub.f32 %v15952_v28, %v16524_v33  ;;  %v25663_v55 = vand.u32 4294901760, %v17203_v36 }
 0x19b   :  { %25657 = vst [vmem:[#allocation137_spill] sm:$0xff] %v17249_v31  ;;  %5492 = vmin.index.xlane.f32.xlu0 %v25658_v39  ;;  %25661 = vst [vmem:[#allocation139_spill] sm:$0xff] %v17266_v22  ;;  %v25664_v39 = vand.u32 4294901760, %v17149_v51  ;;  %vm24753_vm0 = vcmp.eq.s32.totalorder %v16605_v20, %v17266_v22  ;;  %v10325_v33 = vrot.slane %v17266_v22, %v16656_v46 }
 0x19c   :  { %25659 = vst [vmem:[#allocation138_spill] sm:$0xff] %v17261_v38  ;;  %5562 = vmin.index.xlane.f32.xlu1 %v25660_v52  ;;  %25662 = vst [vmem:[#allocation140_spill] sm:$0xff] %v17268_v47  ;;  %v17273_v8 = vsub.f32 %v17203_v36, %v25663_v55  ;;  %vm24690_vm4 = vcmp.eq.s32.totalorder %v16605_v20, %v17268_v47  ;;  %v11329_v55 = vsel %vm24753_vm0, 1.0, %v25563_v32  ;;  %vm10361_vm0 = vcmask 654912  }
 0x19d   :  { %v17279_v1 = vsub.f32 %v17149_v51, %v25664_v39  ;;  %v17296_v39 = vsel %vm24690_vm4, 1.0, %v25563_v32  ;;  %v17301_v51 = vsub.f32 %v11329_v55, %v11329_v55  ;;  %v17303_v36 = vadd.f32 %v11329_v55, %v5385_v15  ;;  %v17318_v12 = vpop.xlane.xlu0 %1320  ;;  %v17320_v11 = vpop.xlane.xlu1 %1326 }
 0x19e   :  { %v17306_v52 = vsel %vm10326_vm5, %v10325_v33, %v10320_v16  ;;  %v17310_v22 = vsub.f32 %v17296_v39, %v17296_v39  ;;  %v25668_v3 = vsub.f32 %v15952_v28, %v16488_v54  ;;  %v25669_v59 = vsub.f32 %v15945_v18, %v16538_v26  ;;  %25670 = vst [vmem:[#allocation144_spill] sm:$0xff] %v17318_v12 }
 0x19f   :  { %25665 = vst [vmem:[#allocation141_spill] sm:$0xff] %v17279_v1  ;;  %25666 = vst [vmem:[#allocation142_spill] sm:$0xff] %v17301_v51  ;;  %v25672_v15 = vand.u32 4294901760, %v17249_v31  ;;  %vm24698_vm7 = vcmp.eq.s32.totalorder %v16605_v20, %v17318_v12  ;;  %v10506_v54 = vrot.slane %v17318_v12, %v16656_v46  ;;  %vm24697_vm4 = vcmp.eq.s32.totalorder %v16605_v20, %v17320_v11 }
 0x1a0   :  { %25667 = vst [vmem:[#allocation143_spill] sm:$0xff] %v17310_v22  ;;  %5556 = vmin.index.xlane.f32.xlu0 %v25668_v3  ;;  %1298 = vmin.index.xlane.f32.xlu1 %v25669_v59  ;;  %25671 = vst [vmem:[#allocation145_spill] sm:$0xff] %v17320_v11  ;;  %v17340_v3 = vsel %vm24698_vm7, 1.0, %v25563_v32  ;;  %v17346_v59 = vsel %vm24697_vm4, 1.0, %v25563_v32  ;;  %v24707_v12 = vand.u32 4294901760, %v17310_v22  ;;  %v25681_v6 = vrot.slane %v17115_v23, %v25638_v35 }
 0x1a1   :  { %v1698_v16 = vsub.f32 %v17249_v31, %v25672_v15  ;;  %25673 = vst [vmem:[#allocation146_spill] sm:$0xff] %v17346_v59  ;;  %v17351_v33 = vsub.f32 %v17340_v3, %v17340_v3  ;;  %v10507_v26 = vsel %vm10326_vm5, %v10506_v54, %v17169_v61  ;;  %v17357_v29 = vsub.f32 %v17346_v59, %v17346_v59  ;;  %v17366_v55 = vpop.xlane.xlu0 %5460  ;;  %v17368_v1 = vpop.xlane.xlu1 %5466 }
 0x1a2   :  { %v25676_v31 = vsub.f32 %v15945_v18, %v16504_v2  ;;  %25678 = vst [vmem:[#allocation149_spill] sm:$0xff] %v17366_v55  ;;  %25679 = vst [vmem:[#allocation150_spill] sm:$0xff] %v17368_v1  ;;  %v25680_v61 = vand.u32 4294901760, %v17301_v51  ;;  %v17377_v2 = vsel %vm10333_vm3, %v25681_v6, %v10507_v26  ;;  %vm24711_vm4 = vcmp.eq.s32.totalorder %v16605_v20, %v17366_v55 }
 0x1a3   :  { %v1699_v15 = vand.u32 4294901760, %v1698_v16  ;;  %25674 = vst [vmem:[#allocation147_spill] sm:$0xff] %v17351_v33  ;;  %25675 = vst [vmem:[#allocation148_spill] sm:$0xff] %v17357_v29  ;;  %v25677_v16 = vsub.f32 %v15945_v18, %v25553_v9  ;;  %vm24710_vm7 = vcmp.eq.s32.totalorder %v16605_v20, %v17368_v1  ;;  %v11585_v26 = vsel %vm24711_vm4, 1.0, %v25563_v32 }
 0x1a4   :  { %1292 = vmin.index.xlane.f32.xlu0 %v25676_v31  ;;  %v1708_v54 = vsub.f32 %v17301_v51, %v25680_v61  ;;  %v25682_v31 = vand.u32 4294901760, %v17213_v50  ;;  %v17401_v61 = vsel %vm24710_vm7, 1.0, %v25563_v32  ;;  %v17406_v9 = vsub.f32 %v17310_v22, %v24707_v12 }
 0x1a5   :  { %12849 = vmatmul.mubr.f32.gmra.mrb[66].mxu1 %v1699_v15  ;;  %1362 = vmin.index.xlane.f32.xlu1 %v25677_v16  ;;  %v10664_v16 = vrot.slane %v17366_v55, %v16656_v46  ;;  %v10102_v6 = vadd.f32 %v11585_v26, %v17088_v7  ;;  %v17415_v23 = vsub.f32 %v17401_v61, %v17401_v61  ;;  %v17423_v12 = vpop.xlane.xlu0 %5524  ;;  %v17425_v22 = vpop.xlane.xlu1 %5530  ;;  %vm10340_vm7 = vcmask 458112  }
 0x1a6   :  { %v17382_v15 = vsub.f32 %v17213_v50, %v25682_v31  ;;  %v1709_v31 = vand.u32 4294901760, %v1708_v54  ;;  %v17408_v50 = vsub.f32 %v11585_v26, %v11585_v26  ;;  %v25686_v55 = vsub.f32 %v15945_v18, %v16506_v57  ;;  %25688 = vst [vmem:[#allocation154_spill] sm:$0xff] %v17423_v12  ;;  %25689 = vst [vmem:[#allocation155_spill] sm:$0xff] %v17425_v22 }
 0x1a7   :  { %v10665_v51 = vsel %vm10326_vm5, %v10664_v16, %v17074_v44  ;;  %25685 = vst [vmem:[#allocation153_spill] sm:$0xff] %v17415_v23  ;;  %v25687_v54 = vsub.f32 %v15952_v28, %v16546_v30  ;;  %v25690_v44 = vrot.slane %v17160_v42, %v25638_v35  ;;  %vm24719_vm4 = vcmp.eq.s32.totalorder %v16605_v20, %v17423_v12 }
 0x1a8   :  { %25683 = vst [vmem:[#allocation151_spill] sm:$0xff] %v17382_v15  ;;  %25684 = vst [vmem:[#allocation152_spill] sm:$0xff] %v17408_v50  ;;  %1356 = vmin.index.xlane.f32.xlu0 %v25686_v55  ;;  %12851 = vmatprep.mubr.f32.mxu1 %v1709_v31  ;;  %v10822_v30 = vrot.slane %v17423_v12, %v16656_v46  ;;  %vm24718_vm14 = vcmp.eq.s32.totalorder %v16605_v20, %v17425_v22  ;;  %v15397_v15 = vld [vmem:[%s24465_s2 + $0x88] sm:$0xff] }
 0x1a9   :  { %5502 = vmin.index.xlane.f32.xlu1 %v25687_v54  ;;  %v17431_v7 = vsel %vm10333_vm3, %v25690_v44, %v10665_v51  ;;  %v17448_v51 = vsel %vm24719_vm4, 1.0, %v25563_v32  ;;  %v17454_v31 = vsel %vm24718_vm14, 1.0, %v25563_v32  ;;  %v17458_v44 = vadd.f32 %v17194_v58, %v10102_v6  ;;  %v17477_v6 = vpop.xlane.xlu0 %1258  ;;  %v17479_v12 = vpop.xlane.xlu1 %1266 }
 0x1aa   :  { %25691 = vst [vmem:[#allocation156_spill] sm:$0xff] %v17448_v51  ;;  %25692 = vst [vmem:[#allocation157_spill] sm:$0xff] %v17454_v31  ;;  %v17462_v55 = vsub.f32 %v17448_v51, %v17448_v51  ;;  %v10823_v26 = vsel %vm10326_vm5, %v10822_v30, %v17223_v37  ;;  %v17468_v16 = vsub.f32 %v17454_v31, %v17454_v31  ;;  %v25699_v37 = vand.u32 4294901760, %v17408_v50 }
 0x1ab   :  { %v25695_v57 = vsub.f32 %v15952_v28, %v16510_v14  ;;  %v25696_v58 = vsub.f32 %v15952_v28, %v16548_v49  ;;  %25697 = vst [vmem:[#allocation160_spill] sm:$0xff] %v17477_v6  ;;  %25698 = vst [vmem:[#allocation161_spill] sm:$0xff] %v17479_v12  ;;  %v25700_v42 = vrot.slane %v17220_v60, %v25638_v35  ;;  %v25703_v49 = vand.u32 4294901760, %v17415_v23 }
 0x1ac   :  { %25693 = vst [vmem:[#allocation158_spill] sm:$0xff] %v17462_v55  ;;  %25694 = vst [vmem:[#allocation159_spill] sm:$0xff] %v17468_v16  ;;  %v5913_v30 = vsub.f32 %v17408_v50, %v25699_v37  ;;  %vm24732_vm14 = vcmp.eq.s32.totalorder %v16605_v20, %v17477_v6  ;;  %vm24731_vm4 = vcmp.eq.s32.totalorder %v16605_v20, %v17479_v12 }
 0x1ad   :  { %5496 = vmin.index.xlane.f32.xlu0 %v25695_v57  ;;  %5566 = vmin.index.xlane.f32.xlu1 %v25696_v58  ;;  %v17488_v14 = vsel %vm10333_vm3, %v25700_v42, %v10823_v26  ;;  %v25701_v57 = vand.u32 4294901760, %v17351_v33  ;;  %v10332_v58 = vrot.slane %v17477_v6, %v25638_v35  ;;  %v11330_v26 = vsel %vm24732_vm14, 1.0, %v25563_v32 }
 0x1ae   :  { %v17512_v37 = vsel %vm24731_vm4, 1.0, %v25563_v32  ;;  %v17519_v50 = vsub.f32 %v11330_v26, %v11330_v26  ;;  %v5387_v42 = vadd.f32 %v11330_v26, %v17303_v36  ;;  %v25706_v31 = vsub.f32 %v15952_v28, %v16512_v21 }
 0x1af   :  { %v17493_v54 = vsub.f32 %v17351_v33, %v25701_v57  ;;  %v5914_v57 = vand.u32 4294901760, %v5913_v30  ;;  %v17517_v33 = vsub.f32 %v17415_v23, %v25703_v49  ;;  %v10334_v60 = vsel %vm10333_vm3, %v10332_v58, %v17306_v52  ;;  %v17534_v49 = vpop.xlane.xlu0 %1260  ;;  %v17536_v23 = vpop.xlane.xlu1 %1330 }
 0x1b0   :  { %25704 = vst [vmem:[#allocation163_spill] sm:$0xff] %v17519_v50  ;;  %v17526_v6 = vsub.f32 %v17512_v37, %v17512_v37  ;;  %v25707_v30 = vsub.f32 %v15952_v28, %v16558_v10  ;;  %25708 = vst [vmem:[#allocation165_spill] sm:$0xff] %v17534_v49  ;;  %v25710_v58 = vand.u32 4294901760, %v17357_v29  ;;  %v25712_v21 = vand.u32 4294901760, %v17108_v62 }
 0x1b1   :  { %25702 = vst [vmem:[#allocation162_spill] sm:$0xff] %v17493_v54  ;;  %5560 = vmin.index.xlane.f32.xlu0 %v25706_v31  ;;  %13619 = vmatprep.mubr.f32.mxu0 %v5914_v57  ;;  %25709 = vst [vmem:[#allocation166_spill] sm:$0xff] %v17536_v23  ;;  %v25714_v10 = vand.u32 4294901760, %v17273_v8  ;;  %vm24740_vm4 = vcmp.eq.s32.totalorder %v16605_v20, %v17534_v49  ;;  %v10339_v57 = vrot.slane %v17534_v49, %v16695_v34  ;;  %v25766_v54 = vld [vmem:[#allocation61_spill] sm:$0xff] }
 0x1b2   :  { %25705 = vst [vmem:[#allocation164_spill] sm:$0xff] %v17526_v6  ;;  %5568 = vmin.index.xlane.f32.xlu1 %v25707_v30  ;;  %v17543_v26 = vsub.f32 %v17357_v29, %v25710_v58  ;;  %v17548_v31 = vsub.f32 %v17108_v62, %v25712_v21  ;;  %vm24739_vm14 = vcmp.eq.s32.totalorder %v16605_v20, %v17536_v23  ;;  %v11331_v58 = vsel %vm24740_vm4, 1.0, %v25563_v32 }
 0x1b3   :  { %13620 = vmatmul.mubr.f32.gmra.mrb[68].mxu0 %v25714_v10  ;;  %v17568_v8 = vsel %vm24739_vm14, 1.0, %v25563_v32  ;;  %v17572_v52 = vsub.f32 %v11331_v58, %v11331_v58  ;;  %v5388_v36 = vadd.f32 %v11331_v58, %v5387_v42  ;;  %v10341_v30 = vsel %vm10340_vm7, %v10339_v57, %v10334_v60  ;;  %v17585_v21 = vpop.xlane.xlu0 %1324  ;;  %v17587_v10 = vpop.xlane.xlu1 %5470 }
 0x1b4   :  { %25711 = vst [vmem:[#allocation167_spill] sm:$0xff] %v17543_v26  ;;  %25713 = vst [vmem:[#allocation168_spill] sm:$0xff] %v17548_v31  ;;  %v17577_v29 = vsub.f32 %v17568_v8, %v17568_v8  ;;  %v25718_v62 = vsub.f32 %v15945_v18, %v16526_v63  ;;  %v25719_v49 = vsub.f32 %v15945_v18, %v25556_v24  ;;  %v25722_v42 = vand.u32 4294901760, %v17519_v50 }
 0x1b5   :  { %25715 = vst [vmem:[#allocation169_spill] sm:$0xff] %v17568_v8  ;;  %25716 = vst [vmem:[#allocation170_spill] sm:$0xff] %v17572_v52  ;;  %v25723_v57 = vrot.slane %v17268_v47, %v16664_v5  ;;  %v25724_v63 = vand.u32 4294901760, %v17526_v6  ;;  %vm24750_vm14 = vcmp.eq.s32.totalorder %v16605_v20, %v17585_v21  ;;  %vm24751_vm4 = vcmp.eq.s32.totalorder %v16605_v20, %v17587_v10 }
 0x1b6   :  { %25717 = vst [vmem:[#allocation171_spill] sm:$0xff] %v17577_v29  ;;  %1296 = vmin.index.xlane.f32.xlu0 %v25718_v62  ;;  %1302 = vmin.index.xlane.f32.xlu1 %v25719_v49  ;;  %25720 = vst [vmem:[#allocation172_spill] sm:$0xff] %v17585_v21  ;;  %v1718_v60 = vsub.f32 %v17519_v50, %v25722_v42  ;;  %v10516_v49 = vrot.slane %v17585_v21, %v16695_v34  ;;  %v17616_v42 = vsel %vm24750_vm14, 1.0, %v25563_v32  ;;  %vm10354_vm14 = vcmask 589312  }
 0x1b7   :  { %25721 = vst [vmem:[#allocation173_spill] sm:$0xff] %v17587_v10  ;;  %v17596_v58 = vsel %vm10347_vm8, %v25723_v57, %v10341_v30  ;;  %v17601_v62 = vsub.f32 %v17526_v6, %v25724_v63  ;;  %v17622_v57 = vsel %vm24751_vm4, 1.0, %v25563_v32  ;;  %v17627_v6 = vsub.f32 %v17616_v42, %v17616_v42  ;;  %v17644_v24 = vpop.xlane.xlu0 %5464  ;;  %v17646_v26 = vpop.xlane.xlu1 %5534 }
 0x1b8   :  { %v1719_v63 = vand.u32 4294901760, %v1718_v60  ;;  %v10517_v30 = vsel %vm10340_vm7, %v10516_v49, %v17377_v2  ;;  %v17633_v50 = vsub.f32 %v17622_v57, %v17622_v57  ;;  %v25727_v21 = vsub.f32 %v15945_v18, %v16528_v43  ;;  %25729 = vst [vmem:[#allocation176_spill] sm:$0xff] %v17644_v24  ;;  %25730 = vst [vmem:[#allocation177_spill] sm:$0xff] %v17646_v26 }
 0x1b9   :  { %25725 = vst [vmem:[#allocation174_spill] sm:$0xff] %v17627_v6  ;;  %v17639_v47 = vadd.f32 %v17296_v39, %v5388_v36  ;;  %v25728_v60 = vsub.f32 %v15945_v18, %v25557_v40  ;;  %v25731_v2 = vand.u32 4294901760, %v17572_v52  ;;  %v25732_v43 = vrot.slane %v17320_v11, %v16664_v5  ;;  %v25736_v11 = vld [vmem:[#allocation57_spill] sm:$0xff] }
 0x1ba   :  { %25726 = vst [vmem:[#allocation175_spill] sm:$0xff] %v17633_v50  ;;  %1360 = vmin.index.xlane.f32.xlu0 %v25727_v21  ;;  %12852 = vmatmul.mubr.f32.gmra.mrb[68].mxu1 %v1719_v63  ;;  %vm24762_vm4 = vcmp.eq.s32.totalorder %v16605_v20, %v17644_v24  ;;  %v10674_v21 = vrot.slane %v17644_v24, %v16695_v34 }
 0x1bb   :  { %1366 = vmin.index.xlane.f32.xlu1 %v25728_v60  ;;  %v1728_v49 = vsub.f32 %v17572_v52, %v25731_v2  ;;  %v17655_v39 = vsel %vm10347_vm8, %v25732_v43, %v10517_v30  ;;  %vm24761_vm13 = vcmp.eq.s32.totalorder %v16605_v20, %v17646_v26  ;;  %v11587_v30 = vsel %vm24762_vm4, 1.0, %v25563_v32  ;;  %v17693_v43 = vpop.xlane.xlu0 %5528  ;;  %v17695_v31 = vpop.xlane.xlu1 %1270 }
 0x1bc   :  { %v17675_v60 = vsel %vm24761_vm13, 1.0, %v25563_v32  ;;  %v17678_v40 = vsub.f32 %v11587_v30, %v11587_v30  ;;  %v10104_v36 = vadd.f32 %v11587_v30, %v17458_v44  ;;  %v10675_v63 = vsel %vm10340_vm7, %v10674_v21, %v17431_v7  ;;  %25739 = vst [vmem:[#allocation57_spill] sm:$0xff] %v17693_v43  ;;  %25740 = vst [vmem:[#allocation181_spill] sm:$0xff] %v17695_v31 }
 0x1bd   :  { %25733 = vst [vmem:[#allocation178_spill] sm:$0xff] %v17675_v60  ;;  %v1729_v2 = vand.u32 4294901760, %v1728_v49  ;;  %v17685_v52 = vsub.f32 %v17675_v60, %v17675_v60  ;;  %v25737_v24 = vsub.f32 %v15952_v28, %v25736_v11  ;;  %v25738_v49 = vsub.f32 %v15952_v28, %v16570_v53 }
 0x1be   :  { %25734 = vst [vmem:[#allocation179_spill] sm:$0xff] %v17678_v40  ;;  %v25741_v7 = vrot.slane %v17368_v1, %v16664_v5  ;;  %v25742_v21 = vand.u32 4294901760, %v17633_v50  ;;  %vm24775_vm13 = vcmp.eq.s32.totalorder %v16605_v20, %v17693_v43  ;;  %v10832_v30 = vrot.slane %v17693_v43, %v16695_v34 }
 0x1bf   :  { %25735 = vst [vmem:[#allocation180_spill] sm:$0xff] %v17685_v52  ;;  %5500 = vmin.index.xlane.f32.xlu0 %v25737_v24  ;;  %12854 = vmatprep.mubr.f32.mxu1 %v1729_v2  ;;  %v25743_v2 = vand.u32 4294901760, %v17406_v9  ;;  %vm24776_vm4 = vcmp.eq.s32.totalorder %v16605_v20, %v17695_v31  ;;  %v17753_v1 = vpop.xlane.xlu0 %1264  ;;  %v17755_v60 = vpop.xlane.xlu1 %1334  ;;  %v25755_v52 = vrot.slane %v17425_v22, %v16664_v5 }
 0x1c0   :  { %5506 = vmin.index.xlane.f32.xlu1 %v25738_v49  ;;  %v17701_v44 = vsel %vm10347_vm8, %v25741_v7, %v10675_v63  ;;  %v17706_v11 = vsub.f32 %v17633_v50, %v25742_v21  ;;  %v25744_v63 = vld [vmem:[#allocation86_spill] sm:$0xff]  ;;  %v17724_v7 = vsel %vm24775_vm13, 1.0, %v25563_v32  ;;  %v17730_v21 = vsel %vm24776_vm4, 1.0, %v25563_v32 }
 0x1c1   :  { %12855 = vmatmul.mubr.f32.gmra.mrb[70].mxu1 %v25743_v2  ;;  %25745 = vst [vmem:[#allocation86_spill] sm:$0xff] %v17724_v7  ;;  %v17734_v2 = vadd.f32 %v17401_v61, %v10104_v36  ;;  %v17738_v53 = vsub.f32 %v17724_v7, %v17724_v7  ;;  %v10833_v49 = vsel %vm10340_vm7, %v10832_v30, %v17488_v14  ;;  %v25748_v50 = vld [vmem:[#allocation58_spill] sm:$0xff]  ;;  %v25750_v61 = vld [vmem:[#allocation65_spill] sm:$0xff]  ;;  %v25754_v14 = vand.u32 4294901760, %v17678_v40  ;;  %v25759_v7 = vld [vmem:[#allocation15_spill] sm:$0xff] }
 0x1c2   :  { %v17744_v24 = vsub.f32 %v17730_v21, %v17730_v21  ;;  %v25749_v43 = vsub.f32 %v15952_v28, %v25748_v50  ;;  %v25751_v36 = vsub.f32 %v15952_v28, %v25750_v61  ;;  %25752 = vst [vmem:[#allocation58_spill] sm:$0xff] %v17753_v1  ;;  %25753 = vst [vmem:[#allocation65_spill] sm:$0xff] %v17755_v60  ;;  %v25756_v61 = vld [vmem:[#allocation14_spill] sm:$0xff] }
 0x1c3   :  { %25746 = vst [vmem:[#allocation182_spill] sm:$0xff] %v17738_v53  ;;  %v5933_v30 = vsub.f32 %v17678_v40, %v25754_v14  ;;  %v17764_v50 = vsel %vm10347_vm8, %v25755_v52, %v10833_v49  ;;  %v25760_v14 = vand.u32 4294901760, %v25759_v7  ;;  %vm24786_vm13 = vcmp.eq.s32.totalorder %v16605_v20, %v17753_v1  ;;  %v25762_v52 = vld [vmem:[#allocation87_spill] sm:$0xff]  ;;  %v17816_v19 = vpop.xlane.xlu1 %5474 }
 0x1c4   :  { %25747 = vst [vmem:[#allocation183_spill] sm:$0xff] %v17744_v24  ;;  %5564 = vmin.index.xlane.f32.xlu0 %v25749_v43  ;;  %5570 = vmin.index.xlane.f32.xlu1 %v25751_v36  ;;  %v15396_v43 = vld [vmem:[%s24465_s2 + $0x80] sm:$0xff]  ;;  %v25757_v36 = vand.u32 4294901760, %v25756_v61  ;;  %v10353_v49 = vrot.slane %v17753_v1, %v25762_v52  ;;  %vm24785_vm4 = vcmp.eq.s32.totalorder %v16605_v20, %v17755_v60  ;;  %v11333_v61 = vsel %vm24786_vm13, 1.0, %v25563_v32 }
 0x1c5   :  { %v17778_v40 = vsub.f32 %v15397_v15, %v25760_v14  ;;  %v17796_v15 = vsel %vm24785_vm4, 1.0, %v25563_v32  ;;  %v5934_v7 = vand.u32 4294901760, %v5933_v30  ;;  %v17799_v14 = vsub.f32 %v11333_v61, %v11333_v61  ;;  %v25768_v30 = vld [vmem:[#allocation68_spill] sm:$0xff] }
 0x1c6   :  { %v17771_v9 = vsub.f32 %v15396_v43, %v25757_v36  ;;  %25763 = vst [vmem:[#allocation87_spill] sm:$0xff] %v17796_v15  ;;  %v5390_v22 = vadd.f32 %v11333_v61, %v17639_v47  ;;  %v10355_v43 = vsel %vm10354_vm14, %v10353_v49, %v17596_v58  ;;  %v17806_v1 = vsub.f32 %v17796_v15, %v17796_v15  ;;  %v17814_v36 = vpop.xlane.xlu0 %1328 }
 0x1c7   :  { %25761 = vst [vmem:[#allocation15_spill] sm:$0xff] %v17778_v40  ;;  %25764 = vst [vmem:[#allocation184_spill] sm:$0xff] %v17799_v14  ;;  %v25767_v8 = vsub.f32 %v15945_v18, %v25766_v54  ;;  %13622 = vmatprep.mubr.f32.mxu0 %v5934_v7  ;;  %v25769_v16 = vsub.f32 %v15952_v28, %v25768_v30  ;;  %v25772_v47 = vrot.slane %v17479_v12, %v16688_v56  ;;  %v17876_v12 = vpop.xlane.xlu1 %5538 }
 0x1c8   :  { %25758 = vst [vmem:[#allocation14_spill] sm:$0xff] %v17771_v9  ;;  %25765 = vst [vmem:[#allocation185_spill] sm:$0xff] %v17806_v1  ;;  %v25773_v49 = vand.u32 4294901760, %v17744_v24  ;;  %vm24793_vm4 = vcmp.eq.s32.totalorder %v16605_v20, %v17814_v36  ;;  %v10526_v7 = vrot.slane %v17814_v36, %v25762_v52  ;;  %vm24795_vm13 = vcmp.eq.s32.totalorder %v16605_v20, %v17816_v19 }
 0x1c9   :  { %1300 = vmin.index.xlane.f32.xlu0 %v25767_v8  ;;  %5572 = vmin.index.xlane.f32.xlu1 %v25769_v16  ;;  %25770 = vst [vmem:[#allocation61_spill] sm:$0xff] %v17814_v36  ;;  %25771 = vst [vmem:[#allocation68_spill] sm:$0xff] %v17816_v19  ;;  %v17822_v58 = vsel %vm10361_vm0, %v25772_v47, %v10355_v43  ;;  %v25774_v16 = vand.u32 4294901760, %v17517_v33  ;;  %v17845_v30 = vsel %vm24793_vm4, 1.0, %v25563_v32  ;;  %v17851_v33 = vsel %vm24795_vm13, 1.0, %v25563_v32  ;;  %v25778_v8 = vld [vmem:[#allocation60_spill] sm:$0xff] }
 0x1ca   :  { %v17827_v54 = vsub.f32 %v17744_v24, %v25773_v49  ;;  %25775 = vst [vmem:[#allocation186_spill] sm:$0xff] %v17845_v30  ;;  %v17855_v49 = vadd.f32 %v17512_v37, %v5390_v22  ;;  %v10527_v43 = vsel %vm10354_vm14, %v10526_v7, %v17655_v39  ;;  %v17865_v61 = vsub.f32 %v17851_v33, %v17851_v33  ;;  %v25780_v22 = vld [vmem:[#allocation70_spill] sm:$0xff]  ;;  %v17874_v36 = vpop.xlane.xlu0 %5468 }
 0x1cb   :  { %13623 = vmatmul.mubr.f32.gmra.mrb[70].mxu0 %v25774_v16  ;;  %v17859_v16 = vsub.f32 %v17845_v30, %v17845_v30  ;;  %v25779_v24 = vsub.f32 %v15945_v18, %v25778_v8  ;;  %v25781_v37 = vsub.f32 %v15945_v18, %v25780_v22  ;;  %25782 = vst [vmem:[#allocation60_spill] sm:$0xff] %v17874_v36  ;;  %25783 = vst [vmem:[#allocation70_spill] sm:$0xff] %v17876_v12  ;;  %vm10368_vm4 = vcmask 720512   ;;  %v17929_v1 = vpop.xlane.xlu1 %1274 }
 0x1cc   :  { %25777 = vst [vmem:[#allocation188_spill] sm:$0xff] %v17865_v61  ;;  %v25784_v39 = vand.u32 4294901760, %v17799_v14  ;;  %v25785_v15 = vrot.slane %v17536_v23, %v16688_v56  ;;  %v25786_v8 = vand.u32 4294901760, %v17771_v9  ;;  %vm24812_vm13 = vcmp.eq.s32.totalorder %v16605_v20, %v17874_v36 }
 0x1cd   :  { %25776 = vst [vmem:[#allocation187_spill] sm:$0xff] %v17859_v16  ;;  %1364 = vmin.index.xlane.f32.xlu0 %v25779_v24  ;;  %1306 = vmin.index.xlane.f32.xlu1 %v25781_v37  ;;  %v25787_v37 = vand.u32 4294901760, %v17778_v40  ;;  %vm24811_vm12 = vcmp.eq.s32.totalorder %v16605_v20, %v17876_v12 }
 0x1ce   :  { %v1748_v7 = vsub.f32 %v17799_v14, %v25784_v39  ;;  %v17885_v24 = vsel %vm10361_vm0, %v25785_v15, %v10527_v43  ;;  %v6514_v22 = vsub.f32 %v17771_v9, %v25786_v8  ;;  %v10684_v39 = vrot.slane %v17874_v36, %v25762_v52  ;;  %v25791_v9 = vld [vmem:[#allocation62_spill] sm:$0xff]  ;;  %v17927_v14 = vpop.xlane.xlu0 %5532 }
 0x1cf   :  { %v6521_v47 = vsub.f32 %v17778_v40, %v25787_v37  ;;  %v11589_v43 = vsel %vm24812_vm13, 1.0, %v25563_v32  ;;  %v17909_v8 = vsel %vm24811_vm12, 1.0, %v25563_v32  ;;  %v25792_v51 = vsub.f32 %v15952_v28, %v25791_v9  ;;  %25795 = vst [vmem:[#allocation62_spill] sm:$0xff] %v17927_v14 }
 0x1d0   :  { %25788 = vst [vmem:[#allocation189_spill] sm:$0xff] %v17909_v8  ;;  %v1749_v37 = vand.u32 4294901760, %v1748_v7  ;;  %v17912_v23 = vsub.f32 %v11589_v43, %v11589_v43  ;;  %v10106_v40 = vadd.f32 %v11589_v43, %v17734_v2  ;;  %v10685_v15 = vsel %vm10354_vm14, %v10684_v39, %v17701_v44  ;;  %v25793_v7 = vld [vmem:[#allocation71_spill] sm:$0xff] }
 0x1d1   :  { %v17919_v36 = vsub.f32 %v17909_v8, %v17909_v8  ;;  %5504 = vmin.index.xlane.f32.xlu0 %v25792_v51  ;;  %v25794_v30 = vsub.f32 %v15945_v18, %v25793_v7  ;;  %25796 = vst [vmem:[#allocation71_spill] sm:$0xff] %v17929_v1  ;;  %v25797_v44 = vrot.slane %v17587_v10, %v16688_v56  ;;  %v25798_v39 = vand.u32 4294901760, %v17865_v61  ;;  %v17987_v8 = vpop.xlane.xlu1 %1338 }
 0x1d2   :  { %25789 = vst [vmem:[#allocation190_spill] sm:$0xff] %v17912_v23  ;;  %12857 = vmatprep.mubr.f32.mxu1 %v1749_v37  ;;  %v6515_v51 = vand.u32 4294901760, %v6514_v22  ;;  %v6522_v43 = vand.u32 4294901760, %v6521_v47  ;;  %vm24821_vm12 = vcmp.eq.s32.totalorder %v16605_v20, %v17927_v14  ;;  %v25799_v37 = vand.u32 4294901760, %v17601_v62  ;;  %v17985_v10 = vpop.xlane.xlu0 %1268 }
 0x1d3   :  { %25790 = vst [vmem:[#allocation191_spill] sm:$0xff] %v17919_v36  ;;  %1370 = vmin.index.xlane.f32.xlu1 %v25794_v30  ;;  %v17935_v2 = vsel %vm10361_vm0, %v25797_v44, %v10685_v15  ;;  %v17940_v9 = vsub.f32 %v17865_v61, %v25798_v39  ;;  %v10842_v30 = vrot.slane %v17927_v14, %v25762_v52  ;;  %v25800_v15 = vld [vmem:[#allocation59_spill] sm:$0xff]  ;;  %v17956_v47 = vsel %vm24821_vm12, 1.0, %v25563_v32 }
 0x1d4   :  { %12858 = vmatmul.mubr.f32.gmra.mrb[72].mxu1 %v25799_v37  ;;  %vm24823_vm13 = vcmp.eq.s32.totalorder %v16605_v20, %v17929_v1  ;;  %25801 = vst [vmem:[#allocation59_spill] sm:$0xff] %v17956_v47  ;;  %v17966_v44 = vadd.f32 %v17622_v57, %v10106_v40  ;;  %v17970_v39 = vsub.f32 %v17956_v47, %v17956_v47  ;;  %v25804_v61 = vld [vmem:[#allocation67_spill] sm:$0xff]  ;;  %v25806_v57 = vld [vmem:[#allocation72_spill] sm:$0xff]  ;;  %v25812_v62 = vand.u32 4294901760, %v17627_v6 }
 0x1d5   :  { %v17962_v22 = vsel %vm24823_vm13, 1.0, %v25563_v32  ;;  %v10843_v37 = vsel %vm10354_vm14, %v10842_v30, %v17764_v50  ;;  %v25805_v14 = vsub.f32 %v15945_v18, %v25804_v61  ;;  %v25807_v40 = vsub.f32 %v15952_v28, %v25806_v57  ;;  %25808 = vst [vmem:[#allocation67_spill] sm:$0xff] %v17985_v10  ;;  %25809 = vst [vmem:[#allocation72_spill] sm:$0xff] %v17987_v8  ;;  %v18039_v53 = vpop.xlane.xlu1 %5478 }
 0x1d6   :  { %25802 = vst [vmem:[#allocation192_spill] sm:$0xff] %v17970_v39  ;;  %v17976_v7 = vsub.f32 %v17962_v22, %v17962_v22  ;;  %v25810_v50 = vand.u32 4294901760, %v17912_v23  ;;  %v25811_v36 = vrot.slane %v17646_v26, %v16688_v56  ;;  %v18001_v57 = vsub.f32 %v17627_v6, %v25812_v62  ;;  %v25818_v26 = vld [vmem:[#allocation66_spill] sm:$0xff]  ;;  %v18037_v39 = vpop.xlane.xlu0 %1332 }
 0x1d7   :  { %1304 = vmin.index.xlane.f32.xlu0 %v25805_v14  ;;  %5510 = vmin.index.xlane.f32.xlu1 %v25807_v40  ;;  %v14581_v14 = vpack.c.bf16 %v6522_v43, %v6515_v51  ;;  %vm24837_vm12 = vcmp.eq.s32.totalorder %v16605_v20, %v17985_v10  ;;  %v25814_v40 = vld [vmem:[#allocation64_spill] sm:$0xff]  ;;  %vm24836_vm13 = vcmp.eq.s32.totalorder %v16605_v20, %v17987_v8 }
 0x1d8   :  { %25803 = vst [vmem:[#allocation193_spill] sm:$0xff] %v17976_v7  ;;  %v5953_v30 = vsub.f32 %v17912_v23, %v25810_v50  ;;  %v17996_v61 = vsel %vm10361_vm0, %v25811_v36, %v10843_v37  ;;  %25813 = vst [vmem:[#allocation194_spill] sm:$0xff] %v18001_v57  ;;  %v10367_v47 = vrot.slane %v17985_v10, %v25814_v40  ;;  %v11335_v36 = vsel %vm24837_vm12, 1.0, %v25563_v32 }
 0x1d9   :  { %v18019_v51 = vsel %vm24836_vm13, 1.0, %v25563_v32  ;;  %14582 = vmatprep.subr.bf16.mxu0 %v14581_v14  ;;  %v18022_v37 = vsub.f32 %v11335_v36, %v11335_v36  ;;  %v5392_v6 = vadd.f32 %v11335_v36, %v17855_v49  ;;  %v25819_v10 = vsub.f32 %v15945_v18, %v25818_v26  ;;  %25822 = vst [vmem:[#allocation66_spill] sm:$0xff] %v18037_v39  ;;  %v25826_v36 = vld [vmem:[#allocation20_spill] sm:$0xff] }
 0x1da   :  { %25815 = vst [vmem:[#allocation64_spill] sm:$0xff] %v18019_v51  ;;  %v5954_v43 = vand.u32 4294901760, %v5953_v30  ;;  %v10369_v50 = vsel %vm10368_vm4, %v10367_v47, %v17822_v58  ;;  %v18029_v23 = vsub.f32 %v18019_v51, %v18019_v51  ;;  %v25820_v30 = vld [vmem:[#allocation73_spill] sm:$0xff]  ;;  %v25824_v58 = vrot.slane %v17695_v31, %v25744_v63  ;;  %14584 = vmatpush3.bf16.msra.mxu0 %v14581_v14  ;;  %v18103_v14 = vpop.xlane.xlu0 %5472 }
 0x1db   :  { %25816 = vst [vmem:[#allocation195_spill] sm:$0xff] %v18022_v37  ;;  %1368 = vmin.index.xlane.f32.xlu0 %v25819_v10  ;;  %v25821_v62 = vsub.f32 %v15952_v28, %v25820_v30  ;;  %25823 = vst [vmem:[#allocation73_spill] sm:$0xff] %v18039_v53  ;;  %v25825_v47 = vand.u32 4294901760, %v17976_v7  ;;  %v15398_v10 = vld [vmem:[%s24465_s2 + $0x90] sm:$0xff]  ;;  %v25829_v31 = vand.u32 4294901760, %v17706_v11  ;;  %vm24842_vm13 = vcmp.eq.s32.totalorder %v16605_v20, %v18037_v39 }
 0x1dc   :  { %25817 = vst [vmem:[#allocation196_spill] sm:$0xff] %v18029_v23  ;;  %13625 = vmatprep.mubr.f32.mxu0 %v5954_v43  ;;  %v18045_v49 = vsel %vm24894_vm6, %v25824_v58, %v10369_v50  ;;  %v25827_v43 = vand.u32 4294901760, %v25826_v36  ;;  %v10536_v50 = vrot.slane %v18037_v39, %v25814_v40  ;;  %vm24845_vm12 = vcmp.eq.s32.totalorder %v16605_v20, %v18039_v53  ;;  %v25833_v58 = vld [vmem:[#allocation69_spill] sm:$0xff]  ;;  %v18105_v39 = vpop.xlane.xlu1 %5542 }
 0x1dd   :  { %5574 = vmin.index.xlane.f32.xlu1 %v25821_v62  ;;  %v18050_v26 = vsub.f32 %v17976_v7, %v25825_v47  ;;  %13626 = vmatmul.mubr.f32.gmra.mrb[72].mxu0 %v25829_v31  ;;  %v18074_v47 = vsel %vm24842_vm13, 1.0, %v25563_v32  ;;  %v18080_v31 = vsel %vm24845_vm12, 1.0, %v25563_v32  ;;  %v25834_v7 = vsub.f32 %v15952_v28, %v25833_v58  ;;  %25837 = vst [vmem:[#allocation69_spill] sm:$0xff] %v18103_v14 }
 0x1de   :  { %v18057_v62 = vsub.f32 %v15398_v10, %v25827_v43  ;;  %25830 = vst [vmem:[#allocation197_spill] sm:$0xff] %v18074_v47  ;;  %v18084_v10 = vadd.f32 %v17730_v21, %v5392_v6  ;;  %v18088_v36 = vsub.f32 %v18074_v47, %v18074_v47  ;;  %v10537_v43 = vsel %vm10368_vm4, %v10536_v50, %v17885_v24  ;;  %v25835_v6 = vld [vmem:[#allocation77_spill] sm:$0xff] }
 0x1df   :  { %v18094_v30 = vsub.f32 %v18080_v31, %v18080_v31  ;;  %5508 = vmin.index.xlane.f32.xlu0 %v25834_v7  ;;  %v25836_v21 = vsub.f32 %v15952_v28, %v25835_v6  ;;  %25838 = vst [vmem:[#allocation77_spill] sm:$0xff] %v18105_v39  ;;  %v25839_v24 = vand.u32 4294901760, %v18022_v37  ;;  %vm10382_vm13 = vcmask 851712   ;;  %v15399_v6 = vld [vmem:[%s24465_s2 + $0x98] sm:$0xff] }
 0x1e0   :  { %25828 = vst [vmem:[#allocation20_spill] sm:$0xff] %v18057_v62  ;;  %25831 = vst [vmem:[#allocation198_spill] sm:$0xff] %v18088_v36  ;;  %v25840_v51 = vrot.slane %v17755_v60, %v25744_v63  ;;  %vm24857_vm12 = vcmp.eq.s32.totalorder %v16605_v20, %v18103_v14  ;;  %vm24856_vm15 = vcmp.eq.s32.totalorder %v16605_v20, %v18105_v39  ;;  %v18160_v47 = vpop.xlane.xlu1 %1278 }
 0x1e1   :  { %25832 = vst [vmem:[#allocation199_spill] sm:$0xff] %v18094_v30  ;;  %5576 = vmin.index.xlane.f32.xlu1 %v25836_v21  ;;  %v1768_v50 = vsub.f32 %v18022_v37, %v25839_v24  ;;  %v25841_v21 = vld [vmem:[#allocation21_spill] sm:$0xff]  ;;  %v10694_v24 = vrot.slane %v18103_v14, %v25814_v40  ;;  %v25847_v14 = vld [vmem:[#allocation75_spill] sm:$0xff]  ;;  %25851 = vst [vmem:[#allocation203_spill] sm:$0xff] %v18160_v47 }
 0x1e2   :  { %v18114_v7 = vsel %vm24894_vm6, %v25840_v51, %v10537_v43  ;;  %v25842_v11 = vand.u32 4294901760, %v25841_v21  ;;  %v11591_v43 = vsel %vm24857_vm12, 1.0, %v25563_v32  ;;  %v25848_v23 = vsub.f32 %v15945_v18, %v25847_v14  ;;  %v18158_v21 = vpop.xlane.xlu0 %5536 }
 0x1e3   :  { %v18143_v58 = vsub.f32 %v11591_v43, %v11591_v43  ;;  %v10108_v37 = vadd.f32 %v11591_v43, %v17966_v44  ;;  %v10695_v51 = vsel %vm10368_vm4, %v10694_v24, %v17935_v2  ;;  %25850 = vst [vmem:[#allocation75_spill] sm:$0xff] %v18158_v21  ;;  %v25852_v2 = vrot.slane %v17816_v19, %v25744_v63 }
 0x1e4   :  { %v18122_v57 = vsub.f32 %v15399_v6, %v25842_v11  ;;  %v18140_v11 = vsel %vm24856_vm15, 1.0, %v25563_v32  ;;  %v1769_v6 = vand.u32 4294901760, %v1768_v50  ;;  %1308 = vmin.index.xlane.f32.xlu0 %v25848_v23  ;;  %v25849_v50 = vsub.f32 %v15945_v18, %v25581_v27 }
 0x1e5   :  { %25844 = vst [vmem:[#allocation200_spill] sm:$0xff] %v18140_v11  ;;  %25845 = vst [vmem:[#allocation201_spill] sm:$0xff] %v18143_v58  ;;  %v18150_v60 = vsub.f32 %v18140_v11, %v18140_v11  ;;  %v18166_v44 = vsel %vm24894_vm6, %v25852_v2, %v10695_v51  ;;  %v25853_v24 = vand.u32 4294901760, %v18094_v30  ;;  %v25854_v23 = vand.u32 4294901760, %v18057_v62  ;;  %v18224_v11 = vpop.xlane.xlu1 %1342 }
 0x1e6   :  { %25843 = vst [vmem:[#allocation21_spill] sm:$0xff] %v18122_v57  ;;  %12860 = vmatprep.mubr.f32.mxu1 %v1769_v6  ;;  %1310 = vmin.index.xlane.f32.xlu1 %v25849_v50  ;;  %vm24868_vm15 = vcmp.eq.s32.totalorder %v16605_v20, %v18158_v21  ;;  %v10852_v6 = vrot.slane %v18158_v21, %v25814_v40  ;;  %v25855_v51 = vand.u32 4294901760, %v17827_v54  ;;  %v25856_v50 = vld [vmem:[#allocation95_spill] sm:$0xff]  ;;  %v25860_v21 = vld [vmem:[#allocation74_spill] sm:$0xff]  ;;  %v25868_v54 = vand.u32 4294901760, %v18122_v57 }
 0x1e7   :  { %25846 = vst [vmem:[#allocation202_spill] sm:$0xff] %v18150_v60  ;;  %v18171_v14 = vsub.f32 %v18094_v30, %v25853_v24  ;;  %v18176_v27 = vsub.f32 %v18057_v62, %v25854_v23  ;;  %vm24869_vm12 = vcmp.eq.s32.totalorder %v16605_v20, %v18160_v47  ;;  %v18193_v24 = vsel %vm24868_vm15, 1.0, %v25563_v32  ;;  %v18222_v62 = vpop.xlane.xlu0 %1272 }
 0x1e8   :  { %12861 = vmatmul.mubr.f32.gmra.mrb[74].mxu1 %v25855_v51  ;;  %25857 = vst [vmem:[#allocation95_spill] sm:$0xff] %v18193_v24  ;;  %v18199_v23 = vsel %vm24869_vm12, 1.0, %v25563_v32  ;;  %v18203_v51 = vadd.f32 %v17851_v33, %v10108_v37  ;;  %v18207_v2 = vsub.f32 %v18193_v24, %v18193_v24  ;;  %v10853_v43 = vsel %vm10368_vm4, %v10852_v6, %v17996_v61  ;;  %v25862_v33 = vld [vmem:[#allocation80_spill] sm:$0xff] }
 0x1e9   :  { %v18213_v30 = vsub.f32 %v18199_v23, %v18199_v23  ;;  %v25861_v19 = vsub.f32 %v15945_v18, %v25860_v21  ;;  %v25863_v37 = vsub.f32 %v15945_v18, %v25862_v33  ;;  %25864 = vst [vmem:[#allocation74_spill] sm:$0xff] %v18222_v62  ;;  %25865 = vst [vmem:[#allocation80_spill] sm:$0xff] %v18224_v11  ;;  %v25866_v61 = vand.u32 4294901760, %v18143_v58  ;;  %v25869_v33 = vld [vmem:[#allocation99_spill] sm:$0xff]  ;;  %v18275_v36 = vpop.xlane.xlu1 %5482 }
 0x1ea   :  { %25858 = vst [vmem:[#allocation204_spill] sm:$0xff] %v18207_v2  ;;  %v25867_v60 = vrot.slane %v17876_v12, %v25744_v63  ;;  %v6535_v18 = vsub.f32 %v18122_v57, %v25868_v54  ;;  %vm24883_vm15 = vcmp.eq.s32.totalorder %v16605_v20, %v18222_v62  ;;  %vm24882_vm12 = vcmp.eq.s32.totalorder %v16605_v20, %v18224_v11  ;;  %v25873_v57 = vld [vmem:[#allocation78_spill] sm:$0xff] }
 0x1eb   :  { %25859 = vst [vmem:[#allocation205_spill] sm:$0xff] %v18213_v30  ;;  %1372 = vmin.index.xlane.f32.xlu0 %v25861_v19  ;;  %1374 = vmin.index.xlane.f32.xlu1 %v25863_v37  ;;  %v5973_v6 = vsub.f32 %v18143_v58, %v25866_v61  ;;  %v6529_v19 = vand.u32 4294901760, %v18176_v27  ;;  %v10381_v37 = vrot.slane %v18222_v62, %v25869_v33  ;;  %v18255_v27 = vsel %vm24882_vm12, 1.0, %v25563_v32  ;;  %v18273_v54 = vpop.xlane.xlu0 %1336 }
 0x1ec   :  { %v18233_v21 = vsel %vm24894_vm6, %v25867_v60, %v10853_v43  ;;  %v11337_v60 = vsel %vm24883_vm15, 1.0, %v25563_v32  ;;  %25870 = vst [vmem:[#allocation99_spill] sm:$0xff] %v18255_v27  ;;  %v18265_v62 = vsub.f32 %v18255_v27, %v18255_v27  ;;  %v25874_v24 = vsub.f32 %v15952_v28, %v25873_v57  ;;  %25877 = vst [vmem:[#allocation78_spill] sm:$0xff] %v18273_v54 }
 0x1ed   :  { %v5974_v43 = vand.u32 4294901760, %v5973_v6  ;;  %v18258_v58 = vsub.f32 %v11337_v60, %v11337_v60  ;;  %v5394_v12 = vadd.f32 %v11337_v60, %v18084_v10  ;;  %v10383_v61 = vsel %vm10382_vm13, %v10381_v37, %v18045_v49  ;;  %v25875_v6 = vld [vmem:[#allocation81_spill] sm:$0xff] }
 0x1ee   :  { %25872 = vst [vmem:[#allocation207_spill] sm:$0xff] %v18265_v62  ;;  %v25876_v2 = vsub.f32 %v15952_v28, %v25875_v6  ;;  %25878 = vst [vmem:[#allocation81_spill] sm:$0xff] %v18275_v36  ;;  %v25879_v49 = vrot.slane %v17929_v1, %v25800_v15  ;;  %v25880_v37 = vand.u32 4294901760, %v18213_v30  ;;  %v25881_v60 = vld [vmem:[#allocation9_spill] sm:$0xff]  ;;  %v25884_v27 = vand.u32 4294901760, %v17940_v9 }
 0x1ef   :  { %25871 = vst [vmem:[#allocation206_spill] sm:$0xff] %v18258_v58  ;;  %5512 = vmin.index.xlane.f32.xlu0 %v25874_v24  ;;  %13628 = vmatprep.mubr.f32.mxu0 %v5974_v43  ;;  %v6536_v24 = vand.u32 4294901760, %v6535_v18  ;;  %v25882_v43 = vand.u32 4294901760, %v25881_v60  ;;  %vm24890_vm12 = vcmp.eq.s32.totalorder %v16605_v20, %v18273_v54  ;;  %vm24892_vm15 = vcmp.eq.s32.totalorder %v16605_v20, %v18275_v36 }
 0x1f0   :  { %5514 = vmin.index.xlane.f32.xlu1 %v25876_v2  ;;  %v18281_v10 = vsel %vm10389_vm11, %v25879_v49, %v10383_v61  ;;  %v18286_v57 = vsub.f32 %v18213_v30, %v25880_v37  ;;  %v15400_v2 = vld [vmem:[%s24465_s2] sm:$0xff]  ;;  %13629 = vmatmul.mubr.f32.gmra.mrb[74].mxu0 %v25884_v27  ;;  %v10546_v61 = vrot.slane %v18273_v54, %v25869_v33  ;;  %v18309_v49 = vsel %vm24890_vm12, 1.0, %v25563_v32  ;;  %v25888_v30 = vld [vmem:[#allocation82_spill] sm:$0xff]  ;;  %v18335_v27 = vpop.xlane.xlu0 %5476 }
 0x1f1   :  { %v18293_v6 = vsub.f32 %v15400_v2, %v25882_v43  ;;  %25885 = vst [vmem:[#allocation208_spill] sm:$0xff] %v18309_v49  ;;  %v18315_v9 = vsel %vm24892_vm15, 1.0, %v25563_v32  ;;  %v18319_v37 = vadd.f32 %v17962_v22, %v5394_v12  ;;  %v18323_v2 = vsub.f32 %v18309_v49, %v18309_v49  ;;  %25890 = vst [vmem:[#allocation82_spill] sm:$0xff] %v18335_v27  ;;  %v18337_v12 = vpop.xlane.xlu1 %5546 }
 0x1f2   :  { %v10547_v60 = vsel %vm10382_vm13, %v10546_v61, %v18114_v7  ;;  %v18329_v43 = vsub.f32 %v18315_v9, %v18315_v9  ;;  %v25889_v54 = vsub.f32 %v15952_v28, %v25888_v30  ;;  %25891 = vst [vmem:[#allocation211_spill] sm:$0xff] %v18337_v12  ;;  %v25892_v22 = vand.u32 4294901760, %v18258_v58 }
 0x1f3   :  { %25883 = vst [vmem:[#allocation9_spill] sm:$0xff] %v18293_v6  ;;  %25886 = vst [vmem:[#allocation209_spill] sm:$0xff] %v18323_v2  ;;  %vm10396_vm12 = vcmask 982912   ;;  %v25893_v7 = vrot.slane %v17987_v8, %v25800_v15  ;;  %v14585_v18 = vpack.c.bf16 %v6536_v24, %v6529_v19  ;;  %vm24904_vm15 = vcmp.eq.s32.totalorder %v16605_v20, %v18335_v27 }
 0x1f4   :  { %25887 = vst [vmem:[#allocation210_spill] sm:$0xff] %v18329_v43  ;;  %5578 = vmin.index.xlane.f32.xlu1 %v25889_v54  ;;  %v1788_v1 = vsub.f32 %v18258_v58, %v25892_v22  ;;  %v10704_v28 = vrot.slane %v18335_v27, %v25869_v33  ;;  %vm24903_vm1 = vcmp.eq.s32.totalorder %v16605_v20, %v18337_v12  ;;  %vm24988_vm6 = vcmask 1048512   ;;  %v18377_v58 = vpop.xlane.xlu0 %5540 }
 0x1f5   :  { %v18346_v61 = vsel %vm10389_vm11, %v25893_v7, %v10547_v60  ;;  %v11593_v19 = vsel %vm24904_vm15, 1.0, %v25563_v32  ;;  %v18365_v54 = vsel %vm24903_vm1, 1.0, %v25563_v32  ;;  %14586 = vmatprep.subr.bf16.mxu0 %v14585_v18  ;;  %25897 = vst [vmem:[#allocation215_spill] sm:$0xff] %v18377_v58  ;;  %v18379_v8 = vpop.xlane.xlu1 %1282  ;;  %vm24913_vm1 = vcmp.eq.s32.totalorder %v16605_v20, %v18377_v58 }
 0x1f6   :  { %25894 = vst [vmem:[#allocation212_spill] sm:$0xff] %v18365_v54  ;;  %v1789_v24 = vand.u32 4294901760, %v1788_v1  ;;  %v18368_v22 = vsub.f32 %v11593_v19, %v11593_v19  ;;  %v10110_v7 = vadd.f32 %v11593_v19, %v18203_v51  ;;  %v10705_v30 = vsel %vm10382_vm13, %v10704_v28, %v18166_v44  ;;  %14588 = vmatpush3.bf16.msra.mxu0 %v14585_v18  ;;  %v15401_v19 = vld [vmem:[%s24465_s2 + $0x8] sm:$0xff] }
 0x1f7   :  { %v18375_v62 = vsub.f32 %v18365_v54, %v18365_v54  ;;  %25898 = vst [vmem:[#allocation216_spill] sm:$0xff] %v18379_v8  ;;  %v25899_v1 = vrot.slane %v18039_v53, %v25800_v15  ;;  %v25900_v51 = vand.u32 4294901760, %v18329_v43  ;;  %v25901_v28 = vand.u32 4294901760, %v18293_v6 }
 0x1f8   :  { %25895 = vst [vmem:[#allocation213_spill] sm:$0xff] %v18368_v22  ;;  %12863 = vmatprep.mubr.f32.mxu1 %v1789_v24  ;;  %v25902_v24 = vld [vmem:[#allocation10_spill] sm:$0xff]  ;;  %vm24915_vm15 = vcmp.eq.s32.totalorder %v16605_v20, %v18379_v8 }
 0x1f9   :  { %25896 = vst [vmem:[#allocation214_spill] sm:$0xff] %v18375_v62  ;;  %v18385_v60 = vsel %vm10389_vm11, %v25899_v1, %v10705_v30  ;;  %v18390_v44 = vsub.f32 %v18329_v43, %v25900_v51  ;;  %v18395_v18 = vsub.f32 %v18293_v6, %v25901_v28  ;;  %v25903_v27 = vand.u32 4294901760, %v25902_v24  ;;  %v25906_v51 = vld [vmem:[#allocation84_spill] sm:$0xff]  ;;  %v18439_v6 = vpop.xlane.xlu0 %1276  ;;  %v18441_v62 = vpop.xlane.xlu1 %1346 }
 0x1fa   :  { %v10862_v30 = vrot.slane %v18377_v58, %v25869_v33  ;;  %v25905_v1 = vand.u32 4294901760, %v18050_v26  ;;  %v24916_v26 = vand.u32 4294901760, %v18368_v22  ;;  %v10111_v24 = vadd.f32 %v18080_v31, %v10110_v7  ;;  %25910 = vst [vmem:[#allocation219_spill] sm:$0xff] %v18439_v6  ;;  %25911 = vst [vmem:[#allocation220_spill] sm:$0xff] %v18441_v62  ;;  %v25913_v58 = vld [vmem:[#allocation100_spill] sm:$0xff] }
 0x1fb   :  { %v18402_v53 = vsub.f32 %v15401_v19, %v25903_v27  ;;  %v18418_v27 = vsel %vm24913_vm1, 1.0, %v25563_v32  ;;  %v18424_v19 = vsel %vm24915_vm15, 1.0, %v25563_v32  ;;  %v25912_v7 = vrot.slane %v18105_v39, %v25800_v15 }
 0x1fc   :  { %12864 = vmatmul.mubr.f32.gmra.mrb[76].mxu1 %v25905_v1  ;;  %25907 = vst [vmem:[#allocation84_spill] sm:$0xff] %v18418_v27  ;;  %v18430_v1 = vsub.f32 %v18418_v27, %v18418_v27  ;;  %v10863_v28 = vsel %vm10382_vm13, %v10862_v30, %v18233_v21  ;;  %v18436_v43 = vsub.f32 %v18424_v19, %v18424_v19  ;;  %v2310_v21 = vand.u32 4294901760, %v18395_v18 }
 0x1fd   :  { %25904 = vst [vmem:[#allocation10_spill] sm:$0xff] %v18402_v53  ;;  %v5993_v31 = vsub.f32 %v18368_v22, %v24916_v26  ;;  %v18450_v54 = vsel %vm10389_vm11, %v25912_v7, %v10863_v28  ;;  %vm24929_vm1 = vcmp.eq.s32.totalorder %v16605_v20, %v18439_v6  ;;  %v10395_v27 = vrot.slane %v18439_v6, %v25913_v58  ;;  %v18490_v30 = vpop.xlane.xlu1 %5486 }
 0x1fe   :  { %25908 = vst [vmem:[#allocation217_spill] sm:$0xff] %v18430_v1  ;;  %25909 = vst [vmem:[#allocation218_spill] sm:$0xff] %v18436_v43  ;;  %vm24928_vm15 = vcmp.eq.s32.totalorder %v16605_v20, %v18441_v62  ;;  %v11339_v28 = vsel %vm24929_vm1, 1.0, %v25563_v32  ;;  %v25917_v1 = vrot.slane %v18160_v47, %v25856_v50  ;;  %v15402_v47 = vld [vmem:[%s24465_s2 + $0xa0] sm:$0xff]  ;;  %vm24939_vm1 = vcmp.eq.s32.totalorder %v16605_v20, %v18490_v30 }
 0x1ff   :  { %v18470_v18 = vsel %vm24928_vm15, 1.0, %v25563_v32  ;;  %v5994_v7 = vand.u32 4294901760, %v5993_v31  ;;  %v18473_v22 = vsub.f32 %v11339_v28, %v11339_v28  ;;  %v5396_v39 = vadd.f32 %v11339_v28, %v18319_v37  ;;  %v18488_v31 = vpop.xlane.xlu0 %1340  ;;  %25919 = vst [vmem:[#allocation224_spill] sm:$0xff] %v18490_v30 }
 0x200   :  { %25914 = vst [vmem:[#allocation100_spill] sm:$0xff] %v18470_v18  ;;  %v10397_v26 = vsel %vm10396_vm12, %v10395_v27, %v18281_v10  ;;  %v18480_v6 = vsub.f32 %v18470_v18, %v18470_v18  ;;  %25918 = vst [vmem:[#allocation223_spill] sm:$0xff] %v18488_v31  ;;  %v25920_v37 = vand.u32 4294901760, %v18436_v43  ;;  %v25921_v10 = vand.u32 4294901760, %v18402_v53 }
 0x201   :  { %25915 = vst [vmem:[#allocation221_spill] sm:$0xff] %v18473_v22  ;;  %v18486_v49 = vsel %vm24988_vm6, %v25917_v1, %v10397_v26  ;;  %13631 = vmatprep.mubr.f32.mxu0 %v5994_v7  ;;  %v25922_v26 = vld [vmem:[#allocation26_spill] sm:$0xff]  ;;  %v25925_v18 = vand.u32 4294901760, %v18171_v14  ;;  %vm24938_vm15 = vcmp.eq.s32.totalorder %v16605_v20, %v18488_v31  ;;  %v18527_v14 = vsel %vm24939_vm1, 1.0, %v25563_v32 }
 0x202   :  { %25916 = vst [vmem:[#allocation222_spill] sm:$0xff] %v18480_v6  ;;  %v18495_v28 = vsub.f32 %v18436_v43, %v25920_v37  ;;  %v2316_v27 = vsub.f32 %v18402_v53, %v25921_v10  ;;  %v25923_v1 = vand.u32 4294901760, %v25922_v26  ;;  %v10556_v37 = vrot.slane %v18488_v31, %v25913_v58 }
 0x203   :  { %13632 = vmatmul.mubr.f32.gmra.mrb[76].mxu0 %v25925_v18  ;;  %v5397_v26 = vadd.f32 %v18199_v23, %v5396_v39  ;;  %v18539_v43 = vsub.f32 %v18527_v14, %v18527_v14  ;;  %v25929_v53 = vrot.slane %v18224_v11, %v25856_v50  ;;  %v18548_v39 = vpop.xlane.xlu0 %5480  ;;  %v18550_v23 = vpop.xlane.xlu1 %5550  ;;  %v25932_v6 = vand.u32 4294901760, %v18473_v22 }
 0x204   :  { %v18505_v7 = vsub.f32 %v15402_v47, %v25923_v1  ;;  %v18521_v47 = vsel %vm24938_vm15, 1.0, %v25563_v32  ;;  %v10557_v10 = vsel %vm10396_vm12, %v10556_v37, %v18346_v61  ;;  %25930 = vst [vmem:[#allocation228_spill] sm:$0xff] %v18548_v39  ;;  %25931 = vst [vmem:[#allocation229_spill] sm:$0xff] %v18550_v23  ;;  %v2317_v37 = vand.u32 4294901760, %v2316_v27 }
 0x205   :  { %25926 = vst [vmem:[#allocation225_spill] sm:$0xff] %v18521_v47  ;;  %v18533_v1 = vsub.f32 %v18521_v47, %v18521_v47  ;;  %25928 = vst [vmem:[#allocation227_spill] sm:$0xff] %v18539_v43  ;;  %v18546_v18 = vsel %vm24988_vm6, %v25929_v53, %v10557_v10  ;;  %v1808_v61 = vsub.f32 %v18473_v22, %v25932_v6 }
 0x206   :  { %25924 = vst [vmem:[#allocation26_spill] sm:$0xff] %v18505_v7  ;;  %vm24950_vm15 = vcmp.eq.s32.totalorder %v16605_v20, %v18548_v39  ;;  %v10714_v31 = vrot.slane %v18548_v39, %v25913_v58  ;;  %vm24949_vm1 = vcmp.eq.s32.totalorder %v16605_v20, %v18550_v23  ;;  %v25936_v39 = vrot.slane %v18275_v36, %v25856_v50 }
 0x207   :  { %25927 = vst [vmem:[#allocation226_spill] sm:$0xff] %v18533_v1  ;;  %v11595_v6 = vsel %vm24950_vm15, 1.0, %v25563_v32  ;;  %v18572_v27 = vsel %vm24949_vm1, 1.0, %v25563_v32  ;;  %v1809_v10 = vand.u32 4294901760, %v1808_v61  ;;  %v18589_v61 = vpop.xlane.xlu0 %5544  ;;  %v18591_v47 = vpop.xlane.xlu1 %1286 }
 0x208   :  { %25933 = vst [vmem:[#allocation230_spill] sm:$0xff] %v18572_v27  ;;  %v18575_v22 = vsub.f32 %v11595_v6, %v11595_v6  ;;  %v10112_v11 = vadd.f32 %v11595_v6, %v10111_v24  ;;  %v10715_v53 = vsel %vm10396_vm12, %v10714_v31, %v18385_v60  ;;  %v18581_v1 = vsub.f32 %v18572_v27, %v18572_v27 }
 0x209   :  { %v18587_v2 = vsel %vm24988_vm6, %v25936_v39, %v10715_v53  ;;  %12866 = vmatprep.mubr.f32.mxu1 %v1809_v10  ;;  %25937 = vst [vmem:[#allocation233_spill] sm:$0xff] %v18589_v61  ;;  %25938 = vst [vmem:[#allocation234_spill] sm:$0xff] %v18591_v47  ;;  %v25939_v24 = vand.u32 4294901760, %v18539_v43  ;;  %v14389_v60 = vpack.c.bf16 %v2317_v37, %v2310_v21  ;;  %v25940_v31 = vand.u32 4294901760, %v18505_v7 }
 0x20a   :  { %25934 = vst [vmem:[#allocation231_spill] sm:$0xff] %v18575_v22  ;;  %25935 = vst [vmem:[#allocation232_spill] sm:$0xff] %v18581_v1  ;;  %vm24961_vm1 = vcmp.eq.s32.totalorder %v16605_v20, %v18589_v61  ;;  %v10872_v39 = vrot.slane %v18589_v61, %v25913_v58  ;;  %v25941_v53 = vand.u32 4294901760, %v18286_v57  ;;  %vm24962_vm15 = vcmp.eq.s32.totalorder %v16605_v20, %v18591_v47 }
 0x20b   :  { %v18596_v6 = vsub.f32 %v18539_v43, %v25939_v24  ;;  %v18601_v1 = vsub.f32 %v18505_v7, %v25940_v31  ;;  %v18617_v37 = vsel %vm24961_vm1, 1.0, %v25563_v32  ;;  %v18623_v10 = vsel %vm24962_vm15, 1.0, %v25563_v32  ;;  %14390 = vmatprep.subr.bf16.mxu1 %v14389_v60  ;;  %v18648_v61 = vpop.xlane.xlu1 %1350  ;;  %v25949_v43 = vld [vmem:[#allocation27_spill] sm:$0xff] }
 0x20c   :  { %12867 = vmatmul.mubr.f32.gmra.mrb[78].mxu1 %v25941_v53  ;;  %25942 = vst [vmem:[#allocation235_spill] sm:$0xff] %v18617_v37  ;;  %v18627_v24 = vadd.f32 %v18315_v9, %v10112_v11  ;;  %v18631_v31 = vsub.f32 %v18617_v37, %v18617_v37  ;;  %v10873_v53 = vsel %vm10396_vm12, %v10872_v39, %v18450_v54  ;;  %v18646_v9 = vpop.xlane.xlu0 %1280  ;;  %25947 = vst [vmem:[#allocation239_spill] sm:$0xff] %v18648_v61 }
 0x20d   :  { %v18637_v21 = vsub.f32 %v18623_v10, %v18623_v10  ;;  %14392 = vmatpush3.bf16.msra.mxu1 %v14389_v60  ;;  %v25945_v57 = vrot.slane %v18337_v12, %v25856_v50  ;;  %25946 = vst [vmem:[#allocation238_spill] sm:$0xff] %v18646_v9  ;;  %v25948_v36 = vand.u32 4294901760, %v18575_v22  ;;  %v15403_v60 = vld [vmem:[%s24465_s2 + $0xa8] sm:$0xff]  ;;  %v25950_v7 = vand.u32 4294901760, %v25949_v43 }
 0x20e   :  { %25943 = vst [vmem:[#allocation236_spill] sm:$0xff] %v18631_v31  ;;  %vm24978_vm1 = vcmp.eq.s32.totalorder %v16605_v20, %v18646_v9  ;;  %vm24977_vm15 = vcmp.eq.s32.totalorder %v16605_v20, %v18648_v61 }
 0x20f   :  { %25944 = vst [vmem:[#allocation237_spill] sm:$0xff] %v18637_v21  ;;  %v18644_v11 = vsel %vm24988_vm6, %v25945_v57, %v10873_v53  ;;  %v6013_v54 = vsub.f32 %v18575_v22, %v25948_v36  ;;  %v18659_v12 = vsub.f32 %v15403_v60, %v25950_v7  ;;  %v25952_v57 = vld [vmem:[#allocation83_spill] sm:$0xff]  ;;  %v11341_v39 = vsel %vm24978_vm1, 1.0, %v25563_v32  ;;  %v18694_v41 = vpop.xlane.xlu1 %5490 }
 0x210   :  { %v10408_v53 = vrot.slane %v18646_v9, %v25952_v57  ;;  %v18677_v43 = vsel %vm24977_vm15, 1.0, %v25563_v32  ;;  %v24976_v60 = vand.u32 4294901760, %v18637_v21  ;;  %v18680_v22 = vsub.f32 %v11341_v39, %v11341_v39  ;;  %v18692_v37 = vpop.xlane.xlu0 %1344  ;;  %25958 = vst [vmem:[#allocation243_spill] sm:$0xff] %v18694_v41 }
 0x211   :  { %25951 = vst [vmem:[#allocation27_spill] sm:$0xff] %v18659_v12  ;;  %25953 = vst [vmem:[#allocation83_spill] sm:$0xff] %v18677_v43  ;;  %v6014_v7 = vand.u32 4294901760, %v6013_v54  ;;  %v5398_v27 = vadd.f32 %v11341_v39, %v5397_v26  ;;  %v25955_v36 = vrot.slane %v18379_v8, %v25906_v51  ;;  %v18690_v9 = vsub.f32 %v18677_v43, %v18677_v43  ;;  %v15404_v39 = vld [vmem:[%s24465_s2 + $0x10] sm:$0xff] }
 0x212   :  { %25954 = vst [vmem:[#allocation240_spill] sm:$0xff] %v18680_v22  ;;  %25957 = vst [vmem:[#allocation242_spill] sm:$0xff] %v18692_v37  ;;  %v18699_v54 = vsub.f32 %v18637_v21, %v24976_v60  ;;  %v25962_v43 = vld [vmem:[#allocation13_spill] sm:$0xff]  ;;  %v25965_v60 = vand.u32 4294901760, %v18390_v44  ;;  %vm24986_vm15 = vcmp.eq.s32.totalorder %v16605_v20, %v18692_v37  ;;  %v10566_v26 = vrot.slane %v18692_v37, %v25952_v57 }
 0x213   :  { %v18686_v31 = vsel %vm10305_vm2, %v25955_v36, %v10408_v53  ;;  %25956 = vst [vmem:[#allocation241_spill] sm:$0xff] %v18690_v9  ;;  %13634 = vmatprep.mubr.f32.mxu0 %v6014_v7  ;;  %v25959_v53 = vld [vmem:[#allocation12_spill] sm:$0xff]  ;;  %v15405_v7 = vld [vmem:[%s24465_s2 + $0x18] sm:$0xff]  ;;  %v25963_v9 = vand.u32 4294901760, %v25962_v43  ;;  %vm24987_vm1 = vcmp.eq.s32.totalorder %v16605_v20, %v18694_v41  ;;  %v18757_v43 = vpop.xlane.xlu1 %5554  ;;  %vm10958_vm6 = vcmask 1040384  }
 0x214   :  { %v25960_v36 = vand.u32 4294901760, %v25959_v53  ;;  %13635 = vmatmul.mubr.f32.gmra.mrb[78].mxu0 %v25965_v60  ;;  %v18736_v44 = vsel %vm24987_vm1, 1.0, %v25563_v32  ;;  %v5399_v60 = vadd.f32 %v18424_v19, %v5398_v27  ;;  %v18755_v37 = vpop.xlane.xlu0 %5484  ;;  %25971 = vst [vmem:[#allocation248_spill] sm:$0xff] %v18757_v43  ;;  %v25972_v19 = vand.u32 4294901760, %v18680_v22 }
 0x215   :  { %v18714_v45 = vsub.f32 %v15405_v7, %v25963_v9  ;;  %v18730_v9 = vsel %vm24986_vm15, 1.0, %v25563_v32  ;;  %25970 = vst [vmem:[#allocation247_spill] sm:$0xff] %v18755_v37  ;;  %vm25003_vm15 = vcmp.eq.s32.totalorder %v16605_v20, %v18755_v37  ;;  %v10724_v21 = vrot.slane %v18755_v37, %v25952_v57 }
 0x216   :  { %v18707_v8 = vsub.f32 %v15404_v39, %v25960_v36  ;;  %25966 = vst [vmem:[#allocation244_spill] sm:$0xff] %v18730_v9  ;;  %v18742_v53 = vsub.f32 %v18730_v9, %v18730_v9  ;;  %v25968_v36 = vrot.slane %v18441_v62, %v25906_v51  ;;  %v18752_v39 = vsub.f32 %v18736_v44, %v18736_v44 }
 0x217   :  { %25964 = vst [vmem:[#allocation13_spill] sm:$0xff] %v18714_v45  ;;  %v1828_v27 = vsub.f32 %v18680_v22, %v25972_v19  ;;  %v25973_v9 = vand.u32 4294901760, %v18659_v12  ;;  %vm25001_vm1 = vcmp.eq.s32.totalorder %v16605_v20, %v18757_v43  ;;  %v25976_v19 = vrot.slane %v18490_v30, %v25906_v51 }
 0x218   :  { %25961 = vst [vmem:[#allocation12_spill] sm:$0xff] %v18707_v8  ;;  %25967 = vst [vmem:[#allocation245_spill] sm:$0xff] %v18742_v53  ;;  %v18748_v7 = vsel %vm10305_vm2, %v25968_v36, %v10566_v26  ;;  %v18783_v36 = vsel %vm25001_vm1, 1.0, %v25563_v32  ;;  %v25004_v22 = vand.u32 4294901760, %v18752_v39  ;;  %v18799_v48 = vpop.xlane.xlu0 %5548 }
 0x219   :  { %25969 = vst [vmem:[#allocation246_spill] sm:$0xff] %v18752_v39  ;;  %v6549_v62 = vsub.f32 %v18659_v12, %v25973_v9  ;;  %v11597_v9 = vsel %vm25003_vm15, 1.0, %v25563_v32  ;;  %25974 = vst [vmem:[#allocation249_spill] sm:$0xff] %v18783_v36  ;;  %v1829_v26 = vand.u32 4294901760, %v1828_v27  ;;  %v18793_v59 = vsel %vm10305_vm2, %v25976_v19, %v10724_v21  ;;  %v18801_v27 = vpop.xlane.xlu1 %1290 }
 0x21a   :  { %v18786_v12 = vsub.f32 %v11597_v9, %v11597_v9  ;;  %v10114_v53 = vadd.f32 %v11597_v9, %v18627_v24  ;;  %v18797_v37 = vsub.f32 %v18783_v36, %v18783_v36  ;;  %25978 = vst [vmem:[#allocation252_spill] sm:$0xff] %v18799_v48  ;;  %25979 = vst [vmem:[#allocation253_spill] sm:$0xff] %v18801_v27  ;;  %v25980_v9 = vand.u32 4294901760, %v18707_v8 }
 0x21b   :  { %12869 = vmatprep.mubr.f32.mxu1 %v1829_v26  ;;  %v18806_v38 = vsub.f32 %v18752_v39, %v25004_v22  ;;  %v6550_v24 = vand.u32 4294901760, %v6549_v62  ;;  %v25981_v19 = vand.u32 4294901760, %v18714_v45  ;;  %vm25015_vm1 = vcmp.eq.s32.totalorder %v16605_v20, %v18799_v48 }
 0x21c   :  { %25975 = vst [vmem:[#allocation250_spill] sm:$0xff] %v18786_v12  ;;  %25977 = vst [vmem:[#allocation251_spill] sm:$0xff] %v18797_v37  ;;  %v2323_v21 = vsub.f32 %v18707_v8, %v25980_v9  ;;  %v10882_v26 = vrot.slane %v18799_v48, %v25952_v57  ;;  %v25982_v37 = vand.u32 4294901760, %v18495_v28  ;;  %vm25022_vm15 = vcmp.eq.s32.totalorder %v16605_v20, %v18801_v27 }
 0x21d   :  { %v2330_v30 = vsub.f32 %v18714_v45, %v25981_v19  ;;  %v18828_v9 = vsel %vm25015_vm1, 1.0, %v25563_v32  ;;  %v18834_v57 = vsel %vm25022_vm15, 1.0, %v25563_v32  ;;  %v25983_v22 = vrot.slane %v18550_v23, %v25906_v51  ;;  %v18853_v45 = vpop.xlane.xlu0 %1284  ;;  %v18855_v28 = vpop.xlane.xlu1 %1354 }
 0x21e   :  { %12870 = vmatmul.mubr.f32.gmra.mrb[80].mxu1 %v25982_v37  ;;  %v10115_v37 = vadd.f32 %v18527_v14, %v10114_v53  ;;  %v18840_v19 = vsub.f32 %v18828_v9, %v18828_v9  ;;  %v18850_v39 = vsub.f32 %v18834_v57, %v18834_v57  ;;  %25985 = vst [vmem:[#allocation255_spill] sm:$0xff] %v18853_v45  ;;  %25986 = vst [vmem:[#allocation256_spill] sm:$0xff] %v18855_v28 }
 0x21f   :  { %v18846_v62 = vsel %vm10305_vm2, %v25983_v22, %v10882_v26  ;;  %v25987_v14 = vand.u32 4294901760, %v18786_v12  ;;  %v25988_v8 = vand.u32 4294901760, %v18601_v1  ;;  %v2324_v23 = vand.u32 4294901760, %v2323_v21 }
 0x220   :  { %25984 = vst [vmem:[#allocation254_spill] sm:$0xff] %v18850_v39  ;;  %v2331_v22 = vand.u32 4294901760, %v2330_v30  ;;  %vm1394_vm2 = vcmp.eq.s32.totalorder %v16605_v20, %v18853_v45  ;;  %v10417_v26 = vrot.slane %v18853_v45, %v16639_v17  ;;  %vm25021_vm1 = vcmp.eq.s32.totalorder %v16605_v20, %v18855_v28 }
 0x221   :  { %v6033_v53 = vsub.f32 %v18786_v12, %v25987_v14  ;;  %v14589_v51 = vpack.c.bf16 %v6550_v24, %v25988_v8  ;;  %v11343_v1 = vsel %vm1394_vm2, 1.0, %v25563_v32  ;;  %v18878_v8 = vsel %vm25021_vm1, 1.0, %v25563_v32  ;;  %v18889_v45 = vpop.xlane.xlu0 %1348 }
 0x222   :  { %v18881_v21 = vsub.f32 %v11343_v1, %v11343_v1  ;;  %v5400_v14 = vadd.f32 %v11343_v1, %v5399_v60  ;;  %v10418_v48 = vsel %vm10312_vm9, %v10417_v26, %v18686_v31  ;;  %v18887_v12 = vsub.f32 %v18878_v8, %v18878_v8  ;;  %25991 = vst [vmem:[#allocation259_spill] sm:$0xff] %v18889_v45  ;;  %v18913_v1 = vpop.xlane.xlu1 %5494 }
 0x223   :  { %v6034_v30 = vand.u32 4294901760, %v6033_v53  ;;  %14590 = vmatprep.subr.bf16.mxu0 %v14589_v51  ;;  %v25992_v53 = vrot.slane %v18591_v47, %v16646_v4  ;;  %v25993_v36 = vand.u32 4294901760, %v18850_v39  ;;  %v14393_v31 = vpack.c.bf16 %v2331_v22, %v2324_v23  ;;  %25995 = vst [vmem:[#allocation260_spill] sm:$0xff] %v18913_v1 }
 0x224   :  { %25989 = vst [vmem:[#allocation257_spill] sm:$0xff] %v18881_v21  ;;  %25990 = vst [vmem:[#allocation258_spill] sm:$0xff] %v18887_v12  ;;  %14592 = vmatpush3.bf16.msra.mxu0 %v14589_v51  ;;  %v18905_v26 = vsel %vm10958_vm6, %v18486_v49, %v18587_v2  ;;  %v25994_v51 = vand.u32 4294901760, %v18596_v6  ;;  %vm25023_vm1 = vcmp.eq.s32.totalorder %v16605_v20, %v18889_v45 }
 0x225   :  { %13637 = vmatprep.mubr.f32.mxu0 %v6034_v30  ;;  %v18895_v24 = vsel %vm10319_vm10, %v25992_v53, %v10418_v48  ;;  %v18900_v60 = vsub.f32 %v18850_v39, %v25993_v36  ;;  %v10575_v48 = vrot.slane %v18889_v45, %v16639_v17  ;;  %v25024_v36 = vand.u32 4294901760, %v18881_v21  ;;  %14394 = vmatprep.subr.bf16.mxu1 %v14393_v31 }
 0x226   :  { %13638 = vmatmul.mubr.f32.gmra.mrb[80].mxu0 %v25994_v51  ;;  %v18917_v23 = vadd.f32 %v18623_v10, %v5400_v14  ;;  %v18923_v49 = vsel %vm25023_vm1, 1.0, %v25563_v32  ;;  %vm25029_vm15 = vcmp.eq.s32.totalorder %v16605_v20, %v18913_v1  ;;  %14396 = vmatpush3.bf16.msra.mxu1 %v14393_v31  ;;  %v18949_v51 = vpop.xlane.xlu0 %5488  ;;  %v18960_v2 = vsel %vm10958_vm6, %v18546_v18, %v18644_v11 }
 0x227   :  { %v18932_v22 = vsub.f32 %v18923_v49, %v18923_v49  ;;  %v10576_v10 = vsel %vm10312_vm9, %v10575_v48, %v18748_v7  ;;  %v18940_v30 = vsel %vm25029_vm15, 1.0, %v25563_v32  ;;  %v1848_v14 = vsub.f32 %v18881_v21, %v25024_v36  ;;  %25998 = vst [vmem:[#allocation263_spill] sm:$0xff] %v18949_v51  ;;  %v18966_v36 = vpop.xlane.xlu1 %5558 }
 0x228   :  { %v18947_v53 = vsub.f32 %v18940_v30, %v18940_v30  ;;  %v25999_v7 = vrot.slane %v18648_v61, %v16646_v4  ;;  %vm25039_vm1 = vcmp.eq.s32.totalorder %v16605_v20, %v18949_v51  ;;  %v10733_v31 = vrot.slane %v18949_v51, %v16639_v17  ;;  %26000 = vst [vmem:[#allocation264_spill] sm:$0xff] %v18966_v36 }
 0x229   :  { %25996 = vst [vmem:[#allocation261_spill] sm:$0xff] %v18932_v22  ;;  %v1849_v6 = vand.u32 4294901760, %v1848_v14  ;;  %v15542_v39 = vmov 1983009808   ;;  %vm25034_vm15 = vcmp.eq.s32.totalorder %v16605_v20, %v18966_v36  ;;  %v26005_v11 = vand.u32 4294901760, %v18699_v54 }
 0x22a   :  { %25997 = vst [vmem:[#allocation262_spill] sm:$0xff] %v18947_v53  ;;  %v18955_v48 = vsel %vm10319_vm10, %v25999_v7, %v10576_v10  ;;  %v10966_v21 = vunpack.c.l.s4 %v15542_v39  ;;  %v11599_v10 = vsel %vm25039_vm1, 1.0, %v25563_v32  ;;  %v10734_v14 = vsel %vm10312_vm9, %v10733_v31, %v18793_v59  ;;  %v18991_v18 = vpop.xlane.xlu0 %5552 }
 0x22b   :  { %v18977_v7 = vsub.f32 %v11599_v10, %v11599_v10  ;;  %v10116_v61 = vadd.f32 %v11599_v10, %v10115_v37  ;;  %v18985_v39 = vsel %vm25034_vm15, 1.0, %v25563_v32  ;;  %12872 = vmatprep.mubr.f32.mxu1 %v1849_v6  ;;  %26004 = vst [vmem:[#allocation268_spill] sm:$0xff] %v18991_v18  ;;  %v26006_v37 = vrot.slane %v18694_v41, %v16646_v4  ;;  %v19010_v54 = vpop.xlane.xlu1 %1294 }
 0x22c   :  { %26002 = vst [vmem:[#allocation266_spill] sm:$0xff] %v18985_v39  ;;  %v18989_v45 = vsub.f32 %v18985_v39, %v18985_v39  ;;  %12873 = vmatmul.mubr.f32.gmra.mrb[82].mxu1 %v26005_v11  ;;  %v26007_v31 = vand.u32 4294901760, %v18947_v53  ;;  %v10967_v6 = vunpack.c.0.s8 %v10966_v21  ;;  %vm25056_vm15 = vcmp.eq.s32.totalorder %v16605_v20, %v18991_v18  ;;  %26008 = vst [vmem:[#allocation269_spill] sm:$0xff] %v19010_v54 }
 0x22d   :  { %26001 = vst [vmem:[#allocation265_spill] sm:$0xff] %v18977_v7  ;;  %v18999_v59 = vsel %vm10319_vm10, %v26006_v37, %v10734_v14  ;;  %v10891_v51 = vrot.slane %v18991_v18, %v16639_v17  ;;  %v25046_v11 = vand.u32 4294901760, %v18977_v7  ;;  %v19014_v41 = vadd.f32 %v18736_v44, %v10116_v61 }
 0x22e   :  { %26003 = vst [vmem:[#allocation267_spill] sm:$0xff] %v18989_v45  ;;  %v19004_v10 = vsub.f32 %v18947_v53, %v26007_v31  ;;  %v19020_v14 = vsel %vm25056_vm15, 1.0, %v25563_v32  ;;  %vm25080_vm1 = vcmp.eq.s32.totalorder %v16605_v20, %v19010_v54  ;;  %v19046_v17 = vpop.xlane.xlu0 %1288  ;;  %v26013_v53 = vrot.slane %v18757_v43, %v16646_v4 }
 0x22f   :  { %26009 = vst [vmem:[#allocation270_spill] sm:$0xff] %v19020_v14  ;;  %v19029_v37 = vsub.f32 %v19020_v14, %v19020_v14  ;;  %v10892_v61 = vsel %vm10312_vm9, %v10891_v51, %v18846_v62  ;;  %v19037_v44 = vsel %vm25080_vm1, 1.0, %v25563_v32  ;;  %v6053_v31 = vsub.f32 %v18977_v7, %v25046_v11  ;;  %26012 = vst [vmem:[#allocation273_spill] sm:$0xff] %v19046_v17  ;;  %v26014_v51 = vld [vmem:[#allocation8_spill] sm:$0xff]  ;;  %v19062_v7 = vpop.xlane.xlu1 %1358 }
 0x230   :  { %v19044_v21 = vsub.f32 %v19037_v44, %v19037_v44  ;;  %v19052_v62 = vsel %vm10319_vm10, %v26013_v53, %v10892_v61  ;;  %v19055_v18 = vsub.s32 %v10967_v6, %v26014_v51  ;;  %vm1396_vm9 = vcmp.eq.s32.totalorder %v16605_v20, %v19046_v17  ;;  %26015 = vst [vmem:[#allocation8_spill] sm:$0xff] %v19062_v7 }
 0x231   :  { %26010 = vst [vmem:[#allocation271_spill] sm:$0xff] %v19029_v37  ;;  %v10427_v11 = vrot.slane %v19046_v17, %v16656_v46  ;;  %v6054_v45 = vand.u32 4294901760, %v6053_v31  ;;  %v26016_v39 = vand.u32 4294901760, %v17462_v55  ;;  %v11345_v53 = vsel %vm1396_vm9, 1.0, %v25563_v32  ;;  %v26032_v37 = vld [vmem:[#allocation32_spill] sm:$0xff] }
 0x232   :  { %26011 = vst [vmem:[#allocation272_spill] sm:$0xff] %v19044_v21  ;;  %vm25055_vm10 = vcmp.eq.s32.totalorder %v16605_v20, %v19062_v7  ;;  %v19078_v51 = vsub.f32 %v11345_v53, %v11345_v53  ;;  %v5402_v31 = vadd.f32 %v11345_v53, %v18917_v23  ;;  %v26020_v6 = vand.u32 4294901760, %v18806_v38  ;;  %v19095_v61 = vpop.xlane.xlu0 %1352 }
 0x233   :  { %v19067_v4 = vsub.f32 %v17462_v55, %v26016_v39  ;;  %v10428_v39 = vsel %vm10326_vm5, %v10427_v11, %v18895_v24  ;;  %v19087_v47 = vsel %vm25055_vm10, 1.0, %v25563_v32  ;;  %13640 = vmatprep.mubr.f32.mxu0 %v6054_v45  ;;  %26021 = vst [vmem:[#allocation277_spill] sm:$0xff] %v19095_v61  ;;  %v26022_v23 = vrot.slane %v18801_v27, %v25638_v35 }
 0x234   :  { %26017 = vst [vmem:[#allocation274_spill] sm:$0xff] %v19078_v51  ;;  %26018 = vst [vmem:[#allocation275_spill] sm:$0xff] %v19087_v47  ;;  %v19091_v55 = vsub.f32 %v19087_v47, %v19087_v47  ;;  %13641 = vmatmul.mubr.f32.gmra.mrb[82].mxu0 %v26020_v6  ;;  %v26023_v11 = vand.u32 4294901760, %v19044_v21  ;;  %v26024_v45 = vand.u32 4294901760, %v17859_v16  ;;  %vm25067_vm10 = vcmp.eq.s32.totalorder %v16605_v20, %v19095_v61  ;;  %v19117_v6 = vpop.xlane.xlu1 %5498 }
 0x235   :  { %v19101_v24 = vsel %vm10333_vm3, %v26022_v23, %v10428_v39  ;;  %v10585_v38 = vrot.slane %v19095_v61, %v16656_v46  ;;  %26025 = vst [vmem:[#allocation278_spill] sm:$0xff] %v19117_v6  ;;  %v19121_v23 = vadd.f32 %v18834_v57, %v5402_v31  ;;  %vm25074_vm15 = vcmp.eq.s32.totalorder %v16605_v20, %v19117_v6 }
 0x236   :  { %26019 = vst [vmem:[#allocation276_spill] sm:$0xff] %v19091_v55  ;;  %v19106_v53 = vsub.f32 %v19044_v21, %v26023_v11  ;;  %v19111_v43 = vsub.f32 %v17859_v16, %v26024_v45  ;;  %v19127_v11 = vsel %vm25067_vm10, 1.0, %v25563_v32  ;;  %v19144_v31 = vsel %vm25074_vm15, 1.0, %v25563_v32  ;;  %v19153_v16 = vpop.xlane.xlu0 %5492 }
 0x237   :  { %v19136_v39 = vsub.f32 %v19127_v11, %v19127_v11  ;;  %v10586_v57 = vsel %vm10326_vm5, %v10585_v38, %v18955_v48  ;;  %v26027_v21 = vand.u32 4294901760, %v19078_v51  ;;  %v19151_v45 = vsub.f32 %v19144_v31, %v19144_v31  ;;  %26029 = vst [vmem:[#allocation281_spill] sm:$0xff] %v19153_v16 }
 0x238   :  { %v26030_v27 = vrot.slane %v18855_v28, %v25638_v35  ;;  %vm5600_vm10 = vcmp.eq.s32.totalorder %v16605_v20, %v19153_v16  ;;  %v15406_v28 = vld [vmem:[%s24465_s2 + $0xb0] sm:$0xff] }
 0x239   :  { %26026 = vst [vmem:[#allocation279_spill] sm:$0xff] %v19136_v39  ;;  %v1868_v61 = vsub.f32 %v19078_v51, %v26027_v21  ;;  %26028 = vst [vmem:[#allocation280_spill] sm:$0xff] %v19151_v45  ;;  %v10743_v21 = vrot.slane %v19153_v16, %v16656_v46  ;;  %v19167_v51 = vpop.xlane.xlu1 %5562  ;;  %v11601_v38 = vsel %vm5600_vm10, 1.0, %v25563_v32 }
 0x23a   :  { %v19159_v48 = vsel %vm10333_vm3, %v26030_v27, %v10586_v57  ;;  %26031 = vst [vmem:[#allocation282_spill] sm:$0xff] %v19167_v51  ;;  %v26033_v27 = vand.u32 4294901760, %v26032_v37  ;;  %vm25077_vm15 = vcmp.eq.s32.totalorder %v16605_v20, %v19167_v51  ;;  %v19185_v47 = vsub.f32 %v11601_v38, %v11601_v38  ;;  %v19200_v17 = vpop.xlane.xlu0 %5556 }
 0x23b   :  { %v1869_v55 = vand.u32 4294901760, %v1868_v61  ;;  %v10118_v12 = vadd.f32 %v11601_v38, %v19014_v41  ;;  %v19194_v37 = vsel %vm25077_vm15, 1.0, %v25563_v32  ;;  %26038 = vst [vmem:[#allocation286_spill] sm:$0xff] %v19200_v17  ;;  %v26039_v61 = vand.u32 4294901760, %v18900_v60 }
 0x23c   :  { %v19174_v57 = vsub.f32 %v15406_v28, %v26033_v27  ;;  %26035 = vst [vmem:[#allocation283_spill] sm:$0xff] %v19185_v47  ;;  %v10744_v28 = vsel %vm10326_vm5, %v10743_v21, %v18999_v59  ;;  %26036 = vst [vmem:[#allocation284_spill] sm:$0xff] %v19194_v37  ;;  %v19198_v27 = vsub.f32 %v19194_v37, %v19194_v37  ;;  %v26041_v38 = vand.u32 4294901760, %v19151_v45 }
 0x23d   :  { %12875 = vmatprep.mubr.f32.mxu1 %v1869_v55  ;;  %v26040_v41 = vrot.slane %v18913_v1, %v25638_v35  ;;  %vm25101_vm15 = vcmp.eq.s32.totalorder %v16605_v20, %v19200_v17  ;;  %v10901_v60 = vrot.slane %v19200_v17, %v16656_v46  ;;  %v25087_v1 = vand.u32 4294901760, %v19185_v47 }
 0x23e   :  { %26034 = vst [vmem:[#allocation32_spill] sm:$0xff] %v19174_v57  ;;  %26037 = vst [vmem:[#allocation285_spill] sm:$0xff] %v19198_v27  ;;  %12876 = vmatmul.mubr.f32.gmra.mrb[84].mxu1 %v26039_v61  ;;  %v19213_v21 = vsub.f32 %v19151_v45, %v26041_v38  ;;  %v19220_v61 = vpop.xlane.xlu1 %1298  ;;  %v19256_v46 = vpop.xlane.xlu0 %1292  ;;  %v26047_v17 = vrot.slane %v18966_v36, %v25638_v35  ;;  %v26053_v36 = vld [vmem:[#allocation18_spill] sm:$0xff] }
 0x23f   :  { %v19208_v59 = vsel %vm10333_vm3, %v26040_v41, %v10744_v28  ;;  %26042 = vst [vmem:[#allocation287_spill] sm:$0xff] %v19220_v61  ;;  %v19224_v28 = vadd.f32 %v18940_v30, %v10118_v12  ;;  %v19230_v41 = vsel %vm25101_vm15, 1.0, %v25563_v32  ;;  %vm25122_vm1 = vcmp.eq.s32.totalorder %v16605_v20, %v19220_v61  ;;  %26046 = vst [vmem:[#allocation291_spill] sm:$0xff] %v19256_v46 }
 0x240   :  { %26043 = vst [vmem:[#allocation288_spill] sm:$0xff] %v19230_v41  ;;  %v19239_v55 = vsub.f32 %v19230_v41, %v19230_v41  ;;  %v10902_v12 = vsel %vm10326_vm5, %v10901_v60, %v19052_v62  ;;  %v19247_v30 = vsel %vm25122_vm1, 1.0, %v25563_v32  ;;  %v6073_v45 = vsub.f32 %v19185_v47, %v25087_v1  ;;  %v15407_v1 = vld [vmem:[%s24465_s2 + $0xb8] sm:$0xff]  ;;  %v26049_v47 = vld [vmem:[#allocation33_spill] sm:$0xff] }
 0x241   :  { %v19254_v38 = vsub.f32 %v19247_v30, %v19247_v30  ;;  %v19262_v62 = vsel %vm10333_vm3, %v26047_v17, %v10902_v12  ;;  %v26048_v60 = vand.u32 4294901760, %v19174_v57  ;;  %v26050_v27 = vand.u32 4294901760, %v26049_v47 }
 0x242   :  { %26044 = vst [vmem:[#allocation289_spill] sm:$0xff] %v19239_v55  ;;  %vm1398_vm5 = vcmp.eq.s32.totalorder %v16605_v20, %v19256_v46  ;;  %v10437_v35 = vrot.slane %v19256_v46, %v16695_v34  ;;  %v19280_v17 = vpop.xlane.xlu1 %1362  ;;  %v6074_v12 = vand.u32 4294901760, %v6073_v45  ;;  %v19315_v45 = vpop.xlane.xlu0 %1356  ;;  %v26069_v46 = vrot.slane %v19062_v7, %v16664_v5  ;;  %v15409_v7 = vld [vmem:[%s24465_s2 + $0x28] sm:$0xff] }
 0x243   :  { %26045 = vst [vmem:[#allocation290_spill] sm:$0xff] %v19254_v38  ;;  %v19267_v16 = vsub.f32 %v19174_v57, %v26048_v60  ;;  %v19274_v37 = vsub.f32 %v15407_v1, %v26050_v27  ;;  %26052 = vst [vmem:[#allocation292_spill] sm:$0xff] %v19280_v17  ;;  %v15408_v60 = vld [vmem:[%s24465_s2 + $0x20] sm:$0xff]  ;;  %v26054_v57 = vand.u32 4294901760, %v26053_v36  ;;  %v11347_v47 = vsel %vm1398_vm5, 1.0, %v25563_v32 }
 0x244   :  { %vm25098_vm3 = vcmp.eq.s32.totalorder %v16605_v20, %v19280_v17  ;;  %v19298_v27 = vsub.f32 %v11347_v47, %v11347_v47  ;;  %v5404_v41 = vadd.f32 %v11347_v47, %v19121_v23  ;;  %v10438_v36 = vsel %vm10340_vm7, %v10437_v35, %v19101_v24  ;;  %13643 = vmatprep.mubr.f32.mxu0 %v6074_v12 }
 0x245   :  { %26051 = vst [vmem:[#allocation33_spill] sm:$0xff] %v19274_v37  ;;  %v19287_v55 = vsub.f32 %v15408_v60, %v26054_v57  ;;  %v19307_v57 = vsel %vm25098_vm3, 1.0, %v25563_v32  ;;  %v26059_v1 = vand.u32 4294901760, %v19004_v10  ;;  %26060 = vst [vmem:[#allocation296_spill] sm:$0xff] %v19315_v45  ;;  %v26061_v23 = vrot.slane %v19010_v54, %v16664_v5 }
 0x246   :  { %26056 = vst [vmem:[#allocation293_spill] sm:$0xff] %v19298_v27  ;;  %26057 = vst [vmem:[#allocation294_spill] sm:$0xff] %v19307_v57  ;;  %v19311_v60 = vsub.f32 %v19307_v57, %v19307_v57  ;;  %v26062_v35 = vand.u32 4294901760, %v19254_v38  ;;  %vm25109_vm3 = vcmp.eq.s32.totalorder %v16605_v20, %v19315_v45  ;;  %v10595_v10 = vrot.slane %v19315_v45, %v16695_v34  ;;  %v19369_v12 = vpop.xlane.xlu0 %5496 }
 0x247   :  { %26055 = vst [vmem:[#allocation18_spill] sm:$0xff] %v19287_v55  ;;  %13644 = vmatmul.mubr.f32.gmra.mrb[84].mxu0 %v26059_v1  ;;  %v19321_v24 = vsel %vm10347_vm8, %v26061_v23, %v10438_v36  ;;  %v19333_v1 = vpop.xlane.xlu1 %5502  ;;  %v19337_v36 = vadd.f32 %v19037_v44, %v5404_v41  ;;  %v19343_v23 = vsel %vm25109_vm3, 1.0, %v25563_v32  ;;  %26068 = vst [vmem:[#allocation301_spill] sm:$0xff] %v19369_v12 }
 0x248   :  { %26058 = vst [vmem:[#allocation295_spill] sm:$0xff] %v19311_v60  ;;  %v19326_v47 = vsub.f32 %v19254_v38, %v26062_v35  ;;  %26063 = vst [vmem:[#allocation297_spill] sm:$0xff] %v19333_v1  ;;  %vm25116_vm15 = vcmp.eq.s32.totalorder %v16605_v20, %v19333_v1  ;;  %v19352_v54 = vsub.f32 %v19343_v23, %v19343_v23  ;;  %v26066_v38 = vand.u32 4294901760, %v19298_v27 }
 0x249   :  { %26064 = vst [vmem:[#allocation298_spill] sm:$0xff] %v19343_v23  ;;  %v10596_v44 = vsel %vm10340_vm7, %v10595_v10, %v19159_v48  ;;  %v19360_v41 = vsel %vm25116_vm15, 1.0, %v25563_v32  ;;  %vm5602_vm3 = vcmp.eq.s32.totalorder %v16605_v20, %v19369_v12 }
 0x24a   :  { %26065 = vst [vmem:[#allocation299_spill] sm:$0xff] %v19352_v54  ;;  %v1888_v45 = vsub.f32 %v19298_v27, %v26066_v38  ;;  %v19367_v35 = vsub.f32 %v19360_v41, %v19360_v41  ;;  %v19375_v48 = vsel %vm10347_vm8, %v26069_v46, %v10596_v44  ;;  %v10753_v38 = vrot.slane %v19369_v12, %v16695_v34  ;;  %v26071_v54 = vld [vmem:[#allocation19_spill] sm:$0xff]  ;;  %v19416_v10 = vpop.xlane.xlu0 %5560 }
 0x24b   :  { %v19383_v27 = vpop.xlane.xlu1 %5566  ;;  %v26072_v46 = vand.u32 4294901760, %v26071_v54  ;;  %v11603_v60 = vsel %vm5602_vm3, 1.0, %v25563_v32  ;;  %26076 = vst [vmem:[#allocation305_spill] sm:$0xff] %v19416_v10 }
 0x24c   :  { %26067 = vst [vmem:[#allocation300_spill] sm:$0xff] %v19367_v35  ;;  %26070 = vst [vmem:[#allocation302_spill] sm:$0xff] %v19383_v27  ;;  %v1889_v57 = vand.u32 4294901760, %v1888_v45  ;;  %vm25121_vm15 = vcmp.eq.s32.totalorder %v16605_v20, %v19383_v27  ;;  %v19401_v14 = vsub.f32 %v11603_v60, %v11603_v60  ;;  %v10120_v23 = vadd.f32 %v11603_v60, %v19224_v28 }
 0x24d   :  { %v19390_v44 = vsub.f32 %v15409_v7, %v26072_v46  ;;  %v10754_v7 = vsel %vm10340_vm7, %v10753_v38, %v19208_v59  ;;  %v19410_v54 = vsel %vm25121_vm15, 1.0, %v25563_v32  ;;  %v26077_v45 = vand.u32 4294901760, %v19106_v53 }
 0x24e   :  { %26074 = vst [vmem:[#allocation303_spill] sm:$0xff] %v19401_v14  ;;  %12878 = vmatprep.mubr.f32.mxu1 %v1889_v57  ;;  %v19414_v46 = vsub.f32 %v19410_v54, %v19410_v54  ;;  %v26078_v28 = vrot.slane %v19117_v6, %v16664_v5  ;;  %v26079_v60 = vand.u32 4294901760, %v19367_v35  ;;  %v26080_v57 = vand.u32 4294901760, %v19274_v37 }
 0x24f   :  { %26073 = vst [vmem:[#allocation19_spill] sm:$0xff] %v19390_v44  ;;  %12879 = vmatmul.mubr.f32.gmra.mrb[86].mxu1 %v26077_v45  ;;  %vm25141_vm15 = vcmp.eq.s32.totalorder %v16605_v20, %v19416_v10  ;;  %v10911_v53 = vrot.slane %v19416_v10, %v16695_v34  ;;  %v19438_v45 = vpop.xlane.xlu1 %5568  ;;  %v26087_v6 = vrot.slane %v19167_v51, %v16664_v5 }
 0x250   :  { %26075 = vst [vmem:[#allocation304_spill] sm:$0xff] %v19414_v46  ;;  %v19424_v59 = vsel %vm10347_vm8, %v26078_v28, %v10754_v7  ;;  %v19429_v38 = vsub.f32 %v19367_v35, %v26079_v60  ;;  %v6563_v12 = vsub.f32 %v19274_v37, %v26080_v57  ;;  %26081 = vst [vmem:[#allocation306_spill] sm:$0xff] %v19438_v45  ;;  %v19448_v60 = vsel %vm25141_vm15, 1.0, %v25563_v32  ;;  %v19474_v57 = vpop.xlane.xlu0 %1296 }
 0x251   :  { %v19442_v28 = vadd.f32 %v19144_v31, %v10120_v23  ;;  %vm25138_vm1 = vcmp.eq.s32.totalorder %v16605_v20, %v19438_v45  ;;  %v19457_v7 = vsub.f32 %v19448_v60, %v19448_v60  ;;  %v10912_v31 = vsel %vm10340_vm7, %v10911_v53, %v19262_v62  ;;  %26086 = vst [vmem:[#allocation310_spill] sm:$0xff] %v19474_v57 }
 0x252   :  { %v19465_v23 = vsel %vm25138_vm1, 1.0, %v25563_v32  ;;  %v26084_v35 = vand.u32 4294901760, %v19401_v14  ;;  %v19480_v62 = vsel %vm10347_vm8, %v26087_v6, %v10912_v31  ;;  %v6564_v53 = vand.u32 4294901760, %v6563_v12 }
 0x253   :  { %26082 = vst [vmem:[#allocation307_spill] sm:$0xff] %v19457_v7  ;;  %26083 = vst [vmem:[#allocation308_spill] sm:$0xff] %v19465_v23  ;;  %v19472_v34 = vsub.f32 %v19465_v23, %v19465_v23  ;;  %v26088_v37 = vand.u32 4294901760, %v19287_v55  ;;  %vm1400_vm7 = vcmp.eq.s32.totalorder %v16605_v20, %v19474_v57 }
 0x254   :  { %v6093_v10 = vsub.f32 %v19401_v14, %v26084_v35  ;;  %v10447_v35 = vrot.slane %v19474_v57, %v25762_v52  ;;  %v19489_v14 = vpop.xlane.xlu1 %1302  ;;  %v11349_v5 = vsel %vm1400_vm7, 1.0, %v25563_v32 }
 0x255   :  { %26085 = vst [vmem:[#allocation309_spill] sm:$0xff] %v19472_v34  ;;  %v2337_v46 = vsub.f32 %v19287_v55, %v26088_v37  ;;  %26089 = vst [vmem:[#allocation311_spill] sm:$0xff] %v19489_v14  ;;  %vm25164_vm8 = vcmp.eq.s32.totalorder %v16605_v20, %v19489_v14  ;;  %v26090_v37 = vand.u32 4294901760, %v19267_v16  ;;  %v19502_v31 = vsub.f32 %v11349_v5, %v11349_v5 }
 0x256   :  { %v6094_v34 = vand.u32 4294901760, %v6093_v10  ;;  %v5406_v10 = vadd.f32 %v11349_v5, %v19337_v36  ;;  %v10448_v23 = vsel %vm10354_vm14, %v10447_v35, %v19321_v24  ;;  %v19511_v51 = vsel %vm25164_vm8, 1.0, %v25563_v32 }
 0x257   :  { %v14593_v12 = vpack.c.bf16 %v6564_v53, %v26090_v37  ;;  %26091 = vst [vmem:[#allocation312_spill] sm:$0xff] %v19502_v31  ;;  %v19515_v6 = vsub.f32 %v19511_v51, %v19511_v51  ;;  %v26093_v16 = vand.u32 4294901760, %v19213_v21  ;;  %v19519_v53 = vpop.xlane.xlu0 %1360  ;;  %v26095_v36 = vrot.slane %v19220_v61, %v16688_v56 }
 0x258   :  { %13646 = vmatprep.mubr.f32.mxu0 %v6094_v34  ;;  %26094 = vst [vmem:[#allocation314_spill] sm:$0xff] %v19519_v53  ;;  %v2338_v35 = vand.u32 4294901760, %v2337_v46  ;;  %v26096_v5 = vand.u32 4294901760, %v19390_v44  ;;  %vm25157_vm1 = vcmp.eq.s32.totalorder %v16605_v20, %v19519_v53  ;;  %v10605_v21 = vrot.slane %v19519_v53, %v25762_v52  ;;  %v19534_v37 = vpop.xlane.xlu1 %1366 }
 0x259   :  { %26092 = vst [vmem:[#allocation313_spill] sm:$0xff] %v19515_v6  ;;  %13647 = vmatmul.mubr.f32.gmra.mrb[86].mxu0 %v26093_v16  ;;  %v19525_v24 = vsel %vm10361_vm0, %v26095_v36, %v10448_v23  ;;  %14594 = vmatprep.subr.bf16.mxu0 %v14593_v12  ;;  %26097 = vst [vmem:[#allocation315_spill] sm:$0xff] %v19534_v37  ;;  %v25149_v16 = vand.u32 4294901760, %v19502_v31  ;;  %v19538_v61 = vadd.f32 %v19247_v30, %v5406_v10 }
 0x25a   :  { %v2344_v34 = vsub.f32 %v19390_v44, %v26096_v5  ;;  %14596 = vmatpush3.bf16.msra.mxu0 %v14593_v12  ;;  %v19544_v46 = vsel %vm25157_vm1, 1.0, %v25563_v32  ;;  %vm25148_vm15 = vcmp.eq.s32.totalorder %v16605_v20, %v19534_v37  ;;  %v10606_v30 = vsel %vm10354_vm14, %v10605_v21, %v19375_v48 }
 0x25b   :  { %v19553_v5 = vsub.f32 %v19544_v46, %v19544_v46  ;;  %v19561_v12 = vsel %vm25148_vm15, 1.0, %v25563_v32  ;;  %v1908_v10 = vsub.f32 %v19502_v31, %v25149_v16  ;;  %v19570_v36 = vpop.xlane.xlu0 %5500  ;;  %v26101_v53 = vrot.slane %v19280_v17, %v16688_v56 }
 0x25c   :  { %v19568_v23 = vsub.f32 %v19561_v12, %v19561_v12  ;;  %26100 = vst [vmem:[#allocation318_spill] sm:$0xff] %v19570_v36  ;;  %v26102_v21 = vand.u32 4294901760, %v19515_v6  ;;  %v2345_v44 = vand.u32 4294901760, %v2344_v34  ;;  %vm5604_vm15 = vcmp.eq.s32.totalorder %v16605_v20, %v19570_v36  ;;  %v19587_v31 = vpop.xlane.xlu1 %5506 }
 0x25d   :  { %26098 = vst [vmem:[#allocation316_spill] sm:$0xff] %v19553_v5  ;;  %v19576_v48 = vsel %vm10361_vm0, %v26101_v53, %v10606_v30  ;;  %v10763_v16 = vrot.slane %v19570_v36, %v25762_v52  ;;  %26103 = vst [vmem:[#allocation319_spill] sm:$0xff] %v19587_v31  ;;  %v1909_v55 = vand.u32 4294901760, %v1908_v10  ;;  %v15410_v53 = vld [vmem:[%s24465_s2 + $0xc0] sm:$0xff]  ;;  %v26104_v30 = vld [vmem:[#allocation38_spill] sm:$0xff]  ;;  %v11605_v34 = vsel %vm5604_vm15, 1.0, %v25563_v32 }
 0x25e   :  { %26099 = vst [vmem:[#allocation317_spill] sm:$0xff] %v19568_v23  ;;  %v19581_v57 = vsub.f32 %v19515_v6, %v26102_v21  ;;  %v26105_v17 = vand.u32 4294901760, %v26104_v30  ;;  %vm25161_vm1 = vcmp.eq.s32.totalorder %v16605_v20, %v19587_v31  ;;  %v19605_v6 = vsub.f32 %v11605_v34, %v11605_v34 }
 0x25f   :  { %v10122_v7 = vadd.f32 %v11605_v34, %v19442_v28  ;;  %12881 = vmatprep.mubr.f32.mxu1 %v1909_v55  ;;  %v19620_v21 = vpop.xlane.xlu0 %5564  ;;  %v26110_v10 = vand.u32 4294901760, %v19326_v47  ;;  %v26111_v28 = vrot.slane %v19333_v1, %v16688_v56  ;;  %v26114_v34 = vrot.slane %v19383_v27, %v16688_v56 }
 0x260   :  { %v19594_v23 = vsub.f32 %v15410_v53, %v26105_v17  ;;  %26107 = vst [vmem:[#allocation320_spill] sm:$0xff] %v19605_v6  ;;  %v10764_v17 = vsel %vm10354_vm14, %v10763_v16, %v19424_v59  ;;  %v19614_v53 = vsel %vm25161_vm1, 1.0, %v25563_v32  ;;  %26109 = vst [vmem:[#allocation322_spill] sm:$0xff] %v19620_v21  ;;  %v14397_v16 = vpack.c.bf16 %v2345_v44, %v2338_v35  ;;  %v19635_v36 = vpop.xlane.xlu1 %5570 }
 0x261   :  { %v19618_v30 = vsub.f32 %v19614_v53, %v19614_v53  ;;  %12882 = vmatmul.mubr.f32.gmra.mrb[88].mxu1 %v26110_v10  ;;  %v19628_v59 = vsel %vm10361_vm0, %v26111_v28, %v10764_v17  ;;  %vm25188_vm1 = vcmp.eq.s32.totalorder %v16605_v20, %v19620_v21  ;;  %v10921_v55 = vrot.slane %v19620_v21, %v25762_v52 }
 0x262   :  { %26106 = vst [vmem:[#allocation38_spill] sm:$0xff] %v19594_v23  ;;  %26112 = vst [vmem:[#allocation323_spill] sm:$0xff] %v19635_v36  ;;  %v25171_v47 = vand.u32 4294901760, %v19605_v6  ;;  %v19639_v10 = vadd.f32 %v19360_v41, %v10122_v7  ;;  %v19645_v44 = vsel %vm25188_vm1, 1.0, %v25563_v32  ;;  %vm25174_vm8 = vcmp.eq.s32.totalorder %v16605_v20, %v19635_v36  ;;  %14398 = vmatprep.subr.bf16.mxu1 %v14397_v16 }
 0x263   :  { %26108 = vst [vmem:[#allocation321_spill] sm:$0xff] %v19618_v30  ;;  %v10936_v35 = vrot.slane %v19635_v36, %v25744_v63  ;;  %v19654_v17 = vsub.f32 %v19645_v44, %v19645_v44  ;;  %v10922_v41 = vsel %vm10354_vm14, %v10921_v55, %v19480_v62  ;;  %v19662_v7 = vsel %vm25174_vm8, 1.0, %v25563_v32  ;;  %14400 = vmatpush3.bf16.msra.mxu1 %v14397_v16  ;;  %v19675_v62 = vpop.xlane.xlu0 %1300 }
 0x264   :  { %v6113_v28 = vsub.f32 %v19605_v6, %v25171_v47  ;;  %v10927_v52 = vsel %vm10361_vm0, %v26114_v34, %v10922_v41  ;;  %v19673_v21 = vsub.f32 %v19662_v7, %v19662_v7  ;;  %26116 = vst [vmem:[#allocation326_spill] sm:$0xff] %v19675_v62  ;;  %v26117_v55 = vand.u32 4294901760, %v19618_v30  ;;  %v19695_v47 = vpop.xlane.xlu1 %5572 }
 0x265   :  { %26113 = vst [vmem:[#allocation324_spill] sm:$0xff] %v19654_v17  ;;  %v26118_v1 = vand.u32 4294901760, %v19594_v23  ;;  %v26119_v56 = vrot.slane %v19438_v45, %v25814_v40  ;;  %vm1402_vm0 = vcmp.eq.s32.totalorder %v16605_v20, %v19675_v62  ;;  %v10457_v41 = vrot.slane %v19675_v62, %v25814_v40  ;;  %26120 = vst [vmem:[#allocation327_spill] sm:$0xff] %v19695_v47 }
 0x266   :  { %26115 = vst [vmem:[#allocation325_spill] sm:$0xff] %v19673_v21  ;;  %v19680_v36 = vsub.f32 %v19618_v30, %v26117_v55  ;;  %v6114_v55 = vand.u32 4294901760, %v6113_v28  ;;  %vm26121_vm14 = vcmask 786112   ;;  %vm25181_vm8 = vcmp.eq.s32.totalorder %v16605_v20, %v19695_v47 }
 0x267   :  { %v19685_v16 = vsub.f32 %v19594_v23, %v26118_v1  ;;  %v10932_v34 = vsel %vm10368_vm4, %v26119_v56, %v10927_v52  ;;  %v11351_v1 = vsel %vm1402_vm0, 1.0, %v25563_v32  ;;  %v10941_v52 = vrot.slane %v19695_v47, %v25869_v33 }
 0x268   :  { %v10937_v30 = vsel %vm26121_vm14, %v10936_v35, %v10932_v34  ;;  %v19706_v56 = vsub.f32 %v11351_v1, %v11351_v1  ;;  %v5408_v6 = vadd.f32 %v11351_v1, %v19538_v61  ;;  %v10458_v28 = vsel %vm10368_vm4, %v10457_v41, %v19525_v24  ;;  %13649 = vmatprep.mubr.f32.mxu0 %v6114_v55  ;;  %v19726_v61 = vpop.xlane.xlu0 %1364 }
 0x269   :  { %v19715_v35 = vsel %vm25181_vm8, 1.0, %v25563_v32  ;;  %v19722_v45 = vsel %vm10382_vm13, %v10941_v52, %v10937_v30  ;;  %v26125_v27 = vand.u32 4294901760, %v19429_v38  ;;  %26126 = vst [vmem:[#allocation331_spill] sm:$0xff] %v19726_v61  ;;  %v26127_v24 = vrot.slane %v19489_v14, %v25744_v63  ;;  %v19737_v30 = vpop.xlane.xlu1 %1306 }
 0x26a   :  { %26122 = vst [vmem:[#allocation328_spill] sm:$0xff] %v19706_v56  ;;  %26123 = vst [vmem:[#allocation329_spill] sm:$0xff] %v19715_v35  ;;  %v19719_v34 = vsub.f32 %v19715_v35, %v19715_v35  ;;  %vm25196_vm8 = vcmp.eq.s32.totalorder %v16605_v20, %v19726_v61  ;;  %v10615_v55 = vrot.slane %v19726_v61, %v25814_v40  ;;  %v25197_v38 = vand.u32 4294901760, %v19706_v56 }
 0x26b   :  { %13650 = vmatmul.mubr.f32.gmra.mrb[88].mxu0 %v26125_v27  ;;  %v10463_v41 = vsel %vm26121_vm14, %v26127_v24, %v10458_v28  ;;  %26128 = vst [vmem:[#allocation332_spill] sm:$0xff] %v19737_v30  ;;  %v5409_v27 = vadd.f32 %v19511_v51, %v5408_v6  ;;  %v19745_v52 = vsel %vm25196_vm8, 1.0, %v25563_v32  ;;  %vm25216_vm14 = vcmp.eq.s32.totalorder %v16605_v20, %v19737_v30 }
 0x26c   :  { %26124 = vst [vmem:[#allocation330_spill] sm:$0xff] %v19719_v34  ;;  %v10472_v28 = vrot.slane %v19737_v30, %v25800_v15  ;;  %v19754_v1 = vsub.f32 %v19745_v52, %v19745_v52  ;;  %v10616_v51 = vsel %vm10368_vm4, %v10615_v55, %v19576_v48  ;;  %v11354_v6 = vsel %vm25216_vm14, 1.0, %v25563_v32  ;;  %v19767_v14 = vpop.xlane.xlu0 %5504  ;;  %v15411_v48 = vld [vmem:[%s24465_s2 + $0xc8] sm:$0xff]  ;;  %v26134_v55 = vld [vmem:[#allocation39_spill] sm:$0xff] }
 0x26d   :  { %v1928_v47 = vsub.f32 %v19706_v56, %v25197_v38  ;;  %v19765_v61 = vsub.f32 %v11354_v6, %v11354_v6  ;;  %26131 = vst [vmem:[#allocation335_spill] sm:$0xff] %v19767_v14  ;;  %v26132_v24 = vrot.slane %v19534_v37, %v25744_v63  ;;  %vm26133_vm1 = vcmask 786112   ;;  %v19785_v56 = vpop.xlane.xlu1 %1370 }
 0x26e   :  { %26129 = vst [vmem:[#allocation333_spill] sm:$0xff] %v19754_v1  ;;  %v26135_v30 = vand.u32 4294901760, %v26134_v55  ;;  %vm5606_vm8 = vcmp.eq.s32.totalorder %v16605_v20, %v19767_v14  ;;  %v10773_v38 = vrot.slane %v19767_v14, %v25814_v40  ;;  %26137 = vst [vmem:[#allocation336_spill] sm:$0xff] %v19785_v56  ;;  %v10630_v40 = vrot.slane %v19785_v56, %v25800_v15 }
 0x26f   :  { %26130 = vst [vmem:[#allocation334_spill] sm:$0xff] %v19765_v61  ;;  %v10621_v62 = vsel %vm26133_vm1, %v26132_v24, %v10616_v51  ;;  %v1929_v37 = vand.u32 4294901760, %v1928_v47  ;;  %v15412_v24 = vld [vmem:[%s24465_s2 + $0x30] sm:$0xff]  ;;  %v26138_v51 = vld [vmem:[#allocation24_spill] sm:$0xff]  ;;  %vm25205_vm1 = vcmp.eq.s32.totalorder %v16605_v20, %v19785_v56  ;;  %v26142_v47 = vand.u32 4294901760, %v19581_v57 }
 0x270   :  { %v19778_v23 = vsub.f32 %v15411_v48, %v26135_v30  ;;  %v26139_v21 = vand.u32 4294901760, %v26138_v51  ;;  %v11607_v30 = vsel %vm5606_vm8, 1.0, %v25563_v32  ;;  %v19820_v14 = vpop.xlane.xlu0 %1304 }
 0x271   :  { %v19803_v48 = vsub.f32 %v11607_v30, %v11607_v30  ;;  %v10124_v34 = vadd.f32 %v11607_v30, %v19639_v10  ;;  %12884 = vmatprep.mubr.f32.mxu1 %v1929_v37  ;;  %26143 = vst [vmem:[#allocation338_spill] sm:$0xff] %v19820_v14  ;;  %v26144_v10 = vrot.slane %v19587_v31, %v25744_v63 }
 0x272   :  { %26136 = vst [vmem:[#allocation39_spill] sm:$0xff] %v19778_v23  ;;  %v19792_v55 = vsub.f32 %v15412_v24, %v26139_v21  ;;  %v10774_v21 = vsel %vm10368_vm4, %v10773_v38, %v19628_v59  ;;  %v19812_v24 = vsel %vm25205_vm1, 1.0, %v25563_v32  ;;  %12885 = vmatmul.mubr.f32.gmra.mrb[90].mxu1 %v26142_v47  ;;  %vm26145_vm4 = vcmask 786112   ;;  %v19834_v47 = vpop.xlane.xlu1 %5510 }
 0x273   :  { %26140 = vst [vmem:[#allocation24_spill] sm:$0xff] %v19803_v48  ;;  %v19816_v51 = vsub.f32 %v19812_v24, %v19812_v24  ;;  %v10779_v59 = vsel %vm26145_vm4, %v26144_v10, %v10774_v21  ;;  %v26146_v38 = vand.u32 4294901760, %v19765_v61  ;;  %vm1404_vm1 = vcmp.eq.s32.totalorder %v16605_v20, %v19820_v14  ;;  %26147 = vst [vmem:[#allocation339_spill] sm:$0xff] %v19834_v47 }
 0x274   :  { %v10467_v57 = vrot.slane %v19820_v14, %v25869_v33  ;;  %v10125_v63 = vadd.f32 %v19614_v53, %v10124_v34  ;;  %v11353_v21 = vsel %vm1404_vm1, 1.0, %v25563_v32  ;;  %vm25219_vm4 = vcmp.eq.s32.totalorder %v16605_v20, %v19834_v47  ;;  %v19855_v56 = vpop.xlane.xlu0 %1368 }
 0x275   :  { %26141 = vst [vmem:[#allocation337_spill] sm:$0xff] %v19816_v51  ;;  %v1958_v30 = vsub.f32 %v19765_v61, %v26146_v38  ;;  %v10788_v10 = vrot.slane %v19834_v47, %v25800_v15  ;;  %v19846_v37 = vsub.f32 %v11353_v21, %v11353_v21  ;;  %v5410_v61 = vadd.f32 %v11353_v21, %v5409_v27 }
 0x276   :  { %v10468_v31 = vsel %vm10382_vm13, %v10467_v57, %v10463_v41  ;;  %v11610_v53 = vsel %vm25219_vm4, 1.0, %v25563_v32  ;;  %26150 = vst [vmem:[#allocation342_spill] sm:$0xff] %v19855_v56  ;;  %v26151_v14 = vand.u32 4294901760, %v19803_v48  ;;  %v26152_v35 = vand.u32 4294901760, %v19778_v23  ;;  %v19868_v57 = vpop.xlane.xlu1 %5574 }
 0x277   :  { %v1959_v38 = vand.u32 4294901760, %v1958_v30  ;;  %26148 = vst [vmem:[#allocation340_spill] sm:$0xff] %v19846_v37  ;;  %v19853_v34 = vsub.f32 %v11610_v53, %v11610_v53  ;;  %v10473_v30 = vsel %vm10389_vm11, %v10472_v28, %v10468_v31  ;;  %vm25231_vm14 = vcmp.eq.s32.totalorder %v16605_v20, %v19855_v56  ;;  %26153 = vst [vmem:[#allocation343_spill] sm:$0xff] %v19868_v57 }
 0x278   :  { %v6133_v51 = vsub.f32 %v19803_v48, %v26151_v14  ;;  %v6577_v27 = vsub.f32 %v19778_v23, %v26152_v35  ;;  %v10625_v41 = vrot.slane %v19855_v56, %v25869_v33  ;;  %v5411_v47 = vadd.f32 %v11354_v6, %v5410_v61  ;;  %v19901_v56 = vpop.xlane.xlu0 %5508 }
 0x279   :  { %26149 = vst [vmem:[#allocation341_spill] sm:$0xff] %v19853_v34  ;;  %v19875_v14 = vsel %vm25231_vm14, 1.0, %v25563_v32  ;;  %vm25226_vm4 = vcmp.eq.s32.totalorder %v16605_v20, %v19868_v57  ;;  %v10946_v31 = vrot.slane %v19868_v57, %v25800_v15  ;;  %v26154_v6 = vand.u32 4294901760, %v19846_v37  ;;  %26156 = vst [vmem:[#allocation345_spill] sm:$0xff] %v19901_v56 }
 0x27a   :  { %v6134_v35 = vand.u32 4294901760, %v6133_v51  ;;  %v19883_v28 = vsub.f32 %v19875_v14, %v19875_v14  ;;  %v10626_v21 = vsel %vm10382_vm13, %v10625_v41, %v10621_v62  ;;  %v19890_v61 = vsel %vm25226_vm4, 1.0, %v25563_v32 }
 0x27b   :  { %v1948_v48 = vsub.f32 %v19846_v37, %v26154_v6  ;;  %v19897_v15 = vsub.f32 %v19890_v61, %v19890_v61  ;;  %v10947_v51 = vsel %vm10389_vm11, %v10946_v31, %v19722_v45  ;;  %v10631_v62 = vsel %vm10389_vm11, %v10630_v40, %v10626_v21  ;;  %v19911_v37 = vpop.xlane.xlu1 %5576 }
 0x27c   :  { %13652 = vmatprep.mubr.f32.mxu0 %v6134_v35  ;;  %v25232_v41 = vand.u32 4294901760, %v19853_v34  ;;  %v26157_v57 = vand.u32 4294901760, %v19680_v36  ;;  %vm25372_vm4 = vcmp.eq.s32.totalorder %v16605_v20, %v19901_v56  ;;  %v10783_v6 = vrot.slane %v19901_v56, %v25869_v33  ;;  %26158 = vst [vmem:[#allocation346_spill] sm:$0xff] %v19911_v37 }
 0x27d   :  { %26155 = vst [vmem:[#allocation344_spill] sm:$0xff] %v19897_v15  ;;  %v1949_v23 = vand.u32 4294901760, %v1948_v48  ;;  %v6578_v45 = vand.u32 4294901760, %v6577_v27  ;;  %v11609_v40 = vsel %vm25372_vm4, 1.0, %v25563_v32  ;;  %vm25235_vm14 = vcmp.eq.s32.totalorder %v16605_v20, %v19911_v37 }
 0x27e   :  { %13653 = vmatmul.mubr.f32.gmra.mrb[90].mxu0 %v26157_v57  ;;  %v10951_v36 = vrot.slane %v19911_v37, %v25913_v58  ;;  %v6163_v57 = vsub.f32 %v19853_v34, %v25232_v41  ;;  %v19924_v33 = vsub.f32 %v11609_v40, %v11609_v40  ;;  %v10126_v21 = vadd.f32 %v11609_v40, %v10125_v63  ;;  %v19940_v41 = vpop.xlane.xlu0 %1308 }
 0x27f   :  { %v10784_v48 = vsel %vm10382_vm13, %v10783_v6, %v10779_v59  ;;  %v19931_v27 = vsel %vm25235_vm14, 1.0, %v25563_v32  ;;  %12887 = vmatprep.mubr.f32.mxu1 %v1949_v23  ;;  %26161 = vst [vmem:[#allocation349_spill] sm:$0xff] %v19940_v41  ;;  %vm1406_vm13 = vcmp.eq.s32.totalorder %v16605_v20, %v19940_v41  ;;  %v10477_v6 = vrot.slane %v19940_v41, %v25913_v58  ;;  %v19947_v23 = vpop.xlane.xlu1 %1310 }
 0x280   :  { %26159 = vst [vmem:[#allocation347_spill] sm:$0xff] %v19924_v33  ;;  %v19935_v31 = vsub.f32 %v19931_v27, %v19931_v27  ;;  %v19938_v35 = vsel %vm10396_vm12, %v10951_v36, %v10947_v51  ;;  %12888 = vmatmul.mubr.f32.gmra.mrb[92].mxu1 %v1959_v38  ;;  %v6164_v63 = vand.u32 4294901760, %v6163_v57  ;;  %v10789_v59 = vsel %vm10389_vm11, %v10788_v10, %v10784_v48 }
 0x281   :  { %26162 = vst [vmem:[#allocation350_spill] sm:$0xff] %v19947_v23  ;;  %v10127_v34 = vadd.f32 %v11610_v53, %v10126_v21  ;;  %v11355_v38 = vsel %vm1406_vm13, 1.0, %v25563_v32  ;;  %vm25242_vm14 = vcmp.eq.s32.totalorder %v16605_v20, %v19947_v23  ;;  %v10482_v10 = vrot.slane %v19947_v23, %v25856_v50 }
 0x282   :  { %26160 = vst [vmem:[#allocation348_spill] sm:$0xff] %v19935_v31  ;;  %v26163_v51 = vand.u32 4294901760, %v19685_v16  ;;  %v19960_v57 = vsub.f32 %v11355_v38, %v11355_v38  ;;  %v5412_v48 = vadd.f32 %v11355_v38, %v5411_v47  ;;  %v10478_v40 = vsel %vm10396_vm12, %v10477_v6, %v10473_v30  ;;  %v19970_v56 = vpop.xlane.xlu0 %1372 }
 0x283   :  { %v11356_v53 = vsel %vm25242_vm14, 1.0, %v25563_v32  ;;  %vm26166_vm11 = vcmask 1048512   ;;  %26167 = vst [vmem:[#allocation353_spill] sm:$0xff] %v19970_v56  ;;  %v26168_v41 = vand.u32 4294901760, %v19924_v33  ;;  %v26169_v47 = vand.u32 4294901760, %v17577_v29 }
 0x284   :  { %v14597_v36 = vpack.c.bf16 %v6578_v45, %v26163_v51  ;;  %26164 = vst [vmem:[#allocation351_spill] sm:$0xff] %v19960_v57  ;;  %v19967_v21 = vsub.f32 %v11356_v53, %v11356_v53  ;;  %v10483_v37 = vsel %vm26166_vm11, %v10482_v10, %v10478_v40  ;;  %v5413_v45 = vadd.f32 %v11356_v53, %v5412_v48  ;;  %v19984_v40 = vpop.xlane.xlu1 %1374  ;;  %v26171_v48 = vld [vmem:[#allocation92_spill] sm:$0xff] }
 0x285   :  { %v6153_v16 = vsub.f32 %v19924_v33, %v26168_v41  ;;  %v19978_v30 = vsub.f32 %v17577_v29, %v26169_v47  ;;  %vm25245_vm14 = vcmp.eq.s32.totalorder %v16605_v20, %v19970_v56  ;;  %v10635_v6 = vrot.slane %v19970_v56, %v25913_v58  ;;  %26170 = vst [vmem:[#allocation354_spill] sm:$0xff] %v19984_v40 }
 0x286   :  { %26165 = vst [vmem:[#allocation352_spill] sm:$0xff] %v19967_v21  ;;  %14598 = vmatprep.subr.bf16.mxu0 %v14597_v36  ;;  %v19991_v41 = vsel %vm25245_vm14, 1.0, %v25563_v32  ;;  %vm25250_vm11 = vcmp.eq.s32.totalorder %v16605_v20, %v19984_v40  ;;  %v10640_v10 = vrot.slane %v19984_v40, %v25856_v50  ;;  %v5414_v53 = vadd.f32 %v26171_v48, %v5413_v45  ;;  %v20014_v45 = vpop.xlane.xlu0 %5512 }
 0x287   :  { %14600 = vmatpush3.bf16.msra.mxu0 %v14597_v36  ;;  %v6154_v51 = vand.u32 4294901760, %v6153_v16  ;;  %v20000_v47 = vsub.f32 %v19991_v41, %v19991_v41  ;;  %v10636_v36 = vsel %vm10396_vm12, %v10635_v6, %v10631_v62  ;;  %v20007_v38 = vsel %vm25250_vm11, 1.0, %v25563_v32  ;;  %26175 = vst [vmem:[#allocation356_spill] sm:$0xff] %v20014_v45  ;;  %v26177_v6 = vld [vmem:[#allocation91_spill] sm:$0xff] }
 0x288   :  { %v20011_v29 = vsub.f32 %v20007_v38, %v20007_v38  ;;  %vm26174_vm14 = vcmask 1048512   ;;  %v26176_v48 = vand.u32 4294901760, %v19960_v57  ;;  %v5415_v56 = vadd.f32 %v26177_v6, %v5414_v53  ;;  %v20025_v23 = vpop.xlane.xlu1 %5514 }
 0x289   :  { %26172 = vst [vmem:[#allocation92_spill] sm:$0xff] %v20000_v47  ;;  %v10641_v16 = vsel %vm26174_vm14, %v10640_v10, %v10636_v36  ;;  %13655 = vmatprep.mubr.f32.mxu0 %v6154_v51  ;;  %vm25255_vm11 = vcmp.eq.s32.totalorder %v16605_v20, %v20014_v45  ;;  %v10793_v40 = vrot.slane %v20014_v45, %v25913_v58  ;;  %26178 = vst [vmem:[#allocation91_spill] sm:$0xff] %v20025_v23 }
 0x28a   :  { %26173 = vst [vmem:[#allocation355_spill] sm:$0xff] %v20011_v29  ;;  %v1968_v33 = vsub.f32 %v19960_v57, %v26176_v48  ;;  %13656 = vmatmul.mubr.f32.gmra.mrb[92].mxu0 %v6164_v63  ;;  %v11611_v51 = vsel %vm25255_vm11, 1.0, %v25563_v32  ;;  %vm25365_vm14 = vcmp.eq.s32.totalorder %v16605_v20, %v20025_v23  ;;  %v10798_v63 = vrot.slane %v20025_v23, %v25856_v50 }
 0x28b   :  { %v5416_v36 = vadd.f32 %v17132_v13, %v5415_v56  ;;  %v20037_v48 = vsub.f32 %v11611_v51, %v11611_v51  ;;  %v10128_v58 = vadd.f32 %v11611_v51, %v10127_v34  ;;  %v10794_v6 = vsel %vm10396_vm12, %v10793_v40, %v10789_v59  ;;  %v26182_v13 = vld [vmem:[#allocation111_spill] sm:$0xff] }
 0x28c   :  { %v1969_v53 = vand.u32 4294901760, %v1968_v33  ;;  %v11612_v10 = vsel %vm25365_vm14, 1.0, %v25563_v32  ;;  %vm26180_vm11 = vcmask 1048512   ;;  %v26181_v57 = vand.u32 4294901760, %v19967_v21  ;;  %v20053_v40 = vpop.xlane.xlu1 %5578 }
 0x28d   :  { %26179 = vst [vmem:[#allocation357_spill] sm:$0xff] %v20037_v48  ;;  %v10799_v62 = vsel %vm26180_vm11, %v10798_v63, %v10794_v6  ;;  %v25265_v33 = vand.u32 4294901760, %v19792_v55  ;;  %v5417_v56 = vadd.f32 %v26182_v13, %v5416_v36  ;;  %v20050_v31 = vsub.f32 %v11612_v10, %v11612_v10  ;;  %26184 = vst [vmem:[#allocation358_spill] sm:$0xff] %v20053_v40 }
 0x28e   :  { %12890 = vmatprep.mubr.f32.mxu1 %v1969_v53  ;;  %v1978_v45 = vsub.f32 %v19967_v21, %v26181_v57  ;;  %v10129_v34 = vadd.f32 %v11612_v10, %v10128_v58  ;;  %v10960_v59 = vsel %vm10958_vm6, %v10483_v37, %v10799_v62  ;;  %vm25363_vm12 = vcmp.eq.s32.totalorder %v16605_v20, %v20053_v40  ;;  %v26185_v53 = vld [vmem:[#allocation105_spill] sm:$0xff] }
 0x28f   :  { %26183 = vst [vmem:[#allocation111_spill] sm:$0xff] %v20050_v31  ;;  %v10963_v51 = vcombine.low %v18905_v26, %v10960_v59  ;;  %v10956_v57 = vrot.slane %v20053_v40, %v25856_v50  ;;  %v5418_v63 = vadd.f32 %v17340_v3, %v5417_v56  ;;  %v20066_v37 = vsel %vm25363_vm12, 1.0, %v25563_v32  ;;  %v26186_v58 = vld [vmem:[#allocation97_spill] sm:$0xff]  ;;  %v26187_v56 = vld [vmem:[#allocation104_spill] sm:$0xff]  ;;  %v26195_v32 = vld [vmem:[#allocation146_spill] sm:$0xff] }
 0x290   :  { %v1979_v23 = vand.u32 4294901760, %v1978_v45  ;;  %v10130_v36 = vadd.f32 %v26185_v53, %v10129_v34  ;;  %v25264_v62 = vand.u32 4294901760, %v20037_v48  ;;  %v20072_v45 = vsub.f32 %v20066_v37, %v20066_v37 }
 0x291   :  { %v10971_v26 = vrot.slane %v10963_v51, %v19055_v18  ;;  %v10957_v3 = vsel %vm26180_vm11, %v10956_v57, %v19938_v35  ;;  %v25263_v50 = vand.u32 4294901760, %v20050_v31  ;;  %v5419_v10 = vadd.f32 %v17138_v25, %v5418_v63  ;;  %v26189_v51 = vld [vmem:[#allocation25_spill] sm:$0xff] }
 0x292   :  { %12891 = vmatmul.mubr.f32.gmra.mrb[94].mxu1 %v1979_v23  ;;  %v10131_v6 = vadd.f32 %v26186_v58, %v10130_v36  ;;  %v10962_v13 = vsel %vm10958_vm6, %v10641_v16, %v10957_v3  ;;  %v26188_v34 = vand.u32 4294901760, %v26187_v56  ;;  %v6173_v23 = vsub.f32 %v20037_v48, %v25264_v62  ;;  %v15413_v16 = vld [vmem:[%s24465_s2 + $0x38] sm:$0xff]  ;;  %v26235_v48 = vld [vmem:[#allocation168_spill] sm:$0xff] }
 0x293   :  { %v10964_v59 = vcombine.low %v18960_v2, %v10962_v13  ;;  %v6183_v35 = vsub.f32 %v20050_v31, %v25263_v50  ;;  %v2351_v25 = vsub.f32 %v19792_v55, %v25265_v33  ;;  %v26190_v57 = vand.u32 4294901760, %v26189_v51  ;;  %v26192_v3 = vld [vmem:[#allocation138_spill] sm:$0xff]  ;;  %v26197_v31 = vld [vmem:[#allocation136_spill] sm:$0xff] }
 0x294   :  { %12893 = vmatprep.mubr.f32.mxu1 %v26188_v34  ;;  %v5420_v53 = vadd.f32 %v17616_v42, %v5419_v10  ;;  %v10132_v2 = vadd.f32 %v17188_v0, %v10131_v6  ;;  %v6174_v36 = vand.u32 4294901760, %v6173_v23  ;;  %v25270_v58 = vand.u32 4294901760, %v26192_v3  ;;  %v26193_v56 = vld [vmem:[#allocation110_spill] sm:$0xff] }
 0x295   :  { %v20097_v63 = vsub.f32 %v15413_v16, %v26190_v57  ;;  %v10978_v13 = vrot.slane %v10964_v59, %v19055_v18  ;;  %v26194_v34 = vand.u32 4294901760, %v26193_v56  ;;  %v6184_v50 = vand.u32 4294901760, %v6183_v35  ;;  %v26196_v16 = vld [vmem:[#allocation123_spill] sm:$0xff]  ;;  %v26199_v18 = vld [vmem:[#allocation198_spill] sm:$0xff]  ;;  %v26201_v35 = vld [vmem:[#allocation185_spill] sm:$0xff] }
 0x296   :  { %v2352_v62 = vand.u32 4294901760, %v2351_v25  ;;  %v5421_v51 = vadd.f32 %v26195_v32, %v5420_v53  ;;  %v10133_v57 = vadd.f32 %v26196_v16, %v10132_v2  ;;  %v26198_v42 = vand.u32 4294901760, %v26197_v31  ;;  %13658 = vmatprep.mubr.f32.mxu0 %v6174_v36  ;;  %v26200_v32 = vld [vmem:[#allocation182_spill] sm:$0xff]  ;;  %v26203_v2 = vld [vmem:[#allocation156_spill] sm:$0xff]  ;;  %v26204_v56 = vld [vmem:[#allocation121_spill] sm:$0xff] }
 0x297   :  { %26191 = vst [vmem:[#allocation105_spill] sm:$0xff] %v20097_v63  ;;  %12894 = vmatmul.mubr.f32.gmra.mrb[96].mxu1 %v26194_v34  ;;  %v25271_v33 = vand.u32 4294901760, %v20097_v63  ;;  %v20113_v0 = vsub.f32 %v26192_v3, %v25270_v58  ;;  %v25269_v10 = vand.u32 4294901760, %v26199_v18  ;;  %v10979_v6 = vcombine.low %v10971_v26, %v10978_v13  ;;  %13659 = vmatmul.mubr.f32.gmra.mrb[94].mxu0 %v6184_v50  ;;  %v26202_v31 = vld [vmem:[#allocation186_spill] sm:$0xff] }
 0x298   :  { %12896 = vmatprep.mubr.f32.mxu1 %v26198_v42  ;;  %v25272_v59 = vand.u32 4294901760, %v26200_v32  ;;  %v25275_v25 = vand.u32 4294901760, %v26201_v35  ;;  %v5422_v53 = vadd.f32 %v26202_v31, %v5421_v51  ;;  %v10134_v36 = vadd.f32 %v26203_v2, %v10133_v57  ;;  %v26206_v50 = vld [vmem:[#allocation130_spill] sm:$0xff]  ;;  %v26209_v2 = vld [vmem:[#allocation169_spill] sm:$0xff] }
 0x299   :  { %v2358_v23 = vsub.f32 %v20097_v63, %v25271_v33  ;;  %v26205_v34 = vand.u32 4294901760, %v26204_v56  ;;  %v6244_v16 = vand.u32 4294901760, %v20113_v0  ;;  %v20129_v26 = vsub.f32 %v26199_v18, %v25269_v10  ;;  %10980 = vst [vmem:[%s24468_s5] sm:$0xff] %v10979_v6  ;;  %v26208_v0 = vld [vmem:[#allocation159_spill] sm:$0xff]  ;;  %v26211_v6 = vld [vmem:[#allocation162_spill] sm:$0xff]  ;;  %v26214_v33 = vld [vmem:[#allocation116_spill] sm:$0xff] }
 0x29a   :  { %v26207_v13 = vand.u32 4294901760, %v26206_v50  ;;  %v6253_v57 = vsub.f32 %v26200_v32, %v25272_v59  ;;  %v20142_v42 = vsub.f32 %v26201_v35, %v25275_v25  ;;  %v25278_v31 = vand.u32 4294901760, %v26208_v0  ;;  %v26213_v50 = vld [vmem:[#allocation209_spill] sm:$0xff]  ;;  %v26251_v63 = vld [vmem:[#allocation207_spill] sm:$0xff] }
 0x29b   :  { %13661 = vmatprep.mubr.f32.mxu0 %v26205_v34  ;;  %v2359_v51 = vand.u32 4294901760, %v2358_v23  ;;  %v5423_v56 = vadd.f32 %v26209_v2, %v5422_v53  ;;  %v26210_v34 = vld [vmem:[#allocation135_spill] sm:$0xff]  ;;  %v26212_v58 = vand.u32 4294901760, %v26211_v6  ;;  %v26215_v59 = vand.u32 4294901760, %v26214_v33  ;;  %v26216_v2 = vld [vmem:[#allocation197_spill] sm:$0xff] }
 0x29c   :  { %12897 = vmatmul.mubr.f32.gmra.mrb[98].mxu1 %v26207_v13  ;;  %v10135_v10 = vadd.f32 %v26210_v34, %v10134_v36  ;;  %v25277_v13 = vand.u32 4294901760, %v26213_v50  ;;  %v6254_v32 = vand.u32 4294901760, %v6253_v57  ;;  %v6263_v53 = vsub.f32 %v26208_v0, %v25278_v31  ;;  %v26217_v34 = vld [vmem:[#allocation86_spill] sm:$0xff]  ;;  %v26230_v23 = vld [vmem:[#allocation87_spill] sm:$0xff] }
 0x29d   :  { %12899 = vmatprep.mubr.f32.mxu1 %v26212_v58  ;;  %13662 = vmatmul.mubr.f32.gmra.mrb[96].mxu0 %v26215_v59  ;;  %v14401_v18 = vpack.c.bf16 %v2359_v51, %v2352_v62  ;;  %v5424_v36 = vadd.f32 %v26216_v2, %v5423_v56  ;;  %v26218_v58 = vld [vmem:[#allocation151_spill] sm:$0xff]  ;;  %v26220_v62 = vld [vmem:[#allocation192_spill] sm:$0xff]  ;;  %v26221_v51 = vld [vmem:[#allocation141_spill] sm:$0xff] }
 0x29e   :  { %v10136_v6 = vadd.f32 %v26217_v34, %v10135_v10  ;;  %v26219_v35 = vand.u32 4294901760, %v26218_v58  ;;  %v20164_v33 = vsub.f32 %v26213_v50, %v25277_v13  ;;  %v26222_v57 = vand.u32 4294901760, %v26221_v51  ;;  %v15414_v56 = vld [vmem:[%s24465_s2 + $0xd0] sm:$0xff]  ;;  %v26223_v10 = vld [vmem:[#allocation44_spill] sm:$0xff] }
 0x29f   :  { %14402 = vmatprep.subr.bf16.mxu1 %v14401_v18  ;;  %v6264_v25 = vand.u32 4294901760, %v6263_v53  ;;  %v26224_v2 = vand.u32 4294901760, %v26223_v10  ;;  %v26226_v58 = vld [vmem:[#allocation45_spill] sm:$0xff]  ;;  %v26229_v51 = vld [vmem:[#allocation196_spill] sm:$0xff]  ;;  %v5425_v53 = vadd.f32 %v26230_v23, %v5424_v36  ;;  %v26232_v0 = vld [vmem:[#allocation194_spill] sm:$0xff]  ;;  %v26234_v10 = vand.u32 4294901760, %v26220_v62 }
 0x2a0   :  { %13664 = vmatprep.mubr.f32.mxu0 %v26219_v35  ;;  %12900 = vmatmul.mubr.f32.gmra.mrb[100].mxu1 %v26222_v57  ;;  %v15415_v35 = vld [vmem:[%s24465_s2 + $0xd8] sm:$0xff]  ;;  %v26227_v13 = vand.u32 4294901760, %v26226_v58  ;;  %v25285_v57 = vand.u32 4294901760, %v26229_v51  ;;  %v26231_v59 = vld [vmem:[#allocation157_spill] sm:$0xff]  ;;  %v26233_v3 = vand.u32 4294901760, %v26232_v0  ;;  %v26236_v58 = vand.u32 4294901760, %v26235_v48 }
 0x2a1   :  { %v20174_v34 = vsub.f32 %v15414_v56, %v26224_v2  ;;  %v10137_v50 = vadd.f32 %v26231_v59, %v10136_v6  ;;  %14404 = vmatpush3.bf16.msra.mxu1 %v14401_v18  ;;  %v2109_v56 = vand.u32 4294901760, %v20164_v33  ;;  %v6273_v2 = vsub.f32 %v26220_v62, %v26234_v10  ;;  %v26238_v0 = vld [vmem:[#allocation208_spill] sm:$0xff]  ;;  %v26239_v6 = vld [vmem:[#allocation59_spill] sm:$0xff]  ;;  %v26241_v10 = vld [vmem:[#allocation226_spill] sm:$0xff] }
 0x2a2   :  { %v20181_v31 = vsub.f32 %v15415_v35, %v26227_v13  ;;  %12902 = vmatprep.mubr.f32.mxu1 %v26233_v3  ;;  %13665 = vmatmul.mubr.f32.gmra.mrb[98].mxu0 %v26236_v58  ;;  %v20199_v23 = vsub.f32 %v26229_v51, %v25285_v57  ;;  %v26237_v3 = vld [vmem:[#allocation180_spill] sm:$0xff]  ;;  %v5426_v36 = vadd.f32 %v26238_v0, %v5425_v53  ;;  %v26240_v59 = vand.u32 4294901760, %v19067_v4  ;;  %v26242_v13 = vld [vmem:[#allocation167_spill] sm:$0xff] }
 0x2a3   :  { %26225 = vst [vmem:[#allocation97_spill] sm:$0xff] %v20174_v34  ;;  %v10138_v33 = vadd.f32 %v26239_v6, %v10137_v50  ;;  %v6274_v48 = vand.u32 4294901760, %v6273_v2  ;;  %v25294_v58 = vand.u32 4294901760, %v26241_v10  ;;  %v26243_v62 = vand.u32 4294901760, %v26242_v13  ;;  %v26247_v2 = vld [vmem:[#allocation64_spill] sm:$0xff]  ;;  %v26248_v6 = vld [vmem:[#allocation178_spill] sm:$0xff] }
 0x2a4   :  { %26228 = vst [vmem:[#allocation104_spill] sm:$0xff] %v20181_v31  ;;  %13667 = vmatprep.mubr.f32.mxu0 %v26240_v59  ;;  %v26244_v35 = vand.u32 4294901760, %v20174_v34  ;;  %v26245_v51 = vand.u32 4294901760, %v20181_v31  ;;  %v2119_v53 = vand.u32 4294901760, %v20199_v23  ;;  %v26246_v50 = vand.u32 4294901760, %v26237_v3 }
 0x2a5   :  { %12903 = vmatmul.mubr.f32.gmra.mrb[102].mxu1 %v26243_v62  ;;  %v5427_v0 = vadd.f32 %v26247_v2, %v5426_v36  ;;  %v10139_v59 = vadd.f32 %v26248_v6, %v10138_v33  ;;  %v26249_v62 = vand.u32 4294901760, %v19111_v43  ;;  %v20226_v13 = vsub.f32 %v26241_v10, %v25294_v58  ;;  %v26253_v2 = vld [vmem:[#allocation95_spill] sm:$0xff]  ;;  %v26260_v10 = vld [vmem:[#allocation217_spill] sm:$0xff] }
 0x2a6   :  { %v6584_v57 = vsub.f32 %v20174_v34, %v26244_v35  ;;  %v6591_v18 = vsub.f32 %v20181_v31, %v26245_v51  ;;  %v6283_v4 = vsub.f32 %v26237_v3, %v26246_v50  ;;  %v26250_v35 = vld [vmem:[#allocation204_spill] sm:$0xff]  ;;  %13668 = vmatmul.mubr.f32.gmra.mrb[100].mxu0 %v6244_v16  ;;  %v25297_v50 = vand.u32 4294901760, %v26251_v63  ;;  %v26252_v3 = vld [vmem:[#allocation225_spill] sm:$0xff] }
 0x2a7   :  { %12905 = vmatprep.mubr.f32.mxu1 %v26249_v62  ;;  %v25295_v51 = vand.u32 4294901760, %v26250_v35  ;;  %v5428_v36 = vadd.f32 %v26252_v3, %v5427_v0  ;;  %v10140_v33 = vadd.f32 %v26253_v2, %v10139_v59  ;;  %13670 = vmatprep.mubr.f32.mxu0 %v6254_v32  ;;  %v2129_v43 = vand.u32 4294901760, %v20226_v13  ;;  %v26256_v3 = vld [vmem:[#allocation245_spill] sm:$0xff]  ;;  %v26257_v59 = vld [vmem:[#allocation99_spill] sm:$0xff] }
 0x2a8   :  { %v6585_v23 = vand.u32 4294901760, %v6584_v57  ;;  %v6592_v21 = vand.u32 4294901760, %v6591_v18  ;;  %v6284_v40 = vand.u32 4294901760, %v6283_v4  ;;  %v26254_v62 = vand.u32 4294901760, %v19978_v30  ;;  %v26255_v18 = vld [vmem:[#allocation191_spill] sm:$0xff]  ;;  %v26258_v2 = vld [vmem:[#allocation189_spill] sm:$0xff] }
 0x2a9   :  { %v6293_v6 = vsub.f32 %v26250_v35, %v25295_v51  ;;  %v2138_v57 = vsub.f32 %v26251_v63, %v25297_v50  ;;  %v25298_v4 = vand.u32 4294901760, %v26255_v18  ;;  %v25300_v0 = vand.u32 4294901760, %v26256_v3 }
 0x2aa   :  { %12906 = vmatmul.mubr.f32.gmra.mrb[104].mxu1 %v26254_v62  ;;  %v14601_v16 = vpack.c.bf16 %v6592_v21, %v6585_v23  ;;  %v5429_v32 = vadd.f32 %v26257_v59, %v5428_v36  ;;  %v10141_v13 = vadd.f32 %v26258_v2, %v10140_v33  ;;  %v26259_v58 = vand.u32 4294901760, %v20129_v26  ;;  %13671 = vmatmul.mubr.f32.gmra.mrb[102].mxu0 %v6264_v25  ;;  %v26261_v36 = vld [vmem:[#allocation222_spill] sm:$0xff]  ;;  %v26262_v33 = vld [vmem:[#allocation244_spill] sm:$0xff] }
 0x2ab   :  { %v6294_v51 = vand.u32 4294901760, %v6293_v6  ;;  %v25301_v30 = vand.u32 4294901760, %v26260_v10  ;;  %v2139_v21 = vand.u32 4294901760, %v2138_v57  ;;  %v6303_v23 = vsub.f32 %v26255_v18, %v25298_v4  ;;  %v26263_v26 = vld [vmem:[#allocation84_spill] sm:$0xff]  ;;  %13673 = vmatprep.mubr.f32.mxu0 %v6274_v48  ;;  %v26264_v6 = vld [vmem:[#allocation202_spill] sm:$0xff] }
 0x2ac   :  { %12908 = vmatprep.mubr.f32.mxu1 %v26259_v58  ;;  %14602 = vmatprep.subr.bf16.mxu0 %v14601_v16  ;;  %v2148_v62 = vsub.f32 %v26256_v3, %v25300_v0  ;;  %v25302_v59 = vand.u32 4294901760, %v26261_v36  ;;  %v5430_v2 = vadd.f32 %v26262_v33, %v5429_v32  ;;  %v10142_v58 = vadd.f32 %v26263_v26, %v10141_v13  ;;  %v15416_v48 = vld [vmem:[%s24465_s2 + $0x40] sm:$0xff] }
 0x2ad   :  { %14604 = vmatpush3.bf16.msra.mxu0 %v14601_v16  ;;  %v6313_v25 = vsub.f32 %v26260_v10, %v25301_v30  ;;  %v26265_v50 = vand.u32 4294901760, %v20142_v42  ;;  %v6304_v4 = vand.u32 4294901760, %v6303_v23  ;;  %v26266_v16 = vld [vmem:[#allocation30_spill] sm:$0xff]  ;;  %v26269_v33 = vld [vmem:[#allocation100_spill] sm:$0xff]  ;;  %v26271_v23 = vld [vmem:[#allocation31_spill] sm:$0xff] }
 0x2ae   :  { %v2149_v63 = vand.u32 4294901760, %v2148_v62  ;;  %v2158_v0 = vsub.f32 %v26261_v36, %v25302_v59  ;;  %v26267_v32 = vand.u32 4294901760, %v26266_v16  ;;  %v5431_v26 = vadd.f32 %v26269_v33, %v5430_v2  ;;  %v26270_v30 = vld [vmem:[#allocation200_spill] sm:$0xff]  ;;  %13674 = vmatmul.mubr.f32.gmra.mrb[104].mxu0 %v6284_v40 }
 0x2af   :  { %12909 = vmatmul.mubr.f32.gmra.mrb[106].mxu1 %v26265_v50  ;;  %v10143_v57 = vadd.f32 %v26270_v30, %v10142_v58  ;;  %v6314_v42 = vand.u32 4294901760, %v6313_v25  ;;  %v15417_v50 = vld [vmem:[%s24465_s2 + $0x48] sm:$0xff]  ;;  %v26272_v62 = vand.u32 4294901760, %v26271_v23  ;;  %v25305_v30 = vand.u32 4294901760, %v18932_v22  ;;  %v26275_v58 = vld [vmem:[#allocation235_spill] sm:$0xff]  ;;  %13676 = vmatprep.mubr.f32.mxu0 %v6294_v51 }
 0x2b0   :  { %v20271_v13 = vsub.f32 %v15416_v48, %v26267_v32  ;;  %12911 = vmatprep.mubr.f32.mxu1 %v2109_v56  ;;  %v2159_v36 = vand.u32 4294901760, %v2158_v0  ;;  %v26274_v48 = vand.u32 4294901760, %v26264_v6  ;;  %v5432_v56 = vadd.f32 %v18923_v49, %v5431_v26  ;;  %v26276_v33 = vld [vmem:[#allocation236_spill] sm:$0xff]  ;;  %v26278_v49 = vld [vmem:[#allocation83_spill] sm:$0xff] }
 0x2b1   :  { %v20280_v59 = vsub.f32 %v15417_v50, %v26272_v62  ;;  %v10144_v25 = vadd.f32 %v26275_v58, %v10143_v57  ;;  %v25310_v50 = vand.u32 4294901760, %v26276_v33  ;;  %v2168_v23 = vsub.f32 %v18932_v22, %v25305_v30  ;;  %v26277_v62 = vld [vmem:[#allocation241_spill] sm:$0xff]  ;;  %v26279_v57 = vld [vmem:[#allocation212_spill] sm:$0xff]  ;;  %v26280_v22 = vld [vmem:[#allocation214_spill] sm:$0xff] }
 0x2b2   :  { %26268 = vst [vmem:[#allocation25_spill] sm:$0xff] %v20271_v13  ;;  %v25304_v16 = vand.u32 4294901760, %v20271_v13  ;;  %v6323_v2 = vsub.f32 %v26264_v6, %v26274_v48  ;;  %v25309_v48 = vand.u32 4294901760, %v26277_v62  ;;  %v5433_v26 = vadd.f32 %v26278_v49, %v5432_v56  ;;  %13677 = vmatmul.mubr.f32.gmra.mrb[106].mxu0 %v6304_v4 }
 0x2b3   :  { %26273 = vst [vmem:[#allocation110_spill] sm:$0xff] %v20280_v59  ;;  %v25308_v32 = vand.u32 4294901760, %v20280_v59  ;;  %12912 = vmatmul.mubr.f32.gmra.mrb[108].mxu1 %v2119_v53  ;;  %v10145_v51 = vadd.f32 %v26279_v57, %v10144_v25  ;;  %v6333_v58 = vsub.f32 %v26276_v33, %v25310_v50  ;;  %v25314_v56 = vand.u32 4294901760, %v26280_v22  ;;  %13679 = vmatprep.mubr.f32.mxu0 %v6314_v42  ;;  %v26281_v50 = vld [vmem:[#allocation230_spill] sm:$0xff] }
 0x2b4   :  { %v2365_v40 = vsub.f32 %v20271_v13, %v25304_v16  ;;  %v6324_v0 = vand.u32 4294901760, %v6323_v2  ;;  %12914 = vmatprep.mubr.f32.mxu1 %v2129_v43  ;;  %v2169_v16 = vand.u32 4294901760, %v2168_v23  ;;  %v2178_v30 = vsub.f32 %v26277_v62, %v25309_v48 }
 0x2b5   :  { %v2372_v53 = vsub.f32 %v20280_v59, %v25308_v32  ;;  %v5434_v25 = vadd.f32 %v19127_v11, %v5433_v26  ;;  %v10146_v43 = vadd.f32 %v18828_v9, %v10145_v51  ;;  %v6334_v57 = vand.u32 4294901760, %v6333_v58  ;;  %v15418_v9 = vld [vmem:[%s24465_s2 + $0xe0] sm:$0xff] }
 0x2b6   :  { %v2366_v2 = vand.u32 4294901760, %v2365_v40  ;;  %v2179_v32 = vand.u32 4294901760, %v2178_v30  ;;  %v6343_v4 = vsub.f32 %v26280_v22, %v25314_v56  ;;  %v25312_v40 = vand.u32 4294901760, %v19136_v39  ;;  %13680 = vmatmul.mubr.f32.gmra.mrb[108].mxu0 %v6324_v0  ;;  %v26289_v0 = vld [vmem:[#allocation270_spill] sm:$0xff] }
 0x2b7   :  { %v2373_v49 = vand.u32 4294901760, %v2372_v53  ;;  %12915 = vmatmul.mubr.f32.gmra.mrb[110].mxu1 %v2139_v21  ;;  %v25313_v23 = vand.u32 4294901760, %v18840_v19  ;;  %v5435_v48 = vadd.f32 %v18878_v8, %v5434_v25  ;;  %v10147_v62 = vadd.f32 %v26281_v50, %v10146_v43  ;;  %v26282_v21 = vld [vmem:[#allocation50_spill] sm:$0xff]  ;;  %v26285_v50 = vld [vmem:[#allocation51_spill] sm:$0xff]  ;;  %13682 = vmatprep.mubr.f32.mxu0 %v6334_v57 }
 0x2b8   :  { %12917 = vmatprep.mubr.f32.mxu1 %v2149_v63  ;;  %v26283_v42 = vand.u32 4294901760, %v26282_v21  ;;  %v6344_v26 = vand.u32 4294901760, %v6343_v4  ;;  %v2188_v51 = vsub.f32 %v19136_v39, %v25312_v40  ;;  %v15419_v63 = vld [vmem:[%s24465_s2 + $0xe8] sm:$0xff]  ;;  %v26286_v53 = vand.u32 4294901760, %v26285_v50  ;;  %v26290_v4 = vld [vmem:[#allocation258_spill] sm:$0xff]  ;;  %v26292_v50 = vld [vmem:[#allocation275_spill] sm:$0xff] }
 0x2b9   :  { %v14405_v11 = vpack.c.bf16 %v2373_v49, %v2366_v2  ;;  %v6353_v8 = vsub.f32 %v18840_v19, %v25313_v23  ;;  %v26288_v2 = vld [vmem:[#allocation298_spill] sm:$0xff]  ;;  %v10148_v43 = vadd.f32 %v26289_v0, %v10147_v62  ;;  %v26291_v23 = vld [vmem:[#allocation232_spill] sm:$0xff] }
 0x2ba   :  { %v20324_v30 = vsub.f32 %v15418_v9, %v26283_v42  ;;  %v20337_v58 = vsub.f32 %v15419_v63, %v26286_v53  ;;  %v5436_v25 = vadd.f32 %v26288_v2, %v5435_v48  ;;  %v25317_v9 = vand.u32 4294901760, %v26290_v4  ;;  %v26293_v53 = vld [vmem:[#allocation249_spill] sm:$0xff]  ;;  %v26294_v48 = vld [vmem:[#allocation299_spill] sm:$0xff]  ;;  %13683 = vmatmul.mubr.f32.gmra.mrb[110].mxu0 %v6344_v26 }
 0x2bb   :  { %14406 = vmatprep.subr.bf16.mxu1 %v14405_v11  ;;  %12918 = vmatmul.mubr.f32.gmra.mrb[112].mxu1 %v2159_v36  ;;  %v2189_v21 = vand.u32 4294901760, %v2188_v51  ;;  %v6354_v42 = vand.u32 4294901760, %v6353_v8  ;;  %v25318_v56 = vand.u32 4294901760, %v26291_v23  ;;  %v10149_v39 = vadd.f32 %v26293_v53, %v10148_v43 }
 0x2bc   :  { %26284 = vst [vmem:[#allocation146_spill] sm:$0xff] %v20324_v30  ;;  %26287 = vst [vmem:[#allocation123_spill] sm:$0xff] %v20337_v58  ;;  %v25320_v49 = vand.u32 4294901760, %v20324_v30  ;;  %v25319_v40 = vand.u32 4294901760, %v20337_v58  ;;  %v5437_v63 = vadd.f32 %v26292_v50, %v5436_v25  ;;  %12920 = vmatprep.mubr.f32.mxu1 %v2169_v16  ;;  %14408 = vmatpush3.bf16.msra.mxu1 %v14405_v11  ;;  %v25322_v57 = vand.u32 4294901760, %v26294_v48  ;;  %v26295_v11 = vld [vmem:[#allocation271_spill] sm:$0xff] }
 0x2bd   :  { %v2198_v51 = vsub.f32 %v26290_v4, %v25317_v9  ;;  %v6363_v16 = vsub.f32 %v26291_v23, %v25318_v56  ;;  %v25332_v8 = vand.u32 4294901760, %v26295_v11  ;;  %v26296_v25 = vld [vmem:[#allocation288_spill] sm:$0xff]  ;;  %13685 = vmatprep.mubr.f32.mxu0 %v6354_v42  ;;  %v26298_v4 = vld [vmem:[#allocation266_spill] sm:$0xff] }
 0x2be   :  { %v6598_v62 = vsub.f32 %v20324_v30, %v25320_v49  ;;  %v6605_v36 = vsub.f32 %v20337_v58, %v25319_v40  ;;  %v5438_v2 = vadd.f32 %v19544_v46, %v5437_v63  ;;  %v10150_v0 = vadd.f32 %v26296_v25, %v10149_v39  ;;  %v26297_v40 = vld [vmem:[#allocation294_spill] sm:$0xff]  ;;  %v26299_v42 = vld [vmem:[#allocation276_spill] sm:$0xff] }
 0x2bf   :  { %v2208_v43 = vsub.f32 %v26294_v48, %v25322_v57  ;;  %12921 = vmatmul.mubr.f32.gmra.mrb[114].mxu1 %v2179_v32  ;;  %v2199_v53 = vand.u32 4294901760, %v2198_v51  ;;  %v6364_v9 = vand.u32 4294901760, %v6363_v16  ;;  %v6373_v56 = vsub.f32 %v26295_v11, %v25332_v8  ;;  %v26300_v57 = vld [vmem:[#allocation251_spill] sm:$0xff] }
 0x2c0   :  { %v6599_v26 = vand.u32 4294901760, %v6598_v62  ;;  %v6606_v50 = vand.u32 4294901760, %v6605_v36  ;;  %v5439_v49 = vadd.f32 %v26297_v40, %v5438_v2  ;;  %v10151_v46 = vadd.f32 %v26298_v4, %v10150_v0  ;;  %12923 = vmatprep.mubr.f32.mxu1 %v2189_v21  ;;  %v26301_v4 = vld [vmem:[#allocation289_spill] sm:$0xff]  ;;  %v26302_v2 = vld [vmem:[#allocation295_spill] sm:$0xff] }
 0x2c1   :  { %v2209_v39 = vand.u32 4294901760, %v2208_v43  ;;  %v25324_v63 = vand.u32 4294901760, %v26299_v42  ;;  %13686 = vmatmul.mubr.f32.gmra.mrb[112].mxu0 %v6364_v9  ;;  %v6374_v25 = vand.u32 4294901760, %v6373_v56  ;;  %v25325_v32 = vand.u32 4294901760, %v26300_v57 }
 0x2c2   :  { %v14605_v62 = vpack.c.bf16 %v6606_v50, %v6599_v26  ;;  %v25323_v36 = vand.u32 4294901760, %v19553_v5  ;;  %v5440_v51 = vadd.f32 %v19745_v52, %v5439_v49  ;;  %v10152_v16 = vadd.f32 %v19448_v60, %v10151_v46  ;;  %v15420_v60 = vld [vmem:[%s24465_s2 + $0x50] sm:$0xff]  ;;  %v26303_v49 = vld [vmem:[#allocation36_spill] sm:$0xff] }
 0x2c3   :  { %v2218_v40 = vsub.f32 %v26299_v42, %v25324_v63  ;;  %v25329_v21 = vand.u32 4294901760, %v26301_v4  ;;  %12924 = vmatmul.mubr.f32.gmra.mrb[116].mxu1 %v2199_v53  ;;  %v6383_v56 = vsub.f32 %v26300_v57, %v25325_v32  ;;  %v25327_v52 = vand.u32 4294901760, %v26302_v2  ;;  %v26306_v50 = vld [vmem:[#allocation284_spill] sm:$0xff]  ;;  %13688 = vmatprep.mubr.f32.mxu0 %v6374_v25 }
 0x2c4   :  { %14606 = vmatprep.subr.bf16.mxu0 %v14605_v62  ;;  %v2228_v9 = vsub.f32 %v19553_v5, %v25323_v36  ;;  %v26304_v0 = vand.u32 4294901760, %v26303_v49  ;;  %v5441_v43 = vadd.f32 %v19561_v12, %v5440_v51  ;;  %v10153_v53 = vadd.f32 %v26306_v50, %v10152_v16  ;;  %12926 = vmatprep.mubr.f32.mxu1 %v2209_v39  ;;  %v15421_v39 = vld [vmem:[%s24465_s2 + $0x58] sm:$0xff]  ;;  %v26307_v16 = vld [vmem:[#allocation37_spill] sm:$0xff] }
 0x2c5   :  { %14608 = vmatpush3.bf16.msra.mxu0 %v14605_v62  ;;  %v2219_v46 = vand.u32 4294901760, %v2218_v40  ;;  %v6393_v36 = vsub.f32 %v26301_v4, %v25329_v21  ;;  %v6384_v63 = vand.u32 4294901760, %v6383_v56  ;;  %v2238_v49 = vsub.f32 %v26302_v2, %v25327_v52  ;;  %v26314_v52 = vld [vmem:[#allocation285_spill] sm:$0xff] }
 0x2c6   :  { %v20392_v26 = vsub.f32 %v15420_v60, %v26304_v0  ;;  %v2229_v32 = vand.u32 4294901760, %v2228_v9  ;;  %v5442_v12 = vadd.f32 %v19875_v14, %v5441_v43  ;;  %v10154_v51 = vadd.f32 %v19645_v44, %v10153_v53  ;;  %v26310_v0 = vld [vmem:[#allocation267_spill] sm:$0xff] }
 0x2c7   :  { %v6394_v62 = vand.u32 4294901760, %v6393_v36  ;;  %v26308_v40 = vand.u32 4294901760, %v26307_v16  ;;  %12927 = vmatmul.mubr.f32.gmra.mrb[118].mxu1 %v2219_v46  ;;  %13689 = vmatmul.mubr.f32.gmra.mrb[114].mxu0 %v6384_v63  ;;  %v2239_v56 = vand.u32 4294901760, %v2238_v49  ;;  %v25328_v14 = vand.u32 4294901760, %v26310_v0  ;;  %v26311_v53 = vld [vmem:[#allocation307_spill] sm:$0xff]  ;;  %v26312_v16 = vld [vmem:[#allocation317_spill] sm:$0xff] }
 0x2c8   :  { %26305 = vst [vmem:[#allocation136_spill] sm:$0xff] %v20392_v26  ;;  %v25342_v60 = vand.u32 4294901760, %v20392_v26  ;;  %v25326_v44 = vand.u32 4294901760, %v19754_v1  ;;  %v5443_v36 = vadd.f32 %v19812_v24, %v5442_v12  ;;  %v10155_v43 = vadd.f32 %v19410_v54, %v10154_v51  ;;  %12929 = vmatprep.mubr.f32.mxu1 %v2229_v32  ;;  %v26313_v54 = vld [vmem:[#allocation308_spill] sm:$0xff] }
 0x2c9   :  { %v20410_v25 = vsub.f32 %v15421_v39, %v26308_v40  ;;  %13691 = vmatprep.mubr.f32.mxu0 %v6394_v62  ;;  %v25331_v46 = vand.u32 4294901760, %v26311_v53  ;;  %v6403_v49 = vsub.f32 %v26310_v0, %v25328_v14  ;;  %v25330_v40 = vand.u32 4294901760, %v26312_v16 }
 0x2ca   :  { %v2379_v9 = vsub.f32 %v20392_v26, %v25342_v60  ;;  %v2248_v39 = vsub.f32 %v19754_v1, %v25326_v44  ;;  %v5444_v24 = vadd.f32 %v19991_v41, %v5443_v36  ;;  %v10156_v32 = vadd.f32 %v26313_v54, %v10155_v43 }
 0x2cb   :  { %26309 = vst [vmem:[#allocation186_spill] sm:$0xff] %v20410_v25  ;;  %v25333_v50 = vand.u32 4294901760, %v20410_v25  ;;  %v6413_v51 = vsub.f32 %v26311_v53, %v25331_v46  ;;  %12930 = vmatmul.mubr.f32.gmra.mrb[120].mxu1 %v2239_v56  ;;  %v6404_v62 = vand.u32 4294901760, %v6403_v49  ;;  %v2258_v44 = vsub.f32 %v26312_v16, %v25330_v40  ;;  %v26315_v46 = vld [vmem:[#allocation329_spill] sm:$0xff] }
 0x2cc   :  { %v2380_v63 = vand.u32 4294901760, %v2379_v9  ;;  %v2249_v9 = vand.u32 4294901760, %v2248_v39  ;;  %v25337_v14 = vand.u32 4294901760, %v26314_v52  ;;  %v5445_v41 = vadd.f32 %v20007_v38, %v5444_v24  ;;  %v26316_v38 = vld [vmem:[#allocation54_spill] sm:$0xff] }
 0x2cd   :  { %v2386_v12 = vsub.f32 %v20410_v25, %v25333_v50  ;;  %v10157_v36 = vadd.f32 %v19662_v7, %v10156_v32  ;;  %v6414_v54 = vand.u32 4294901760, %v6413_v51  ;;  %13692 = vmatmul.mubr.f32.gmra.mrb[116].mxu0 %v6404_v62  ;;  %v2259_v21 = vand.u32 4294901760, %v2258_v44  ;;  %v15422_v7 = vld [vmem:[%s24465_s2 + $0xf0] sm:$0xff]  ;;  %v26319_v51 = vld [vmem:[#allocation55_spill] sm:$0xff] }
 0x2ce   :  { %12932 = vmatprep.mubr.f32.mxu1 %v2249_v9  ;;  %v6423_v56 = vsub.f32 %v26314_v52, %v25337_v14  ;;  %v25334_v49 = vand.u32 4294901760, %v19883_v28  ;;  %v25336_v39 = vand.u32 4294901760, %v19654_v17  ;;  %v5446_v40 = vrot.slane %v5445_v41, 4 }
 0x2cf   :  { %v2387_v43 = vand.u32 4294901760, %v2386_v12  ;;  %v10158_v8 = vadd.f32 %v26315_v46, %v10157_v36  ;;  %13694 = vmatprep.mubr.f32.mxu0 %v6414_v54  ;;  %v26317_v24 = vand.u32 4294901760, %v26316_v38  ;;  %12933 = vmatmul.mubr.f32.gmra.mrb[122].mxu1 %v2259_v21  ;;  %v26320_v62 = vand.u32 4294901760, %v26319_v51  ;;  %v26322_v54 = vld [vmem:[#allocation337_spill] sm:$0xff]  ;;  %v15424_v51 = vld [vmem:[%s24465_s2 + $0x60] sm:$0xff] }
 0x2d0   :  { %v6424_v32 = vand.u32 4294901760, %v6423_v56  ;;  %v2268_v12 = vsub.f32 %v19883_v28, %v25334_v49  ;;  %v6433_v46 = vsub.f32 %v19654_v17, %v25336_v39  ;;  %v5447_v36 = vadd.f32 %v5446_v40, %v5445_v41 }
 0x2d1   :  { %v14409_v50 = vpack.c.bf16 %v2387_v43, %v2380_v63  ;;  %v20453_v44 = vsub.f32 %v15422_v7, %v26317_v24  ;;  %v15423_v63 = vld [vmem:[%s24465_s2 + $0xf8] sm:$0xff]  ;;  %v10159_v21 = vadd.f32 %v19890_v61, %v10158_v8  ;;  %v25335_v56 = vand.u32 4294901760, %v26322_v54 }
 0x2d2   :  { %v20466_v9 = vsub.f32 %v15423_v63, %v26320_v62  ;;  %13695 = vmatmul.mubr.f32.gmra.mrb[118].mxu0 %v6424_v32  ;;  %v2269_v7 = vand.u32 4294901760, %v2268_v12  ;;  %v6434_v38 = vand.u32 4294901760, %v6433_v46  ;;  %v26323_v63 = vld [vmem:[#allocation42_spill] sm:$0xff]  ;;  %v5448_v61 = vrot.slane %v5447_v36, 2  ;;  %v26326_v46 = vld [vmem:[#allocation43_spill] sm:$0xff] }
 0x2d3   :  { %26318 = vst [vmem:[#allocation156_spill] sm:$0xff] %v20453_v44  ;;  %14410 = vmatprep.subr.bf16.mxu1 %v14409_v50  ;;  %v25339_v43 = vand.u32 4294901760, %v20453_v44  ;;  %v26324_v62 = vand.u32 4294901760, %v26323_v63  ;;  %v10160_v8 = vadd.f32 %v19931_v27, %v10159_v21  ;;  %v2278_v41 = vsub.f32 %v26322_v54, %v25335_v56  ;;  %v15425_v27 = vld [vmem:[%s24465_s2 + $0x68] sm:$0xff] }
 0x2d4   :  { %26321 = vst [vmem:[#allocation121_spill] sm:$0xff] %v20466_v9  ;;  %14412 = vmatpush3.bf16.msra.mxu1 %v14409_v50  ;;  %v25338_v24 = vand.u32 4294901760, %v20466_v9  ;;  %12935 = vmatprep.mubr.f32.mxu1 %v2269_v7  ;;  %v26327_v21 = vand.u32 4294901760, %v26326_v46  ;;  %v26329_v63 = vld [vmem:[#allocation304_spill] sm:$0xff]  ;;  %v5449_v49 = vadd.f32 %v5448_v61, %v5447_v36  ;;  %v25343_v36 = vand.u32 4294901760, %v20000_v47  ;;  %v26330_v61 = vld [vmem:[#allocation309_spill] sm:$0xff] }
 0x2d5   :  { %v20477_v40 = vsub.f32 %v15424_v51, %v26324_v62  ;;  %v6612_v50 = vsub.f32 %v20453_v44, %v25339_v43  ;;  %13697 = vmatprep.mubr.f32.mxu0 %v6434_v38  ;;  %v25341_v62 = vand.u32 4294901760, %v26329_v63  ;;  %v10161_v7 = vadd.f32 %v20066_v37, %v10160_v8 }
 0x2d6   :  { %v6619_v32 = vsub.f32 %v20466_v9, %v25338_v24  ;;  %v20495_v51 = vsub.f32 %v15425_v27, %v26327_v21  ;;  %v2279_v56 = vand.u32 4294901760, %v2278_v41  ;;  %v5450_v27 = vrot.slane %v5449_v49, 1 }
 0x2d7   :  { %26325 = vst [vmem:[#allocation130_spill] sm:$0xff] %v20477_v40  ;;  %v25340_v12 = vand.u32 4294901760, %v20477_v40  ;;  %v6613_v38 = vand.u32 4294901760, %v6612_v50  ;;  %v6443_v46 = vsub.f32 %v26329_v63, %v25341_v62  ;;  %v10162_v21 = vrot.slane %v10161_v7, 4 }
 0x2d8   :  { %26328 = vst [vmem:[#allocation169_spill] sm:$0xff] %v20495_v51  ;;  %v6620_v39 = vand.u32 4294901760, %v6619_v32  ;;  %v25345_v24 = vand.u32 4294901760, %v20495_v51  ;;  %12936 = vmatmul.mubr.f32.gmra.mrb[124].mxu1 %v2279_v56  ;;  %v25344_v37 = vand.u32 4294901760, %v26330_v61  ;;  %v5451_v43 = vadd.f32 %v5450_v27, %v5449_v49  ;;  %v26334_v27 = vld [vmem:[#allocation49_spill] sm:$0xff] }
 0x2d9   :  { %v2393_v14 = vsub.f32 %v20477_v40, %v25340_v12  ;;  %v6444_v32 = vand.u32 4294901760, %v6443_v46  ;;  %v10163_v12 = vadd.f32 %v10162_v21, %v10161_v7  ;;  %v2288_v62 = vsub.f32 %v20000_v47, %v25343_v36  ;;  %v15427_v46 = vld [vmem:[%s24465_s2 + $0x78] sm:$0xff] }
 0x2da   :  { %v14609_v8 = vpack.c.bf16 %v6620_v39, %v6613_v38  ;;  %v2400_v41 = vsub.f32 %v20495_v51, %v25345_v24  ;;  %v6453_v56 = vsub.f32 %v26330_v61, %v25344_v37  ;;  %v15426_v39 = vld [vmem:[%s24465_s2 + $0x70] sm:$0xff]  ;;  %v26331_v38 = vld [vmem:[#allocation48_spill] sm:$0xff]  ;;  %v26335_v21 = vand.u32 4294901760, %v26334_v27 }
 0x2db   :  { %v2394_v50 = vand.u32 4294901760, %v2393_v14  ;;  %13698 = vmatmul.mubr.f32.gmra.mrb[120].mxu0 %v6444_v32  ;;  %v26332_v49 = vand.u32 4294901760, %v26331_v38  ;;  %v2289_v32 = vand.u32 4294901760, %v2288_v62  ;;  %v26337_v24 = vld [vmem:[#allocation325_spill] sm:$0xff]  ;;  %v26338_v54 = vand.u32 4294901760, %v20011_v29  ;;  %v26339_v62 = vld [vmem:[#allocation330_spill] sm:$0xff] }
 0x2dc   :  { %14610 = vmatprep.subr.bf16.mxu0 %v14609_v8  ;;  %v2401_v60 = vand.u32 4294901760, %v2400_v41  ;;  %v20530_v36 = vsub.f32 %v15427_v46, %v26335_v21  ;;  %v10164_v41 = vrot.slane %v10163_v12, 2  ;;  %v6454_v37 = vand.u32 4294901760, %v6453_v56  ;;  %v26340_v21 = vld [vmem:[#allocation348_spill] sm:$0xff] }
 0x2dd   :  { %v20523_v7 = vsub.f32 %v15426_v39, %v26332_v49  ;;  %14612 = vmatpush3.bf16.msra.mxu0 %v14609_v8  ;;  %v25350_v14 = vand.u32 4294901760, %v26337_v24  ;;  %v2298_v39 = vsub.f32 %v20011_v29, %v26338_v54  ;;  %12938 = vmatprep.mubr.f32.mxu1 %v2289_v32  ;;  %v25353_v56 = vand.u32 4294901760, %v26339_v62 }
 0x2de   :  { %26336 = vst [vmem:[#allocation162_spill] sm:$0xff] %v20530_v36  ;;  %v14413_v47 = vpack.c.bf16 %v2401_v60, %v2394_v50  ;;  %v25351_v49 = vand.u32 4294901760, %v20530_v36  ;;  %v10165_v61 = vadd.f32 %v10164_v41, %v10163_v12  ;;  %13700 = vmatprep.mubr.f32.mxu0 %v6454_v37  ;;  %v25354_v12 = vand.u32 4294901760, %v19897_v15 }
 0x2df   :  { %26333 = vst [vmem:[#allocation135_spill] sm:$0xff] %v20523_v7  ;;  %v25352_v38 = vand.u32 4294901760, %v20523_v7  ;;  %v6463_v8 = vsub.f32 %v26337_v24, %v25350_v14  ;;  %v2299_v46 = vand.u32 4294901760, %v2298_v39  ;;  %v6473_v27 = vsub.f32 %v26339_v62, %v25353_v56  ;;  %v26341_v56 = vld [vmem:[#allocation63_spill] sm:$0xff] }
 0x2e0   :  { %14414 = vmatprep.subr.bf16.mxu1 %v14413_v47  ;;  %v2414_v54 = vsub.f32 %v20530_v36, %v25351_v49  ;;  %v10166_v50 = vrot.slane %v10165_v61, 1  ;;  %v25364_v41 = vand.u32 4294901760, %v26340_v21  ;;  %v6483_v14 = vsub.f32 %v19897_v15, %v25354_v12  ;;  %v26344_v12 = vld [vmem:[#allocation15_spill] sm:$0xff] }
 0x2e1   :  { %v2407_v60 = vsub.f32 %v20523_v7, %v25352_v38  ;;  %14416 = vmatpush3.bf16.msra.mxu1 %v14413_v47  ;;  %v6464_v37 = vand.u32 4294901760, %v6463_v8  ;;  %v10981_v47 = vld [vmem:[%s24469_s6] sm:$0x3]  ;;  %v25359_v8 = vmov 1.0   ;;  %vm26342_vm11 = vcmp.eq.s32.totalorder %v16605_v20, %v26341_v56  ;;  %v26346_v56 = vld [vmem:[#allocation9_spill] sm:$0xff] }
 0x2e2   :  { %12939 = vmatmul.mubr.f32.gmra.mrb[126].mxu1 %v2299_v46  ;;  %v2415_v39 = vand.u32 4294901760, %v2414_v54  ;;  %v10167_v38 = vadd.f32 %v10166_v50, %v10165_v61  ;;  %v6474_v46 = vand.u32 4294901760, %v6473_v27  ;;  %v26343_v54 = vld [vmem:[#allocation14_spill] sm:$0xff]  ;;  %v6484_v15 = vand.u32 4294901760, %v6483_v14 }
 0x2e3   :  { %v2408_v32 = vand.u32 4294901760, %v2407_v60  ;;  %13701 = vmatmul.mubr.f32.gmra.mrb[122].mxu0 %v6464_v37  ;;  %12973 = vmatprep.mubr.msk.f32.mxu1 %vm26342_vm11, %v25359_v8  ;;  %v6493_v60 = vsub.f32 %v26340_v21, %v25364_v41  ;;  %v14613_v49 = vpack.c.bf16 %v26344_v12, %v26343_v54  ;;  %v26345_v37 = vand.u32 4294901760, %v20072_v45  ;;  %v26347_v8 = vld [vmem:[#allocation10_spill] sm:$0xff] }
 0x2e4   :  { %v10982_v50 = vsel %vm10958_vm6, %v5451_v43, %v10167_v38  ;;  %13703 = vmatprep.mubr.f32.mxu0 %v6474_v46  ;;  %v14421_v27 = vpack.c.bf16 %v26347_v8, %v26346_v56  ;;  %v20580_v43 = vpack.c.bf16 %v20181_v31, %v20174_v34  ;;  %v14437_v14 = vpack.c.bf16 %v20280_v59, %v20271_v13  ;;  %v26361_v41 = vld [vmem:[#allocation18_spill] sm:$0xff]  ;;  %v26381_v34 = vld [vmem:[#allocation33_spill] sm:$0xff] }
 0x2e5   :  { %v14417_v61 = vpack.c.bf16 %v2415_v39, %v2408_v32  ;;  %v6503_v29 = vsub.f32 %v20072_v45, %v26345_v37  ;;  %14614 = vmatprep.subr.bf16.mxu0 %v14613_v49  ;;  %v10983_v62 = vadd.f32 %v10982_v50, %v10981_v47  ;;  %v6494_v24 = vand.u32 4294901760, %v6493_v60  ;;  %v26348_v39 = vld [vmem:[#allocation12_spill] sm:$0xff]  ;;  %v26355_v60 = vld [vmem:[#allocation94_spill] sm:$0xff]  ;;  %v26359_v37 = vld [vmem:[#allocation133_spill] sm:$0xff] }
 0x2e6   :  { %v20586_v38 = vpack.c.bf16 %v20337_v58, %v20324_v30  ;;  %v26350_v46 = vmov 1.0   ;;  %vm26356_vm12 = vcmp.eq.s32.totalorder %v16605_v20, %v26355_v60  ;;  %v26367_v60 = vld [vmem:[#allocation103_spill] sm:$0xff] }
 0x2e7   :  { %14418 = vmatprep.subr.bf16.mxu1 %v14417_v61  ;;  %13704 = vmatmul.mubr.f32.gmra.mrb[124].mxu0 %v6484_v15  ;;  %10984 = vst [vmem:[%s24469_s6] sm:$0x3] %v10983_v62  ;;  %v6504_v32 = vand.u32 4294901760, %v6503_v29  ;;  %v26349_v15 = vld [vmem:[#allocation13_spill] sm:$0xff]  ;;  %v26351_v62 = vld [vmem:[#allocation108_spill] sm:$0xff]  ;;  %vm26368_vm14 = vcmp.eq.s32.totalorder %v16605_v20, %v26367_v60  ;;  %v26370_v58 = vld [vmem:[#allocation27_spill] sm:$0xff]  ;;  %s15544_s6 = smov 16  }
 0x2e8   :  { %14420 = vmatpush3.bf16.msra.mxu1 %v14417_v61  ;;  %13706 = vmatprep.mubr.f32.mxu0 %v6494_v24  ;;  %v14425_v47 = vpack.c.bf16 %v26349_v15, %v26348_v39  ;;  %vm26352_vm6 = vcmp.eq.s32.totalorder %v16605_v20, %v26351_v62  ;;  %v26353_v24 = vld [vmem:[#allocation119_spill] sm:$0xff]  ;;  %v26357_v29 = vld [vmem:[#allocation20_spill] sm:$0xff]  ;;  %v26358_v61 = vld [vmem:[#allocation21_spill] sm:$0xff] }
 0x2e9   :  { %14422 = vmatprep.subr.bf16.mxu1 %v14421_v27  ;;  %vm26354_vm11 = vcmp.eq.s32.totalorder %v16605_v20, %v26353_v24  ;;  %v14617_v50 = vpack.c.bf16 %v26358_v61, %v26357_v29  ;;  %v26362_v62 = vld [vmem:[#allocation19_spill] sm:$0xff] }
 0x2ea   :  { %v14429_v24 = vpack.c.bf16 %v26362_v62, %v26361_v41  ;;  %v26376_v60 = vld [vmem:[#allocation115_spill] sm:$0xff] }
 0x2eb   :  { %12974 = vmatmul.mubr.msk.f32.vlgmr.msra.gmra.mrb[64].mxu1 %vm26352_vm6, %v26350_v46  ;;  %13707 = vmatmul.mubr.f32.gmra.mrb[126].mxu0 %v6504_v32  ;;  %vm26360_vm6 = vcmp.eq.s32.totalorder %v16605_v20, %v26359_v37  ;;  %v26363_v32 = vld [vmem:[#allocation139_spill] sm:$0xff]  ;;  %v26369_v37 = vld [vmem:[#allocation26_spill] sm:$0xff] }
 0x2ec   :  { %12976 = vmatprep.mubr.msk.f32.mxu1 %vm26354_vm11, %v26350_v46  ;;  %13741 = vmatprep.mubr.msk.f32.mxu0 %vm26356_vm12, %v26350_v46  ;;  %vm26364_vm11 = vcmp.eq.s32.totalorder %v16605_v20, %v26363_v32  ;;  %v14621_v30 = vpack.c.bf16 %v26370_v58, %v26369_v37  ;;  %v26371_v32 = vld [vmem:[#allocation160_spill] sm:$0xff] }
 0x2ed   :  { %14424 = vmatpush3.bf16.msra.mxu1 %v14421_v27  ;;  %v26365_v27 = vld [vmem:[#allocation114_spill] sm:$0xff] }
 0x2ee   :  { %14426 = vmatprep.subr.bf16.mxu1 %v14425_v47  ;;  %vm26366_vm12 = vcmp.eq.s32.totalorder %v16605_v20, %v26365_v27  ;;  %v26373_v27 = vld [vmem:[#allocation105_spill] sm:$0xff] }
 0x2ef   :  { %12977 = vmatmul.mubr.msk.f32.gmra.mrb[66].mxu1 %vm26360_vm6, %v26350_v46  ;;  %13742 = vmatmul.mubr.msk.f32.vlgmr.msra.gmra.mrb[64].mxu0 %vm26366_vm12, %v26350_v46  ;;  %vm26372_vm6 = vcmp.eq.s32.totalorder %v16605_v20, %v26371_v32  ;;  %v14433_v31 = vpack.c.bf16 %v26373_v27, %v19792_v55  ;;  %v26380_v32 = vld [vmem:[#allocation32_spill] sm:$0xff] }
 0x2f0   :  { %12979 = vmatprep.mubr.msk.f32.mxu1 %vm26364_vm11, %v26350_v46  ;;  %14616 = vmatpush3.bf16.msra.mxu0 %v14613_v49  ;;  %v26374_v49 = vld [vmem:[#allocation165_spill] sm:$0xff]  ;;  %v14625_v59 = vpack.c.bf16 %v26381_v34, %v26380_v32  ;;  %v26394_v34 = vld [vmem:[#allocation67_spill] sm:$0xff]  ;;  %v26659_v32 = vld [vmem:[#allocation250_spill] sm:$0xff] }
 0x2f1   :  { %13744 = vmatprep.mubr.msk.f32.mxu0 %vm26368_vm14, %v26350_v46  ;;  %14618 = vmatprep.subr.bf16.mxu0 %v14617_v50  ;;  %vm26375_vm11 = vcmp.eq.s32.totalorder %v16605_v20, %v26374_v49  ;;  %vm26377_vm14 = vcmp.eq.s32.totalorder %v16605_v20, %v26376_v60  ;;  %v26382_v49 = vld [vmem:[#allocation140_spill] sm:$0xff]  ;;  %v26384_v60 = vld [vmem:[#allocation58_spill] sm:$0xff] }
 0x2f2   :  { %14428 = vmatpush3.bf16.msra.mxu1 %v14425_v47  ;;  %v26378_v47 = vld [vmem:[#allocation149_spill] sm:$0xff] }
 0x2f3   :  { %12980 = vmatmul.mubr.msk.f32.gmra.mrb[68].mxu1 %vm26372_vm6, %v26350_v46  ;;  %14430 = vmatprep.subr.bf16.mxu1 %v14429_v24  ;;  %vm26379_vm12 = vcmp.eq.s32.totalorder %v16605_v20, %v26378_v47  ;;  %vm26383_vm6 = vcmp.eq.s32.totalorder %v16605_v20, %v26382_v49  ;;  %v26386_v47 = vld [vmem:[#allocation129_spill] sm:$0xff]  ;;  %v26391_v49 = vld [vmem:[#allocation39_spill] sm:$0xff] }
 0x2f4   :  { %12982 = vmatprep.mubr.msk.f32.mxu1 %vm26375_vm11, %v26350_v46  ;;  %13745 = vmatmul.mubr.msk.f32.gmra.mrb[66].mxu0 %vm26377_vm14, %v26350_v46  ;;  %vm26385_vm11 = vcmp.eq.s32.totalorder %v16605_v20, %v26384_v60  ;;  %vm26387_vm14 = vcmp.eq.s32.totalorder %v16605_v20, %v26386_v47  ;;  %v26392_v60 = vld [vmem:[#allocation161_spill] sm:$0xff]  ;;  %v14441_v47 = vpack.c.bf16 %v20410_v25, %v20392_v26  ;;  %v26626_v25 = vld [vmem:[#allocation179_spill] sm:$0xff] }
 0x2f5   :  { %13747 = vmatprep.mubr.msk.f32.mxu0 %vm26379_vm12, %v26350_v46  ;;  %14620 = vmatpush3.bf16.msra.mxu0 %v14617_v50  ;;  %v26388_v50 = vld [vmem:[#allocation176_spill] sm:$0xff]  ;;  %v26627_v26 = vld [vmem:[#allocation35_spill] sm:$0xff] }
 0x2f6   :  { %14622 = vmatprep.subr.bf16.mxu0 %v14621_v30  ;;  %14432 = vmatpush3.bf16.msra.mxu1 %v14429_v24  ;;  %vm26389_vm12 = vcmp.eq.s32.totalorder %v16605_v20, %v26388_v50  ;;  %v26390_v24 = vld [vmem:[#allocation38_spill] sm:$0xff] }
 0x2f7   :  { %12983 = vmatmul.mubr.msk.f32.gmra.mrb[70].mxu1 %vm26383_vm6, %v26350_v46  ;;  %14434 = vmatprep.subr.bf16.mxu1 %v14433_v31  ;;  %v14629_v13 = vpack.c.bf16 %v26391_v49, %v26390_v24  ;;  %vm26393_vm6 = vcmp.eq.s32.totalorder %v16605_v20, %v26392_v60  ;;  %v26400_v60 = vld [vmem:[#allocation181_spill] sm:$0xff]  ;;  %v26612_v50 = vld [vmem:[#allocation142_spill] sm:$0xff] }
 0x2f8   :  { %12985 = vmatprep.mubr.msk.f32.mxu1 %vm26385_vm11, %v26350_v46  ;;  %13748 = vmatmul.mubr.msk.f32.gmra.mrb[68].mxu0 %vm26387_vm14, %v26350_v46  ;;  %vm26395_vm11 = vcmp.eq.s32.totalorder %v16605_v20, %v26394_v34  ;;  %v14445_v34 = vpack.c.bf16 %v20495_v51, %v20477_v40  ;;  %v26623_v51 = vld [vmem:[#allocation28_spill] sm:$0xff]  ;;  %v26625_v40 = vld [vmem:[#allocation131_spill] sm:$0xff]  ;;  %v26629_v49 = vld [vmem:[#allocation34_spill] sm:$0xff] }
 0x2f9   :  { %13750 = vmatprep.mubr.msk.f32.mxu0 %vm26389_vm12, %v26350_v46  ;;  %14624 = vmatpush3.bf16.msra.mxu0 %v14621_v30  ;;  %v26396_v30 = vld [vmem:[#allocation150_spill] sm:$0xff]  ;;  %v26631_v24 = vld [vmem:[#allocation153_spill] sm:$0xff] }
 0x2fa   :  { %14626 = vmatprep.subr.bf16.mxu0 %v14625_v59  ;;  %14436 = vmatpush3.bf16.msra.mxu1 %v14433_v31  ;;  %vm26397_vm14 = vcmp.eq.s32.totalorder %v16605_v20, %v26396_v30  ;;  %v26398_v31 = vld [vmem:[#allocation60_spill] sm:$0xff]  ;;  %v26402_v30 = vld [vmem:[#allocation74_spill] sm:$0xff] }
 0x2fb   :  { %12986 = vmatmul.mubr.msk.f32.gmra.mrb[72].mxu1 %vm26393_vm6, %v26350_v46  ;;  %14438 = vmatprep.subr.bf16.mxu1 %v14437_v14  ;;  %vm26399_vm12 = vcmp.eq.s32.totalorder %v16605_v20, %v26398_v31  ;;  %vm26401_vm6 = vcmp.eq.s32.totalorder %v16605_v20, %v26400_v60  ;;  %v26404_v31 = vld [vmem:[#allocation173_spill] sm:$0xff] }
 0x2fc   :  { %12988 = vmatprep.mubr.msk.f32.mxu1 %vm26395_vm11, %v26350_v46  ;;  %13751 = vmatmul.mubr.msk.f32.gmra.mrb[70].mxu0 %vm26397_vm14, %v26350_v46  ;;  %vm26403_vm11 = vcmp.eq.s32.totalorder %v16605_v20, %v26402_v30  ;;  %vm26405_vm14 = vcmp.eq.s32.totalorder %v16605_v20, %v26404_v31  ;;  %v14449_v30 = vpack.c.bf16 %v20530_v36, %v20523_v7  ;;  %v26410_v31 = vld [vmem:[#allocation219_spill] sm:$0xff]  ;;  %v26611_v60 = vld [vmem:[#allocation137_spill] sm:$0xff]  ;;  %v26620_v36 = vld [vmem:[#allocation152_spill] sm:$0xff] }
 0x2fd   :  { %13753 = vmatprep.mubr.msk.f32.mxu0 %vm26399_vm12, %v26350_v46  ;;  %14628 = vmatpush3.bf16.msra.mxu0 %v14625_v59  ;;  %v26406_v59 = vld [vmem:[#allocation69_spill] sm:$0xff] }
 0x2fe   :  { %14630 = vmatprep.subr.bf16.mxu0 %v14629_v13  ;;  %14440 = vmatpush3.bf16.msra.mxu1 %v14437_v14  ;;  %vm26407_vm12 = vcmp.eq.s32.totalorder %v16605_v20, %v26406_v59  ;;  %v26408_v14 = vld [vmem:[#allocation71_spill] sm:$0xff]  ;;  %v26609_v59 = vld [vmem:[#allocation98_spill] sm:$0xff]  ;;  %v26621_v7 = vld [vmem:[#allocation29_spill] sm:$0xff] }
 0x2ff   :  { %12989 = vmatmul.mubr.msk.f32.gmra.mrb[74].mxu1 %vm26401_vm6, %v26350_v46  ;;  %14442 = vmatprep.subr.bf16.mxu1 %v14441_v47  ;;  %vm26409_vm6 = vcmp.eq.s32.totalorder %v16605_v20, %v26408_v14  ;;  %v14641_v14 = vpack.c.bf16 %v20466_v9, %v20453_v44  ;;  %v26614_v9 = vld [vmem:[#allocation106_spill] sm:$0xff]  ;;  %v26615_v44 = vld [vmem:[#allocation23_spill] sm:$0xff] }
 0x300   :  { %12991 = vmatprep.mubr.msk.f32.mxu1 %vm26403_vm11, %v26350_v46  ;;  %13754 = vmatmul.mubr.msk.f32.gmra.mrb[72].mxu0 %vm26405_vm14, %v26350_v46  ;;  %vm26411_vm11 = vcmp.eq.s32.totalorder %v16605_v20, %v26410_v31  ;;  %v26416_v31 = vld [vmem:[#allocation203_spill] sm:$0xff] }
 0x301   :  { %13756 = vmatprep.mubr.msk.f32.mxu0 %vm26407_vm12, %v26350_v46  ;;  %14632 = vmatpush3.bf16.msra.mxu0 %v14629_v13  ;;  %v26412_v13 = vld [vmem:[#allocation68_spill] sm:$0xff] }
 0x302   :  { %14634 = vmatprep.subr.bf16.mxu0 %v20580_v43  ;;  %14444 = vmatpush3.bf16.msra.mxu1 %v14441_v47  ;;  %vm26413_vm14 = vcmp.eq.s32.totalorder %v16605_v20, %v26412_v13  ;;  %v26414_v47 = vld [vmem:[#allocation82_spill] sm:$0xff] }
 0x303   :  { %12992 = vmatmul.mubr.msk.f32.gmra.mrb[76].mxu1 %vm26409_vm6, %v26350_v46  ;;  %14446 = vmatprep.subr.bf16.mxu1 %v14445_v34  ;;  %vm26415_vm12 = vcmp.eq.s32.totalorder %v16605_v20, %v26414_v47  ;;  %vm26417_vm6 = vcmp.eq.s32.totalorder %v16605_v20, %v26416_v31  ;;  %v26418_v13 = vld [vmem:[#allocation238_spill] sm:$0xff]  ;;  %v26422_v47 = vld [vmem:[#allocation228_spill] sm:$0xff] }
 0x304   :  { %12994 = vmatprep.mubr.msk.f32.mxu1 %vm26411_vm11, %v26350_v46  ;;  %13757 = vmatmul.mubr.msk.f32.gmra.mrb[74].mxu0 %vm26413_vm14, %v26350_v46  ;;  %vm26419_vm11 = vcmp.eq.s32.totalorder %v16605_v20, %v26418_v13  ;;  %v26426_v13 = vld [vmem:[#allocation11_spill] sm:$0xff]  ;;  %v26605_v31 = vld [vmem:[#allocation112_spill] sm:$0xff] }
 0x305   :  { %13759 = vmatprep.mubr.msk.f32.mxu0 %vm26415_vm12, %v26350_v46  ;;  %14636 = vmatpush3.bf16.msra.mxu0 %v20580_v43  ;;  %v26420_v43 = vld [vmem:[#allocation73_spill] sm:$0xff]  ;;  %vm26423_vm12 = vcmp.eq.s32.totalorder %v16605_v20, %v26422_v47 }
 0x306   :  { %14638 = vmatprep.subr.bf16.mxu0 %v20586_v38  ;;  %14448 = vmatpush3.bf16.msra.mxu1 %v14445_v34  ;;  %vm26421_vm14 = vcmp.eq.s32.totalorder %v16605_v20, %v26420_v43  ;;  %v26424_v34 = vld [vmem:[#allocation216_spill] sm:$0xff]  ;;  %v26428_v47 = vld [vmem:[#allocation81_spill] sm:$0xff]  ;;  %v26443_v43 = vld [vmem:[#allocation243_spill] sm:$0xff] }
 0x307   :  { %12995 = vmatmul.mubr.msk.f32.gmra.mrb[78].mxu1 %vm26417_vm6, %v26350_v46  ;;  %14450 = vmatprep.subr.bf16.mxu1 %v14449_v30  ;;  %vm26425_vm6 = vcmp.eq.s32.totalorder %v16605_v20, %v26424_v34  ;;  %v26433_v34 = vld [vmem:[#allocation234_spill] sm:$0xff] }
 0x308   :  { %12997 = vmatprep.mubr.msk.f32.mxu1 %vm26419_vm11, %v26350_v46  ;;  %13760 = vmatmul.mubr.msk.f32.gmra.mrb[76].mxu0 %vm26421_vm14, %v26350_v46  ;;  %vm26429_vm11 = vcmp.eq.s32.totalorder %v16605_v20, %v26428_v47  ;;  %v26436_v47 = vld [vmem:[#allocation224_spill] sm:$0xff] }
 0x309   :  { %13762 = vmatprep.mubr.msk.f32.mxu0 %vm26423_vm12, %v26350_v46  ;;  %14640 = vmatpush3.bf16.msra.mxu0 %v20586_v38  ;;  %v26430_v38 = vld [vmem:[#allocation247_spill] sm:$0xff]  ;;  %vm26434_vm12 = vcmp.eq.s32.totalorder %v16605_v20, %v26433_v34  ;;  %v26449_v34 = vld [vmem:[#allocation260_spill] sm:$0xff] }
 0x30a   :  { %14642 = vmatprep.subr.bf16.mxu0 %v14641_v14  ;;  %14452 = vmatpush3.bf16.msra.mxu1 %v14449_v30  ;;  %vm26431_vm14 = vcmp.eq.s32.totalorder %v16605_v20, %v26430_v38  ;;  %v26432_v30 = vld [vmem:[#allocation17_spill] sm:$0xff] }
 0x30b   :  { %12998 = vmatmul.mubr.msk.f32.gmra.mrb[80].mxu1 %vm26425_vm6, %v26350_v46  ;;  %14454 = vmatprep.subr.bf16.mxu1 %v26426_v13  ;;  %vm26437_vm6 = vcmp.eq.s32.totalorder %v16605_v20, %v26436_v47  ;;  %v26440_v38 = vld [vmem:[#allocation253_spill] sm:$0xff]  ;;  %v26452_v47 = vld [vmem:[#allocation287_spill] sm:$0xff] }
 0x30c   :  { %13000 = vmatprep.mubr.msk.f32.mxu1 %vm1394_vm2, %v26350_v46  ;;  %13763 = vmatmul.mubr.msk.f32.gmra.mrb[78].mxu0 %vm26429_vm11, %v26350_v46 }
 0x30d   :  { %13765 = vmatprep.mubr.msk.f32.mxu0 %vm26431_vm14, %v26350_v46  ;;  %14644 = vmatpush3.bf16.msra.mxu0 %v14641_v14  ;;  %v26438_v14 = vld [vmem:[#allocation263_spill] sm:$0xff]  ;;  %vm26441_vm14 = vcmp.eq.s32.totalorder %v16605_v20, %v26440_v38  ;;  %v26455_v38 = vld [vmem:[#allocation278_spill] sm:$0xff] }
 0x30e   :  { %14646 = vmatprep.subr.bf16.mxu0 %v26432_v30  ;;  %vm26439_vm11 = vcmp.eq.s32.totalorder %v16605_v20, %v26438_v14  ;;  %v26446_v14 = vld [vmem:[#allocation269_spill] sm:$0xff] }
 0x30f   :  { %13001 = vmatmul.mubr.msk.f32.gmra.mrb[82].mxu1 %vm26434_vm12, %v26350_v46  ;;  %vm26444_vm12 = vcmp.eq.s32.totalorder %v16605_v20, %v26443_v43  ;;  %v26458_v43 = vld [vmem:[#allocation311_spill] sm:$0xff] }
 0x310   :  { %13003 = vmatprep.mubr.msk.f32.mxu1 %vm1396_vm9, %v26350_v46  ;;  %13766 = vmatmul.mubr.msk.f32.gmra.mrb[80].mxu0 %vm26437_vm6, %v26350_v46  ;;  %vm26447_vm6 = vcmp.eq.s32.totalorder %v16605_v20, %v26446_v14  ;;  %v26461_v14 = vld [vmem:[#allocation297_spill] sm:$0xff] }
 0x311   :  { %13768 = vmatprep.mubr.msk.f32.mxu0 %vm26439_vm11, %v26350_v46  ;;  %vm26450_vm11 = vcmp.eq.s32.totalorder %v16605_v20, %v26449_v34  ;;  %v26464_v34 = vld [vmem:[#allocation332_spill] sm:$0xff] }
 0x313   :  { %13004 = vmatmul.mubr.msk.f32.gmra.mrb[84].mxu1 %vm26441_vm14, %v26350_v46  ;;  %vm26453_vm14 = vcmp.eq.s32.totalorder %v16605_v20, %v26452_v47  ;;  %v26467_v47 = vld [vmem:[#allocation319_spill] sm:$0xff] }
 0x314   :  { %13006 = vmatprep.mubr.msk.f32.mxu1 %vm1398_vm5, %v26350_v46  ;;  %13769 = vmatmul.mubr.msk.f32.gmra.mrb[82].mxu0 %vm26444_vm12, %v26350_v46  ;;  %vm26456_vm12 = vcmp.eq.s32.totalorder %v16605_v20, %v26455_v38  ;;  %v26470_v38 = vld [vmem:[#allocation350_spill] sm:$0xff] }
 0x315   :  { %13771 = vmatprep.mubr.msk.f32.mxu0 %vm5600_vm10, %v26350_v46 }
 0x317   :  { %13007 = vmatmul.mubr.msk.f32.gmra.mrb[86].mxu1 %vm26447_vm6, %v26350_v46  ;;  %vm26459_vm6 = vcmp.eq.s32.totalorder %v16605_v20, %v26458_v43  ;;  %v26474_v43 = vld [vmem:[#allocation339_spill] sm:$0xff] }
 0x318   :  { %13009 = vmatprep.mubr.msk.f32.mxu1 %vm1400_vm7, %v26350_v46  ;;  %13772 = vmatmul.mubr.msk.f32.gmra.mrb[84].mxu0 %vm26450_vm11, %v26350_v46  ;;  %vm26462_vm11 = vcmp.eq.s32.totalorder %v16605_v20, %v26461_v14  ;;  %v26478_v14 = vld [vmem:[#allocation89_spill] sm:$0xff] }
 0x319   :  { %13774 = vmatprep.mubr.msk.f32.mxu0 %vm5602_vm3, %v26350_v46 }
 0x31b   :  { %13010 = vmatmul.mubr.msk.f32.gmra.mrb[88].mxu1 %vm26453_vm14, %v26350_v46  ;;  %vm26465_vm14 = vcmp.eq.s32.totalorder %v16605_v20, %v26464_v34  ;;  %v26472_v34 = vld [vmem:[#allocation90_spill] sm:$0xff] }
 0x31c   :  { %13012 = vmatprep.mubr.msk.f32.mxu1 %vm1402_vm0, %v26350_v46  ;;  %13775 = vmatmul.mubr.msk.f32.gmra.mrb[86].mxu0 %vm26456_vm12, %v26350_v46  ;;  %vm26468_vm12 = vcmp.eq.s32.totalorder %v16605_v20, %v26467_v47  ;;  %v26476_v47 = vld [vmem:[#allocation356_spill] sm:$0xff] }
 0x31d   :  { %13777 = vmatprep.mubr.msk.f32.mxu0 %vm5604_vm15, %v26350_v46 }
 0x31f   :  { %13013 = vmatmul.mubr.msk.f32.gmra.mrb[90].mxu1 %vm26459_vm6, %v26350_v46  ;;  %vm26471_vm6 = vcmp.eq.s32.totalorder %v16605_v20, %v26470_v38  ;;  %v26480_v38 = vld [vmem:[#allocation125_spill] sm:$0xff] }
 0x320   :  { %13015 = vmatprep.mubr.msk.f32.mxu1 %vm1404_vm1, %v26350_v46  ;;  %13778 = vmatmul.mubr.msk.f32.gmra.mrb[88].mxu0 %vm26462_vm11, %v26350_v46  ;;  %vm26473_vm11 = vcmp.eq.s32.totalorder %v16605_v20, %v26472_v34  ;;  %v26482_v34 = vld [vmem:[#allocation91_spill] sm:$0xff] }
 0x321   :  { %13780 = vmatprep.mubr.msk.f32.mxu0 %vm5606_vm8, %v26350_v46 }
 0x323   :  { %13016 = vmatmul.mubr.msk.f32.gmra.mrb[92].mxu1 %vm26465_vm14, %v26350_v46  ;;  %vm26475_vm14 = vcmp.eq.s32.totalorder %v16605_v20, %v26474_v43  ;;  %v26484_v43 = vld [vmem:[#allocation102_spill] sm:$0xff] }
 0x324   :  { %13018 = vmatprep.mubr.msk.f32.mxu1 %vm1406_vm13, %v26350_v46  ;;  %13781 = vmatmul.mubr.msk.f32.gmra.mrb[90].mxu0 %vm26468_vm12, %v26350_v46  ;;  %vm26477_vm12 = vcmp.eq.s32.totalorder %v16605_v20, %v26476_v47  ;;  %v26486_v47 = vld [vmem:[#allocation109_spill] sm:$0xff] }
 0x325   :  { %13783 = vmatprep.mubr.msk.f32.mxu0 %vm25372_vm4, %v26350_v46  ;;  %vm26479_vm4 = vcmp.eq.s32.totalorder %v16605_v20, %v26478_v14  ;;  %v26488_v14 = vld [vmem:[#allocation144_spill] sm:$0xff] }
 0x327   :  { %13019 = vmatmul.mubr.msk.f32.gmra.mrb[94].mxu1 %vm26471_vm6, %v26350_v46  ;;  %vm26481_vm6 = vcmp.eq.s32.totalorder %v16605_v20, %v26480_v38  ;;  %v26490_v38 = vld [vmem:[#allocation79_spill] sm:$0xff] }
 0x328   :  { %13021 = vmatprep.mubr.msk.f32.mxu1 %vm26473_vm11, %v26350_v46  ;;  %13784 = vmatmul.mubr.msk.f32.gmra.mrb[92].mxu0 %vm26475_vm14, %v26350_v46  ;;  %vm26483_vm11 = vcmp.eq.s32.totalorder %v16605_v20, %v26482_v34  ;;  %vm26485_vm14 = vcmp.eq.s32.totalorder %v16605_v20, %v26484_v43  ;;  %v26492_v34 = vld [vmem:[#allocation128_spill] sm:$0xff]  ;;  %v26494_v43 = vld [vmem:[#allocation126_spill] sm:$0xff] }
 0x329   :  { %13786 = vmatprep.mubr.msk.f32.mxu0 %vm26477_vm12, %v26350_v46  ;;  %vm26487_vm12 = vcmp.eq.s32.totalorder %v16605_v20, %v26486_v47  ;;  %v26496_v47 = vld [vmem:[#allocation172_spill] sm:$0xff] }
 0x32b   :  { %13022 = vmatmul.mubr.msk.f32.gmra.mrb[96].mxu1 %vm26479_vm4, %v26350_v46  ;;  %vm26489_vm4 = vcmp.eq.s32.totalorder %v16605_v20, %v26488_v14  ;;  %v26498_v14 = vld [vmem:[#allocation120_spill] sm:$0xff] }
 0x32c   :  { %13024 = vmatprep.mubr.msk.f32.mxu1 %vm26481_vm6, %v26350_v46  ;;  %13787 = vmatmul.mubr.msk.f32.gmra.mrb[94].mxu0 %vm26483_vm11, %v26350_v46  ;;  %vm26491_vm6 = vcmp.eq.s32.totalorder %v16605_v20, %v26490_v38  ;;  %vm26493_vm11 = vcmp.eq.s32.totalorder %v16605_v20, %v26492_v34  ;;  %v26500_v38 = vld [vmem:[#allocation154_spill] sm:$0xff]  ;;  %v26502_v34 = vld [vmem:[#allocation145_spill] sm:$0xff] }
 0x32d   :  { %13789 = vmatprep.mubr.msk.f32.mxu0 %vm26485_vm14, %v26350_v46  ;;  %vm26495_vm14 = vcmp.eq.s32.totalorder %v16605_v20, %v26494_v43  ;;  %v26504_v43 = vld [vmem:[#allocation61_spill] sm:$0xff] }
 0x32f   :  { %13025 = vmatmul.mubr.msk.f32.gmra.mrb[98].mxu1 %vm26487_vm12, %v26350_v46  ;;  %vm26497_vm12 = vcmp.eq.s32.totalorder %v16605_v20, %v26496_v47  ;;  %v26506_v47 = vld [vmem:[#allocation134_spill] sm:$0xff] }
 0x330   :  { %13027 = vmatprep.mubr.msk.f32.mxu1 %vm26489_vm4, %v26350_v46  ;;  %13790 = vmatmul.mubr.msk.f32.gmra.mrb[96].mxu0 %vm26491_vm6, %v26350_v46  ;;  %vm26499_vm4 = vcmp.eq.s32.totalorder %v16605_v20, %v26498_v14  ;;  %vm26501_vm6 = vcmp.eq.s32.totalorder %v16605_v20, %v26500_v38  ;;  %v26508_v14 = vld [vmem:[#allocation57_spill] sm:$0xff]  ;;  %v26510_v38 = vld [vmem:[#allocation166_spill] sm:$0xff] }
 0x331   :  { %13792 = vmatprep.mubr.msk.f32.mxu0 %vm26493_vm11, %v26350_v46  ;;  %vm26503_vm11 = vcmp.eq.s32.totalorder %v16605_v20, %v26502_v34  ;;  %v26512_v34 = vld [vmem:[#allocation66_spill] sm:$0xff] }
 0x333   :  { %13028 = vmatmul.mubr.msk.f32.gmra.mrb[100].mxu1 %vm26495_vm14, %v26350_v46  ;;  %vm26505_vm14 = vcmp.eq.s32.totalorder %v16605_v20, %v26504_v43  ;;  %v26514_v43 = vld [vmem:[#allocation155_spill] sm:$0xff] }
 0x334   :  { %13030 = vmatprep.mubr.msk.f32.mxu1 %vm26497_vm12, %v26350_v46  ;;  %13793 = vmatmul.mubr.msk.f32.gmra.mrb[98].mxu0 %vm26499_vm4, %v26350_v46  ;;  %vm26507_vm12 = vcmp.eq.s32.totalorder %v16605_v20, %v26506_v47  ;;  %vm26509_vm4 = vcmp.eq.s32.totalorder %v16605_v20, %v26508_v14  ;;  %v26516_v47 = vld [vmem:[#allocation62_spill] sm:$0xff]  ;;  %v26518_v14 = vld [vmem:[#allocation65_spill] sm:$0xff] }
 0x335   :  { %13795 = vmatprep.mubr.msk.f32.mxu0 %vm26501_vm6, %v26350_v46  ;;  %vm26511_vm6 = vcmp.eq.s32.totalorder %v16605_v20, %v26510_v38  ;;  %v26520_v38 = vld [vmem:[#allocation78_spill] sm:$0xff] }
 0x337   :  { %13031 = vmatmul.mubr.msk.f32.gmra.mrb[102].mxu1 %vm26503_vm11, %v26350_v46  ;;  %vm26513_vm11 = vcmp.eq.s32.totalorder %v16605_v20, %v26512_v34  ;;  %v26522_v34 = vld [vmem:[#allocation177_spill] sm:$0xff] }
 0x338   :  { %13033 = vmatprep.mubr.msk.f32.mxu1 %vm26505_vm14, %v26350_v46  ;;  %13796 = vmatmul.mubr.msk.f32.gmra.mrb[100].mxu0 %vm26507_vm12, %v26350_v46  ;;  %vm26515_vm14 = vcmp.eq.s32.totalorder %v16605_v20, %v26514_v43  ;;  %vm26517_vm12 = vcmp.eq.s32.totalorder %v16605_v20, %v26516_v47  ;;  %v26524_v43 = vld [vmem:[#allocation75_spill] sm:$0xff]  ;;  %v26526_v47 = vld [vmem:[#allocation72_spill] sm:$0xff] }
 0x339   :  { %13798 = vmatprep.mubr.msk.f32.mxu0 %vm26509_vm4, %v26350_v46  ;;  %vm26519_vm4 = vcmp.eq.s32.totalorder %v16605_v20, %v26518_v14  ;;  %v26528_v14 = vld [vmem:[#allocation223_spill] sm:$0xff] }
 0x33b   :  { %13034 = vmatmul.mubr.msk.f32.gmra.mrb[104].mxu1 %vm26511_vm6, %v26350_v46  ;;  %vm26521_vm6 = vcmp.eq.s32.totalorder %v16605_v20, %v26520_v38  ;;  %v26530_v38 = vld [vmem:[#allocation70_spill] sm:$0xff] }
 0x33c   :  { %13036 = vmatprep.mubr.msk.f32.mxu1 %vm26513_vm11, %v26350_v46  ;;  %13799 = vmatmul.mubr.msk.f32.gmra.mrb[102].mxu0 %vm26515_vm14, %v26350_v46  ;;  %vm26523_vm11 = vcmp.eq.s32.totalorder %v16605_v20, %v26522_v34  ;;  %vm26525_vm14 = vcmp.eq.s32.totalorder %v16605_v20, %v26524_v43  ;;  %v26532_v34 = vld [vmem:[#allocation215_spill] sm:$0xff]  ;;  %v26534_v43 = vld [vmem:[#allocation80_spill] sm:$0xff] }
 0x33d   :  { %13801 = vmatprep.mubr.msk.f32.mxu0 %vm26517_vm12, %v26350_v46  ;;  %vm26527_vm12 = vcmp.eq.s32.totalorder %v16605_v20, %v26526_v47  ;;  %v26536_v47 = vld [vmem:[#allocation242_spill] sm:$0xff] }
 0x33f   :  { %13037 = vmatmul.mubr.msk.f32.gmra.mrb[106].mxu1 %vm26519_vm4, %v26350_v46  ;;  %vm26529_vm4 = vcmp.eq.s32.totalorder %v16605_v20, %v26528_v14  ;;  %v26538_v14 = vld [vmem:[#allocation77_spill] sm:$0xff] }
 0x340   :  { %13039 = vmatprep.mubr.msk.f32.mxu1 %vm26521_vm6, %v26350_v46  ;;  %13802 = vmatmul.mubr.msk.f32.gmra.mrb[104].mxu0 %vm26523_vm11, %v26350_v46  ;;  %vm26531_vm6 = vcmp.eq.s32.totalorder %v16605_v20, %v26530_v38  ;;  %vm26533_vm11 = vcmp.eq.s32.totalorder %v16605_v20, %v26532_v34  ;;  %v26540_v38 = vld [vmem:[#allocation233_spill] sm:$0xff]  ;;  %v26542_v34 = vld [vmem:[#allocation220_spill] sm:$0xff] }
 0x341   :  { %13804 = vmatprep.mubr.msk.f32.mxu0 %vm26525_vm14, %v26350_v46  ;;  %vm26535_vm14 = vcmp.eq.s32.totalorder %v16605_v20, %v26534_v43  ;;  %v26544_v43 = vld [vmem:[#allocation259_spill] sm:$0xff] }
 0x343   :  { %13040 = vmatmul.mubr.msk.f32.gmra.mrb[108].mxu1 %vm26527_vm12, %v26350_v46  ;;  %vm26537_vm12 = vcmp.eq.s32.totalorder %v16605_v20, %v26536_v47  ;;  %v26546_v47 = vld [vmem:[#allocation211_spill] sm:$0xff] }
 0x344   :  { %13042 = vmatprep.mubr.msk.f32.mxu1 %vm26529_vm4, %v26350_v46  ;;  %13805 = vmatmul.mubr.msk.f32.gmra.mrb[106].mxu0 %vm26531_vm6, %v26350_v46  ;;  %vm26539_vm4 = vcmp.eq.s32.totalorder %v16605_v20, %v26538_v14  ;;  %vm26541_vm6 = vcmp.eq.s32.totalorder %v16605_v20, %v26540_v38  ;;  %v26548_v14 = vld [vmem:[#allocation252_spill] sm:$0xff]  ;;  %v26550_v38 = vld [vmem:[#allocation239_spill] sm:$0xff] }
 0x345   :  { %13807 = vmatprep.mubr.msk.f32.mxu0 %vm26533_vm11, %v26350_v46  ;;  %vm26543_vm11 = vcmp.eq.s32.totalorder %v16605_v20, %v26542_v34  ;;  %v26552_v34 = vld [vmem:[#allocation277_spill] sm:$0xff] }
 0x347   :  { %13043 = vmatmul.mubr.msk.f32.gmra.mrb[110].mxu1 %vm26535_vm14, %v26350_v46  ;;  %vm26545_vm14 = vcmp.eq.s32.totalorder %v16605_v20, %v26544_v43  ;;  %v26554_v43 = vld [vmem:[#allocation229_spill] sm:$0xff] }
 0x348   :  { %13045 = vmatprep.mubr.msk.f32.mxu1 %vm26537_vm12, %v26350_v46  ;;  %13808 = vmatmul.mubr.msk.f32.gmra.mrb[108].mxu0 %vm26539_vm4, %v26350_v46  ;;  %vm26547_vm12 = vcmp.eq.s32.totalorder %v16605_v20, %v26546_v47  ;;  %vm26549_vm4 = vcmp.eq.s32.totalorder %v16605_v20, %v26548_v14  ;;  %v26556_v47 = vld [vmem:[#allocation268_spill] sm:$0xff] }
 0x349   :  { %13810 = vmatprep.mubr.msk.f32.mxu0 %vm26541_vm6, %v26350_v46  ;;  %vm26551_vm6 = vcmp.eq.s32.totalorder %v16605_v20, %v26550_v38  ;;  %v26558_v14 = vld [vmem:[#allocation256_spill] sm:$0xff] }
 0x34a   :  { %v26560_v38 = vld [vmem:[#allocation296_spill] sm:$0xff] }
 0x34b   :  { %13046 = vmatmul.mubr.msk.f32.gmra.mrb[112].mxu1 %vm26543_vm11, %v26350_v46  ;;  %vm26553_vm11 = vcmp.eq.s32.totalorder %v16605_v20, %v26552_v34  ;;  %v26562_v34 = vld [vmem:[#allocation248_spill] sm:$0xff] }
 0x34c   :  { %13048 = vmatprep.mubr.msk.f32.mxu1 %vm26545_vm14, %v26350_v46  ;;  %13811 = vmatmul.mubr.msk.f32.gmra.mrb[110].mxu0 %vm26547_vm12, %v26350_v46  ;;  %vm26555_vm14 = vcmp.eq.s32.totalorder %v16605_v20, %v26554_v43  ;;  %vm26557_vm12 = vcmp.eq.s32.totalorder %v16605_v20, %v26556_v47  ;;  %v26564_v43 = vld [vmem:[#allocation286_spill] sm:$0xff]  ;;  %v26566_v47 = vld [vmem:[#allocation8_spill] sm:$0xff] }
 0x34d   :  { %13813 = vmatprep.mubr.msk.f32.mxu0 %vm26549_vm4, %v26350_v46  ;;  %vm26559_vm4 = vcmp.eq.s32.totalorder %v16605_v20, %v26558_v14  ;;  %v26568_v14 = vld [vmem:[#allocation314_spill] sm:$0xff] }
 0x34f   :  { %13049 = vmatmul.mubr.msk.f32.gmra.mrb[114].mxu1 %vm26551_vm6, %v26350_v46  ;;  %vm26561_vm6 = vcmp.eq.s32.totalorder %v16605_v20, %v26560_v38  ;;  %v26570_v38 = vld [vmem:[#allocation264_spill] sm:$0xff] }
 0x350   :  { %13051 = vmatprep.mubr.msk.f32.mxu1 %vm26553_vm11, %v26350_v46  ;;  %13814 = vmatmul.mubr.msk.f32.gmra.mrb[112].mxu0 %vm26555_vm14, %v26350_v46  ;;  %vm26563_vm11 = vcmp.eq.s32.totalorder %v16605_v20, %v26562_v34  ;;  %vm26565_vm14 = vcmp.eq.s32.totalorder %v16605_v20, %v26564_v43  ;;  %v26572_v34 = vld [vmem:[#allocation305_spill] sm:$0xff]  ;;  %v26574_v43 = vld [vmem:[#allocation292_spill] sm:$0xff] }
 0x351   :  { %13816 = vmatprep.mubr.msk.f32.mxu0 %vm26557_vm12, %v26350_v46  ;;  %vm26567_vm12 = vcmp.eq.s32.totalorder %v16605_v20, %v26566_v47  ;;  %v26576_v47 = vld [vmem:[#allocation331_spill] sm:$0xff] }
 0x353   :  { %13052 = vmatmul.mubr.msk.f32.gmra.mrb[116].mxu1 %vm26559_vm4, %v26350_v46  ;;  %vm26569_vm4 = vcmp.eq.s32.totalorder %v16605_v20, %v26568_v14  ;;  %v26578_v14 = vld [vmem:[#allocation282_spill] sm:$0xff] }
 0x354   :  { %13054 = vmatprep.mubr.msk.f32.mxu1 %vm26561_vm6, %v26350_v46  ;;  %13817 = vmatmul.mubr.msk.f32.gmra.mrb[114].mxu0 %vm26563_vm11, %v26350_v46  ;;  %vm26571_vm6 = vcmp.eq.s32.totalorder %v16605_v20, %v26570_v38  ;;  %vm26573_vm11 = vcmp.eq.s32.totalorder %v16605_v20, %v26572_v34  ;;  %v26580_v38 = vld [vmem:[#allocation322_spill] sm:$0xff]  ;;  %v26582_v34 = vld [vmem:[#allocation315_spill] sm:$0xff] }
 0x355   :  { %13819 = vmatprep.mubr.msk.f32.mxu0 %vm26565_vm14, %v26350_v46  ;;  %vm26575_vm14 = vcmp.eq.s32.totalorder %v16605_v20, %v26574_v43  ;;  %v26584_v43 = vld [vmem:[#allocation342_spill] sm:$0xff] }
 0x357   :  { %13055 = vmatmul.mubr.msk.f32.gmra.mrb[118].mxu1 %vm26567_vm12, %v26350_v46  ;;  %vm26577_vm12 = vcmp.eq.s32.totalorder %v16605_v20, %v26576_v47  ;;  %v26586_v47 = vld [vmem:[#allocation302_spill] sm:$0xff] }
 0x358   :  { %13057 = vmatprep.mubr.msk.f32.mxu1 %vm26569_vm4, %v26350_v46  ;;  %13820 = vmatmul.mubr.msk.f32.gmra.mrb[116].mxu0 %vm26571_vm6, %v26350_v46  ;;  %vm26579_vm4 = vcmp.eq.s32.totalorder %v16605_v20, %v26578_v14  ;;  %vm26581_vm6 = vcmp.eq.s32.totalorder %v16605_v20, %v26580_v38  ;;  %v26588_v14 = vld [vmem:[#allocation306_spill] sm:$0xff]  ;;  %v26590_v38 = vld [vmem:[#allocation336_spill] sm:$0xff] }
 0x359   :  { %13822 = vmatprep.mubr.msk.f32.mxu0 %vm26573_vm11, %v26350_v46  ;;  %vm26583_vm11 = vcmp.eq.s32.totalorder %v16605_v20, %v26582_v34  ;;  %v26592_v34 = vld [vmem:[#allocation353_spill] sm:$0xff] }
 0x35b   :  { %13058 = vmatmul.mubr.msk.f32.gmra.mrb[120].mxu1 %vm26575_vm14, %v26350_v46  ;;  %vm26585_vm14 = vcmp.eq.s32.totalorder %v16605_v20, %v26584_v43  ;;  %v26594_v43 = vld [vmem:[#allocation323_spill] sm:$0xff] }
 0x35c   :  { %13060 = vmatprep.mubr.msk.f32.mxu1 %vm26577_vm12, %v26350_v46  ;;  %13823 = vmatmul.mubr.msk.f32.gmra.mrb[118].mxu0 %vm26579_vm4, %v26350_v46  ;;  %vm26587_vm12 = vcmp.eq.s32.totalorder %v16605_v20, %v26586_v47  ;;  %vm26589_vm4 = vcmp.eq.s32.totalorder %v16605_v20, %v26588_v14  ;;  %v26596_v47 = vld [vmem:[#allocation327_spill] sm:$0xff]  ;;  %v26598_v14 = vld [vmem:[#allocation354_spill] sm:$0xff] }
 0x35d   :  { %13825 = vmatprep.mubr.msk.f32.mxu0 %vm26581_vm6, %v26350_v46  ;;  %vm26591_vm6 = vcmp.eq.s32.totalorder %v16605_v20, %v26590_v38  ;;  %v26600_v38 = vld [vmem:[#allocation88_spill] sm:$0xff] }
 0x35f   :  { %13061 = vmatmul.mubr.msk.f32.gmra.mrb[122].mxu1 %vm26583_vm11, %v26350_v46  ;;  %vm26593_vm11 = vcmp.eq.s32.totalorder %v16605_v20, %v26592_v34  ;;  %v26601_v34 = vld [vmem:[#allocation343_spill] sm:$0xff] }
 0x360   :  { %13063 = vmatprep.mubr.msk.f32.mxu1 %vm26585_vm14, %v26350_v46  ;;  %13826 = vmatmul.mubr.msk.f32.gmra.mrb[120].mxu0 %vm26587_vm12, %v26350_v46  ;;  %vm26595_vm14 = vcmp.eq.s32.totalorder %v16605_v20, %v26594_v43  ;;  %vm26597_vm12 = vcmp.eq.s32.totalorder %v16605_v20, %v26596_v47  ;;  %v26603_v43 = vld [vmem:[#allocation346_spill] sm:$0xff] }
 0x361   :  { %13828 = vmatprep.mubr.msk.f32.mxu0 %vm26589_vm4, %v26350_v46  ;;  %vm26599_vm4 = vcmp.eq.s32.totalorder %v16605_v20, %v26598_v14  ;;  %v26606_v47 = vld [vmem:[#allocation122_spill] sm:$0xff] }
 0x362   :  { %v26607_v14 = vld [vmem:[#allocation358_spill] sm:$0xff] }
 0x363   :  { %13064 = vmatmul.mubr.msk.f32.gmra.mrb[124].mxu1 %vm26591_vm6, %v26350_v46  ;;  %vm26602_vm6 = vcmp.eq.s32.totalorder %v16605_v20, %v26601_v34  ;;  %v26610_v34 = vld [vmem:[#allocation16_spill] sm:$0xff] }
 0x364   :  { %13066 = vmatprep.mubr.msk.f32.mxu1 %vm26593_vm11, %v26350_v46  ;;  %13829 = vmatmul.mubr.msk.f32.gmra.mrb[122].mxu0 %vm26595_vm14, %v26350_v46  ;;  %vm26604_vm11 = vcmp.eq.s32.totalorder %v16605_v20, %v26603_v43  ;;  %vm26608_vm14 = vcmp.eq.s32.totalorder %v16605_v20, %v26607_v14  ;;  %v26613_v43 = vld [vmem:[#allocation117_spill] sm:$0xff]  ;;  %v26616_v14 = vld [vmem:[#allocation163_spill] sm:$0xff]  ;;  %v26617_v20 = vld [vmem:[#allocation22_spill] sm:$0xff] }
 0x365   :  { %13831 = vmatprep.mubr.msk.f32.mxu0 %vm26597_vm12, %v26350_v46 }
 0x367   :  { %13067 = vmatmul.mubr.msk.f32.gmra.mrb[126].mxu1 %vm26599_vm4, %v26350_v46 }
 0x368   :  { %13101 = vmatprep.mubr.f32.mxu1 %v26600_v38  ;;  %13832 = vmatmul.mubr.msk.f32.gmra.mrb[124].mxu0 %vm26602_vm6, %v26350_v46 }
 0x369   :  { %13834 = vmatprep.mubr.msk.f32.mxu0 %vm26604_vm11, %v26350_v46 }
 0x36b   :  { %13102 = vmatmul.mubr.f32.vlgmr.msra.gmra.mrb[64].mxu1 %v26605_v31 }
 0x36c   :  { %13104 = vmatprep.mubr.f32.mxu1 %v26606_v47  ;;  %13835 = vmatmul.mubr.msk.f32.gmra.mrb[126].mxu0 %vm26608_vm14, %v26350_v46  ;;  %v26618_v46 = vld [vmem:[#allocation170_spill] sm:$0xff] }
 0x36d   :  { %13869 = vmatprep.mubr.f32.mxu0 %v26609_v59  ;;  %14456 = vmatpush3.bf16.msra.mxu1 %v26426_v13  ;;  %v26619_v13 = vld [vmem:[#allocation118_spill] sm:$0xff] }
 0x36e   :  { %14458 = vmatprep.subr.bf16.mxu1 %v26610_v34 }
 0x36f   :  { %13105 = vmatmul.mubr.f32.gmra.mrb[66].mxu1 %v26611_v60 }
 0x370   :  { %13107 = vmatprep.mubr.f32.mxu1 %v26612_v50  ;;  %13870 = vmatmul.mubr.f32.vlgmr.msra.gmra.mrb[64].mxu0 %v26613_v43 }
 0x371   :  { %14648 = vmatpush3.bf16.msra.mxu0 %v26432_v30  ;;  %13872 = vmatprep.mubr.f32.mxu0 %v26614_v9  ;;  %v26622_v30 = vld [vmem:[#allocation143_spill] sm:$0xff] }
 0x372   :  { %14650 = vmatprep.subr.bf16.mxu0 %v26615_v44  ;;  %14460 = vmatpush3.bf16.msra.mxu1 %v26610_v34  ;;  %v26624_v34 = vld [vmem:[#allocation184_spill] sm:$0xff] }
 0x373   :  { %13108 = vmatmul.mubr.f32.gmra.mrb[68].mxu1 %v26616_v14  ;;  %14462 = vmatprep.subr.bf16.mxu1 %v26617_v20 }
 0x374   :  { %13110 = vmatprep.mubr.f32.mxu1 %v26618_v46  ;;  %13873 = vmatmul.mubr.f32.gmra.mrb[66].mxu0 %v26619_v13 }
 0x375   :  { %13875 = vmatprep.mubr.f32.mxu0 %v26620_v36  ;;  %14652 = vmatpush3.bf16.msra.mxu0 %v26615_v44  ;;  %v26628_v44 = vld [vmem:[#allocation164_spill] sm:$0xff] }
 0x376   :  { %14654 = vmatprep.subr.bf16.mxu0 %v26621_v7  ;;  %14464 = vmatpush3.bf16.msra.mxu1 %v26617_v20  ;;  %v26630_v20 = vld [vmem:[#allocation195_spill] sm:$0xff] }
 0x377   :  { %13111 = vmatmul.mubr.f32.gmra.mrb[70].mxu1 %v26622_v30  ;;  %14466 = vmatprep.subr.bf16.mxu1 %v26623_v51  ;;  %v26632_v30 = vld [vmem:[#allocation190_spill] sm:$0xff] }
 0x378   :  { %13113 = vmatprep.mubr.f32.mxu1 %v26624_v34  ;;  %13876 = vmatmul.mubr.f32.gmra.mrb[68].mxu0 %v26625_v40  ;;  %v26633_v40 = vld [vmem:[#allocation41_spill] sm:$0xff] }
 0x379   :  { %13878 = vmatprep.mubr.f32.mxu0 %v26626_v25  ;;  %14656 = vmatpush3.bf16.msra.mxu0 %v26621_v7  ;;  %v26634_v7 = vld [vmem:[#allocation183_spill] sm:$0xff]  ;;  %v26635_v25 = vld [vmem:[#allocation40_spill] sm:$0xff]  ;;  %v26638_v34 = vld [vmem:[#allocation201_spill] sm:$0xff] }
 0x37a   :  { %14658 = vmatprep.subr.bf16.mxu0 %v26627_v26  ;;  %14468 = vmatpush3.bf16.msra.mxu1 %v26623_v51  ;;  %v26636_v51 = vld [vmem:[#allocation206_spill] sm:$0xff] }
 0x37b   :  { %13114 = vmatmul.mubr.f32.gmra.mrb[72].mxu1 %v26628_v44  ;;  %14470 = vmatprep.subr.bf16.mxu1 %v26629_v49  ;;  %v26637_v44 = vld [vmem:[#allocation175_spill] sm:$0xff] }
 0x37c   :  { %13116 = vmatprep.mubr.f32.mxu1 %v26630_v20  ;;  %13879 = vmatmul.mubr.f32.gmra.mrb[70].mxu0 %v26631_v24  ;;  %v26639_v24 = vld [vmem:[#allocation47_spill] sm:$0xff]  ;;  %v26644_v20 = vld [vmem:[#allocation213_spill] sm:$0xff] }
 0x37d   :  { %13881 = vmatprep.mubr.f32.mxu0 %v26632_v30  ;;  %14660 = vmatpush3.bf16.msra.mxu0 %v26627_v26  ;;  %v26640_v26 = vld [vmem:[#allocation193_spill] sm:$0xff]  ;;  %v26641_v30 = vld [vmem:[#allocation46_spill] sm:$0xff] }
 0x37e   :  { %14662 = vmatprep.subr.bf16.mxu0 %v26633_v40  ;;  %14472 = vmatpush3.bf16.msra.mxu1 %v26629_v49  ;;  %v26642_v49 = vld [vmem:[#allocation221_spill] sm:$0xff] }
 0x37f   :  { %13117 = vmatmul.mubr.f32.gmra.mrb[74].mxu1 %v26634_v7  ;;  %14474 = vmatprep.subr.bf16.mxu1 %v26635_v25  ;;  %v26643_v7 = vld [vmem:[#allocation188_spill] sm:$0xff] }
 0x380   :  { %13119 = vmatprep.mubr.f32.mxu1 %v26636_v51  ;;  %13882 = vmatmul.mubr.f32.gmra.mrb[72].mxu0 %v26637_v44  ;;  %v26645_v44 = vld [vmem:[#allocation53_spill] sm:$0xff]  ;;  %v26650_v51 = vld [vmem:[#allocation231_spill] sm:$0xff] }
 0x381   :  { %13884 = vmatprep.mubr.f32.mxu0 %v26638_v34  ;;  %14664 = vmatpush3.bf16.msra.mxu0 %v26633_v40  ;;  %v26646_v40 = vld [vmem:[#allocation205_spill] sm:$0xff]  ;;  %v26647_v34 = vld [vmem:[#allocation52_spill] sm:$0xff] }
 0x382   :  { %14666 = vmatprep.subr.bf16.mxu0 %v26639_v24  ;;  %14476 = vmatpush3.bf16.msra.mxu1 %v26635_v25  ;;  %v26648_v25 = vld [vmem:[#allocation240_spill] sm:$0xff] }
 0x383   :  { %13120 = vmatmul.mubr.f32.gmra.mrb[76].mxu1 %v26640_v26  ;;  %14478 = vmatprep.subr.bf16.mxu1 %v26641_v30  ;;  %v26649_v26 = vld [vmem:[#allocation199_spill] sm:$0xff] }
 0x384   :  { %13122 = vmatprep.mubr.f32.mxu1 %v26642_v49  ;;  %13885 = vmatmul.mubr.f32.gmra.mrb[74].mxu0 %v26643_v7  ;;  %v26651_v7 = vld [vmem:[#allocation56_spill] sm:$0xff] }
 0x385   :  { %13887 = vmatprep.mubr.f32.mxu0 %v26644_v20  ;;  %14668 = vmatpush3.bf16.msra.mxu0 %v26639_v24  ;;  %v26652_v24 = vand.u32 4294901760, %v26343_v54  ;;  %v26661_v54 = vld [vmem:[#allocation274_spill] sm:$0xff] }
 0x386   :  { %14670 = vmatprep.subr.bf16.mxu0 %v26645_v44  ;;  %14480 = vmatpush3.bf16.msra.mxu1 %v26641_v30  ;;  %v26653_v30 = vand.u32 4294901760, %v26344_v12  ;;  %v26660_v12 = vld [vmem:[#allocation237_spill] sm:$0xff] }
 0x387   :  { %13123 = vmatmul.mubr.f32.gmra.mrb[78].mxu1 %v26646_v40  ;;  %14482 = vmatprep.subr.bf16.mxu1 %v26647_v34  ;;  %v26654_v40 = vld [vmem:[#allocation218_spill] sm:$0xff] }
 0x388   :  { %13125 = vmatprep.mubr.f32.mxu1 %v26648_v25  ;;  %13888 = vmatmul.mubr.f32.gmra.mrb[76].mxu0 %v26649_v26  ;;  %v21189_v20 = vpack.c.bf16 %v26653_v30, %v26652_v24  ;;  %v26655_v25 = vand.u32 4294901760, %v26346_v56  ;;  %v26656_v26 = vand.u32 4294901760, %v26347_v8  ;;  %v26662_v56 = vld [vmem:[#allocation227_spill] sm:$0xff]  ;;  %v26665_v8 = vld [vmem:[#allocation293_spill] sm:$0xff]  ;;  %v26666_v24 = vld [vmem:[#allocation246_spill] sm:$0xff] }
 0x389   :  { %13890 = vmatprep.mubr.f32.mxu0 %v26650_v51  ;;  %14672 = vmatpush3.bf16.msra.mxu0 %v26645_v44  ;;  %v26657_v51 = vld [vmem:[#allocation257_spill] sm:$0xff]  ;;  %v26658_v44 = vld [vmem:[#allocation210_spill] sm:$0xff]  ;;  %v26667_v30 = vld [vmem:[#allocation283_spill] sm:$0xff] }
 0x38a   :  { %14674 = vmatprep.subr.bf16.mxu0 %v26651_v7  ;;  %14484 = vmatpush3.bf16.msra.mxu1 %v26647_v34  ;;  %v21196_v49 = vpack.c.bf16 %v26656_v26, %v26655_v25  ;;  %v26663_v26 = vld [vmem:[#allocation265_spill] sm:$0xff]  ;;  %v26664_v25 = vld [vmem:[#allocation254_spill] sm:$0xff]  ;;  %v26669_v34 = vld [vmem:[#allocation312_spill] sm:$0xff] }
 0x38b   :  { %13126 = vmatmul.mubr.f32.gmra.mrb[80].mxu1 %v26654_v40 }
 0x38c   :  { %13128 = vmatprep.mubr.f32.mxu1 %v26657_v51  ;;  %13891 = vmatmul.mubr.f32.gmra.mrb[78].mxu0 %v26658_v44 }
 0x38d   :  { %13893 = vmatprep.mubr.f32.mxu0 %v26659_v32  ;;  %14676 = vmatpush3.bf16.msra.mxu0 %v26651_v7  ;;  %v26668_v7 = vld [vmem:[#allocation272_spill] sm:$0xff]  ;;  %v26670_v32 = vld [vmem:[#allocation262_spill] sm:$0xff] }
 0x38e   :  { %14678 = vmatprep.subr.bf16.mxu0 %v21189_v20  ;;  %14486 = vmatprep.subr.bf16.mxu1 %v21196_v49 }
 0x38f   :  { %13129 = vmatmul.mubr.f32.gmra.mrb[82].mxu1 %v26660_v12  ;;  %v26671_v12 = vld [vmem:[#allocation303_spill] sm:$0xff] }
 0x390   :  { %13131 = vmatprep.mubr.f32.mxu1 %v26661_v54  ;;  %13894 = vmatmul.mubr.f32.gmra.mrb[80].mxu0 %v26662_v56  ;;  %v26672_v54 = vld [vmem:[#allocation290_spill] sm:$0xff]  ;;  %v26673_v56 = vld [vmem:[#allocation328_spill] sm:$0xff] }
 0x391   :  { %13896 = vmatprep.mubr.f32.mxu0 %v26663_v26  ;;  %v26674_v26 = vld [vmem:[#allocation280_spill] sm:$0xff] }
 0x393   :  { %13132 = vmatmul.mubr.f32.gmra.mrb[84].mxu1 %v26664_v25  ;;  %v26675_v25 = vld [vmem:[#allocation320_spill] sm:$0xff] }
 0x394   :  { %13134 = vmatprep.mubr.f32.mxu1 %v26665_v8  ;;  %13897 = vmatmul.mubr.f32.gmra.mrb[82].mxu0 %v26666_v24  ;;  %v26676_v8 = vld [vmem:[#allocation313_spill] sm:$0xff]  ;;  %v26677_v24 = vld [vmem:[#allocation340_spill] sm:$0xff] }
 0x395   :  { %13899 = vmatprep.mubr.f32.mxu0 %v26667_v30  ;;  %v26678_v30 = vld [vmem:[#allocation300_spill] sm:$0xff] }
 0x397   :  { %13135 = vmatmul.mubr.f32.gmra.mrb[86].mxu1 %v26668_v7  ;;  %v26679_v7 = vld [vmem:[#allocation24_spill] sm:$0xff] }
 0x398   :  { %13137 = vmatprep.mubr.f32.mxu1 %v26669_v34  ;;  %13900 = vmatmul.mubr.f32.gmra.mrb[84].mxu0 %v26670_v32  ;;  %v26680_v34 = vld [vmem:[#allocation334_spill] sm:$0xff]  ;;  %v26681_v32 = vld [vmem:[#allocation351_spill] sm:$0xff] }
 0x399   :  { %13902 = vmatprep.mubr.f32.mxu0 %v26671_v12  ;;  %v26682_v12 = vld [vmem:[#allocation321_spill] sm:$0xff] }
 0x39b   :  { %13138 = vmatmul.mubr.f32.gmra.mrb[88].mxu1 %v26672_v54  ;;  %v26683_v54 = vld [vmem:[#allocation347_spill] sm:$0xff] }
 0x39c   :  { %13140 = vmatprep.mubr.f32.mxu1 %v26673_v56  ;;  %13903 = vmatmul.mubr.f32.gmra.mrb[86].mxu0 %v26674_v26  ;;  %v26684_v56 = vld [vmem:[#allocation352_spill] sm:$0xff]  ;;  %v26685_v26 = vld [vmem:[#allocation93_spill] sm:$0xff] }
 0x39d   :  { %13905 = vmatprep.mubr.f32.mxu0 %v26675_v25  ;;  %v26686_v25 = vld [vmem:[#allocation341_spill] sm:$0xff] }
 0x39f   :  { %13141 = vmatmul.mubr.f32.gmra.mrb[90].mxu1 %v26676_v8  ;;  %v26687_v8 = vld [vmem:[#allocation357_spill] sm:$0xff] }
 0x3a0   :  { %13143 = vmatprep.mubr.f32.mxu1 %v26677_v24  ;;  %13906 = vmatmul.mubr.f32.gmra.mrb[88].mxu0 %v26678_v30  ;;  %v26688_v24 = vld [vmem:[#allocation96_spill] sm:$0xff]  ;;  %v26689_v30 = vld [vmem:[#allocation85_spill] sm:$0xff] }
 0x3a1   :  { %13908 = vmatprep.mubr.f32.mxu0 %v26679_v7  ;;  %v26690_v7 = vld [vmem:[#allocation111_spill] sm:$0xff] }
 0x3a3   :  { %13144 = vmatmul.mubr.f32.gmra.mrb[92].mxu1 %v26680_v34  ;;  %v26691_v34 = vld [vmem:[#allocation107_spill] sm:$0xff] }
 0x3a4   :  { %13146 = vmatprep.mubr.f32.mxu1 %v26681_v32  ;;  %13909 = vmatmul.mubr.f32.gmra.mrb[90].mxu0 %v26682_v12  ;;  %v26692_v32 = vld [vmem:[#allocation113_spill] sm:$0xff]  ;;  %v26693_v12 = vld [vmem:[#allocation147_spill] sm:$0xff] }
 0x3a5   :  { %13911 = vmatprep.mubr.f32.mxu0 %v26683_v54  ;;  %v26694_v54 = vld [vmem:[#allocation101_spill] sm:$0xff] }
 0x3a7   :  { %13147 = vmatmul.mubr.f32.gmra.mrb[94].mxu1 %v26684_v56  ;;  %v26695_v56 = vld [vmem:[#allocation132_spill] sm:$0xff] }
 0x3a8   :  { %13149 = vmatprep.mubr.f32.mxu1 %v26685_v26  ;;  %13912 = vmatmul.mubr.f32.gmra.mrb[92].mxu0 %v26686_v25  ;;  %v26696_v26 = vld [vmem:[#allocation127_spill] sm:$0xff]  ;;  %v26697_v25 = vld [vmem:[#allocation174_spill] sm:$0xff] }
 0x3a9   :  { %13914 = vmatprep.mubr.f32.mxu0 %v26687_v8  ;;  %v26698_v8 = vld [vmem:[#allocation124_spill] sm:$0xff] }
 0x3ab   :  { %13150 = vmatmul.mubr.f32.gmra.mrb[96].mxu1 %v26688_v24  ;;  %v26699_v24 = vld [vmem:[#allocation158_spill] sm:$0xff] }
 0x3ac   :  { %13152 = vmatprep.mubr.f32.mxu1 %v26689_v30  ;;  %13915 = vmatmul.mubr.f32.gmra.mrb[94].mxu0 %v26690_v7  ;;  %v26700_v30 = vld [vmem:[#allocation148_spill] sm:$0xff]  ;;  %v26701_v7 = vld [vmem:[#allocation187_spill] sm:$0xff] }
 0x3ad   :  { %13917 = vmatprep.mubr.f32.mxu0 %v26691_v34  ;;  %v26702_v34 = vld [vmem:[#allocation138_spill] sm:$0xff] }
 0x3af   :  { %13153 = vmatmul.mubr.f32.gmra.mrb[98].mxu1 %v26692_v32  ;;  %v26703_v32 = vld [vmem:[#allocation182_spill] sm:$0xff] }
 0x3b0   :  { %13155 = vmatprep.mubr.f32.mxu1 %v26693_v12  ;;  %13918 = vmatmul.mubr.f32.gmra.mrb[96].mxu0 %v26694_v54  ;;  %v26704_v12 = vld [vmem:[#allocation171_spill] sm:$0xff]  ;;  %v26705_v54 = vld [vmem:[#allocation198_spill] sm:$0xff] }
 0x3b1   :  { %13920 = vmatprep.mubr.f32.mxu0 %v26695_v56  ;;  %v26706_v56 = vld [vmem:[#allocation159_spill] sm:$0xff] }
 0x3b3   :  { %13156 = vmatmul.mubr.f32.gmra.mrb[100].mxu1 %v26696_v26  ;;  %v26707_v26 = vld [vmem:[#allocation192_spill] sm:$0xff] }
 0x3b4   :  { %13158 = vmatprep.mubr.f32.mxu1 %v26697_v25  ;;  %13921 = vmatmul.mubr.f32.gmra.mrb[98].mxu0 %v26698_v8  ;;  %v26708_v25 = vld [vmem:[#allocation185_spill] sm:$0xff] }
 0x3b5   :  { %13923 = vmatprep.mubr.f32.mxu0 %v26699_v24  ;;  %v26709_v8 = vld [vmem:[#allocation209_spill] sm:$0xff]  ;;  %v26710_v24 = vld [vmem:[#allocation180_spill] sm:$0xff] }
 0x3b7   :  { %13159 = vmatmul.mubr.f32.gmra.mrb[102].mxu1 %v26700_v30 }
 0x3b8   :  { %13161 = vmatprep.mubr.f32.mxu1 %v26701_v7  ;;  %13924 = vmatmul.mubr.f32.gmra.mrb[100].mxu0 %v26702_v34  ;;  %v26711_v7 = vld [vmem:[#allocation196_spill] sm:$0xff]  ;;  %v26712_v34 = vld [vmem:[#allocation226_spill] sm:$0xff] }
 0x3b9   :  { %13926 = vmatprep.mubr.f32.mxu0 %v26703_v32 }
 0x3bb   :  { %13162 = vmatmul.mubr.f32.gmra.mrb[104].mxu1 %v26704_v12 }
 0x3bc   :  { %13164 = vmatprep.mubr.f32.mxu1 %v26705_v54  ;;  %13927 = vmatmul.mubr.f32.gmra.mrb[102].mxu0 %v26706_v56  ;;  %v26713_v54 = vld [vmem:[#allocation207_spill] sm:$0xff] }
 0x3bd   :  { %13929 = vmatprep.mubr.f32.mxu0 %v26707_v26 }
 0x3bf   :  { %13165 = vmatmul.mubr.f32.gmra.mrb[106].mxu1 %v26708_v25 }
 0x3c0   :  { %13167 = vmatprep.mubr.f32.mxu1 %v26709_v8  ;;  %13930 = vmatmul.mubr.f32.gmra.mrb[104].mxu0 %v26710_v24  ;;  %v26714_v8 = vld [vmem:[#allocation222_spill] sm:$0xff]  ;;  %v26715_v24 = vld [vmem:[#allocation261_spill] sm:$0xff] }
 0x3c1   :  { %13932 = vmatprep.mubr.f32.mxu0 %v26250_v35 }
 0x3c3   :  { %13168 = vmatmul.mubr.f32.gmra.mrb[108].mxu1 %v26711_v7 }
 0x3c4   :  { %13170 = vmatprep.mubr.f32.mxu1 %v26712_v34  ;;  %13933 = vmatmul.mubr.f32.gmra.mrb[106].mxu0 %v26255_v18  ;;  %v26716_v34 = vld [vmem:[#allocation241_spill] sm:$0xff]  ;;  %v26717_v18 = vld [vmem:[#allocation279_spill] sm:$0xff] }
 0x3c5   :  { %13935 = vmatprep.mubr.f32.mxu0 %v26260_v10 }
 0x3c7   :  { %13171 = vmatmul.mubr.f32.gmra.mrb[110].mxu1 %v26713_v54 }
 0x3c8   :  { %13173 = vmatprep.mubr.f32.mxu1 %v26256_v3  ;;  %13936 = vmatmul.mubr.f32.gmra.mrb[108].mxu0 %v26264_v6  ;;  %v26718_v3 = vld [vmem:[#allocation258_spill] sm:$0xff] }
 0x3c9   :  { %13938 = vmatprep.mubr.f32.mxu0 %v26276_v33 }
 0x3cb   :  { %13174 = vmatmul.mubr.f32.gmra.mrb[112].mxu1 %v26714_v8 }
 0x3cc   :  { %13176 = vmatprep.mubr.f32.mxu1 %v26715_v24  ;;  %13939 = vmatmul.mubr.f32.gmra.mrb[110].mxu0 %v26280_v22 }
 0x3cd   :  { %13941 = vmatprep.mubr.f32.mxu0 %v18840_v19 }
 0x3cf   :  { %13177 = vmatmul.mubr.f32.gmra.mrb[114].mxu1 %v26716_v34 }
 0x3d0   :  { %13179 = vmatprep.mubr.f32.mxu1 %v26717_v18  ;;  %13942 = vmatmul.mubr.f32.gmra.mrb[112].mxu0 %v26291_v23 }
 0x3d1   :  { %13944 = vmatprep.mubr.f32.mxu0 %v26295_v11 }
 0x3d3   :  { %13180 = vmatmul.mubr.f32.gmra.mrb[116].mxu1 %v26718_v3 }
 0x3d4   :  { %13182 = vmatprep.mubr.f32.mxu1 %v26294_v48  ;;  %13945 = vmatmul.mubr.f32.gmra.mrb[114].mxu0 %v26300_v57 }
 0x3d5   :  { %13947 = vmatprep.mubr.f32.mxu0 %v26301_v4 }
 0x3d7   :  { %13183 = vmatmul.mubr.f32.gmra.mrb[118].mxu1 %v26299_v42  ;;  %v26719_v42 = vld [vmem:[#allocation309_spill] sm:$0xff] }
 0x3d8   :  { %13185 = vmatprep.mubr.f32.mxu1 %v19553_v5  ;;  %13948 = vmatmul.mubr.f32.gmra.mrb[116].mxu0 %v26310_v0  ;;  %v26720_v5 = vld [vmem:[#allocation337_spill] sm:$0xff]  ;;  %v26721_v0 = vld [vmem:[#allocation92_spill] sm:$0xff] }
 0x3d9   :  { %13950 = vmatprep.mubr.f32.mxu0 %v26311_v53  ;;  %v26722_v53 = vld [vmem:[#allocation325_spill] sm:$0xff] }
 0x3db   :  { %13186 = vmatmul.mubr.f32.gmra.mrb[120].mxu1 %v26302_v2  ;;  %v26723_v2 = vld [vmem:[#allocation330_spill] sm:$0xff] }
 0x3dc   :  { %13188 = vmatprep.mubr.f32.mxu1 %v19754_v1  ;;  %13951 = vmatmul.mubr.f32.gmra.mrb[118].mxu0 %v26314_v52  ;;  %v26724_v1 = vld [vmem:[#allocation355_spill] sm:$0xff] }
 0x3dd   :  { %13953 = vmatprep.mubr.f32.mxu0 %v19654_v17  ;;  %v26725_v17 = vand.u32 4294901760, %v26600_v38  ;;  %v26731_v38 = vand.u32 4294901760, %v26609_v59 }
 0x3df   :  { %13189 = vmatmul.mubr.f32.gmra.mrb[122].mxu1 %v26312_v16  ;;  %v26726_v16 = vld [vmem:[#allocation344_spill] sm:$0xff] }
 0x3e0   :  { %13191 = vmatprep.mubr.f32.mxu1 %v19883_v28  ;;  %13954 = vmatmul.mubr.f32.gmra.mrb[120].mxu0 %v26329_v63  ;;  %v26727_v63 = vand.u32 4294901760, %v26348_v39  ;;  %v26733_v39 = vand.u32 4294901760, %v26358_v61  ;;  %v26741_v61 = vand.u32 4294901760, %v26370_v58 }
 0x3e1   :  { %13956 = vmatprep.mubr.f32.mxu0 %v26719_v42  ;;  %v26728_v42 = vand.u32 4294901760, %v26349_v15  ;;  %v26737_v15 = vand.u32 4294901760, %v26612_v50  ;;  %v26744_v50 = vand.u32 4294901760, %v26373_v27 }
 0x3e3   :  { %13192 = vmatmul.mubr.f32.gmra.mrb[124].mxu1 %v26720_v5  ;;  %v14489_v5 = vpack.c.bf16 %v26728_v42, %v26727_v63  ;;  %v26734_v42 = vand.u32 4294901760, %v26611_v60  ;;  %v26740_v60 = vand.u32 4294901760, %v26369_v37  ;;  %v26747_v37 = vand.u32 4294901760, %v26620_v36 }
 0x3e4   :  { %13194 = vmatprep.mubr.f32.mxu1 %v26721_v0  ;;  %13957 = vmatmul.mubr.f32.gmra.mrb[122].mxu0 %v26722_v53  ;;  %v26729_v0 = vand.u32 4294901760, %v26605_v31  ;;  %v26730_v53 = vand.u32 4294901760, %v26606_v47  ;;  %v26738_v31 = vand.u32 4294901760, %v26613_v43  ;;  %v26750_v47 = vld [vmem:[#allocation33_spill] sm:$0xff] }
 0x3e5   :  { %13959 = vmatprep.mubr.f32.mxu0 %v26723_v2  ;;  %v26751_v43 = vand.u32 4294901760, %v26750_v47 }
 0x3e7   :  { %13195 = vmatmul.mubr.f32.gmra.mrb[126].mxu1 %v26724_v1 }
 0x3e8   :  { %13229 = vmatprep.mubr.f32.mxu1 %v26725_v17  ;;  %13960 = vmatmul.mubr.f32.gmra.mrb[124].mxu0 %v26726_v16  ;;  %v26732_v17 = vand.u32 4294901760, %v26357_v29  ;;  %v26739_v29 = vand.u32 4294901760, %v26614_v9  ;;  %v26746_v9 = vand.u32 4294901760, %v26619_v13 }
 0x3e9   :  { %13962 = vmatprep.mubr.f32.mxu0 %v26340_v21 }
 0x3ea   :  { %v14681_v21 = vpack.c.bf16 %v26733_v39, %v26732_v17  ;;  %v26756_v17 = vld [vmem:[#allocation110_spill] sm:$0xff] }
 0x3eb   :  { %13230 = vmatmul.mubr.f32.vlgmr.msra.gmra.mrb[64].mxu1 %v26729_v0  ;;  %v26735_v0 = vand.u32 4294901760, %v26361_v41  ;;  %v14685_v41 = vpack.c.bf16 %v26741_v61, %v26740_v60  ;;  %v26757_v13 = vand.u32 4294901760, %v26756_v17 }
 0x3ec   :  { %13232 = vmatprep.mubr.f32.mxu1 %v26730_v53  ;;  %13963 = vmatmul.mubr.f32.gmra.mrb[126].mxu0 %v20072_v45  ;;  %v26736_v53 = vand.u32 4294901760, %v26362_v62  ;;  %v26742_v62 = vand.u32 4294901760, %v26616_v14 }
 0x3ed   :  { %13997 = vmatprep.mubr.f32.mxu0 %v26731_v38  ;;  %14488 = vmatpush3.bf16.msra.mxu1 %v21196_v49  ;;  %v26743_v49 = vand.u32 4294901760, %v19792_v55  ;;  %v26752_v55 = vld [vmem:[#allocation143_spill] sm:$0xff] }
 0x3ee   :  { %14490 = vmatprep.subr.bf16.mxu1 %v14489_v5  ;;  %v14493_v63 = vpack.c.bf16 %v26736_v53, %v26735_v0  ;;  %v26753_v27 = vand.u32 4294901760, %v26752_v55  ;;  %v26762_v53 = vld [vmem:[#allocation179_spill] sm:$0xff]  ;;  %v26778_v55 = vld [vmem:[#allocation190_spill] sm:$0xff] }
 0x3ef   :  { %13233 = vmatmul.mubr.f32.gmra.mrb[66].mxu1 %v26734_v42  ;;  %v14497_v59 = vpack.c.bf16 %v26744_v50, %v26743_v49  ;;  %v26758_v42 = vld [vmem:[#allocation184_spill] sm:$0xff] }
 0x3f0   :  { %13235 = vmatprep.mubr.f32.mxu1 %v26737_v15  ;;  %13998 = vmatmul.mubr.f32.vlgmr.msra.gmra.mrb[64].mxu0 %v26738_v31  ;;  %v26759_v36 = vand.u32 4294901760, %v26758_v42  ;;  %v26763_v15 = vand.u32 4294901760, %v26762_v53  ;;  %v26770_v50 = vld [vmem:[#allocation136_spill] sm:$0xff]  ;;  %v26784_v42 = vld [vmem:[#allocation183_spill] sm:$0xff]  ;;  %v26788_v53 = vld [vmem:[#allocation169_spill] sm:$0xff] }
 0x3f1   :  { %14680 = vmatpush3.bf16.msra.mxu0 %v21189_v20  ;;  %14000 = vmatprep.mubr.f32.mxu0 %v26739_v29  ;;  %v26745_v20 = vand.u32 4294901760, %v26618_v46  ;;  %v26754_v46 = vld [vmem:[#allocation25_spill] sm:$0xff]  ;;  %v26766_v29 = vld [vmem:[#allocation39_spill] sm:$0xff] }
 0x3f2   :  { %14682 = vmatprep.subr.bf16.mxu0 %v14681_v21  ;;  %14492 = vmatpush3.bf16.msra.mxu1 %v14489_v5  ;;  %v26748_v5 = vld [vmem:[#allocation32_spill] sm:$0xff]  ;;  %v26755_v38 = vand.u32 4294901760, %v26754_v46  ;;  %v26767_v60 = vand.u32 4294901760, %v26766_v29 }
 0x3f3   :  { %13236 = vmatmul.mubr.f32.gmra.mrb[68].mxu1 %v26742_v62  ;;  %14494 = vmatprep.subr.bf16.mxu1 %v14493_v63  ;;  %v26749_v58 = vand.u32 4294901760, %v26748_v5  ;;  %v26768_v62 = vld [vmem:[#allocation164_spill] sm:$0xff] }
 0x3f4   :  { %13238 = vmatprep.mubr.f32.mxu1 %v26745_v20  ;;  %14001 = vmatmul.mubr.f32.gmra.mrb[66].mxu0 %v26746_v9  ;;  %v14501_v39 = vpack.c.bf16 %v26757_v13, %v26755_v38  ;;  %v26769_v49 = vand.u32 4294901760, %v26768_v62  ;;  %v26771_v20 = vand.u32 4294901760, %v26770_v50  ;;  %v26772_v9 = vld [vmem:[#allocation186_spill] sm:$0xff]  ;;  %v26782_v38 = vld [vmem:[#allocation104_spill] sm:$0xff]  ;;  %v26794_v62 = vld [vmem:[#allocation201_spill] sm:$0xff] }
 0x3f5   :  { %14003 = vmatprep.mubr.f32.mxu0 %v26747_v37  ;;  %14684 = vmatpush3.bf16.msra.mxu0 %v14681_v21  ;;  %v14689_v14 = vpack.c.bf16 %v26751_v43, %v26749_v58  ;;  %v26760_v21 = vld [vmem:[#allocation131_spill] sm:$0xff]  ;;  %v26773_v37 = vand.u32 4294901760, %v26772_v9  ;;  %v26783_v17 = vand.u32 4294901760, %v26782_v38 }
 0x3f6   :  { %14686 = vmatprep.subr.bf16.mxu0 %v14685_v41  ;;  %14496 = vmatpush3.bf16.msra.mxu1 %v14493_v63  ;;  %v26761_v0 = vand.u32 4294901760, %v26760_v21  ;;  %v26764_v63 = vld [vmem:[#allocation38_spill] sm:$0xff]  ;;  %v26774_v58 = vld [vmem:[#allocation195_spill] sm:$0xff] }
 0x3f7   :  { %13239 = vmatmul.mubr.f32.gmra.mrb[70].mxu1 %v26753_v27  ;;  %14498 = vmatprep.subr.bf16.mxu1 %v14497_v59  ;;  %v26765_v31 = vand.u32 4294901760, %v26764_v63  ;;  %v14505_v5 = vpack.c.bf16 %v26773_v37, %v26771_v20  ;;  %v26775_v47 = vand.u32 4294901760, %v26774_v58  ;;  %v26779_v27 = vand.u32 4294901760, %v26778_v55  ;;  %v26786_v21 = vld [vmem:[#allocation130_spill] sm:$0xff]  ;;  %v26798_v20 = vld [vmem:[#allocation123_spill] sm:$0xff]  ;;  %v26800_v58 = vld [vmem:[#allocation193_spill] sm:$0xff] }
 0x3f8   :  { %13241 = vmatprep.mubr.f32.mxu1 %v26759_v36  ;;  %14004 = vmatmul.mubr.f32.gmra.mrb[68].mxu0 %v26761_v0  ;;  %v26785_v36 = vand.u32 4294901760, %v26784_v42  ;;  %v26787_v0 = vand.u32 4294901760, %v26786_v21  ;;  %v26799_v9 = vand.u32 4294901760, %v26798_v20  ;;  %v26804_v55 = vld [vmem:[#allocation162_spill] sm:$0xff]  ;;  %v26810_v42 = vld [vmem:[#allocation213_spill] sm:$0xff]  ;;  %v26826_v20 = vand.u32 4294901760, %v26657_v51 }
 0x3f9   :  { %14006 = vmatprep.mubr.f32.mxu0 %v26763_v15  ;;  %14688 = vmatpush3.bf16.msra.mxu0 %v14685_v41  ;;  %v14693_v61 = vpack.c.bf16 %v26767_v60, %v26765_v31  ;;  %v26776_v41 = vld [vmem:[#allocation153_spill] sm:$0xff]  ;;  %v26789_v15 = vand.u32 4294901760, %v26788_v53  ;;  %v26790_v31 = vld [vmem:[#allocation206_spill] sm:$0xff] }
 0x3fa   :  { %14690 = vmatprep.subr.bf16.mxu0 %v14689_v14  ;;  %14500 = vmatpush3.bf16.msra.mxu1 %v14497_v59  ;;  %v26777_v43 = vand.u32 4294901760, %v26776_v41  ;;  %v26780_v59 = vld [vmem:[#allocation97_spill] sm:$0xff]  ;;  %v26791_v29 = vand.u32 4294901760, %v26790_v31  ;;  %v26802_v41 = vld [vmem:[#allocation135_spill] sm:$0xff] }
 0x3fb   :  { %13242 = vmatmul.mubr.f32.gmra.mrb[72].mxu1 %v26769_v49  ;;  %14502 = vmatprep.subr.bf16.mxu1 %v14501_v39  ;;  %v26781_v46 = vand.u32 4294901760, %v26780_v59  ;;  %v14509_v63 = vpack.c.bf16 %v26789_v15, %v26787_v0  ;;  %v26795_v49 = vand.u32 4294901760, %v26794_v62  ;;  %v26814_v0 = vld [vmem:[#allocation121_spill] sm:$0xff]  ;;  %v26820_v62 = vld [vmem:[#allocation199_spill] sm:$0xff] }
 0x3fc   :  { %13244 = vmatprep.mubr.f32.mxu1 %v26775_v47  ;;  %14007 = vmatmul.mubr.f32.gmra.mrb[70].mxu0 %v26777_v43  ;;  %v26801_v47 = vand.u32 4294901760, %v26800_v58  ;;  %v26803_v43 = vand.u32 4294901760, %v26802_v41  ;;  %v26815_v53 = vand.u32 4294901760, %v26814_v0  ;;  %v26816_v31 = vld [vmem:[#allocation205_spill] sm:$0xff]  ;;  %v26828_v58 = vld [vmem:[#allocation250_spill] sm:$0xff]  ;;  %v26847_v0 = vld [vmem:[#allocation272_spill] sm:$0xff] }
 0x3fd   :  { %14009 = vmatprep.mubr.f32.mxu0 %v26779_v27  ;;  %14692 = vmatpush3.bf16.msra.mxu0 %v14689_v14  ;;  %v14697_v13 = vpack.c.bf16 %v26783_v17, %v26781_v46  ;;  %v26792_v14 = vld [vmem:[#allocation175_spill] sm:$0xff]  ;;  %v26805_v27 = vand.u32 4294901760, %v26804_v55  ;;  %v26806_v46 = vld [vmem:[#allocation221_spill] sm:$0xff]  ;;  %v26833_v55 = vld [vmem:[#allocation274_spill] sm:$0xff] }
 0x3fe   :  { %14694 = vmatprep.subr.bf16.mxu0 %v14693_v61  ;;  %14504 = vmatpush3.bf16.msra.mxu1 %v14501_v39  ;;  %v26793_v60 = vand.u32 4294901760, %v26792_v14  ;;  %v26796_v39 = vld [vmem:[#allocation146_spill] sm:$0xff]  ;;  %v26807_v38 = vand.u32 4294901760, %v26806_v46  ;;  %v26818_v14 = vld [vmem:[#allocation240_spill] sm:$0xff]  ;;  %v26830_v41 = vld [vmem:[#allocation17_spill] sm:$0xff] }
 0x3ff   :  { %13245 = vmatmul.mubr.f32.gmra.mrb[74].mxu1 %v26785_v36  ;;  %14506 = vmatprep.subr.bf16.mxu1 %v14505_v5  ;;  %v26797_v50 = vand.u32 4294901760, %v26796_v39  ;;  %v14513_v59 = vpack.c.bf16 %v26805_v27, %v26803_v43  ;;  %v26811_v36 = vand.u32 4294901760, %v26810_v42  ;;  %v26822_v39 = vld [vmem:[#allocation231_spill] sm:$0xff]  ;;  %v26837_v51 = vld [vmem:[#allocation265_spill] sm:$0xff]  ;;  %v26843_v42 = vld [vmem:[#allocation246_spill] sm:$0xff] }
 0x400   :  { %13247 = vmatprep.mubr.f32.mxu1 %v26791_v29  ;;  %14010 = vmatmul.mubr.f32.gmra.mrb[72].mxu0 %v26793_v60  ;;  %v26817_v29 = vand.u32 4294901760, %v26816_v31  ;;  %v26819_v60 = vand.u32 4294901760, %v26818_v14  ;;  %v26835_v27 = vld [vmem:[#allocation227_spill] sm:$0xff]  ;;  %v26838_v46 = vand.u32 4294901760, %v26837_v51  ;;  %v26869_v51 = vld [vmem:[#allocation24_spill] sm:$0xff] }
 0x401   :  { %14012 = vmatprep.mubr.f32.mxu0 %v26795_v49  ;;  %14696 = vmatpush3.bf16.msra.mxu0 %v14693_v61  ;;  %v14701_v37 = vpack.c.bf16 %v26799_v9, %v26797_v50  ;;  %v26808_v61 = vld [vmem:[#allocation188_spill] sm:$0xff]  ;;  %v26821_v49 = vand.u32 4294901760, %v26820_v62  ;;  %v26823_v50 = vand.u32 4294901760, %v26822_v39  ;;  %v26827_v9 = vand.u32 4294901760, %v26658_v44  ;;  %v26839_v44 = vld [vmem:[#allocation254_spill] sm:$0xff] }
 0x402   :  { %14698 = vmatprep.subr.bf16.mxu0 %v14697_v13  ;;  %14508 = vmatpush3.bf16.msra.mxu1 %v14505_v5  ;;  %v26809_v17 = vand.u32 4294901760, %v26808_v61  ;;  %v26812_v5 = vld [vmem:[#allocation156_spill] sm:$0xff]  ;;  %v26841_v61 = vld [vmem:[#allocation293_spill] sm:$0xff] }
 0x403   :  { %13248 = vmatmul.mubr.f32.gmra.mrb[76].mxu1 %v26801_v47  ;;  %14510 = vmatprep.subr.bf16.mxu1 %v14509_v63  ;;  %v26813_v21 = vand.u32 4294901760, %v26812_v5  ;;  %v26829_v47 = vand.u32 4294901760, %v26828_v58  ;;  %v26845_v5 = vld [vmem:[#allocation283_spill] sm:$0xff]  ;;  %v26861_v58 = vld [vmem:[#allocation320_spill] sm:$0xff] }
 0x404   :  { %13250 = vmatprep.mubr.f32.mxu1 %v26807_v38  ;;  %14013 = vmatmul.mubr.f32.gmra.mrb[74].mxu0 %v26809_v17  ;;  %v26840_v38 = vand.u32 4294901760, %v26839_v44  ;;  %v26842_v17 = vand.u32 4294901760, %v26841_v61  ;;  %v26871_v44 = vld [vmem:[#allocation334_spill] sm:$0xff]  ;;  %v26873_v61 = vld [vmem:[#allocation351_spill] sm:$0xff] }
 0x405   :  { %14015 = vmatprep.mubr.f32.mxu0 %v26811_v36  ;;  %14700 = vmatpush3.bf16.msra.mxu0 %v14697_v13  ;;  %v14705_v15 = vpack.c.bf16 %v26815_v53, %v26813_v21  ;;  %v26824_v13 = vand.u32 4294901760, %v26654_v40  ;;  %v26834_v40 = vand.u32 4294901760, %v26833_v55  ;;  %v26844_v36 = vand.u32 4294901760, %v26843_v42  ;;  %v26865_v55 = vld [vmem:[#allocation340_spill] sm:$0xff]  ;;  %v26875_v42 = vld [vmem:[#allocation321_spill] sm:$0xff] }
 0x406   :  { %14702 = vmatprep.subr.bf16.mxu0 %v14701_v37  ;;  %14512 = vmatpush3.bf16.msra.mxu1 %v14509_v63  ;;  %v26825_v63 = vld [vmem:[#allocation11_spill] sm:$0xff]  ;;  %v26846_v21 = vand.u32 4294901760, %v26845_v5  ;;  %v26848_v53 = vand.u32 4294901760, %v26847_v0  ;;  %v26879_v0 = vld [vmem:[#allocation352_spill] sm:$0xff] }
 0x407   :  { %13251 = vmatmul.mubr.f32.gmra.mrb[78].mxu1 %v26817_v29  ;;  %14514 = vmatprep.subr.bf16.mxu1 %v14513_v59  ;;  %v26851_v29 = vld [vmem:[#allocation262_spill] sm:$0xff]  ;;  %v26877_v5 = vld [vmem:[#allocation347_spill] sm:$0xff] }
 0x408   :  { %13253 = vmatprep.mubr.f32.mxu1 %v26819_v60  ;;  %14016 = vmatmul.mubr.f32.gmra.mrb[76].mxu0 %v26821_v49  ;;  %v26852_v14 = vand.u32 4294901760, %v26851_v29  ;;  %v26853_v60 = vld [vmem:[#allocation303_spill] sm:$0xff]  ;;  %v26855_v49 = vld [vmem:[#allocation290_spill] sm:$0xff]  ;;  %v26883_v29 = vld [vmem:[#allocation341_spill] sm:$0xff] }
 0x409   :  { %14018 = vmatprep.mubr.f32.mxu0 %v26823_v50  ;;  %14704 = vmatpush3.bf16.msra.mxu0 %v14701_v37  ;;  %v26831_v37 = vld [vmem:[#allocation237_spill] sm:$0xff]  ;;  %v26854_v62 = vand.u32 4294901760, %v26853_v60  ;;  %v26856_v39 = vand.u32 4294901760, %v26855_v49  ;;  %v26857_v50 = vld [vmem:[#allocation328_spill] sm:$0xff] }
 0x40a   :  { %14706 = vmatprep.subr.bf16.mxu0 %v14705_v15  ;;  %14516 = vmatpush3.bf16.msra.mxu1 %v14513_v59  ;;  %v26832_v43 = vand.u32 4294901760, %v26831_v37  ;;  %v26836_v59 = vand.u32 4294901760, %v26835_v27  ;;  %v26863_v37 = vld [vmem:[#allocation313_spill] sm:$0xff]  ;;  %v26867_v27 = vld [vmem:[#allocation300_spill] sm:$0xff] }
 0x40b   :  { %13254 = vmatmul.mubr.f32.gmra.mrb[80].mxu1 %v26824_v13  ;;  %14518 = vmatprep.subr.bf16.mxu1 %v26825_v63  ;;  %v26858_v13 = vand.u32 4294901760, %v26857_v50  ;;  %v26885_v60 = vld [vmem:[#allocation357_spill] sm:$0xff]  ;;  %v26887_v49 = vld [vmem:[#allocation96_spill] sm:$0xff] }
 0x40c   :  { %13256 = vmatprep.mubr.f32.mxu1 %v26826_v20  ;;  %14019 = vmatmul.mubr.f32.gmra.mrb[78].mxu0 %v26827_v9  ;;  %v26859_v20 = vld [vmem:[#allocation280_spill] sm:$0xff]  ;;  %v26889_v50 = vld [vmem:[#allocation85_spill] sm:$0xff] }
 0x40d   :  { %14021 = vmatprep.mubr.f32.mxu0 %v26829_v47  ;;  %14708 = vmatpush3.bf16.msra.mxu0 %v14705_v15  ;;  %v26849_v15 = vld [vmem:[#allocation312_spill] sm:$0xff]  ;;  %v26860_v9 = vand.u32 4294901760, %v26859_v20  ;;  %v26862_v47 = vand.u32 4294901760, %v26861_v58  ;;  %v26891_v20 = vld [vmem:[#allocation111_spill] sm:$0xff] }
 0x40e   :  { %14710 = vmatprep.subr.bf16.mxu0 %v26830_v41  ;;  %v26850_v31 = vand.u32 4294901760, %v26849_v15  ;;  %v26881_v15 = vld [vmem:[#allocation93_spill] sm:$0xff]  ;;  %v26893_v58 = vld [vmem:[#allocation107_spill] sm:$0xff] }
 0x40f   :  { %13257 = vmatmul.mubr.f32.gmra.mrb[82].mxu1 %v26832_v43  ;;  %v26864_v43 = vand.u32 4294901760, %v26863_v37  ;;  %v26895_v37 = vld [vmem:[#allocation113_spill] sm:$0xff] }
 0x410   :  { %13259 = vmatprep.mubr.f32.mxu1 %v26834_v40  ;;  %14022 = vmatmul.mubr.f32.gmra.mrb[80].mxu0 %v26836_v59  ;;  %v26866_v40 = vand.u32 4294901760, %v26865_v55  ;;  %v26868_v59 = vand.u32 4294901760, %v26867_v27  ;;  %v26897_v55 = vld [vmem:[#allocation147_spill] sm:$0xff]  ;;  %v26899_v27 = vld [vmem:[#allocation101_spill] sm:$0xff] }
 0x411   :  { %14024 = vmatprep.mubr.f32.mxu0 %v26838_v46  ;;  %v26870_v46 = vand.u32 4294901760, %v26869_v51  ;;  %v26901_v51 = vld [vmem:[#allocation132_spill] sm:$0xff] }
 0x413   :  { %13260 = vmatmul.mubr.f32.gmra.mrb[84].mxu1 %v26840_v38  ;;  %v26872_v38 = vand.u32 4294901760, %v26871_v44  ;;  %v26903_v44 = vld [vmem:[#allocation127_spill] sm:$0xff] }
 0x414   :  { %13262 = vmatprep.mubr.f32.mxu1 %v26842_v17  ;;  %14025 = vmatmul.mubr.f32.gmra.mrb[82].mxu0 %v26844_v36  ;;  %v26874_v17 = vand.u32 4294901760, %v26873_v61  ;;  %v26876_v36 = vand.u32 4294901760, %v26875_v42  ;;  %v26905_v61 = vld [vmem:[#allocation174_spill] sm:$0xff]  ;;  %v26907_v42 = vld [vmem:[#allocation124_spill] sm:$0xff] }
 0x415   :  { %14027 = vmatprep.mubr.f32.mxu0 %v26846_v21  ;;  %v26878_v21 = vand.u32 4294901760, %v26877_v5  ;;  %v26909_v5 = vld [vmem:[#allocation158_spill] sm:$0xff] }
 0x417   :  { %13263 = vmatmul.mubr.f32.gmra.mrb[86].mxu1 %v26848_v53  ;;  %v26880_v53 = vand.u32 4294901760, %v26879_v0  ;;  %v26911_v0 = vand.u32 4294901760, %v26700_v30  ;;  %v26921_v30 = vand.u32 4294901760, %v26707_v26  ;;  %v26931_v26 = vld [vmem:[#allocation191_spill] sm:$0xff] }
 0x418   :  { %13265 = vmatprep.mubr.f32.mxu1 %v26850_v31  ;;  %14028 = vmatmul.mubr.f32.gmra.mrb[84].mxu0 %v26852_v14  ;;  %v26882_v31 = vand.u32 4294901760, %v26881_v15  ;;  %v26884_v14 = vand.u32 4294901760, %v26883_v29 }
 0x419   :  { %14030 = vmatprep.mubr.f32.mxu0 %v26854_v62  ;;  %v26886_v62 = vand.u32 4294901760, %v26885_v60  ;;  %v26917_v60 = vand.u32 4294901760, %v26704_v12  ;;  %v26927_v12 = vand.u32 4294901760, %v26250_v35  ;;  %v26937_v35 = vand.u32 4294901760, %v26264_v6 }
 0x41a   :  { %v26944_v6 = vand.u32 4294901760, %v26717_v18  ;;  %v26951_v18 = vld [vmem:[#allocation276_spill] sm:$0xff] }
 0x41b   :  { %13266 = vmatmul.mubr.f32.gmra.mrb[88].mxu1 %v26856_v39  ;;  %v26888_v39 = vand.u32 4294901760, %v26887_v49 }
 0x41c   :  { %13268 = vmatprep.mubr.f32.mxu1 %v26858_v13  ;;  %14031 = vmatmul.mubr.f32.gmra.mrb[86].mxu0 %v26860_v9  ;;  %v26890_v13 = vand.u32 4294901760, %v26889_v50  ;;  %v26892_v9 = vand.u32 4294901760, %v26891_v20  ;;  %v26922_v50 = vand.u32 4294901760, %v26708_v25  ;;  %v26933_v25 = vand.u32 4294901760, %v26260_v10 }
 0x41d   :  { %14033 = vmatprep.mubr.f32.mxu0 %v26862_v47  ;;  %v26894_v47 = vand.u32 4294901760, %v26893_v58  ;;  %v26928_v58 = vand.u32 4294901760, %v26711_v7  ;;  %v26938_v7 = vand.u32 4294901760, %v26276_v33  ;;  %v26941_v10 = vand.u32 4294901760, %v26280_v22 }
 0x41e   :  { %v26945_v33 = vand.u32 4294901760, %v26291_v23  ;;  %v26948_v22 = vand.u32 4294901760, %v26294_v48  ;;  %v26953_v23 = vld [vmem:[#allocation316_spill] sm:$0xff]  ;;  %v26959_v48 = vld [vmem:[#allocation295_spill] sm:$0xff] }
 0x41f   :  { %13269 = vmatmul.mubr.f32.gmra.mrb[90].mxu1 %v26864_v43  ;;  %v26896_v43 = vand.u32 4294901760, %v26895_v37  ;;  %v26932_v37 = vand.u32 4294901760, %v26931_v26  ;;  %v26996_v26 = vld [vmem:[#allocation133_spill] sm:$0xff] }
 0x420   :  { %13271 = vmatprep.mubr.f32.mxu1 %v26866_v40  ;;  %14034 = vmatmul.mubr.f32.gmra.mrb[88].mxu0 %v26868_v59  ;;  %v26898_v40 = vand.u32 4294901760, %v26897_v55  ;;  %v26900_v59 = vand.u32 4294901760, %v26899_v27  ;;  %v26935_v55 = vld [vmem:[#allocation245_spill] sm:$0xff]  ;;  %v26939_v27 = vand.u32 4294901760, %v26714_v8  ;;  %v26946_v8 = vand.u32 4294901760, %v26295_v11  ;;  %v26955_v11 = vld [vmem:[#allocation267_spill] sm:$0xff] }
 0x421   :  { %14036 = vmatprep.mubr.f32.mxu0 %v26870_v46  ;;  %v26902_v46 = vand.u32 4294901760, %v26901_v51  ;;  %v26943_v51 = vand.u32 4294901760, %v26716_v34  ;;  %v26950_v34 = vand.u32 4294901760, %v26301_v4  ;;  %v26963_v4 = vand.u32 4294901760, %v26314_v52  ;;  %v26975_v52 = vld [vmem:[#allocation92_spill] sm:$0xff] }
 0x423   :  { %13272 = vmatmul.mubr.f32.gmra.mrb[92].mxu1 %v26872_v38  ;;  %v26904_v38 = vand.u32 4294901760, %v26903_v44  ;;  %v26954_v44 = vand.u32 4294901760, %v26953_v23  ;;  %v27038_v23 = vld [vmem:[#allocation74_spill] sm:$0xff] }
 0x424   :  { %13274 = vmatprep.mubr.f32.mxu1 %v26874_v17  ;;  %14037 = vmatmul.mubr.f32.gmra.mrb[90].mxu0 %v26876_v36  ;;  %v26906_v17 = vand.u32 4294901760, %v26905_v61  ;;  %v26908_v36 = vand.u32 4294901760, %v26907_v42 }
 0x425   :  { %14039 = vmatprep.mubr.f32.mxu0 %v26878_v21  ;;  %v26910_v21 = vand.u32 4294901760, %v26909_v5 }
 0x427   :  { %13275 = vmatmul.mubr.f32.gmra.mrb[94].mxu1 %v26880_v53  ;;  %v26912_v53 = vld [vmem:[#allocation187_spill] sm:$0xff] }
 0x428   :  { %13277 = vmatprep.mubr.f32.mxu1 %v26882_v31  ;;  %14040 = vmatmul.mubr.f32.gmra.mrb[92].mxu0 %v26884_v14  ;;  %v26913_v15 = vand.u32 4294901760, %v26912_v53  ;;  %v26914_v31 = vld [vmem:[#allocation138_spill] sm:$0xff]  ;;  %v26916_v14 = vand.u32 4294901760, %v26703_v32  ;;  %v26925_v32 = vld [vmem:[#allocation180_spill] sm:$0xff]  ;;  %v26968_v53 = vand.u32 4294901760, %v19883_v28  ;;  %v26980_v28 = vand.u32 4294901760, %v26724_v1 }
 0x429   :  { %14042 = vmatprep.mubr.f32.mxu0 %v26886_v62  ;;  %v26915_v29 = vand.u32 4294901760, %v26914_v31  ;;  %v26918_v62 = vld [vmem:[#allocation198_spill] sm:$0xff]  ;;  %v26990_v1 = vld [vmem:[#allocation119_spill] sm:$0xff] }
 0x42a   :  { %v26919_v49 = vand.u32 4294901760, %v26918_v62 }
 0x42b   :  { %13278 = vmatmul.mubr.f32.gmra.mrb[96].mxu1 %v26888_v39  ;;  %v26920_v39 = vand.u32 4294901760, %v26706_v56  ;;  %v26929_v56 = vld [vmem:[#allocation226_spill] sm:$0xff] }
 0x42c   :  { %13280 = vmatprep.mubr.f32.mxu1 %v26890_v13  ;;  %14043 = vmatmul.mubr.f32.gmra.mrb[94].mxu0 %v26892_v9  ;;  %v26923_v13 = vld [vmem:[#allocation209_spill] sm:$0xff]  ;;  %v26926_v9 = vand.u32 4294901760, %v26925_v32  ;;  %v26983_v32 = vld [vmem:[#allocation63_spill] sm:$0xff] }
 0x42d   :  { %14045 = vmatprep.mubr.f32.mxu0 %v26894_v47  ;;  %v26924_v20 = vand.u32 4294901760, %v26923_v13  ;;  %v26930_v47 = vand.u32 4294901760, %v26929_v56  ;;  %v26981_v13 = vmov 1.0   ;;  %v26988_v56 = vld [vmem:[#allocation108_spill] sm:$0xff] }
 0x42f   :  { %13281 = vmatmul.mubr.f32.gmra.mrb[98].mxu1 %v26896_v43  ;;  %v26934_v43 = vand.u32 4294901760, %v26713_v54  ;;  %v26942_v54 = vand.u32 4294901760, %v18840_v19  ;;  %v26949_v19 = vand.u32 4294901760, %v26300_v57  ;;  %v26961_v57 = vld [vmem:[#allocation333_spill] sm:$0xff] }
 0x430   :  { %13283 = vmatprep.mubr.f32.mxu1 %v26898_v40  ;;  %14046 = vmatmul.mubr.f32.gmra.mrb[96].mxu0 %v26900_v59  ;;  %v26936_v40 = vand.u32 4294901760, %v26935_v55  ;;  %v26940_v59 = vand.u32 4294901760, %v26715_v24  ;;  %v26947_v24 = vand.u32 4294901760, %v26718_v3  ;;  %v26957_v3 = vld [vmem:[#allocation307_spill] sm:$0xff]  ;;  %v26962_v42 = vand.u32 4294901760, %v26961_v57  ;;  %v27007_v55 = vld [vmem:[#allocation22_spill] sm:$0xff] }
 0x431   :  { %14048 = vmatprep.mubr.f32.mxu0 %v26902_v46  ;;  %v26952_v46 = vand.u32 4294901760, %v26951_v18  ;;  %v26958_v61 = vand.u32 4294901760, %v26957_v3  ;;  %v27035_v18 = vld [vmem:[#allocation181_spill] sm:$0xff]  ;;  %v27045_v3 = vld [vmem:[#allocation71_spill] sm:$0xff]  ;;  %v27052_v57 = vld [vmem:[#allocation82_spill] sm:$0xff] }
 0x433   :  { %13284 = vmatmul.mubr.f32.gmra.mrb[100].mxu1 %v26904_v38  ;;  %v26956_v38 = vand.u32 4294901760, %v26955_v11  ;;  %v27042_v11 = vld [vmem:[#allocation69_spill] sm:$0xff] }
 0x434   :  { %13286 = vmatprep.mubr.f32.mxu1 %v26906_v17  ;;  %14049 = vmatmul.mubr.f32.gmra.mrb[98].mxu0 %v26908_v36  ;;  %v26960_v17 = vand.u32 4294901760, %v26959_v48  ;;  %v26964_v36 = vld [vmem:[#allocation324_spill] sm:$0xff]  ;;  %v27048_v48 = vld [vmem:[#allocation219_spill] sm:$0xff] }
 0x435   :  { %14051 = vmatprep.mubr.f32.mxu0 %v26910_v21  ;;  %v26965_v5 = vand.u32 4294901760, %v26964_v36  ;;  %v26966_v21 = vld [vmem:[#allocation317_spill] sm:$0xff]  ;;  %v27057_v36 = vld [vmem:[#allocation52_spill] sm:$0xff] }
 0x437   :  { %13287 = vmatmul.mubr.f32.gmra.mrb[102].mxu1 %v26911_v0  ;;  %v26967_v0 = vand.u32 4294901760, %v26966_v21  ;;  %v27060_v21 = vld [vmem:[#allocation73_spill] sm:$0xff] }
 0x438   :  { %13289 = vmatprep.mubr.f32.mxu1 %v26913_v15  ;;  %14052 = vmatmul.mubr.f32.gmra.mrb[100].mxu0 %v26915_v29  ;;  %v26969_v15 = vld [vmem:[#allocation304_spill] sm:$0xff]  ;;  %v26971_v29 = vld [vmem:[#allocation309_spill] sm:$0xff] }
 0x439   :  { %14054 = vmatprep.mubr.f32.mxu0 %v26916_v14  ;;  %v26970_v31 = vand.u32 4294901760, %v26969_v15  ;;  %v26972_v14 = vand.u32 4294901760, %v26971_v29  ;;  %v27065_v15 = vld [vmem:[#allocation216_spill] sm:$0xff]  ;;  %v27068_v29 = vld [vmem:[#allocation81_spill] sm:$0xff] }
 0x43b   :  { %13290 = vmatmul.mubr.f32.gmra.mrb[104].mxu1 %v26917_v60  ;;  %v26973_v60 = vld [vmem:[#allocation337_spill] sm:$0xff] }
 0x43c   :  { %13292 = vmatprep.mubr.f32.mxu1 %v26919_v49  ;;  %14055 = vmatmul.mubr.f32.gmra.mrb[102].mxu0 %v26920_v39  ;;  %v26974_v62 = vand.u32 4294901760, %v26973_v60  ;;  %v26976_v49 = vand.u32 4294901760, %v26975_v52  ;;  %v26977_v39 = vld [vmem:[#allocation325_spill] sm:$0xff]  ;;  %v27072_v60 = vld [vmem:[#allocation234_spill] sm:$0xff]  ;;  %v27075_v52 = vld [vmem:[#allocation224_spill] sm:$0xff] }
 0x43d   :  { %14057 = vmatprep.mubr.f32.mxu0 %v26921_v30  ;;  %v26978_v30 = vand.u32 4294901760, %v26977_v39  ;;  %v27079_v39 = vld [vmem:[#allocation253_spill] sm:$0xff] }
 0x43f   :  { %13293 = vmatmul.mubr.f32.gmra.mrb[106].mxu1 %v26922_v50  ;;  %v26979_v50 = vand.u32 4294901760, %v26723_v2  ;;  %v26992_v2 = vand.u32 4294901760, %v20072_v45  ;;  %v27000_v45 = vld [vmem:[#allocation114_spill] sm:$0xff] }
 0x440   :  { %13295 = vmatprep.mubr.f32.mxu1 %v26924_v20  ;;  %14058 = vmatmul.mubr.f32.gmra.mrb[104].mxu0 %v26926_v9  ;;  %v26982_v20 = vld [vmem:[#allocation76_spill] sm:$0xff]  ;;  %v26985_v9 = vand.u32 4294901760, %v26726_v16  ;;  %v26993_v16 = vld [vmem:[#allocation94_spill] sm:$0xff] }
 0x441   :  { %14060 = vmatprep.mubr.f32.mxu0 %v26927_v12  ;;  %vm26984_vm12 = vcmp.eq.s32.totalorder %v26982_v20, %v26983_v32  ;;  %v26986_v12 = vld [vmem:[#allocation348_spill] sm:$0xff]  ;;  %vm26989_vm4 = vcmp.eq.s32.totalorder %v26982_v20, %v26988_v56  ;;  %vm26991_vm6 = vcmp.eq.s32.totalorder %v26982_v20, %v26990_v1  ;;  %vm26994_vm11 = vcmp.eq.s32.totalorder %v26982_v20, %v26993_v16 }
 0x442   :  { %vm26997_vm14 = vcmp.eq.s32.totalorder %v26982_v20, %v26996_v26 }
 0x443   :  { %13296 = vmatmul.mubr.f32.gmra.mrb[108].mxu1 %v26928_v58  ;;  %v26987_v58 = vand.u32 4294901760, %v26986_v12  ;;  %v27380_v12 = vld [vmem:[#allocation277_spill] sm:$0xff] }
 0x444   :  { %13298 = vmatprep.mubr.f32.mxu1 %v26930_v47  ;;  %14061 = vmatmul.mubr.f32.gmra.mrb[106].mxu0 %v26932_v37  ;;  %v26995_v47 = vld [vmem:[#allocation16_spill] sm:$0xff]  ;;  %v26998_v37 = vld [vmem:[#allocation139_spill] sm:$0xff] }
 0x445   :  { %14063 = vmatprep.mubr.f32.mxu0 %v26933_v25  ;;  %v27004_v25 = vld [vmem:[#allocation23_spill] sm:$0xff] }
 0x447   :  { %13299 = vmatmul.mubr.f32.gmra.mrb[110].mxu1 %v26934_v43  ;;  %v27005_v43 = vld [vmem:[#allocation160_spill] sm:$0xff] }
 0x448   :  { %13301 = vmatprep.mubr.f32.mxu1 %v26936_v40  ;;  %14064 = vmatmul.mubr.f32.gmra.mrb[108].mxu0 %v26937_v35  ;;  %v27008_v40 = vld [vmem:[#allocation165_spill] sm:$0xff] }
 0x449   :  { %14066 = vmatprep.mubr.f32.mxu0 %v26938_v7  ;;  %v27012_v35 = vld [vmem:[#allocation149_spill] sm:$0xff] }
 0x44a   :  { %v27014_v7 = vld [vmem:[#allocation29_spill] sm:$0xff] }
 0x44b   :  { %13302 = vmatmul.mubr.f32.gmra.mrb[112].mxu1 %v26939_v27  ;;  %v27015_v27 = vld [vmem:[#allocation140_spill] sm:$0xff] }
 0x44c   :  { %13304 = vmatprep.mubr.f32.mxu1 %v26940_v59  ;;  %14067 = vmatmul.mubr.f32.gmra.mrb[110].mxu0 %v26941_v10  ;;  %v27017_v59 = vld [vmem:[#allocation28_spill] sm:$0xff]  ;;  %v27018_v10 = vld [vmem:[#allocation58_spill] sm:$0xff] }
 0x44d   :  { %14069 = vmatprep.mubr.f32.mxu0 %v26942_v54  ;;  %v27020_v54 = vld [vmem:[#allocation129_spill] sm:$0xff] }
 0x44f   :  { %13305 = vmatmul.mubr.f32.gmra.mrb[114].mxu1 %v26943_v51  ;;  %v27022_v51 = vld [vmem:[#allocation176_spill] sm:$0xff] }
 0x450   :  { %13307 = vmatprep.mubr.f32.mxu1 %v26944_v6  ;;  %14070 = vmatmul.mubr.f32.gmra.mrb[112].mxu0 %v26945_v33  ;;  %v27024_v6 = vld [vmem:[#allocation35_spill] sm:$0xff]  ;;  %v27025_v33 = vld [vmem:[#allocation161_spill] sm:$0xff] }
 0x451   :  { %14072 = vmatprep.mubr.f32.mxu0 %v26946_v8  ;;  %v27027_v8 = vld [vmem:[#allocation34_spill] sm:$0xff] }
 0x453   :  { %13308 = vmatmul.mubr.f32.gmra.mrb[116].mxu1 %v26947_v24  ;;  %v27028_v24 = vld [vmem:[#allocation67_spill] sm:$0xff] }
 0x454   :  { %13310 = vmatprep.mubr.f32.mxu1 %v26948_v22  ;;  %14073 = vmatmul.mubr.f32.gmra.mrb[114].mxu0 %v26949_v19  ;;  %v27030_v22 = vld [vmem:[#allocation150_spill] sm:$0xff]  ;;  %v27032_v19 = vld [vmem:[#allocation60_spill] sm:$0xff] }
 0x455   :  { %14075 = vmatprep.mubr.f32.mxu0 %v26950_v34  ;;  %v27034_v34 = vld [vmem:[#allocation41_spill] sm:$0xff] }
 0x457   :  { %13311 = vmatmul.mubr.f32.gmra.mrb[118].mxu1 %v26952_v46  ;;  %v27037_v46 = vld [vmem:[#allocation40_spill] sm:$0xff] }
 0x458   :  { %13313 = vmatprep.mubr.f32.mxu1 %v26954_v44  ;;  %14076 = vmatmul.mubr.f32.gmra.mrb[116].mxu0 %v26956_v38  ;;  %v27040_v44 = vld [vmem:[#allocation173_spill] sm:$0xff]  ;;  %v27044_v38 = vld [vmem:[#allocation47_spill] sm:$0xff] }
 0x459   :  { %14078 = vmatprep.mubr.f32.mxu0 %v26958_v61  ;;  %v27047_v61 = vld [vmem:[#allocation46_spill] sm:$0xff] }
 0x45b   :  { %13314 = vmatmul.mubr.f32.gmra.mrb[120].mxu1 %v26960_v17  ;;  %v27050_v17 = vld [vmem:[#allocation68_spill] sm:$0xff] }
 0x45c   :  { %13316 = vmatprep.mubr.f32.mxu1 %v26962_v42  ;;  %14079 = vmatmul.mubr.f32.gmra.mrb[118].mxu0 %v26963_v4  ;;  %v27054_v42 = vld [vmem:[#allocation53_spill] sm:$0xff]  ;;  %v27055_v4 = vld [vmem:[#allocation203_spill] sm:$0xff] }
 0x45d   :  { %14081 = vmatprep.mubr.f32.mxu0 %v26965_v5  ;;  %v27058_v5 = vld [vmem:[#allocation238_spill] sm:$0xff] }
 0x45f   :  { %13317 = vmatmul.mubr.f32.gmra.mrb[122].mxu1 %v26967_v0  ;;  %v27062_v0 = vld [vmem:[#allocation228_spill] sm:$0xff] }
 0x460   :  { %13319 = vmatprep.mubr.f32.mxu1 %v26968_v53  ;;  %14082 = vmatmul.mubr.f32.gmra.mrb[120].mxu0 %v26970_v31  ;;  %v27064_v53 = vld [vmem:[#allocation56_spill] sm:$0xff]  ;;  %v27356_v31 = vld [vmem:[#allocation223_spill] sm:$0xff] }
 0x461   :  { %14084 = vmatprep.mubr.f32.mxu0 %v26972_v14  ;;  %v27070_v14 = vld [vmem:[#allocation247_spill] sm:$0xff] }
 0x463   :  { %13320 = vmatmul.mubr.f32.gmra.mrb[124].mxu1 %v26974_v62  ;;  %v27364_v62 = vld [vmem:[#allocation242_spill] sm:$0xff] }
 0x464   :  { %13322 = vmatprep.mubr.f32.mxu1 %v26976_v49  ;;  %14085 = vmatmul.mubr.f32.gmra.mrb[122].mxu0 %v26978_v30  ;;  %v27077_v49 = vld [vmem:[#allocation263_spill] sm:$0xff] }
 0x465   :  { %14087 = vmatprep.mubr.f32.mxu0 %v26979_v50  ;;  %v27082_v50 = vld [vmem:[#allocation243_spill] sm:$0xff] }
 0x466   :  { %v27372_v30 = vld [vmem:[#allocation259_spill] sm:$0xff] }
 0x467   :  { %13323 = vmatmul.mubr.f32.gmra.mrb[126].mxu1 %v26980_v28  ;;  %v27376_v28 = vld [vmem:[#allocation252_spill] sm:$0xff] }
 0x468   :  { %13357 = vmatprep.mubr.msk.f32.mxu1 %vm26984_vm12, %v26981_v13  ;;  %14088 = vmatmul.mubr.f32.gmra.mrb[124].mxu0 %v26985_v9  ;;  %vm26999_vm12 = vcmp.eq.s32.totalorder %v26982_v20, %v26998_v37  ;;  %v27085_v9 = vld [vmem:[#allocation269_spill] sm:$0xff] }
 0x469   :  { %14090 = vmatprep.mubr.f32.mxu0 %v26987_v58  ;;  %v27088_v58 = vld [vmem:[#allocation260_spill] sm:$0xff] }
 0x46b   :  { %13358 = vmatmul.mubr.msk.f32.vlgmr.msra.gmra.mrb[64].mxu1 %vm26989_vm4, %v26981_v13  ;;  %vm27001_vm4 = vcmp.eq.s32.totalorder %v26982_v20, %v27000_v45 }
 0x46c   :  { %13360 = vmatprep.mubr.msk.f32.mxu1 %vm26991_vm6, %v26981_v13  ;;  %14091 = vmatmul.mubr.f32.gmra.mrb[126].mxu0 %v26992_v2  ;;  %v27384_v2 = vld [vmem:[#allocation268_spill] sm:$0xff] }
 0x46d   :  { %14125 = vmatprep.mubr.msk.f32.mxu0 %vm26994_vm11, %v26981_v13  ;;  %14520 = vmatpush3.bf16.msra.mxu1 %v26825_v63  ;;  %v27002_v63 = vld [vmem:[#allocation103_spill] sm:$0xff]  ;;  %vm27006_vm11 = vcmp.eq.s32.totalorder %v26982_v20, %v27005_v43 }
 0x46e   :  { %14522 = vmatprep.subr.bf16.mxu1 %v26995_v47  ;;  %vm27003_vm6 = vcmp.eq.s32.totalorder %v26982_v20, %v27002_v63 }
 0x46f   :  { %13361 = vmatmul.mubr.msk.f32.gmra.mrb[66].mxu1 %vm26997_vm14, %v26981_v13  ;;  %vm27009_vm14 = vcmp.eq.s32.totalorder %v26982_v20, %v27008_v40 }
 0x470   :  { %13363 = vmatprep.mubr.msk.f32.mxu1 %vm26999_vm12, %v26981_v13  ;;  %14126 = vmatmul.mubr.msk.f32.vlgmr.msra.gmra.mrb[64].mxu0 %vm27001_vm4, %v26981_v13  ;;  %vm27013_vm4 = vcmp.eq.s32.totalorder %v26982_v20, %v27012_v35 }
 0x471   :  { %14712 = vmatpush3.bf16.msra.mxu0 %v26830_v41  ;;  %14128 = vmatprep.mubr.msk.f32.mxu0 %vm27003_vm6, %v26981_v13  ;;  %v27010_v41 = vld [vmem:[#allocation115_spill] sm:$0xff]  ;;  %vm27016_vm6 = vcmp.eq.s32.totalorder %v26982_v20, %v27015_v27 }
 0x472   :  { %14714 = vmatprep.subr.bf16.mxu0 %v27004_v25  ;;  %14524 = vmatpush3.bf16.msra.mxu1 %v26995_v47  ;;  %vm27011_vm12 = vcmp.eq.s32.totalorder %v26982_v20, %v27010_v41  ;;  %v27091_v47 = vld [vmem:[#allocation287_spill] sm:$0xff] }
 0x473   :  { %13364 = vmatmul.mubr.msk.f32.gmra.mrb[68].mxu1 %vm27006_vm11, %v26981_v13  ;;  %14526 = vmatprep.subr.bf16.mxu1 %v27007_v55  ;;  %vm27019_vm11 = vcmp.eq.s32.totalorder %v26982_v20, %v27018_v10 }
 0x474   :  { %13366 = vmatprep.mubr.msk.f32.mxu1 %vm27009_vm14, %v26981_v13  ;;  %14129 = vmatmul.mubr.msk.f32.gmra.mrb[66].mxu0 %vm27011_vm12, %v26981_v13  ;;  %vm27021_vm14 = vcmp.eq.s32.totalorder %v26982_v20, %v27020_v54  ;;  %vm27023_vm12 = vcmp.eq.s32.totalorder %v26982_v20, %v27022_v51 }
 0x475   :  { %14131 = vmatprep.mubr.msk.f32.mxu0 %vm27013_vm4, %v26981_v13  ;;  %14716 = vmatpush3.bf16.msra.mxu0 %v27004_v25  ;;  %vm27026_vm4 = vcmp.eq.s32.totalorder %v26982_v20, %v27025_v33  ;;  %v27388_v25 = vld [vmem:[#allocation296_spill] sm:$0xff] }
 0x476   :  { %14718 = vmatprep.subr.bf16.mxu0 %v27014_v7  ;;  %14528 = vmatpush3.bf16.msra.mxu1 %v27007_v55  ;;  %v27094_v55 = vld [vmem:[#allocation278_spill] sm:$0xff] }
 0x477   :  { %13367 = vmatmul.mubr.msk.f32.gmra.mrb[70].mxu1 %vm27016_vm6, %v26981_v13  ;;  %14530 = vmatprep.subr.bf16.mxu1 %v27017_v59  ;;  %vm27029_vm6 = vcmp.eq.s32.totalorder %v26982_v20, %v27028_v24 }
 0x478   :  { %13369 = vmatprep.mubr.msk.f32.mxu1 %vm27019_vm11, %v26981_v13  ;;  %14132 = vmatmul.mubr.msk.f32.gmra.mrb[68].mxu0 %vm27021_vm14, %v26981_v13  ;;  %vm27031_vm11 = vcmp.eq.s32.totalorder %v26982_v20, %v27030_v22  ;;  %vm27033_vm14 = vcmp.eq.s32.totalorder %v26982_v20, %v27032_v19 }
 0x479   :  { %14134 = vmatprep.mubr.msk.f32.mxu0 %vm27023_vm12, %v26981_v13  ;;  %14720 = vmatpush3.bf16.msra.mxu0 %v27014_v7  ;;  %vm27036_vm12 = vcmp.eq.s32.totalorder %v26982_v20, %v27035_v18  ;;  %v27392_v7 = vld [vmem:[#allocation286_spill] sm:$0xff] }
 0x47a   :  { %14722 = vmatprep.subr.bf16.mxu0 %v27024_v6  ;;  %14532 = vmatpush3.bf16.msra.mxu1 %v27017_v59  ;;  %v27097_v59 = vld [vmem:[#allocation311_spill] sm:$0xff] }
 0x47b   :  { %13370 = vmatmul.mubr.msk.f32.gmra.mrb[72].mxu1 %vm27026_vm4, %v26981_v13  ;;  %14534 = vmatprep.subr.bf16.mxu1 %v27027_v8  ;;  %vm27039_vm4 = vcmp.eq.s32.totalorder %v26982_v20, %v27038_v23 }
 0x47c   :  { %13372 = vmatprep.mubr.msk.f32.mxu1 %vm27029_vm6, %v26981_v13  ;;  %14135 = vmatmul.mubr.msk.f32.gmra.mrb[70].mxu0 %vm27031_vm11, %v26981_v13  ;;  %vm27041_vm6 = vcmp.eq.s32.totalorder %v26982_v20, %v27040_v44  ;;  %vm27043_vm11 = vcmp.eq.s32.totalorder %v26982_v20, %v27042_v11 }
 0x47d   :  { %14137 = vmatprep.mubr.msk.f32.mxu0 %vm27033_vm14, %v26981_v13  ;;  %14724 = vmatpush3.bf16.msra.mxu0 %v27024_v6  ;;  %vm27046_vm14 = vcmp.eq.s32.totalorder %v26982_v20, %v27045_v3  ;;  %v27396_v6 = vld [vmem:[#allocation314_spill] sm:$0xff] }
 0x47e   :  { %14726 = vmatprep.subr.bf16.mxu0 %v27034_v34  ;;  %14536 = vmatpush3.bf16.msra.mxu1 %v27027_v8  ;;  %v27100_v8 = vld [vmem:[#allocation297_spill] sm:$0xff] }
 0x47f   :  { %13373 = vmatmul.mubr.msk.f32.gmra.mrb[74].mxu1 %vm27036_vm12, %v26981_v13  ;;  %14538 = vmatprep.subr.bf16.mxu1 %v27037_v46  ;;  %vm27049_vm12 = vcmp.eq.s32.totalorder %v26982_v20, %v27048_v48 }
 0x480   :  { %13375 = vmatprep.mubr.msk.f32.mxu1 %vm27039_vm4, %v26981_v13  ;;  %14138 = vmatmul.mubr.msk.f32.gmra.mrb[72].mxu0 %vm27041_vm6, %v26981_v13  ;;  %vm27051_vm4 = vcmp.eq.s32.totalorder %v26982_v20, %v27050_v17  ;;  %vm27053_vm6 = vcmp.eq.s32.totalorder %v26982_v20, %v27052_v57 }
 0x481   :  { %14140 = vmatprep.mubr.msk.f32.mxu0 %vm27043_vm11, %v26981_v13  ;;  %14728 = vmatpush3.bf16.msra.mxu0 %v27034_v34  ;;  %vm27056_vm11 = vcmp.eq.s32.totalorder %v26982_v20, %v27055_v4  ;;  %v27400_v34 = vld [vmem:[#allocation305_spill] sm:$0xff] }
 0x482   :  { %14730 = vmatprep.subr.bf16.mxu0 %v27044_v38  ;;  %14540 = vmatpush3.bf16.msra.mxu1 %v27037_v46  ;;  %v27103_v46 = vld [vmem:[#allocation332_spill] sm:$0xff] }
 0x483   :  { %13376 = vmatmul.mubr.msk.f32.gmra.mrb[76].mxu1 %vm27046_vm14, %v26981_v13  ;;  %14542 = vmatprep.subr.bf16.mxu1 %v27047_v61  ;;  %vm27059_vm14 = vcmp.eq.s32.totalorder %v26982_v20, %v27058_v5 }
 0x484   :  { %13378 = vmatprep.mubr.msk.f32.mxu1 %vm27049_vm12, %v26981_v13  ;;  %14141 = vmatmul.mubr.msk.f32.gmra.mrb[74].mxu0 %vm27051_vm4, %v26981_v13  ;;  %vm27061_vm12 = vcmp.eq.s32.totalorder %v26982_v20, %v27060_v21  ;;  %vm27063_vm4 = vcmp.eq.s32.totalorder %v26982_v20, %v27062_v0 }
 0x485   :  { %14143 = vmatprep.mubr.msk.f32.mxu0 %vm27053_vm6, %v26981_v13  ;;  %14732 = vmatpush3.bf16.msra.mxu0 %v27044_v38  ;;  %vm27066_vm6 = vcmp.eq.s32.totalorder %v26982_v20, %v27065_v15  ;;  %v27114_v38 = vld [vmem:[#allocation339_spill] sm:$0xff] }
 0x486   :  { %14734 = vmatprep.subr.bf16.mxu0 %v27054_v42  ;;  %14544 = vmatpush3.bf16.msra.mxu1 %v27047_v61  ;;  %v27106_v61 = vld [vmem:[#allocation319_spill] sm:$0xff] }
 0x487   :  { %13379 = vmatmul.mubr.msk.f32.gmra.mrb[78].mxu1 %vm27056_vm11, %v26981_v13  ;;  %14546 = vmatprep.subr.bf16.mxu1 %v27057_v36  ;;  %vm27069_vm11 = vcmp.eq.s32.totalorder %v26982_v20, %v27068_v29 }
 0x488   :  { %13381 = vmatprep.mubr.msk.f32.mxu1 %vm27059_vm14, %v26981_v13  ;;  %14144 = vmatmul.mubr.msk.f32.gmra.mrb[76].mxu0 %vm27061_vm12, %v26981_v13  ;;  %vm27071_vm14 = vcmp.eq.s32.totalorder %v26982_v20, %v27070_v14  ;;  %vm27073_vm12 = vcmp.eq.s32.totalorder %v26982_v20, %v27072_v60 }
 0x489   :  { %14146 = vmatprep.mubr.msk.f32.mxu0 %vm27063_vm4, %v26981_v13  ;;  %14736 = vmatpush3.bf16.msra.mxu0 %v27054_v42  ;;  %vm27076_vm4 = vcmp.eq.s32.totalorder %v26982_v20, %v27075_v52  ;;  %v27108_v42 = vld [vmem:[#allocation345_spill] sm:$0xff] }
 0x48a   :  { %14738 = vmatprep.subr.bf16.mxu0 %v27064_v53  ;;  %14548 = vmatpush3.bf16.msra.mxu1 %v27057_v36  ;;  %v27110_v36 = vld [vmem:[#allocation350_spill] sm:$0xff] }
 0x48b   :  { %13382 = vmatmul.mubr.msk.f32.gmra.mrb[80].mxu1 %vm27066_vm6, %v26981_v13  ;;  %vm27078_vm6 = vcmp.eq.s32.totalorder %v26982_v20, %v27077_v49 }
 0x48c   :  { %13384 = vmatprep.mubr.msk.f32.mxu1 %vm1394_vm2, %v26981_v13  ;;  %14147 = vmatmul.mubr.msk.f32.gmra.mrb[78].mxu0 %vm27069_vm11, %v26981_v13  ;;  %vm27080_vm11 = vcmp.eq.s32.totalorder %v26982_v20, %v27079_v39 }
 0x48d   :  { %14149 = vmatprep.mubr.msk.f32.mxu0 %vm27071_vm14, %v26981_v13  ;;  %14740 = vmatpush3.bf16.msra.mxu0 %v27064_v53  ;;  %vm27083_vm14 = vcmp.eq.s32.totalorder %v26982_v20, %v27082_v50  ;;  %v27112_v53 = vld [vmem:[#allocation90_spill] sm:$0xff] }
 0x48f   :  { %13385 = vmatmul.mubr.msk.f32.gmra.mrb[82].mxu1 %vm27073_vm12, %v26981_v13  ;;  %vm27086_vm12 = vcmp.eq.s32.totalorder %v26982_v20, %v27085_v9 }
 0x490   :  { %13387 = vmatprep.mubr.msk.f32.mxu1 %vm1396_vm9, %v26981_v13  ;;  %14150 = vmatmul.mubr.msk.f32.gmra.mrb[80].mxu0 %vm27076_vm4, %v26981_v13  ;;  %vm27089_vm4 = vcmp.eq.s32.totalorder %v26982_v20, %v27088_v58 }
 0x491   :  { %14152 = vmatprep.mubr.msk.f32.mxu0 %vm27078_vm6, %v26981_v13  ;;  %vm27092_vm6 = vcmp.eq.s32.totalorder %v26982_v20, %v27091_v47 }
 0x493   :  { %13388 = vmatmul.mubr.msk.f32.gmra.mrb[84].mxu1 %vm27080_vm11, %v26981_v13  ;;  %vm27095_vm11 = vcmp.eq.s32.totalorder %v26982_v20, %v27094_v55 }
 0x494   :  { %13390 = vmatprep.mubr.msk.f32.mxu1 %vm1398_vm5, %v26981_v13  ;;  %14153 = vmatmul.mubr.msk.f32.gmra.mrb[82].mxu0 %vm27083_vm14, %v26981_v13  ;;  %vm27098_vm14 = vcmp.eq.s32.totalorder %v26982_v20, %v27097_v59 }
 0x495   :  { %14155 = vmatprep.mubr.msk.f32.mxu0 %vm5600_vm10, %v26981_v13 }
 0x497   :  { %13391 = vmatmul.mubr.msk.f32.gmra.mrb[86].mxu1 %vm27086_vm12, %v26981_v13  ;;  %vm27101_vm12 = vcmp.eq.s32.totalorder %v26982_v20, %v27100_v8 }
 0x498   :  { %13393 = vmatprep.mubr.msk.f32.mxu1 %vm1400_vm7, %v26981_v13  ;;  %14156 = vmatmul.mubr.msk.f32.gmra.mrb[84].mxu0 %vm27089_vm4, %v26981_v13  ;;  %vm27104_vm4 = vcmp.eq.s32.totalorder %v26982_v20, %v27103_v46 }
 0x499   :  { %14158 = vmatprep.mubr.msk.f32.mxu0 %vm5602_vm3, %v26981_v13 }
 0x49b   :  { %13394 = vmatmul.mubr.msk.f32.gmra.mrb[88].mxu1 %vm27092_vm6, %v26981_v13  ;;  %vm27107_vm6 = vcmp.eq.s32.totalorder %v26982_v20, %v27106_v61  ;;  %v27116_v61 = vld [vmem:[#allocation356_spill] sm:$0xff] }
 0x49c   :  { %13396 = vmatprep.mubr.msk.f32.mxu1 %vm1402_vm0, %v26981_v13  ;;  %14159 = vmatmul.mubr.msk.f32.gmra.mrb[86].mxu0 %vm27095_vm11, %v26981_v13  ;;  %vm27109_vm11 = vcmp.eq.s32.totalorder %v26982_v20, %v27108_v42  ;;  %v27118_v42 = vld [vmem:[#allocation89_spill] sm:$0xff] }
 0x49d   :  { %14161 = vmatprep.mubr.msk.f32.mxu0 %vm5604_vm15, %v26981_v13 }
 0x49f   :  { %13397 = vmatmul.mubr.msk.f32.gmra.mrb[90].mxu1 %vm27098_vm14, %v26981_v13  ;;  %vm27111_vm14 = vcmp.eq.s32.totalorder %v26982_v20, %v27110_v36  ;;  %v27120_v36 = vld [vmem:[#allocation125_spill] sm:$0xff] }
 0x4a0   :  { %13399 = vmatprep.mubr.msk.f32.mxu1 %vm1404_vm1, %v26981_v13  ;;  %14162 = vmatmul.mubr.msk.f32.gmra.mrb[88].mxu0 %vm27101_vm12, %v26981_v13  ;;  %vm27113_vm12 = vcmp.eq.s32.totalorder %v26982_v20, %v27112_v53  ;;  %v27122_v53 = vld [vmem:[#allocation91_spill] sm:$0xff] }
 0x4a1   :  { %14164 = vmatprep.mubr.msk.f32.mxu0 %vm5606_vm8, %v26981_v13 }
 0x4a3   :  { %13400 = vmatmul.mubr.msk.f32.gmra.mrb[92].mxu1 %vm27104_vm4, %v26981_v13  ;;  %vm27115_vm4 = vcmp.eq.s32.totalorder %v26982_v20, %v27114_v38  ;;  %v27124_v38 = vld [vmem:[#allocation102_spill] sm:$0xff] }
 0x4a4   :  { %13402 = vmatprep.mubr.msk.f32.mxu1 %vm1406_vm13, %v26981_v13  ;;  %14165 = vmatmul.mubr.msk.f32.gmra.mrb[90].mxu0 %vm27107_vm6, %v26981_v13  ;;  %vm27117_vm6 = vcmp.eq.s32.totalorder %v26982_v20, %v27116_v61  ;;  %v27126_v61 = vld [vmem:[#allocation109_spill] sm:$0xff] }
 0x4a5   :  { %14167 = vmatprep.mubr.msk.f32.mxu0 %vm27109_vm11, %v26981_v13  ;;  %vm27119_vm11 = vcmp.eq.s32.totalorder %v26982_v20, %v27118_v42  ;;  %v27128_v42 = vld [vmem:[#allocation144_spill] sm:$0xff] }
 0x4a7   :  { %13403 = vmatmul.mubr.msk.f32.gmra.mrb[94].mxu1 %vm27111_vm14, %v26981_v13  ;;  %vm27121_vm14 = vcmp.eq.s32.totalorder %v26982_v20, %v27120_v36  ;;  %v27130_v36 = vld [vmem:[#allocation79_spill] sm:$0xff] }
 0x4a8   :  { %13405 = vmatprep.mubr.msk.f32.mxu1 %vm27113_vm12, %v26981_v13  ;;  %14168 = vmatmul.mubr.msk.f32.gmra.mrb[92].mxu0 %vm27115_vm4, %v26981_v13  ;;  %vm27123_vm12 = vcmp.eq.s32.totalorder %v26982_v20, %v27122_v53  ;;  %vm27125_vm4 = vcmp.eq.s32.totalorder %v26982_v20, %v27124_v38  ;;  %v27132_v53 = vld [vmem:[#allocation128_spill] sm:$0xff]  ;;  %v27134_v38 = vld [vmem:[#allocation126_spill] sm:$0xff] }
 0x4a9   :  { %14170 = vmatprep.mubr.msk.f32.mxu0 %vm27117_vm6, %v26981_v13  ;;  %vm27127_vm6 = vcmp.eq.s32.totalorder %v26982_v20, %v27126_v61  ;;  %v27136_v61 = vld [vmem:[#allocation172_spill] sm:$0xff] }
 0x4ab   :  { %13406 = vmatmul.mubr.msk.f32.gmra.mrb[96].mxu1 %vm27119_vm11, %v26981_v13  ;;  %vm27129_vm11 = vcmp.eq.s32.totalorder %v26982_v20, %v27128_v42  ;;  %v27138_v42 = vld [vmem:[#allocation120_spill] sm:$0xff] }
 0x4ac   :  { %13408 = vmatprep.mubr.msk.f32.mxu1 %vm27121_vm14, %v26981_v13  ;;  %14171 = vmatmul.mubr.msk.f32.gmra.mrb[94].mxu0 %vm27123_vm12, %v26981_v13  ;;  %vm27131_vm14 = vcmp.eq.s32.totalorder %v26982_v20, %v27130_v36  ;;  %vm27133_vm12 = vcmp.eq.s32.totalorder %v26982_v20, %v27132_v53  ;;  %v27140_v36 = vld [vmem:[#allocation154_spill] sm:$0xff]  ;;  %v27142_v53 = vld [vmem:[#allocation145_spill] sm:$0xff] }
 0x4ad   :  { %14173 = vmatprep.mubr.msk.f32.mxu0 %vm27125_vm4, %v26981_v13  ;;  %vm27135_vm4 = vcmp.eq.s32.totalorder %v26982_v20, %v27134_v38  ;;  %v27144_v38 = vld [vmem:[#allocation61_spill] sm:$0xff] }
 0x4af   :  { %13409 = vmatmul.mubr.msk.f32.gmra.mrb[98].mxu1 %vm27127_vm6, %v26981_v13  ;;  %vm27137_vm6 = vcmp.eq.s32.totalorder %v26982_v20, %v27136_v61  ;;  %v27146_v61 = vld [vmem:[#allocation134_spill] sm:$0xff] }
 0x4b0   :  { %13411 = vmatprep.mubr.msk.f32.mxu1 %vm27129_vm11, %v26981_v13  ;;  %14174 = vmatmul.mubr.msk.f32.gmra.mrb[96].mxu0 %vm27131_vm14, %v26981_v13  ;;  %vm27139_vm11 = vcmp.eq.s32.totalorder %v26982_v20, %v27138_v42  ;;  %vm27141_vm14 = vcmp.eq.s32.totalorder %v26982_v20, %v27140_v36  ;;  %v27148_v42 = vld [vmem:[#allocation57_spill] sm:$0xff]  ;;  %v27150_v36 = vld [vmem:[#allocation166_spill] sm:$0xff] }
 0x4b1   :  { %14176 = vmatprep.mubr.msk.f32.mxu0 %vm27133_vm12, %v26981_v13  ;;  %vm27143_vm12 = vcmp.eq.s32.totalorder %v26982_v20, %v27142_v53  ;;  %v27152_v53 = vld [vmem:[#allocation66_spill] sm:$0xff] }
 0x4b3   :  { %13412 = vmatmul.mubr.msk.f32.gmra.mrb[100].mxu1 %vm27135_vm4, %v26981_v13  ;;  %vm27145_vm4 = vcmp.eq.s32.totalorder %v26982_v20, %v27144_v38  ;;  %v27154_v38 = vld [vmem:[#allocation155_spill] sm:$0xff] }
 0x4b4   :  { %13414 = vmatprep.mubr.msk.f32.mxu1 %vm27137_vm6, %v26981_v13  ;;  %14177 = vmatmul.mubr.msk.f32.gmra.mrb[98].mxu0 %vm27139_vm11, %v26981_v13  ;;  %vm27147_vm6 = vcmp.eq.s32.totalorder %v26982_v20, %v27146_v61  ;;  %vm27149_vm11 = vcmp.eq.s32.totalorder %v26982_v20, %v27148_v42  ;;  %v27156_v61 = vld [vmem:[#allocation62_spill] sm:$0xff]  ;;  %v27158_v42 = vld [vmem:[#allocation65_spill] sm:$0xff] }
 0x4b5   :  { %14179 = vmatprep.mubr.msk.f32.mxu0 %vm27141_vm14, %v26981_v13  ;;  %vm27151_vm14 = vcmp.eq.s32.totalorder %v26982_v20, %v27150_v36  ;;  %v27160_v36 = vld [vmem:[#allocation78_spill] sm:$0xff] }
 0x4b7   :  { %13415 = vmatmul.mubr.msk.f32.gmra.mrb[102].mxu1 %vm27143_vm12, %v26981_v13  ;;  %vm27153_vm12 = vcmp.eq.s32.totalorder %v26982_v20, %v27152_v53  ;;  %v27162_v53 = vld [vmem:[#allocation177_spill] sm:$0xff] }
 0x4b8   :  { %13417 = vmatprep.mubr.msk.f32.mxu1 %vm27145_vm4, %v26981_v13  ;;  %14180 = vmatmul.mubr.msk.f32.gmra.mrb[100].mxu0 %vm27147_vm6, %v26981_v13  ;;  %vm27155_vm4 = vcmp.eq.s32.totalorder %v26982_v20, %v27154_v38  ;;  %vm27157_vm6 = vcmp.eq.s32.totalorder %v26982_v20, %v27156_v61  ;;  %v27164_v38 = vld [vmem:[#allocation75_spill] sm:$0xff]  ;;  %v27166_v61 = vld [vmem:[#allocation72_spill] sm:$0xff] }
 0x4b9   :  { %14182 = vmatprep.mubr.msk.f32.mxu0 %vm27149_vm11, %v26981_v13  ;;  %vm27159_vm11 = vcmp.eq.s32.totalorder %v26982_v20, %v27158_v42  ;;  %v27168_v42 = vld [vmem:[#allocation223_spill] sm:$0xff] }
 0x4bb   :  { %13418 = vmatmul.mubr.msk.f32.gmra.mrb[104].mxu1 %vm27151_vm14, %v26981_v13  ;;  %vm27161_vm14 = vcmp.eq.s32.totalorder %v26982_v20, %v27160_v36  ;;  %v27170_v36 = vld [vmem:[#allocation70_spill] sm:$0xff] }
 0x4bc   :  { %13420 = vmatprep.mubr.msk.f32.mxu1 %vm27153_vm12, %v26981_v13  ;;  %14183 = vmatmul.mubr.msk.f32.gmra.mrb[102].mxu0 %vm27155_vm4, %v26981_v13  ;;  %vm27163_vm12 = vcmp.eq.s32.totalorder %v26982_v20, %v27162_v53  ;;  %vm27165_vm4 = vcmp.eq.s32.totalorder %v26982_v20, %v27164_v38  ;;  %v27172_v53 = vld [vmem:[#allocation215_spill] sm:$0xff]  ;;  %v27174_v38 = vld [vmem:[#allocation80_spill] sm:$0xff] }
 0x4bd   :  { %14185 = vmatprep.mubr.msk.f32.mxu0 %vm27157_vm6, %v26981_v13  ;;  %vm27167_vm6 = vcmp.eq.s32.totalorder %v26982_v20, %v27166_v61  ;;  %v27176_v61 = vld [vmem:[#allocation242_spill] sm:$0xff] }
 0x4bf   :  { %13421 = vmatmul.mubr.msk.f32.gmra.mrb[106].mxu1 %vm27159_vm11, %v26981_v13  ;;  %vm27169_vm11 = vcmp.eq.s32.totalorder %v26982_v20, %v27168_v42  ;;  %v27178_v42 = vld [vmem:[#allocation77_spill] sm:$0xff] }
 0x4c0   :  { %13423 = vmatprep.mubr.msk.f32.mxu1 %vm27161_vm14, %v26981_v13  ;;  %14186 = vmatmul.mubr.msk.f32.gmra.mrb[104].mxu0 %vm27163_vm12, %v26981_v13  ;;  %vm27171_vm14 = vcmp.eq.s32.totalorder %v26982_v20, %v27170_v36  ;;  %vm27173_vm12 = vcmp.eq.s32.totalorder %v26982_v20, %v27172_v53  ;;  %v27180_v36 = vld [vmem:[#allocation233_spill] sm:$0xff]  ;;  %v27182_v53 = vld [vmem:[#allocation220_spill] sm:$0xff] }
 0x4c1   :  { %14188 = vmatprep.mubr.msk.f32.mxu0 %vm27165_vm4, %v26981_v13  ;;  %vm27175_vm4 = vcmp.eq.s32.totalorder %v26982_v20, %v27174_v38  ;;  %v27184_v38 = vld [vmem:[#allocation259_spill] sm:$0xff] }
 0x4c3   :  { %13424 = vmatmul.mubr.msk.f32.gmra.mrb[108].mxu1 %vm27167_vm6, %v26981_v13  ;;  %vm27177_vm6 = vcmp.eq.s32.totalorder %v26982_v20, %v27176_v61  ;;  %v27186_v61 = vld [vmem:[#allocation211_spill] sm:$0xff] }
 0x4c4   :  { %13426 = vmatprep.mubr.msk.f32.mxu1 %vm27169_vm11, %v26981_v13  ;;  %14189 = vmatmul.mubr.msk.f32.gmra.mrb[106].mxu0 %vm27171_vm14, %v26981_v13  ;;  %vm27179_vm11 = vcmp.eq.s32.totalorder %v26982_v20, %v27178_v42  ;;  %vm27181_vm14 = vcmp.eq.s32.totalorder %v26982_v20, %v27180_v36  ;;  %v27188_v42 = vld [vmem:[#allocation252_spill] sm:$0xff]  ;;  %v27190_v36 = vld [vmem:[#allocation239_spill] sm:$0xff] }
 0x4c5   :  { %14191 = vmatprep.mubr.msk.f32.mxu0 %vm27173_vm12, %v26981_v13  ;;  %vm27183_vm12 = vcmp.eq.s32.totalorder %v26982_v20, %v27182_v53  ;;  %v27192_v53 = vld [vmem:[#allocation277_spill] sm:$0xff] }
 0x4c7   :  { %13427 = vmatmul.mubr.msk.f32.gmra.mrb[110].mxu1 %vm27175_vm4, %v26981_v13  ;;  %vm27185_vm4 = vcmp.eq.s32.totalorder %v26982_v20, %v27184_v38  ;;  %v27194_v38 = vld [vmem:[#allocation229_spill] sm:$0xff] }
 0x4c8   :  { %13429 = vmatprep.mubr.msk.f32.mxu1 %vm27177_vm6, %v26981_v13  ;;  %14192 = vmatmul.mubr.msk.f32.gmra.mrb[108].mxu0 %vm27179_vm11, %v26981_v13  ;;  %vm27187_vm6 = vcmp.eq.s32.totalorder %v26982_v20, %v27186_v61  ;;  %vm27189_vm11 = vcmp.eq.s32.totalorder %v26982_v20, %v27188_v42  ;;  %v27196_v61 = vld [vmem:[#allocation268_spill] sm:$0xff] }
 0x4c9   :  { %14194 = vmatprep.mubr.msk.f32.mxu0 %vm27181_vm14, %v26981_v13  ;;  %vm27191_vm14 = vcmp.eq.s32.totalorder %v26982_v20, %v27190_v36  ;;  %v27198_v42 = vld [vmem:[#allocation256_spill] sm:$0xff] }
 0x4ca   :  { %v27200_v36 = vld [vmem:[#allocation296_spill] sm:$0xff] }
 0x4cb   :  { %13430 = vmatmul.mubr.msk.f32.gmra.mrb[112].mxu1 %vm27183_vm12, %v26981_v13  ;;  %vm27193_vm12 = vcmp.eq.s32.totalorder %v26982_v20, %v27192_v53  ;;  %v27202_v53 = vld [vmem:[#allocation248_spill] sm:$0xff] }
 0x4cc   :  { %13432 = vmatprep.mubr.msk.f32.mxu1 %vm27185_vm4, %v26981_v13  ;;  %14195 = vmatmul.mubr.msk.f32.gmra.mrb[110].mxu0 %vm27187_vm6, %v26981_v13  ;;  %vm27195_vm4 = vcmp.eq.s32.totalorder %v26982_v20, %v27194_v38  ;;  %vm27197_vm6 = vcmp.eq.s32.totalorder %v26982_v20, %v27196_v61  ;;  %v27204_v38 = vld [vmem:[#allocation286_spill] sm:$0xff]  ;;  %v27206_v61 = vld [vmem:[#allocation8_spill] sm:$0xff] }
 0x4cd   :  { %14197 = vmatprep.mubr.msk.f32.mxu0 %vm27189_vm11, %v26981_v13  ;;  %vm27199_vm11 = vcmp.eq.s32.totalorder %v26982_v20, %v27198_v42  ;;  %v27208_v42 = vld [vmem:[#allocation314_spill] sm:$0xff] }
 0x4cf   :  { %13433 = vmatmul.mubr.msk.f32.gmra.mrb[114].mxu1 %vm27191_vm14, %v26981_v13  ;;  %vm27201_vm14 = vcmp.eq.s32.totalorder %v26982_v20, %v27200_v36  ;;  %v27210_v36 = vld [vmem:[#allocation264_spill] sm:$0xff] }
 0x4d0   :  { %13435 = vmatprep.mubr.msk.f32.mxu1 %vm27193_vm12, %v26981_v13  ;;  %14198 = vmatmul.mubr.msk.f32.gmra.mrb[112].mxu0 %vm27195_vm4, %v26981_v13  ;;  %vm27203_vm12 = vcmp.eq.s32.totalorder %v26982_v20, %v27202_v53  ;;  %vm27205_vm4 = vcmp.eq.s32.totalorder %v26982_v20, %v27204_v38  ;;  %v27212_v53 = vld [vmem:[#allocation305_spill] sm:$0xff]  ;;  %v27214_v38 = vld [vmem:[#allocation292_spill] sm:$0xff] }
 0x4d1   :  { %14200 = vmatprep.mubr.msk.f32.mxu0 %vm27197_vm6, %v26981_v13  ;;  %vm27207_vm6 = vcmp.eq.s32.totalorder %v26982_v20, %v27206_v61  ;;  %v27216_v61 = vld [vmem:[#allocation331_spill] sm:$0xff] }
 0x4d3   :  { %13436 = vmatmul.mubr.msk.f32.gmra.mrb[116].mxu1 %vm27199_vm11, %v26981_v13  ;;  %vm27209_vm11 = vcmp.eq.s32.totalorder %v26982_v20, %v27208_v42  ;;  %v27218_v42 = vld [vmem:[#allocation282_spill] sm:$0xff] }
 0x4d4   :  { %13438 = vmatprep.mubr.msk.f32.mxu1 %vm27201_vm14, %v26981_v13  ;;  %14201 = vmatmul.mubr.msk.f32.gmra.mrb[114].mxu0 %vm27203_vm12, %v26981_v13  ;;  %vm27211_vm14 = vcmp.eq.s32.totalorder %v26982_v20, %v27210_v36  ;;  %vm27213_vm12 = vcmp.eq.s32.totalorder %v26982_v20, %v27212_v53  ;;  %v27220_v36 = vld [vmem:[#allocation322_spill] sm:$0xff]  ;;  %v27222_v53 = vld [vmem:[#allocation315_spill] sm:$0xff] }
 0x4d5   :  { %14203 = vmatprep.mubr.msk.f32.mxu0 %vm27205_vm4, %v26981_v13  ;;  %vm27215_vm4 = vcmp.eq.s32.totalorder %v26982_v20, %v27214_v38  ;;  %v27224_v38 = vld [vmem:[#allocation342_spill] sm:$0xff] }
 0x4d7   :  { %13439 = vmatmul.mubr.msk.f32.gmra.mrb[118].mxu1 %vm27207_vm6, %v26981_v13  ;;  %vm27217_vm6 = vcmp.eq.s32.totalorder %v26982_v20, %v27216_v61  ;;  %v27226_v61 = vld [vmem:[#allocation302_spill] sm:$0xff] }
 0x4d8   :  { %13441 = vmatprep.mubr.msk.f32.mxu1 %vm27209_vm11, %v26981_v13  ;;  %14204 = vmatmul.mubr.msk.f32.gmra.mrb[116].mxu0 %vm27211_vm14, %v26981_v13  ;;  %vm27219_vm11 = vcmp.eq.s32.totalorder %v26982_v20, %v27218_v42  ;;  %vm27221_vm14 = vcmp.eq.s32.totalorder %v26982_v20, %v27220_v36  ;;  %v27228_v42 = vld [vmem:[#allocation306_spill] sm:$0xff]  ;;  %v27230_v36 = vld [vmem:[#allocation336_spill] sm:$0xff] }
 0x4d9   :  { %14206 = vmatprep.mubr.msk.f32.mxu0 %vm27213_vm12, %v26981_v13  ;;  %vm27223_vm12 = vcmp.eq.s32.totalorder %v26982_v20, %v27222_v53  ;;  %v27232_v53 = vld [vmem:[#allocation353_spill] sm:$0xff] }
 0x4db   :  { %13442 = vmatmul.mubr.msk.f32.gmra.mrb[120].mxu1 %vm27215_vm4, %v26981_v13  ;;  %vm27225_vm4 = vcmp.eq.s32.totalorder %v26982_v20, %v27224_v38  ;;  %v27234_v38 = vld [vmem:[#allocation323_spill] sm:$0xff] }
 0x4dc   :  { %13444 = vmatprep.mubr.msk.f32.mxu1 %vm27217_vm6, %v26981_v13  ;;  %14207 = vmatmul.mubr.msk.f32.gmra.mrb[118].mxu0 %vm27219_vm11, %v26981_v13  ;;  %vm27227_vm6 = vcmp.eq.s32.totalorder %v26982_v20, %v27226_v61  ;;  %vm27229_vm11 = vcmp.eq.s32.totalorder %v26982_v20, %v27228_v42  ;;  %v27236_v61 = vld [vmem:[#allocation327_spill] sm:$0xff]  ;;  %v27238_v42 = vld [vmem:[#allocation354_spill] sm:$0xff] }
 0x4dd   :  { %14209 = vmatprep.mubr.msk.f32.mxu0 %vm27221_vm14, %v26981_v13  ;;  %vm27231_vm14 = vcmp.eq.s32.totalorder %v26982_v20, %v27230_v36 }
 0x4df   :  { %13445 = vmatmul.mubr.msk.f32.gmra.mrb[122].mxu1 %vm27223_vm12, %v26981_v13  ;;  %vm27233_vm12 = vcmp.eq.s32.totalorder %v26982_v20, %v27232_v53  ;;  %v27241_v53 = vld [vmem:[#allocation343_spill] sm:$0xff] }
 0x4e0   :  { %13447 = vmatprep.mubr.msk.f32.mxu1 %vm27225_vm4, %v26981_v13  ;;  %14210 = vmatmul.mubr.msk.f32.gmra.mrb[120].mxu0 %vm27227_vm6, %v26981_v13  ;;  %vm27235_vm4 = vcmp.eq.s32.totalorder %v26982_v20, %v27234_v38  ;;  %vm27237_vm6 = vcmp.eq.s32.totalorder %v26982_v20, %v27236_v61  ;;  %v27243_v38 = vld [vmem:[#allocation346_spill] sm:$0xff] }
 0x4e1   :  { %14212 = vmatprep.mubr.msk.f32.mxu0 %vm27229_vm11, %v26981_v13  ;;  %vm27239_vm11 = vcmp.eq.s32.totalorder %v26982_v20, %v27238_v42 }
 0x4e3   :  { %13448 = vmatmul.mubr.msk.f32.gmra.mrb[124].mxu1 %vm27231_vm14, %v26981_v13  ;;  %vm27240_vm14 = vcmp.eq.s32.totalorder %v26982_v20, %v26983_v32  ;;  %v27247_v32 = vld [vmem:[#allocation358_spill] sm:$0xff] }
 0x4e4   :  { %13450 = vmatprep.mubr.msk.f32.mxu1 %vm27233_vm12, %v26981_v13  ;;  %14213 = vmatmul.mubr.msk.f32.gmra.mrb[122].mxu0 %vm27235_vm4, %v26981_v13  ;;  %vm27242_vm12 = vcmp.eq.s32.totalorder %v26982_v20, %v27241_v53  ;;  %vm27244_vm4 = vcmp.eq.s32.totalorder %v26982_v20, %v27243_v38 }
 0x4e5   :  { %14215 = vmatprep.mubr.msk.f32.mxu0 %vm27237_vm6, %v26981_v13  ;;  %vm27245_vm6 = vcmp.eq.s32.totalorder %v26982_v20, %v26988_v56  ;;  %v27404_v56 = vld [vmem:[#allocation331_spill] sm:$0xff] }
 0x4e7   :  { %13451 = vmatmul.mubr.msk.f32.gmra.mrb[126].mxu1 %vm27239_vm11, %v26981_v13  ;;  %vm27246_vm11 = vcmp.eq.s32.totalorder %v26982_v20, %v26990_v1  ;;  %v27294_v1 = vld [vmem:[#allocation319_spill] sm:$0xff] }
 0x4e8   :  { %13485 = vmatprep.mubr.msk.f32.mxu1 %vm27240_vm14, %v26981_v13  ;;  %14216 = vmatmul.mubr.msk.f32.gmra.mrb[124].mxu0 %vm27242_vm12, %v26981_v13  ;;  %vm27248_vm14 = vcmp.eq.s32.totalorder %v26982_v20, %v27247_v32  ;;  %vm27249_vm12 = vcmp.eq.s32.totalorder %v26982_v20, %v26993_v16  ;;  %v27296_v16 = vld [vmem:[#allocation345_spill] sm:$0xff] }
 0x4e9   :  { %14218 = vmatprep.mubr.msk.f32.mxu0 %vm27244_vm4, %v26981_v13  ;;  %vm27250_vm4 = vcmp.eq.s32.totalorder %v26982_v20, %v26996_v26  ;;  %v27298_v26 = vld [vmem:[#allocation350_spill] sm:$0xff] }
 0x4eb   :  { %13486 = vmatmul.mubr.msk.f32.vlgmr.msra.gmra.mrb[64].mxu1 %vm27245_vm6, %v26981_v13  ;;  %vm27251_vm6 = vcmp.eq.s32.totalorder %v26982_v20, %v26998_v37  ;;  %v27300_v37 = vld [vmem:[#allocation90_spill] sm:$0xff] }
 0x4ec   :  { %13488 = vmatprep.mubr.msk.f32.mxu1 %vm27246_vm11, %v26981_v13  ;;  %14219 = vmatmul.mubr.msk.f32.gmra.mrb[126].mxu0 %vm27248_vm14, %v26981_v13  ;;  %vm27252_vm11 = vcmp.eq.s32.totalorder %v26982_v20, %v27000_v45  ;;  %vm27253_vm14 = vcmp.eq.s32.totalorder %v26982_v20, %v27002_v63  ;;  %v27302_v45 = vld [vmem:[#allocation339_spill] sm:$0xff]  ;;  %v27304_v63 = vld [vmem:[#allocation356_spill] sm:$0xff] }
 0x4ed   :  { %14253 = vmatprep.mubr.msk.f32.mxu0 %vm27249_vm12, %v26981_v13  ;;  %vm27254_vm12 = vcmp.eq.s32.totalorder %v26982_v20, %v27005_v43  ;;  %v27306_v43 = vld [vmem:[#allocation89_spill] sm:$0xff] }
 0x4ef   :  { %13489 = vmatmul.mubr.msk.f32.gmra.mrb[66].mxu1 %vm27250_vm4, %v26981_v13  ;;  %vm27255_vm4 = vcmp.eq.s32.totalorder %v26982_v20, %v27008_v40  ;;  %v27308_v40 = vld [vmem:[#allocation125_spill] sm:$0xff] }
 0x4f0   :  { %13491 = vmatprep.mubr.msk.f32.mxu1 %vm27251_vm6, %v26981_v13  ;;  %14254 = vmatmul.mubr.msk.f32.vlgmr.msra.gmra.mrb[64].mxu0 %vm27252_vm11, %v26981_v13  ;;  %vm27256_vm6 = vcmp.eq.s32.totalorder %v26982_v20, %v27010_v41  ;;  %vm27257_vm11 = vcmp.eq.s32.totalorder %v26982_v20, %v27012_v35  ;;  %v27310_v41 = vld [vmem:[#allocation91_spill] sm:$0xff]  ;;  %v27312_v35 = vld [vmem:[#allocation102_spill] sm:$0xff] }
 0x4f1   :  { %14256 = vmatprep.mubr.msk.f32.mxu0 %vm27253_vm14, %v26981_v13  ;;  %vm27258_vm14 = vcmp.eq.s32.totalorder %v26982_v20, %v27015_v27  ;;  %v27314_v27 = vld [vmem:[#allocation109_spill] sm:$0xff] }
 0x4f3   :  { %13492 = vmatmul.mubr.msk.f32.gmra.mrb[68].mxu1 %vm27254_vm12, %v26981_v13  ;;  %vm27259_vm12 = vcmp.eq.s32.totalorder %v26982_v20, %v27018_v10  ;;  %v27316_v10 = vld [vmem:[#allocation144_spill] sm:$0xff] }
 0x4f4   :  { %13494 = vmatprep.mubr.msk.f32.mxu1 %vm27255_vm4, %v26981_v13  ;;  %14257 = vmatmul.mubr.msk.f32.gmra.mrb[66].mxu0 %vm27256_vm6, %v26981_v13  ;;  %vm27260_vm4 = vcmp.eq.s32.totalorder %v26982_v20, %v27020_v54  ;;  %vm27261_vm6 = vcmp.eq.s32.totalorder %v26982_v20, %v27022_v51  ;;  %v27318_v54 = vld [vmem:[#allocation79_spill] sm:$0xff]  ;;  %v27320_v51 = vld [vmem:[#allocation128_spill] sm:$0xff] }
 0x4f5   :  { %14259 = vmatprep.mubr.msk.f32.mxu0 %vm27257_vm11, %v26981_v13  ;;  %vm27262_vm11 = vcmp.eq.s32.totalorder %v26982_v20, %v27025_v33  ;;  %v27322_v33 = vld [vmem:[#allocation126_spill] sm:$0xff] }
 0x4f7   :  { %13495 = vmatmul.mubr.msk.f32.gmra.mrb[70].mxu1 %vm27258_vm14, %v26981_v13  ;;  %vm27263_vm14 = vcmp.eq.s32.totalorder %v26982_v20, %v27028_v24  ;;  %v27324_v24 = vld [vmem:[#allocation172_spill] sm:$0xff] }
 0x4f8   :  { %13497 = vmatprep.mubr.msk.f32.mxu1 %vm27259_vm12, %v26981_v13  ;;  %14260 = vmatmul.mubr.msk.f32.gmra.mrb[68].mxu0 %vm27260_vm4, %v26981_v13  ;;  %vm27264_vm12 = vcmp.eq.s32.totalorder %v26982_v20, %v27030_v22  ;;  %vm27265_vm4 = vcmp.eq.s32.totalorder %v26982_v20, %v27032_v19  ;;  %v27326_v22 = vld [vmem:[#allocation120_spill] sm:$0xff]  ;;  %v27328_v19 = vld [vmem:[#allocation154_spill] sm:$0xff] }
 0x4f9   :  { %14262 = vmatprep.mubr.msk.f32.mxu0 %vm27261_vm6, %v26981_v13  ;;  %vm27266_vm6 = vcmp.eq.s32.totalorder %v26982_v20, %v27035_v18  ;;  %v27330_v18 = vld [vmem:[#allocation145_spill] sm:$0xff] }
 0x4fb   :  { %13498 = vmatmul.mubr.msk.f32.gmra.mrb[72].mxu1 %vm27262_vm11, %v26981_v13  ;;  %vm27267_vm11 = vcmp.eq.s32.totalorder %v26982_v20, %v27038_v23  ;;  %v27332_v23 = vld [vmem:[#allocation61_spill] sm:$0xff] }
 0x4fc   :  { %13500 = vmatprep.mubr.msk.f32.mxu1 %vm27263_vm14, %v26981_v13  ;;  %14263 = vmatmul.mubr.msk.f32.gmra.mrb[70].mxu0 %vm27264_vm12, %v26981_v13  ;;  %vm27268_vm14 = vcmp.eq.s32.totalorder %v26982_v20, %v27040_v44  ;;  %vm27269_vm12 = vcmp.eq.s32.totalorder %v26982_v20, %v27042_v11  ;;  %v27334_v44 = vld [vmem:[#allocation134_spill] sm:$0xff]  ;;  %v27336_v11 = vld [vmem:[#allocation57_spill] sm:$0xff] }
 0x4fd   :  { %14265 = vmatprep.mubr.msk.f32.mxu0 %vm27265_vm4, %v26981_v13  ;;  %vm27270_vm4 = vcmp.eq.s32.totalorder %v26982_v20, %v27045_v3  ;;  %v27338_v3 = vld [vmem:[#allocation166_spill] sm:$0xff] }
 0x4ff   :  { %13501 = vmatmul.mubr.msk.f32.gmra.mrb[74].mxu1 %vm27266_vm6, %v26981_v13  ;;  %vm27271_vm6 = vcmp.eq.s32.totalorder %v26982_v20, %v27048_v48  ;;  %v27340_v48 = vld [vmem:[#allocation66_spill] sm:$0xff] }
 0x500   :  { %13503 = vmatprep.mubr.msk.f32.mxu1 %vm27267_vm11, %v26981_v13  ;;  %14266 = vmatmul.mubr.msk.f32.gmra.mrb[72].mxu0 %vm27268_vm14, %v26981_v13  ;;  %vm27272_vm11 = vcmp.eq.s32.totalorder %v26982_v20, %v27050_v17  ;;  %vm27273_vm14 = vcmp.eq.s32.totalorder %v26982_v20, %v27052_v57  ;;  %v27342_v17 = vld [vmem:[#allocation155_spill] sm:$0xff]  ;;  %v27344_v57 = vld [vmem:[#allocation62_spill] sm:$0xff] }
 0x501   :  { %14268 = vmatprep.mubr.msk.f32.mxu0 %vm27269_vm12, %v26981_v13  ;;  %vm27274_vm12 = vcmp.eq.s32.totalorder %v26982_v20, %v27055_v4  ;;  %v27346_v4 = vld [vmem:[#allocation65_spill] sm:$0xff] }
 0x503   :  { %13504 = vmatmul.mubr.msk.f32.gmra.mrb[76].mxu1 %vm27270_vm4, %v26981_v13  ;;  %vm27275_vm4 = vcmp.eq.s32.totalorder %v26982_v20, %v27058_v5  ;;  %v27348_v5 = vld [vmem:[#allocation78_spill] sm:$0xff] }
 0x504   :  { %13506 = vmatprep.mubr.msk.f32.mxu1 %vm27271_vm6, %v26981_v13  ;;  %14269 = vmatmul.mubr.msk.f32.gmra.mrb[74].mxu0 %vm27272_vm11, %v26981_v13  ;;  %vm27276_vm6 = vcmp.eq.s32.totalorder %v26982_v20, %v27060_v21  ;;  %vm27277_vm11 = vcmp.eq.s32.totalorder %v26982_v20, %v27062_v0  ;;  %v27350_v21 = vld [vmem:[#allocation177_spill] sm:$0xff]  ;;  %v27352_v0 = vld [vmem:[#allocation75_spill] sm:$0xff] }
 0x505   :  { %14271 = vmatprep.mubr.msk.f32.mxu0 %vm27273_vm14, %v26981_v13  ;;  %vm27278_vm14 = vcmp.eq.s32.totalorder %v26982_v20, %v27065_v15  ;;  %v27354_v15 = vld [vmem:[#allocation72_spill] sm:$0xff] }
 0x507   :  { %13507 = vmatmul.mubr.msk.f32.gmra.mrb[78].mxu1 %vm27274_vm12, %v26981_v13  ;;  %vm27279_vm12 = vcmp.eq.s32.totalorder %v26982_v20, %v27068_v29  ;;  %v27358_v29 = vld [vmem:[#allocation70_spill] sm:$0xff] }
 0x508   :  { %13509 = vmatprep.mubr.msk.f32.mxu1 %vm27275_vm4, %v26981_v13  ;;  %14272 = vmatmul.mubr.msk.f32.gmra.mrb[76].mxu0 %vm27276_vm6, %v26981_v13  ;;  %vm27280_vm4 = vcmp.eq.s32.totalorder %v26982_v20, %v27070_v14  ;;  %vm27281_vm6 = vcmp.eq.s32.totalorder %v26982_v20, %v27072_v60  ;;  %v27360_v14 = vld [vmem:[#allocation215_spill] sm:$0xff]  ;;  %v27362_v60 = vld [vmem:[#allocation80_spill] sm:$0xff] }
 0x509   :  { %14274 = vmatprep.mubr.msk.f32.mxu0 %vm27277_vm11, %v26981_v13  ;;  %vm27283_vm11 = vcmp.eq.s32.totalorder %v26982_v20, %v27077_v49  ;;  %v27368_v49 = vld [vmem:[#allocation233_spill] sm:$0xff] }
 0x50b   :  { %13510 = vmatmul.mubr.msk.f32.gmra.mrb[80].mxu1 %vm27278_vm14, %v26981_v13  ;;  %vm27284_vm14 = vcmp.eq.s32.totalorder %v26982_v20, %v27079_v39  ;;  %v27370_v39 = vld [vmem:[#allocation220_spill] sm:$0xff] }
 0x50c   :  { %13512 = vmatprep.mubr.msk.f32.mxu1 %vm1394_vm2, %v26981_v13  ;;  %14275 = vmatmul.mubr.msk.f32.gmra.mrb[78].mxu0 %vm27279_vm12, %v26981_v13  ;;  %vm27282_vm2 = vcmp.eq.s32.totalorder %v26982_v20, %v27075_v52  ;;  %vm27286_vm12 = vcmp.eq.s32.totalorder %v26982_v20, %v27085_v9  ;;  %v27366_v52 = vld [vmem:[#allocation77_spill] sm:$0xff]  ;;  %v27378_v9 = vld [vmem:[#allocation239_spill] sm:$0xff] }
 0x50d   :  { %14277 = vmatprep.mubr.msk.f32.mxu0 %vm27280_vm4, %v26981_v13  ;;  %vm27297_vm4 = vcmp.eq.s32.totalorder %v26982_v20, %v27296_v16  ;;  %v27408_v16 = vld [vmem:[#allocation322_spill] sm:$0xff] }
 0x50f   :  { %13513 = vmatmul.mubr.msk.f32.gmra.mrb[82].mxu1 %vm27281_vm6, %v26981_v13  ;;  %vm27301_vm6 = vcmp.eq.s32.totalorder %v26982_v20, %v27300_v37  ;;  %v27412_v37 = vld [vmem:[#allocation342_spill] sm:$0xff] }
 0x510   :  { %13515 = vmatprep.mubr.msk.f32.mxu1 %vm1396_vm9, %v26981_v13  ;;  %14278 = vmatmul.mubr.msk.f32.gmra.mrb[80].mxu0 %vm27282_vm2, %v26981_v13  ;;  %vm27285_vm9 = vcmp.eq.s32.totalorder %v26982_v20, %v27082_v50  ;;  %vm27305_vm2 = vcmp.eq.s32.totalorder %v26982_v20, %v27304_v63  ;;  %v27374_v50 = vld [vmem:[#allocation211_spill] sm:$0xff]  ;;  %v27416_v63 = vld [vmem:[#allocation306_spill] sm:$0xff] }
 0x511   :  { %14280 = vmatprep.mubr.msk.f32.mxu0 %vm27283_vm11, %v26981_v13  ;;  %vm27307_vm11 = vcmp.eq.s32.totalorder %v26982_v20, %v27306_v43  ;;  %v27419_v43 = vld [vmem:[#allocation353_spill] sm:$0xff] }
 0x513   :  { %13516 = vmatmul.mubr.msk.f32.gmra.mrb[84].mxu1 %vm27284_vm14, %v26981_v13  ;;  %vm27309_vm14 = vcmp.eq.s32.totalorder %v26982_v20, %v27308_v40  ;;  %v27421_v40 = vld [vmem:[#allocation323_spill] sm:$0xff] }
 0x514   :  { %13518 = vmatprep.mubr.msk.f32.mxu1 %vm1398_vm5, %v26981_v13  ;;  %14281 = vmatmul.mubr.msk.f32.gmra.mrb[82].mxu0 %vm27285_vm9, %v26981_v13  ;;  %vm27287_vm5 = vcmp.eq.s32.totalorder %v26982_v20, %v27088_v58  ;;  %vm27311_vm9 = vcmp.eq.s32.totalorder %v26982_v20, %v27310_v41  ;;  %v27382_v58 = vld [vmem:[#allocation229_spill] sm:$0xff] }
 0x515   :  { %14283 = vmatprep.mubr.msk.f32.mxu0 %vm5600_vm10, %v26981_v13  ;;  %vm27288_vm10 = vcmp.eq.s32.totalorder %v26982_v20, %v27091_v47  ;;  %v27386_v47 = vld [vmem:[#allocation256_spill] sm:$0xff] }
 0x517   :  { %13519 = vmatmul.mubr.msk.f32.gmra.mrb[86].mxu1 %vm27286_vm12, %v26981_v13  ;;  %vm27313_vm12 = vcmp.eq.s32.totalorder %v26982_v20, %v27312_v35 }
 0x518   :  { %13521 = vmatprep.mubr.msk.f32.mxu1 %vm1400_vm7, %v26981_v13  ;;  %14284 = vmatmul.mubr.msk.f32.gmra.mrb[84].mxu0 %vm27287_vm5, %v26981_v13  ;;  %vm27289_vm7 = vcmp.eq.s32.totalorder %v26982_v20, %v27094_v55  ;;  %vm27315_vm5 = vcmp.eq.s32.totalorder %v26982_v20, %v27314_v27  ;;  %v27390_v55 = vld [vmem:[#allocation248_spill] sm:$0xff] }
 0x519   :  { %14286 = vmatprep.mubr.msk.f32.mxu0 %vm5602_vm3, %v26981_v13  ;;  %vm27290_vm3 = vcmp.eq.s32.totalorder %v26982_v20, %v27097_v59  ;;  %v27394_v59 = vld [vmem:[#allocation8_spill] sm:$0xff] }
 0x51b   :  { %13522 = vmatmul.mubr.msk.f32.gmra.mrb[88].mxu1 %vm27288_vm10, %v26981_v13  ;;  %vm27317_vm10 = vcmp.eq.s32.totalorder %v26982_v20, %v27316_v10 }
 0x51c   :  { %13524 = vmatprep.mubr.msk.f32.mxu1 %vm1402_vm0, %v26981_v13  ;;  %14287 = vmatmul.mubr.msk.f32.gmra.mrb[86].mxu0 %vm27289_vm7, %v26981_v13  ;;  %vm27291_vm0 = vcmp.eq.s32.totalorder %v26982_v20, %v27100_v8  ;;  %vm27319_vm7 = vcmp.eq.s32.totalorder %v26982_v20, %v27318_v54  ;;  %v27398_v8 = vld [vmem:[#allocation264_spill] sm:$0xff] }
 0x51d   :  { %14289 = vmatprep.mubr.msk.f32.mxu0 %vm5604_vm15, %v26981_v13  ;;  %vm27292_vm15 = vcmp.eq.s32.totalorder %v26982_v20, %v27103_v46  ;;  %v27402_v46 = vld [vmem:[#allocation292_spill] sm:$0xff] }
 0x51f   :  { %13525 = vmatmul.mubr.msk.f32.gmra.mrb[90].mxu1 %vm27290_vm3, %v26981_v13  ;;  %vm27321_vm3 = vcmp.eq.s32.totalorder %v26982_v20, %v27320_v51 }
 0x520   :  { %13527 = vmatprep.mubr.msk.f32.mxu1 %vm1404_vm1, %v26981_v13  ;;  %14290 = vmatmul.mubr.msk.f32.gmra.mrb[88].mxu0 %vm27291_vm0, %v26981_v13  ;;  %vm27295_vm1 = vcmp.eq.s32.totalorder %v26982_v20, %v27294_v1  ;;  %vm27323_vm0 = vcmp.eq.s32.totalorder %v26982_v20, %v27322_v33  ;;  %v27406_v1 = vld [vmem:[#allocation282_spill] sm:$0xff] }
 0x521   :  { %14292 = vmatprep.mubr.msk.f32.mxu0 %vm5606_vm8, %v26981_v13  ;;  %vm27299_vm8 = vcmp.eq.s32.totalorder %v26982_v20, %v27298_v26  ;;  %v27410_v26 = vld [vmem:[#allocation315_spill] sm:$0xff] }
 0x523   :  { %13528 = vmatmul.mubr.msk.f32.gmra.mrb[92].mxu1 %vm27292_vm15, %v26981_v13  ;;  %vm27325_vm15 = vcmp.eq.s32.totalorder %v26982_v20, %v27324_v24 }
 0x524   :  { %13530 = vmatprep.mubr.msk.f32.mxu1 %vm1406_vm13, %v26981_v13  ;;  %14293 = vmatmul.mubr.msk.f32.gmra.mrb[90].mxu0 %vm27295_vm1, %v26981_v13  ;;  %vm27303_vm13 = vcmp.eq.s32.totalorder %v26982_v20, %v27302_v45  ;;  %vm27327_vm1 = vcmp.eq.s32.totalorder %v26982_v20, %v27326_v22  ;;  %v27414_v45 = vld [vmem:[#allocation302_spill] sm:$0xff] }
 0x525   :  { %14295 = vmatprep.mubr.msk.f32.mxu0 %vm27297_vm4, %v26981_v13  ;;  %vm27329_vm4 = vcmp.eq.s32.totalorder %v26982_v20, %v27328_v19 }
 0x527   :  { %13531 = vmatmul.mubr.msk.f32.gmra.mrb[94].mxu1 %vm27299_vm8, %v26981_v13  ;;  %vm27331_vm8 = vcmp.eq.s32.totalorder %v26982_v20, %v27330_v18 }
 0x528   :  { %13533 = vmatprep.mubr.msk.f32.mxu1 %vm27301_vm6, %v26981_v13  ;;  %14296 = vmatmul.mubr.msk.f32.gmra.mrb[92].mxu0 %vm27303_vm13, %v26981_v13  ;;  %vm27333_vm6 = vcmp.eq.s32.totalorder %v26982_v20, %v27332_v23  ;;  %vm27335_vm13 = vcmp.eq.s32.totalorder %v26982_v20, %v27334_v44 }
 0x529   :  { %14298 = vmatprep.mubr.msk.f32.mxu0 %vm27305_vm2, %v26981_v13  ;;  %vm27337_vm2 = vcmp.eq.s32.totalorder %v26982_v20, %v27336_v11 }
 0x52b   :  { %13534 = vmatmul.mubr.msk.f32.gmra.mrb[96].mxu1 %vm27307_vm11, %v26981_v13  ;;  %vm27339_vm11 = vcmp.eq.s32.totalorder %v26982_v20, %v27338_v3 }
 0x52c   :  { %13536 = vmatprep.mubr.msk.f32.mxu1 %vm27309_vm14, %v26981_v13  ;;  %14299 = vmatmul.mubr.msk.f32.gmra.mrb[94].mxu0 %vm27311_vm9, %v26981_v13  ;;  %vm27341_vm14 = vcmp.eq.s32.totalorder %v26982_v20, %v27340_v48  ;;  %vm27343_vm9 = vcmp.eq.s32.totalorder %v26982_v20, %v27342_v17 }
 0x52d   :  { %14301 = vmatprep.mubr.msk.f32.mxu0 %vm27313_vm12, %v26981_v13  ;;  %vm27345_vm12 = vcmp.eq.s32.totalorder %v26982_v20, %v27344_v57 }
 0x52f   :  { %13537 = vmatmul.mubr.msk.f32.gmra.mrb[98].mxu1 %vm27315_vm5, %v26981_v13  ;;  %vm27347_vm5 = vcmp.eq.s32.totalorder %v26982_v20, %v27346_v4  ;;  %v15428_v4 = vld [vmem:[%s24463_s0] sm:$0xff] }
 0x530   :  { %13539 = vmatprep.mubr.msk.f32.mxu1 %vm27317_vm10, %v26981_v13  ;;  %14302 = vmatmul.mubr.msk.f32.gmra.mrb[96].mxu0 %vm27319_vm7, %v26981_v13  ;;  %vm27349_vm10 = vcmp.eq.s32.totalorder %v26982_v20, %v27348_v5  ;;  %vm27351_vm7 = vcmp.eq.s32.totalorder %v26982_v20, %v27350_v21 }
 0x531   :  { %14304 = vmatprep.mubr.msk.f32.mxu0 %vm27321_vm3, %v26981_v13  ;;  %vm27353_vm3 = vcmp.eq.s32.totalorder %v26982_v20, %v27352_v0 }
 0x533   :  { %13540 = vmatmul.mubr.msk.f32.gmra.mrb[100].mxu1 %vm27323_vm0, %v26981_v13  ;;  %vm27355_vm0 = vcmp.eq.s32.totalorder %v26982_v20, %v27354_v15 }
 0x534   :  { %13542 = vmatprep.mubr.msk.f32.mxu1 %vm27325_vm15, %v26981_v13  ;;  %14305 = vmatmul.mubr.msk.f32.gmra.mrb[98].mxu0 %vm27327_vm1, %v26981_v13  ;;  %vm27357_vm15 = vcmp.eq.s32.totalorder %v26982_v20, %v27356_v31  ;;  %vm27359_vm1 = vcmp.eq.s32.totalorder %v26982_v20, %v27358_v29 }
 0x535   :  { %14307 = vmatprep.mubr.msk.f32.mxu0 %vm27329_vm4, %v26981_v13  ;;  %vm27361_vm4 = vcmp.eq.s32.totalorder %v26982_v20, %v27360_v14 }
 0x537   :  { %13543 = vmatmul.mubr.msk.f32.gmra.mrb[102].mxu1 %vm27331_vm8, %v26981_v13  ;;  %vm27363_vm8 = vcmp.eq.s32.totalorder %v26982_v20, %v27362_v60 }
 0x538   :  { %13545 = vmatprep.mubr.msk.f32.mxu1 %vm27333_vm6, %v26981_v13  ;;  %14308 = vmatmul.mubr.msk.f32.gmra.mrb[100].mxu0 %vm27335_vm13, %v26981_v13  ;;  %vm27365_vm6 = vcmp.eq.s32.totalorder %v26982_v20, %v27364_v62  ;;  %vm27367_vm13 = vcmp.eq.s32.totalorder %v26982_v20, %v27366_v52  ;;  %v22733_v52 = vld [vmem:[%s24463_s0 + $0x8] sm:$0xff] }
 0x539   :  { %14310 = vmatprep.mubr.msk.f32.mxu0 %vm27337_vm2, %v26981_v13  ;;  %vm27369_vm2 = vcmp.eq.s32.totalorder %v26982_v20, %v27368_v49  ;;  %27428 = vst [vmem:[#allocation116_spill] sm:$0xff] %v22733_v52 }
 0x53b   :  { %13546 = vmatmul.mubr.msk.f32.gmra.mrb[104].mxu1 %vm27339_vm11, %v26981_v13  ;;  %vm27371_vm11 = vcmp.eq.s32.totalorder %v26982_v20, %v27370_v39 }
 0x53c   :  { %13548 = vmatprep.mubr.msk.f32.mxu1 %vm27341_vm14, %v26981_v13  ;;  %14311 = vmatmul.mubr.msk.f32.gmra.mrb[102].mxu0 %vm27343_vm9, %v26981_v13  ;;  %vm27373_vm14 = vcmp.eq.s32.totalorder %v26982_v20, %v27372_v30  ;;  %vm27375_vm9 = vcmp.eq.s32.totalorder %v26982_v20, %v27374_v50 }
 0x53d   :  { %14313 = vmatprep.mubr.msk.f32.mxu0 %vm27345_vm12, %v26981_v13  ;;  %vm27377_vm12 = vcmp.eq.s32.totalorder %v26982_v20, %v27376_v28 }
 0x53f   :  { %13549 = vmatmul.mubr.msk.f32.gmra.mrb[106].mxu1 %vm27347_vm5, %v26981_v13  ;;  %vm27379_vm5 = vcmp.eq.s32.totalorder %v26982_v20, %v27378_v9 }
 0x540   :  { %13551 = vmatprep.mubr.msk.f32.mxu1 %vm27349_vm10, %v26981_v13  ;;  %14314 = vmatmul.mubr.msk.f32.gmra.mrb[104].mxu0 %vm27351_vm7, %v26981_v13  ;;  %vm27381_vm10 = vcmp.eq.s32.totalorder %v26982_v20, %v27380_v12  ;;  %vm27383_vm7 = vcmp.eq.s32.totalorder %v26982_v20, %v27382_v58 }
 0x541   :  { %14316 = vmatprep.mubr.msk.f32.mxu0 %vm27353_vm3, %v26981_v13  ;;  %vm27385_vm3 = vcmp.eq.s32.totalorder %v26982_v20, %v27384_v2 }
 0x543   :  { %13552 = vmatmul.mubr.msk.f32.gmra.mrb[108].mxu1 %vm27355_vm0, %v26981_v13  ;;  %vm27387_vm0 = vcmp.eq.s32.totalorder %v26982_v20, %v27386_v47 }
 0x544   :  { %13554 = vmatprep.mubr.msk.f32.mxu1 %vm27357_vm15, %v26981_v13  ;;  %14317 = vmatmul.mubr.msk.f32.gmra.mrb[106].mxu0 %vm27359_vm1, %v26981_v13  ;;  %vm27389_vm15 = vcmp.eq.s32.totalorder %v26982_v20, %v27388_v25  ;;  %vm27391_vm1 = vcmp.eq.s32.totalorder %v26982_v20, %v27390_v55 }
 0x545   :  { %14319 = vmatprep.mubr.msk.f32.mxu0 %vm27361_vm4, %v26981_v13  ;;  %vm27393_vm4 = vcmp.eq.s32.totalorder %v26982_v20, %v27392_v7 }
 0x547   :  { %13555 = vmatmul.mubr.msk.f32.gmra.mrb[110].mxu1 %vm27363_vm8, %v26981_v13  ;;  %vm27395_vm8 = vcmp.eq.s32.totalorder %v26982_v20, %v27394_v59 }
 0x548   :  { %13557 = vmatprep.mubr.msk.f32.mxu1 %vm27365_vm6, %v26981_v13  ;;  %14320 = vmatmul.mubr.msk.f32.gmra.mrb[108].mxu0 %vm27367_vm13, %v26981_v13  ;;  %vm27397_vm6 = vcmp.eq.s32.totalorder %v26982_v20, %v27396_v6  ;;  %vm27399_vm13 = vcmp.eq.s32.totalorder %v26982_v20, %v27398_v8 }
 0x549   :  { %14322 = vmatprep.mubr.msk.f32.mxu0 %vm27369_vm2, %v26981_v13  ;;  %vm27401_vm2 = vcmp.eq.s32.totalorder %v26982_v20, %v27400_v34 }
 0x54b   :  { %13558 = vmatmul.mubr.msk.f32.gmra.mrb[112].mxu1 %vm27371_vm11, %v26981_v13  ;;  %vm27403_vm11 = vcmp.eq.s32.totalorder %v26982_v20, %v27402_v46 }
 0x54c   :  { %13560 = vmatprep.mubr.msk.f32.mxu1 %vm27373_vm14, %v26981_v13  ;;  %14323 = vmatmul.mubr.msk.f32.gmra.mrb[110].mxu0 %vm27375_vm9, %v26981_v13  ;;  %vm27405_vm14 = vcmp.eq.s32.totalorder %v26982_v20, %v27404_v56  ;;  %vm27407_vm9 = vcmp.eq.s32.totalorder %v26982_v20, %v27406_v1 }
 0x54d   :  { %14325 = vmatprep.mubr.msk.f32.mxu0 %vm27377_vm12, %v26981_v13  ;;  %vm27409_vm12 = vcmp.eq.s32.totalorder %v26982_v20, %v27408_v16 }
 0x54f   :  { %13561 = vmatmul.mubr.msk.f32.gmra.mrb[114].mxu1 %vm27379_vm5, %v26981_v13  ;;  %vm27411_vm5 = vcmp.eq.s32.totalorder %v26982_v20, %v27410_v26 }
 0x550   :  { %13563 = vmatprep.mubr.msk.f32.mxu1 %vm27381_vm10, %v26981_v13  ;;  %14326 = vmatmul.mubr.msk.f32.gmra.mrb[112].mxu0 %vm27383_vm7, %v26981_v13  ;;  %vm27413_vm10 = vcmp.eq.s32.totalorder %v26982_v20, %v27412_v37  ;;  %vm27415_vm7 = vcmp.eq.s32.totalorder %v26982_v20, %v27414_v45 }
 0x551   :  { %14328 = vmatprep.mubr.msk.f32.mxu0 %vm27385_vm3, %v26981_v13  ;;  %vm27417_vm3 = vcmp.eq.s32.totalorder %v26982_v20, %v27416_v63 }
 0x553   :  { %13564 = vmatmul.mubr.msk.f32.gmra.mrb[116].mxu1 %vm27387_vm0, %v26981_v13  ;;  %vm27418_vm0 = vcmp.eq.s32.totalorder %v26982_v20, %v27230_v36 }
 0x554   :  { %13566 = vmatprep.mubr.msk.f32.mxu1 %vm27389_vm15, %v26981_v13  ;;  %14329 = vmatmul.mubr.msk.f32.gmra.mrb[114].mxu0 %vm27391_vm1, %v26981_v13  ;;  %vm27420_vm15 = vcmp.eq.s32.totalorder %v26982_v20, %v27419_v43  ;;  %vm27422_vm1 = vcmp.eq.s32.totalorder %v26982_v20, %v27421_v40 }
 0x555   :  { %14331 = vmatprep.mubr.msk.f32.mxu0 %vm27393_vm4, %v26981_v13  ;;  %vm27423_vm4 = vcmp.eq.s32.totalorder %v26982_v20, %v27236_v61 }
 0x557   :  { %13567 = vmatmul.mubr.msk.f32.gmra.mrb[118].mxu1 %vm27395_vm8, %v26981_v13  ;;  %vm27424_vm8 = vcmp.eq.s32.totalorder %v26982_v20, %v27238_v42 }
 0x558   :  { %13569 = vmatprep.mubr.msk.f32.mxu1 %vm27397_vm6, %v26981_v13  ;;  %14332 = vmatmul.mubr.msk.f32.gmra.mrb[116].mxu0 %vm27399_vm13, %v26981_v13  ;;  %vm27425_vm6 = vcmp.eq.s32.totalorder %v26982_v20, %v27241_v53  ;;  %vm27426_vm13 = vcmp.eq.s32.totalorder %v26982_v20, %v27243_v38 }
 0x559   :  { %14334 = vmatprep.mubr.msk.f32.mxu0 %vm27401_vm2, %v26981_v13  ;;  %vm27427_vm2 = vcmp.eq.s32.totalorder %v26982_v20, %v27247_v32 }
 0x55b   :  { %13570 = vmatmul.mubr.msk.f32.gmra.mrb[120].mxu1 %vm27403_vm11, %v26981_v13  ;;  %vm5062_vm11 = vcmask 130048  }
 0x55c   :  { %13572 = vmatprep.mubr.msk.f32.mxu1 %vm27405_vm14, %v26981_v13  ;;  %14335 = vmatmul.mubr.msk.f32.gmra.mrb[118].mxu0 %vm27407_vm9, %v26981_v13  ;;  %vm27495_vm14 = vcmask 261120  }
 0x55d   :  { %14337 = vmatprep.mubr.msk.f32.mxu0 %vm27409_vm12, %v26981_v13  ;;  %vm27497_vm9 = vmmov %vm27495_vm14 }
 0x55e   :  { %vm27505_vm12 = vmmov %vm27497_vm9 }
 0x55f   :  { %13573 = vmatmul.mubr.msk.f32.gmra.mrb[122].mxu1 %vm27411_vm5, %v26981_v13  ;;  %vm27507_vm5 = vmmov %vm27497_vm9 }
 0x560   :  { %13575 = vmatprep.mubr.msk.f32.mxu1 %vm27413_vm10, %v26981_v13  ;;  %14338 = vmatmul.mubr.msk.f32.gmra.mrb[120].mxu0 %vm27415_vm7, %v26981_v13  ;;  %vm27508_vm10 = vmmov %vm27507_vm5 }
 0x561   :  { %14340 = vmatprep.mubr.msk.f32.mxu0 %vm27417_vm3, %v26981_v13  ;;  %vm27510_vm7 = vmmov %vm27507_vm5 }
 0x562   :  { %vm27512_vm3 = vmmov %vm27507_vm5 }
 0x563   :  { %13576 = vmatmul.mubr.msk.f32.gmra.mrb[124].mxu1 %vm27418_vm0, %v26981_v13  ;;  %vm27514_vm0 = vmmov %vm27512_vm3 }
 0x564   :  { %13578 = vmatprep.mubr.msk.f32.mxu1 %vm27420_vm15, %v26981_v13  ;;  %14341 = vmatmul.mubr.msk.f32.gmra.mrb[122].mxu0 %vm27422_vm1, %v26981_v13  ;;  %vm27516_vm15 = vmmov %vm27514_vm0 }
 0x565   :  { %14343 = vmatprep.mubr.msk.f32.mxu0 %vm27423_vm4, %v26981_v13  ;;  %vm27518_vm1 = vmmov %vm27514_vm0 }
 0x566   :  { %vm27520_vm4 = vmmov %vm27514_vm0 }
 0x567   :  { %13579 = vmatmul.mubr.msk.f32.gmra.mrb[126].mxu1 %vm27424_vm8, %v26981_v13  ;;  %vm27522_vm8 = vmmov %vm27514_vm0 }
 0x568   :  { %14344 = vmatmul.mubr.msk.f32.gmra.mrb[124].mxu0 %vm27425_vm6, %v26981_v13  ;;  %vm27524_vm6 = vmmov %vm27514_vm0 }
 0x569   :  { %14346 = vmatprep.mubr.msk.f32.mxu0 %vm27426_vm13, %v26981_v13  ;;  %vm27526_vm13 = vmmov %vm27514_vm0 }
 0x56c   :  { %14347 = vmatmul.mubr.msk.f32.gmra.mrb[126].mxu0 %vm27427_vm2, %v26981_v13  ;;  %vm27528_vm2 = vmmov %vm27514_vm0 }
 0x5be   :  { %v22666_v61 = vpop.f32.mrb[64].mxu1 }
 0x5bf   :  { %v22668_v36 = vpop.f32.mrb[65].mxu1  ;;  %v4935_v49 = vsub.f32 %v22733_v52, %v22666_v61 }
 0x5c0   :  { %v4934_v5 = vsub.f32 %v15428_v4, %v22668_v36 }
 0x5c1   :  { %v4999_v12 = vmul.f32 %v4935_v49, %v4935_v49 }
 0x5c2   :  { %v22670_v42 = vpop.f32.mrb[66].mxu1  ;;  %v4998_v29 = vmul.f32 %v4934_v5, %v4934_v5 }
 0x5c3   :  { %v22672_v41 = vpop.f32.mrb[67].mxu1  ;;  %v14255_v53 = vpop.f32.mrb[64].mxu0  ;;  %v5066_v7 = vsel %vm5062_vm11, %v4999_v12, 0.0 }
 0x5c4   :  { %9205 = vrot.lane.b32.xlu0 %v14255_v53, %s15544_s6  ;;  %v8757_v35 = vpop.f32.mrb[65].mxu0  ;;  %v5063_v50 = vsel %vm5062_vm11, %v4998_v29, 0.0 }
 0x5c5   :  { %9203 = vrot.lane.b32.xlu1 %v8757_v35, %s15544_s6 }
 0x5c6   :  { %v22676_v38 = vpop.f32.mrb[68].mxu1 }
 0x5c7   :  { %v22678_v27 = vpop.f32.mrb[69].mxu1  ;;  %v14258_v13 = vpop.f32.mrb[66].mxu0 }
 0x5c8   :  { %v22680_v20 = vpop.f32.mrb[67].mxu0 }
 0x5ca   :  { %v22682_v32 = vpop.f32.mrb[70].mxu1 }
 0x5cb   :  { %v22684_v10 = vpop.f32.mrb[71].mxu1  ;;  %v14261_v54 = vpop.f32.mrb[68].mxu0 }
 0x5cc   :  { %v22686_v51 = vpop.f32.mrb[69].mxu0 }
 0x5ce   :  { %v22688_v33 = vpop.f32.mrb[72].mxu1 }
 0x5cf   :  { %v22690_v24 = vpop.f32.mrb[73].mxu1  ;;  %v22692_v22 = vpop.f32.mrb[70].mxu0 }
 0x5d0   :  { %v22694_v19 = vpop.f32.mrb[71].mxu0 }
 0x5d2   :  { %v22696_v18 = vpop.f32.mrb[74].mxu1 }
 0x5d3   :  { %v22698_v23 = vpop.f32.mrb[75].mxu1  ;;  %v22700_v44 = vpop.f32.mrb[72].mxu0 }
 0x5d4   :  { %v22702_v11 = vpop.f32.mrb[73].mxu0 }
 0x5d6   :  { %v22704_v3 = vpop.f32.mrb[76].mxu1 }
 0x5d7   :  { %v22706_v48 = vpop.f32.mrb[77].mxu1  ;;  %v22708_v17 = vpop.f32.mrb[74].mxu0 }
 0x5d8   :  { %v22710_v57 = vpop.f32.mrb[75].mxu0 }
 0x5da   :  { %v22716_v21 = vpop.f32.mrb[78].mxu1 }
 0x5db   :  { %v22718_v0 = vpop.f32.mrb[79].mxu1  ;;  %v22720_v15 = vpop.f32.mrb[76].mxu0 }
 0x5dc   :  { %v22722_v31 = vpop.f32.mrb[77].mxu0 }
 0x5de   :  { %v22724_v14 = vpop.f32.mrb[80].mxu1 }
 0x5df   :  { %v22726_v60 = vpop.f32.mrb[81].mxu1  ;;  %v22728_v62 = vpop.f32.mrb[78].mxu0 }
 0x5e0   :  { %v22737_v39 = vpop.f32.mrb[79].mxu0 }
 0x5e2   :  { %v22739_v30 = vpop.f32.mrb[82].mxu1 }
 0x5e3   :  { %v22742_v28 = vpop.f32.mrb[83].mxu1  ;;  %5064 = vadd.xlane.f32.xlu0 %v5063_v50  ;;  %v22744_v9 = vpop.f32.mrb[80].mxu0 }
 0x5e4   :  { %v22746_v58 = vpop.f32.mrb[81].mxu0 }
 0x5e6   :  { %v22748_v2 = vpop.f32.mrb[84].mxu1 }
 0x5e7   :  { %v22750_v47 = vpop.f32.mrb[85].mxu1  ;;  %v22752_v25 = vpop.f32.mrb[82].mxu0 }
 0x5e8   :  { %v22754_v55 = vpop.f32.mrb[83].mxu0 }
 0x5e9   :  { %5067 = vadd.xlane.f32.xlu1 %v5066_v7 }
 0x5ea   :  { %v22757_v59 = vpop.f32.mrb[86].mxu1 }
 0x5eb   :  { %v22759_v6 = vpop.f32.mrb[87].mxu1  ;;  %v22761_v8 = vpop.f32.mrb[84].mxu0 }
 0x5ec   :  { %v22763_v34 = vpop.f32.mrb[85].mxu0 }
 0x5ee   :  { %v22765_v46 = vpop.f32.mrb[88].mxu1 }
 0x5ef   :  { %v22767_v56 = vpop.f32.mrb[89].mxu1  ;;  %v22769_v1 = vpop.f32.mrb[86].mxu0 }
 0x5f0   :  { %v22771_v16 = vpop.f32.mrb[87].mxu0 }
 0x5f2   :  { %v22773_v26 = vpop.f32.mrb[90].mxu1 }
 0x5f3   :  { %v22775_v37 = vpop.f32.mrb[91].mxu1  ;;  %v22777_v45 = vpop.f32.mrb[88].mxu0 }
 0x5f4   :  { %v22779_v63 = vpop.f32.mrb[89].mxu0 }
 0x5f6   :  { %v22781_v43 = vpop.f32.mrb[92].mxu1 }
 0x5f7   :  { %27429 = vst [vmem:[#allocation197_spill] sm:$0xff] %v22781_v43  ;;  %v22783_v40 = vpop.f32.mrb[93].mxu1  ;;  %v22785_v53 = vpop.f32.mrb[90].mxu0 }
 0x5f8   :  { %27430 = vst [vmem:[#allocation86_spill] sm:$0xff] %v22783_v40  ;;  %v22787_v35 = vpop.f32.mrb[91].mxu0 }
 0x5f9   :  { %9213 = vrot.lane.b32.xlu0 %v14261_v54, %s15544_s6 }
 0x5fa   :  { %v22790_v4 = vpop.f32.mrb[94].mxu1  ;;  %9209 = vrot.lane.b32.xlu1 %v14258_v13, %s15544_s6 }
 0x5fb   :  { %27431 = vst [vmem:[#allocation151_spill] sm:$0xff] %v22790_v4  ;;  %v22793_v5 = vpop.f32.mrb[95].mxu1  ;;  %v22795_v29 = vpop.f32.mrb[92].mxu0 }
 0x5fc   :  { %27432 = vst [vmem:[#allocation141_spill] sm:$0xff] %v22793_v5  ;;  %v22797_v49 = vpop.f32.mrb[93].mxu0 }
 0x5fd   :  { %27433 = vst [vmem:[#allocation44_spill] sm:$0xff] %v22797_v49 }
 0x5fe   :  { %v22799_v50 = vpop.f32.mrb[96].mxu1  ;;  %9207 = vrot.lane.b32.xlu1 %v22680_v20, %s15544_s6 }
 0x5ff   :  { %27434 = vst [vmem:[#allocation45_spill] sm:$0xff] %v22799_v50  ;;  %v22803_v12 = vpop.f32.mrb[97].mxu1  ;;  %v22805_v7 = vpop.f32.mrb[94].mxu0 }
 0x600   :  { %27435 = vst [vmem:[#allocation87_spill] sm:$0xff] %v22803_v12  ;;  %27436 = vst [vmem:[#allocation157_spill] sm:$0xff] %v22805_v7  ;;  %v22807_v54 = vpop.f32.mrb[95].mxu0 }
 0x601   :  { %27437 = vst [vmem:[#allocation194_spill] sm:$0xff] %v22807_v54 }
 0x602   :  { %v22809_v52 = vpop.f32.mrb[98].mxu1 }
 0x603   :  { %27438 = vst [vmem:[#allocation168_spill] sm:$0xff] %v22809_v52  ;;  %v22811_v13 = vpop.f32.mrb[99].mxu1  ;;  %v22813_v4 = vpop.f32.mrb[96].mxu0 }
 0x604   :  { %27439 = vst [vmem:[#allocation208_spill] sm:$0xff] %v22811_v13  ;;  %27440 = vst [vmem:[#allocation59_spill] sm:$0xff] %v22813_v4  ;;  %v22815_v5 = vpop.f32.mrb[97].mxu0 }
 0x605   :  { %27441 = vst [vmem:[#allocation167_spill] sm:$0xff] %v22815_v5 }
 0x606   :  { %v22817_v43 = vpop.f32.mrb[100].mxu1 }
 0x607   :  { %27442 = vst [vmem:[#allocation64_spill] sm:$0xff] %v22817_v43  ;;  %v22819_v50 = vpop.f32.mrb[101].mxu1  ;;  %v22821_v40 = vpop.f32.mrb[98].mxu0  ;;  %v22838_v43 = vld [vmem:[%s24463_s0 + $0x10] sm:$0xff] }
 0x608   :  { %27443 = vst [vmem:[#allocation178_spill] sm:$0xff] %v22819_v50  ;;  %27444 = vst [vmem:[#allocation204_spill] sm:$0xff] %v22821_v40  ;;  %v22823_v20 = vpop.f32.mrb[99].mxu0  ;;  %v4936_v50 = vsub.f32 %v22838_v43, %v22672_v41 }
 0x609   :  { %27445 = vst [vmem:[#allocation225_spill] sm:$0xff] %v22823_v20  ;;  %27451 = vst [vmem:[#allocation84_spill] sm:$0xff] %v22838_v43 }
 0x60a   :  { %v22825_v12 = vpop.f32.mrb[102].mxu1 }
 0x60b   :  { %27446 = vst [vmem:[#allocation95_spill] sm:$0xff] %v22825_v12  ;;  %v22827_v49 = vpop.f32.mrb[103].mxu1  ;;  %v22829_v54 = vpop.f32.mrb[100].mxu0 }
 0x60c   :  { %27447 = vst [vmem:[#allocation99_spill] sm:$0xff] %v22827_v49  ;;  %27448 = vst [vmem:[#allocation189_spill] sm:$0xff] %v22829_v54  ;;  %v22831_v52 = vpop.f32.mrb[101].mxu0  ;;  %v5000_v54 = vmul.f32 %v4936_v50, %v4936_v50  ;;  %v22868_v50 = vld [vmem:[%s24463_s0 + $0x18] sm:$0xff] }
 0x60d   :  { %27449 = vst [vmem:[#allocation217_spill] sm:$0xff] %v22831_v52  ;;  %27463 = vst [vmem:[#allocation50_spill] sm:$0xff] %v22868_v50 }
 0x60e   :  { %v22833_v13 = vpop.f32.mrb[104].mxu1 }
 0x60f   :  { %27450 = vst [vmem:[#allocation244_spill] sm:$0xff] %v22833_v13  ;;  %v22842_v5 = vpop.f32.mrb[105].mxu1  ;;  %v22844_v20 = vpop.f32.mrb[102].mxu0 }
 0x610   :  { %27452 = vst [vmem:[#allocation202_spill] sm:$0xff] %v22842_v5  ;;  %27453 = vst [vmem:[#allocation30_spill] sm:$0xff] %v22844_v20  ;;  %v22846_v12 = vpop.f32.mrb[103].mxu0  ;;  %v5069_v5 = vsel %vm5062_vm11, %v5000_v54, 0.0 }
 0x611   :  { %27454 = vst [vmem:[#allocation100_spill] sm:$0xff] %v22846_v12 }
 0x612   :  { %v22848_v49 = vpop.f32.mrb[106].mxu1 }
 0x613   :  { %27455 = vst [vmem:[#allocation200_spill] sm:$0xff] %v22848_v49  ;;  %v22850_v52 = vpop.f32.mrb[107].mxu1  ;;  %v22852_v13 = vpop.f32.mrb[104].mxu0 }
 0x614   :  { %27456 = vst [vmem:[#allocation31_spill] sm:$0xff] %v22850_v52  ;;  %27457 = vst [vmem:[#allocation235_spill] sm:$0xff] %v22852_v13  ;;  %v22854_v40 = vpop.f32.mrb[105].mxu0  ;;  %v4937_v52 = vsub.f32 %v22868_v50, %v22670_v42 }
 0x615   :  { %27458 = vst [vmem:[#allocation236_spill] sm:$0xff] %v22854_v40 }
 0x616   :  { %v22856_v4 = vpop.f32.mrb[108].mxu1  ;;  %v5001_v54 = vmul.f32 %v4937_v52, %v4937_v52 }
 0x617   :  { %27459 = vst [vmem:[#allocation83_spill] sm:$0xff] %v22856_v4  ;;  %v22858_v7 = vpop.f32.mrb[109].mxu1  ;;  %v22860_v43 = vpop.f32.mrb[106].mxu0 }
 0x618   :  { %27460 = vst [vmem:[#allocation212_spill] sm:$0xff] %v22858_v7  ;;  %27461 = vst [vmem:[#allocation214_spill] sm:$0xff] %v22860_v43  ;;  %5070 = vadd.xlane.f32.xlu0 %v5069_v5  ;;  %v22863_v20 = vpop.f32.mrb[107].mxu0  ;;  %v5072_v12 = vsel %vm5062_vm11, %v5001_v54, 0.0 }
 0x619   :  { %27462 = vst [vmem:[#allocation230_spill] sm:$0xff] %v22863_v20 }
 0x61a   :  { %v22872_v49 = vpop.f32.mrb[110].mxu1 }
 0x61b   :  { %27464 = vst [vmem:[#allocation51_spill] sm:$0xff] %v22872_v49  ;;  %v22874_v4 = vpop.f32.mrb[111].mxu1  ;;  %v22876_v7 = vpop.f32.mrb[108].mxu0 }
 0x61c   :  { %27465 = vst [vmem:[#allocation298_spill] sm:$0xff] %v22874_v4  ;;  %27466 = vst [vmem:[#allocation270_spill] sm:$0xff] %v22876_v7  ;;  %v22878_v43 = vpop.f32.mrb[109].mxu0 }
 0x61d   :  { %27467 = vst [vmem:[#allocation232_spill] sm:$0xff] %v22878_v43 }
 0x61e   :  { %v22880_v5 = vpop.f32.mrb[112].mxu1 }
 0x61f   :  { %27468 = vst [vmem:[#allocation275_spill] sm:$0xff] %v22880_v5  ;;  %v22882_v20 = vpop.f32.mrb[113].mxu1  ;;  %v22884_v40 = vpop.f32.mrb[110].mxu0 }
 0x620   :  { %27469 = vst [vmem:[#allocation249_spill] sm:$0xff] %v22882_v20  ;;  %27470 = vst [vmem:[#allocation299_spill] sm:$0xff] %v22884_v40  ;;  %v22886_v13 = vpop.f32.mrb[111].mxu0 }
 0x621   :  { %27471 = vst [vmem:[#allocation271_spill] sm:$0xff] %v22886_v13 }
 0x622   :  { %v22889_v50 = vpop.f32.mrb[114].mxu1  ;;  %5073 = vadd.xlane.f32.xlu1 %v5072_v12 }
 0x623   :  { %27472 = vst [vmem:[#allocation288_spill] sm:$0xff] %v22889_v50  ;;  %v22891_v49 = vpop.f32.mrb[115].mxu1  ;;  %v22893_v4 = vpop.f32.mrb[112].mxu0 }
 0x624   :  { %27473 = vst [vmem:[#allocation294_spill] sm:$0xff] %v22891_v49  ;;  %27474 = vst [vmem:[#allocation266_spill] sm:$0xff] %v22893_v4  ;;  %v22895_v7 = vpop.f32.mrb[113].mxu0  ;;  %v27561_v4 = vld [vmem:[#allocation197_spill] sm:$0xff] }
 0x625   :  { %27475 = vst [vmem:[#allocation251_spill] sm:$0xff] %v22895_v7 }
 0x626   :  { %v22897_v52 = vpop.f32.mrb[116].mxu1 }
 0x627   :  { %27476 = vst [vmem:[#allocation289_spill] sm:$0xff] %v22897_v52  ;;  %v22899_v5 = vpop.f32.mrb[117].mxu1  ;;  %v22901_v20 = vpop.f32.mrb[114].mxu0 }
 0x628   :  { %27477 = vst [vmem:[#allocation36_spill] sm:$0xff] %v22899_v5  ;;  %27478 = vst [vmem:[#allocation284_spill] sm:$0xff] %v22901_v20  ;;  %v22903_v40 = vpop.f32.mrb[115].mxu0 }
 0x629   :  { %27479 = vst [vmem:[#allocation37_spill] sm:$0xff] %v22903_v40 }
 0x62a   :  { %v22905_v13 = vpop.f32.mrb[118].mxu1 }
 0x62b   :  { %27480 = vst [vmem:[#allocation308_spill] sm:$0xff] %v22905_v13  ;;  %v22907_v54 = vpop.f32.mrb[119].mxu1  ;;  %v22909_v50 = vpop.f32.mrb[116].mxu0 }
 0x62c   :  { %27481 = vst [vmem:[#allocation285_spill] sm:$0xff] %v22907_v54  ;;  %27482 = vst [vmem:[#allocation329_spill] sm:$0xff] %v22909_v50  ;;  %v22911_v12 = vpop.f32.mrb[117].mxu0  ;;  %v27551_v50 = vld [vmem:[#allocation157_spill] sm:$0xff] }
 0x62d   :  { %27483 = vst [vmem:[#allocation54_spill] sm:$0xff] %v22911_v12 }
 0x62e   :  { %v22913_v49 = vpop.f32.mrb[120].mxu1  ;;  %9217 = vrot.lane.b32.xlu0 %v22692_v22, %s15544_s6 }
 0x62f   :  { %27484 = vst [vmem:[#allocation55_spill] sm:$0xff] %v22913_v49  ;;  %v22917_v52 = vpop.f32.mrb[121].mxu1  ;;  %v22919_v5 = vpop.f32.mrb[118].mxu0 }
 0x630   :  { %27485 = vst [vmem:[#allocation42_spill] sm:$0xff] %v22917_v52  ;;  %27486 = vst [vmem:[#allocation43_spill] sm:$0xff] %v22919_v5  ;;  %v22921_v20 = vpop.f32.mrb[119].mxu0 }
 0x631   :  { %27487 = vst [vmem:[#allocation48_spill] sm:$0xff] %v22921_v20 }
 0x632   :  { %v22923_v40 = vpop.f32.mrb[122].mxu1 }
 0x633   :  { %27488 = vst [vmem:[#allocation49_spill] sm:$0xff] %v22923_v40  ;;  %v22925_v13 = vpop.f32.mrb[123].mxu1  ;;  %9211 = vrot.lane.b32.xlu1 %v22686_v51, %s15544_s6  ;;  %v22929_v54 = vpop.f32.mrb[120].mxu0 }
 0x634   :  { %27489 = vst [vmem:[#allocation14_spill] sm:$0xff] %v22925_v13  ;;  %27490 = vst [vmem:[#allocation15_spill] sm:$0xff] %v22929_v54  ;;  %v22931_v12 = vpop.f32.mrb[121].mxu0 }
 0x635   :  { %27491 = vst [vmem:[#allocation9_spill] sm:$0xff] %v22931_v12 }
 0x636   :  { %v22933_v49 = vpop.f32.mrb[124].mxu1  ;;  %v22935_v22 = vpop.permute.xlu0 %9205 }
 0x637   :  { %27492 = vst [vmem:[#allocation10_spill] sm:$0xff] %v22933_v49  ;;  %v22937_v52 = vpop.f32.mrb[125].mxu1  ;;  %v10169_v20 = vsel %vm5062_vm11, %v22666_v61, %v22935_v22  ;;  %v22942_v40 = vpop.permute.xlu1 %9203 }
 0x638   :  { %27493 = vst [vmem:[#allocation12_spill] sm:$0xff] %v22937_v52  ;;  %27494 = vst [vmem:[#allocation13_spill] sm:$0xff] %v22942_v40  ;;  %v10168_v51 = vsel %vm5062_vm11, %v22668_v36, %v22942_v40  ;;  %v22948_v13 = vpop.f32.mrb[122].mxu0  ;;  %v22968_v36 = vld [vmem:[%s24463_s0 + $0x20] sm:$0xff] }
 0x639   :  { %10233 = vst.msk [vmem:[#allocation2 + $0x8] sm:$0xff] %vm27495_vm14, %v10169_v20  ;;  %27496 = vst [vmem:[#allocation20_spill] sm:$0xff] %v22948_v13  ;;  %v22951_v49 = vpop.f32.mrb[123].mxu0  ;;  %v23018_v13 = vld [vmem:[%s24463_s0 + $0x38] sm:$0xff] }
 0x63a   :  { %10232 = vst.msk [vmem:[#allocation2] sm:$0xff] %vm27497_vm9, %v10168_v51  ;;  %27498 = vst [vmem:[#allocation21_spill] sm:$0xff] %v22951_v49  ;;  %v22953_v12 = vpop.f32.mrb[126].mxu1  ;;  %v4938_v51 = vsub.f32 %v22968_v36, %v22678_v27 }
 0x63b   :  { %27499 = vst [vmem:[#allocation18_spill] sm:$0xff] %v22953_v12  ;;  %v22955_v52 = vpop.f32.mrb[127].mxu1  ;;  %v22957_v54 = vpop.f32.mrb[124].mxu0  ;;  %vm27530_vm14 = vmmov %vm27514_vm0  ;;  %v27562_v12 = vld [vmem:[#allocation59_spill] sm:$0xff] }
 0x63c   :  { %27500 = vst [vmem:[#allocation19_spill] sm:$0xff] %v22955_v52  ;;  %27501 = vst [vmem:[#allocation26_spill] sm:$0xff] %v22957_v54  ;;  %v22959_v61 = vpop.f32.mrb[125].mxu0  ;;  %v5002_v49 = vmul.f32 %v4938_v51, %v4938_v51  ;;  %v22976_v52 = vld [vmem:[%s24463_s0 + $0x28] sm:$0xff] }
 0x63d   :  { %27502 = vst [vmem:[#allocation27_spill] sm:$0xff] %v22959_v61  ;;  %vm27532_vm9 = vmmov %vm27514_vm0 }
 0x63e   :  { %v5075_v40 = vsel %vm5062_vm11, %v5002_v49, 0.0 }
 0x63f   :  { %v22961_v5 = vpop.f32.mrb[126].mxu0 }
 0x640   :  { %v22963_v20 = vpop.f32.mrb[127].mxu0 }
 0x641   :  { %27503 = vst [vmem:[#allocation105_spill] sm:$0xff] %v22963_v20  ;;  %v4939_v20 = vsub.f32 %v22976_v52, %v22676_v38 }
 0x643   :  { %v5003_v61 = vmul.f32 %v4939_v20, %v4939_v20 }
 0x645   :  { %v5078_v54 = vsel %vm5062_vm11, %v5003_v61, 0.0 }
 0x64d   :  { %5076 = vadd.xlane.f32.xlu0 %v5075_v40 }
 0x657   :  { %5079 = vadd.xlane.f32.xlu1 %v5078_v54  ;;  %v22998_v54 = vld [vmem:[%s24463_s0 + $0x30] sm:$0xff] }
 0x663   :  { %9221 = vrot.lane.b32.xlu0 %v22700_v44, %s15544_s6 }
 0x668   :  { %9215 = vrot.lane.b32.xlu1 %v22694_v19, %s15544_s6  ;;  %v4940_v19 = vsub.f32 %v22998_v54, %v22684_v10 }
 0x670   :  { %v22985_v49 = vpop.xlane.xlu0 %5064 }
 0x671   :  { %27504 = vst [vmem:[#allocation88_spill] sm:$0xff] %v22985_v49 }
 0x674   :  { %v22987_v40 = vpop.permute.xlu0 %9213 }
 0x675   :  { %v10173_v51 = vsel %vm5062_vm11, %v22676_v38, %v22987_v40  ;;  %v5004_v38 = vmul.f32 %v4940_v19, %v4940_v19 }
 0x676   :  { %10237 = vst.msk [vmem:[#allocation2 + $0x28] sm:$0xff] %vm27505_vm12, %v10173_v51  ;;  %v22993_v20 = vpop.xlane.xlu1 %5067  ;;  %vm27534_vm12 = vmmov %vm27514_vm0 }
 0x677   :  { %27506 = vst [vmem:[#allocation112_spill] sm:$0xff] %v22993_v20  ;;  %v5081_v49 = vsel %vm5062_vm11, %v5004_v38, 0.0  ;;  %v23038_v38 = vld [vmem:[%s24463_s0 + $0x40] sm:$0xff] }
 0x67a   :  { %v23002_v44 = vpop.permute.xlu1 %9209 }
 0x67b   :  { %v10171_v61 = vsel %vm5062_vm11, %v22670_v42, %v23002_v44  ;;  %v4941_v42 = vsub.f32 %v23018_v13, %v22682_v32 }
 0x67c   :  { %10235 = vst.msk [vmem:[#allocation2 + $0x18] sm:$0xff] %vm27507_vm5, %v10171_v61  ;;  %vm27536_vm5 = vmmov %vm27514_vm0 }
 0x67d   :  { %v5005_v19 = vmul.f32 %v4941_v42, %v4941_v42 }
 0x67e   :  { %v23008_v51 = vpop.permute.xlu1 %9207 }
 0x67f   :  { %v10170_v20 = vsel %vm5062_vm11, %v22672_v41, %v23008_v51  ;;  %v5084_v61 = vsel %vm5062_vm11, %v5005_v19, 0.0 }
 0x680   :  { %10234 = vst.msk [vmem:[#allocation2 + $0x10] sm:$0xff] %vm27508_vm10, %v10170_v20  ;;  %vm27538_vm10 = vmmov %vm27514_vm0 }
 0x682   :  { %5082 = vadd.xlane.f32.xlu0 %v5081_v49 }
 0x68c   :  { %5085 = vadd.xlane.f32.xlu1 %v5084_v61 }
 0x698   :  { %9225 = vrot.lane.b32.xlu0 %v22708_v17, %s15544_s6  ;;  %v4942_v17 = vsub.f32 %v23038_v38, %v22690_v24 }
 0x69d   :  { %9219 = vrot.lane.b32.xlu1 %v22702_v11, %s15544_s6  ;;  %v5006_v11 = vmul.f32 %v4942_v17, %v4942_v17 }
 0x6a5   :  { %v23027_v41 = vpop.xlane.xlu0 %5070 }
 0x6a6   :  { %27509 = vst [vmem:[#allocation122_spill] sm:$0xff] %v23027_v41 }
 0x6a9   :  { %v23029_v49 = vpop.permute.xlu0 %9217 }
 0x6aa   :  { %v10175_v20 = vsel %vm5062_vm11, %v22682_v32, %v23029_v49  ;;  %v5087_v32 = vsel %vm5062_vm11, %v5006_v11, 0.0 }
 0x6ab   :  { %10239 = vst.msk [vmem:[#allocation2 + $0x38] sm:$0xff] %vm27510_vm7, %v10175_v20  ;;  %v23054_v20 = vld [vmem:[%s24463_s0 + $0x48] sm:$0xff]  ;;  %vm27540_vm7 = vmmov %vm27514_vm0 }
 0x6af   :  { %v23042_v42 = vpop.xlane.xlu1 %5073 }
 0x6b0   :  { %27511 = vst [vmem:[#allocation98_spill] sm:$0xff] %v23042_v42  ;;  %v4943_v42 = vsub.f32 %v23054_v20, %v22688_v33 }
 0x6b2   :  { %v5007_v17 = vmul.f32 %v4943_v42, %v4943_v42 }
 0x6b3   :  { %v23044_v19 = vpop.permute.xlu1 %9211 }
 0x6b4   :  { %v10172_v61 = vsel %vm5062_vm11, %v22678_v27, %v23044_v19  ;;  %v5090_v41 = vsel %vm5062_vm11, %v5007_v17, 0.0 }
 0x6b5   :  { %10236 = vst.msk [vmem:[#allocation2 + $0x20] sm:$0xff] %vm27512_vm3, %v10172_v61  ;;  %vm27542_vm3 = vmmov %vm27514_vm0 }
 0x6b7   :  { %5088 = vadd.xlane.f32.xlu0 %v5087_v32 }
 0x6c1   :  { %5091 = vadd.xlane.f32.xlu1 %v5090_v41  ;;  %v23074_v41 = vld [vmem:[%s24463_s0 + $0x50] sm:$0xff] }
 0x6cd   :  { %9229 = vrot.lane.b32.xlu0 %v22720_v15, %s15544_s6  ;;  %v4944_v15 = vsub.f32 %v23074_v41, %v22698_v23 }
 0x6d2   :  { %9223 = vrot.lane.b32.xlu1 %v22710_v57, %s15544_s6  ;;  %v5008_v57 = vmul.f32 %v4944_v15, %v4944_v15 }
 0x6da   :  { %v23063_v27 = vpop.xlane.xlu0 %5076 }
 0x6db   :  { %27513 = vst [vmem:[#allocation137_spill] sm:$0xff] %v23063_v27 }
 0x6de   :  { %v23065_v11 = vpop.permute.xlu0 %9221 }
 0x6df   :  { %v10177_v61 = vsel %vm5062_vm11, %v22688_v33, %v23065_v11  ;;  %v5093_v33 = vsel %vm5062_vm11, %v5008_v57, 0.0 }
 0x6e0   :  { %10241 = vst.msk [vmem:[#allocation2 + $0x48] sm:$0xff] %vm27514_vm0, %v10177_v61  ;;  %v23090_v61 = vld [vmem:[%s24463_s0 + $0x58] sm:$0xff] }
 0x6e4   :  { %v23078_v42 = vpop.xlane.xlu1 %5079 }
 0x6e5   :  { %27515 = vst [vmem:[#allocation142_spill] sm:$0xff] %v23078_v42  ;;  %v4945_v42 = vsub.f32 %v23090_v61, %v22696_v18 }
 0x6e7   :  { %v5009_v15 = vmul.f32 %v4945_v42, %v4945_v42 }
 0x6e8   :  { %v23080_v32 = vpop.permute.xlu1 %9215 }
 0x6e9   :  { %v10174_v17 = vsel %vm5062_vm11, %v22684_v10, %v23080_v32  ;;  %v5096_v27 = vsel %vm5062_vm11, %v5009_v15, 0.0 }
 0x6ea   :  { %10238 = vst.msk [vmem:[#allocation2 + $0x30] sm:$0xff] %vm27516_vm15, %v10174_v17  ;;  %vm27546_vm15 = vmmov %vm27514_vm0 }
 0x6ec   :  { %5094 = vadd.xlane.f32.xlu0 %v5093_v33 }
 0x6f6   :  { %5097 = vadd.xlane.f32.xlu1 %v5096_v27  ;;  %v23110_v27 = vld [vmem:[%s24463_s0 + $0x60] sm:$0xff] }
 0x702   :  { %9233 = vrot.lane.b32.xlu0 %v22728_v62, %s15544_s6  ;;  %v4946_v62 = vsub.f32 %v23110_v27, %v22706_v48 }
 0x707   :  { %9227 = vrot.lane.b32.xlu1 %v22722_v31, %s15544_s6  ;;  %v5010_v31 = vmul.f32 %v4946_v62, %v4946_v62 }
 0x70f   :  { %v23099_v10 = vpop.xlane.xlu0 %5082 }
 0x710   :  { %27517 = vst [vmem:[#allocation117_spill] sm:$0xff] %v23099_v10 }
 0x713   :  { %v23101_v57 = vpop.permute.xlu0 %9225 }
 0x714   :  { %v10179_v17 = vsel %vm5062_vm11, %v22696_v18, %v23101_v57  ;;  %v5099_v18 = vsel %vm5062_vm11, %v5010_v31, 0.0 }
 0x715   :  { %10243 = vst.msk [vmem:[#allocation2 + $0x58] sm:$0xff] %vm27518_vm1, %v10179_v17  ;;  %v23126_v17 = vld [vmem:[%s24463_s0 + $0x68] sm:$0xff]  ;;  %vm27549_vm1 = vmmov %vm27514_vm0 }
 0x719   :  { %v23114_v42 = vpop.xlane.xlu1 %5085 }
 0x71a   :  { %27519 = vst [vmem:[#allocation106_spill] sm:$0xff] %v23114_v42  ;;  %v4947_v42 = vsub.f32 %v23126_v17, %v22704_v3 }
 0x71c   :  { %v5011_v62 = vmul.f32 %v4947_v42, %v4947_v42 }
 0x71d   :  { %v23116_v33 = vpop.permute.xlu1 %9219 }
 0x71e   :  { %v10176_v15 = vsel %vm5062_vm11, %v22690_v24, %v23116_v33  ;;  %v5102_v10 = vsel %vm5062_vm11, %v5011_v62, 0.0 }
 0x71f   :  { %10240 = vst.msk [vmem:[#allocation2 + $0x40] sm:$0xff] %vm27520_vm4, %v10176_v15  ;;  %vm27555_vm4 = vmmov %vm27514_vm0 }
 0x721   :  { %5100 = vadd.xlane.f32.xlu0 %v5099_v18 }
 0x72b   :  { %5103 = vadd.xlane.f32.xlu1 %v5102_v10  ;;  %v23146_v10 = vld [vmem:[%s24463_s0 + $0x70] sm:$0xff] }
 0x737   :  { %9237 = vrot.lane.b32.xlu0 %v22744_v9, %s15544_s6  ;;  %v4948_v9 = vsub.f32 %v23146_v10, %v22718_v0 }
 0x73c   :  { %9231 = vrot.lane.b32.xlu1 %v22737_v39, %s15544_s6  ;;  %v5012_v39 = vmul.f32 %v4948_v9, %v4948_v9 }
 0x744   :  { %v23135_v24 = vpop.xlane.xlu0 %5088 }
 0x745   :  { %27521 = vst [vmem:[#allocation163_spill] sm:$0xff] %v23135_v24 }
 0x748   :  { %v23137_v31 = vpop.permute.xlu0 %9229 }
 0x749   :  { %v10181_v15 = vsel %vm5062_vm11, %v22704_v3, %v23137_v31  ;;  %v5105_v3 = vsel %vm5062_vm11, %v5012_v39, 0.0 }
 0x74a   :  { %10245 = vst.msk [vmem:[#allocation2 + $0x68] sm:$0xff] %vm27522_vm8, %v10181_v15  ;;  %v23162_v15 = vld [vmem:[%s24463_s0 + $0x78] sm:$0xff]  ;;  %vm27559_vm8 = vmmov %vm27514_vm0 }
 0x74e   :  { %v23150_v42 = vpop.xlane.xlu1 %5091 }
 0x74f   :  { %27523 = vst [vmem:[#allocation170_spill] sm:$0xff] %v23150_v42  ;;  %v4949_v42 = vsub.f32 %v23162_v15, %v22716_v21 }
 0x751   :  { %v5013_v9 = vmul.f32 %v4949_v42, %v4949_v42 }
 0x752   :  { %v23152_v18 = vpop.permute.xlu1 %9223 }
 0x753   :  { %v10178_v62 = vsel %vm5062_vm11, %v22698_v23, %v23152_v18  ;;  %v5108_v24 = vsel %vm5062_vm11, %v5013_v9, 0.0 }
 0x754   :  { %10242 = vst.msk [vmem:[#allocation2 + $0x50] sm:$0xff] %vm27524_vm6, %v10178_v62  ;;  %vm27566_vm6 = vmmov %vm27514_vm0 }
 0x756   :  { %5106 = vadd.xlane.f32.xlu0 %v5105_v3 }
 0x760   :  { %5109 = vadd.xlane.f32.xlu1 %v5108_v24  ;;  %v23182_v24 = vld [vmem:[%s24463_s0 + $0x80] sm:$0xff] }
 0x76c   :  { %9241 = vrot.lane.b32.xlu0 %v22752_v25, %s15544_s6  ;;  %v4950_v25 = vsub.f32 %v23182_v24, %v22726_v60 }
 0x771   :  { %9235 = vrot.lane.b32.xlu1 %v22746_v58, %s15544_s6  ;;  %v5014_v58 = vmul.f32 %v4950_v25, %v4950_v25 }
 0x779   :  { %v23171_v23 = vpop.xlane.xlu0 %5094 }
 0x77a   :  { %27525 = vst [vmem:[#allocation118_spill] sm:$0xff] %v23171_v23 }
 0x77d   :  { %v23173_v39 = vpop.permute.xlu0 %9233 }
 0x77e   :  { %v10183_v62 = vsel %vm5062_vm11, %v22716_v21, %v23173_v39  ;;  %v5111_v21 = vsel %vm5062_vm11, %v5014_v58, 0.0 }
 0x77f   :  { %10247 = vst.msk [vmem:[#allocation2 + $0x78] sm:$0xff] %vm27526_vm13, %v10183_v62  ;;  %v23198_v62 = vld [vmem:[%s24463_s0 + $0x88] sm:$0xff]  ;;  %vm27571_vm13 = vmmov %vm27514_vm0 }
 0x783   :  { %v23186_v42 = vpop.xlane.xlu1 %5097 }
 0x784   :  { %27527 = vst [vmem:[#allocation152_spill] sm:$0xff] %v23186_v42  ;;  %v4951_v42 = vsub.f32 %v23198_v62, %v22724_v14 }
 0x786   :  { %v5015_v25 = vmul.f32 %v4951_v42, %v4951_v42 }
 0x787   :  { %v23188_v3 = vpop.permute.xlu1 %9227 }
 0x788   :  { %v10180_v9 = vsel %vm5062_vm11, %v22706_v48, %v23188_v3  ;;  %v5114_v23 = vsel %vm5062_vm11, %v5015_v25, 0.0 }
 0x789   :  { %10244 = vst.msk [vmem:[#allocation2 + $0x60] sm:$0xff] %vm27528_vm2, %v10180_v9  ;;  %vm27578_vm2 = vmmov %vm27514_vm0 }
 0x78b   :  { %5112 = vadd.xlane.f32.xlu0 %v5111_v21 }
 0x795   :  { %5115 = vadd.xlane.f32.xlu1 %v5114_v23  ;;  %v23218_v23 = vld [vmem:[%s24463_s0 + $0x90] sm:$0xff] }
 0x7a1   :  { %9245 = vrot.lane.b32.xlu0 %v22761_v8, %s15544_s6  ;;  %v4952_v8 = vsub.f32 %v23218_v23, %v22742_v28 }
 0x7a6   :  { %9239 = vrot.lane.b32.xlu1 %v22754_v55, %s15544_s6  ;;  %v5016_v55 = vmul.f32 %v4952_v8, %v4952_v8 }
 0x7ae   :  { %v23207_v48 = vpop.xlane.xlu0 %5100 }
 0x7af   :  { %27529 = vst [vmem:[#allocation218_spill] sm:$0xff] %v23207_v48 }
 0x7b2   :  { %v23209_v58 = vpop.permute.xlu0 %9237 }
 0x7b3   :  { %v10185_v9 = vsel %vm5062_vm11, %v22724_v14, %v23209_v58  ;;  %v5117_v14 = vsel %vm5062_vm11, %v5016_v55, 0.0 }
 0x7b4   :  { %10249 = vst.msk [vmem:[#allocation2 + $0x88] sm:$0xff] %vm27530_vm14, %v10185_v9  ;;  %v23234_v9 = vld [vmem:[%s24463_s0 + $0x98] sm:$0xff]  ;;  %vm27583_vm14 = vmmov %vm27514_vm0 }
 0x7b8   :  { %v23222_v42 = vpop.xlane.xlu1 %5103 }
 0x7b9   :  { %27531 = vst [vmem:[#allocation257_spill] sm:$0xff] %v23222_v42  ;;  %v4953_v42 = vsub.f32 %v23234_v9, %v22739_v30 }
 0x7bb   :  { %v5017_v8 = vmul.f32 %v4953_v42, %v4953_v42 }
 0x7bc   :  { %v23224_v21 = vpop.permute.xlu1 %9231 }
 0x7bd   :  { %v10182_v25 = vsel %vm5062_vm11, %v22718_v0, %v23224_v21  ;;  %v5120_v48 = vsel %vm5062_vm11, %v5017_v8, 0.0 }
 0x7be   :  { %10246 = vst.msk [vmem:[#allocation2 + $0x70] sm:$0xff] %vm27532_vm9, %v10182_v25  ;;  %vm27595_vm9 = vmmov %vm27514_vm0 }
 0x7c0   :  { %5118 = vadd.xlane.f32.xlu0 %v5117_v14 }
 0x7ca   :  { %5121 = vadd.xlane.f32.xlu1 %v5120_v48  ;;  %v23254_v48 = vld [vmem:[%s24463_s0 + $0xa0] sm:$0xff] }
 0x7d6   :  { %9249 = vrot.lane.b32.xlu0 %v22769_v1, %s15544_s6  ;;  %v4954_v1 = vsub.f32 %v23254_v48, %v22750_v47 }
 0x7db   :  { %9243 = vrot.lane.b32.xlu1 %v22763_v34, %s15544_s6  ;;  %v5018_v34 = vmul.f32 %v4954_v1, %v4954_v1 }
 0x7e3   :  { %v23243_v0 = vpop.xlane.xlu0 %5106 }
 0x7e4   :  { %27533 = vst [vmem:[#allocation210_spill] sm:$0xff] %v23243_v0 }
 0x7e7   :  { %v23245_v55 = vpop.permute.xlu0 %9241 }
 0x7e8   :  { %v10187_v25 = vsel %vm5062_vm11, %v22739_v30, %v23245_v55  ;;  %v5123_v30 = vsel %vm5062_vm11, %v5018_v34, 0.0 }
 0x7e9   :  { %10251 = vst.msk [vmem:[#allocation2 + $0x98] sm:$0xff] %vm27534_vm12, %v10187_v25  ;;  %v23270_v25 = vld [vmem:[%s24463_s0 + $0xa8] sm:$0xff]  ;;  %vm27597_vm12 = vmmov %vm27514_vm0 }
 0x7ed   :  { %v23258_v42 = vpop.xlane.xlu1 %5109 }
 0x7ee   :  { %27535 = vst [vmem:[#allocation148_spill] sm:$0xff] %v23258_v42  ;;  %v4955_v42 = vsub.f32 %v23270_v25, %v22748_v2 }
 0x7f0   :  { %v5019_v1 = vmul.f32 %v4955_v42, %v4955_v42 }
 0x7f1   :  { %v23260_v14 = vpop.permute.xlu1 %9235 }
 0x7f2   :  { %v10184_v8 = vsel %vm5062_vm11, %v22726_v60, %v23260_v14  ;;  %v5126_v0 = vsel %vm5062_vm11, %v5019_v1, 0.0 }
 0x7f3   :  { %10248 = vst.msk [vmem:[#allocation2 + $0x80] sm:$0xff] %vm27536_vm5, %v10184_v8  ;;  %vm27600_vm5 = vmmov %vm27514_vm0 }
 0x7f5   :  { %5124 = vadd.xlane.f32.xlu0 %v5123_v30 }
 0x7ff   :  { %5127 = vadd.xlane.f32.xlu1 %v5126_v0  ;;  %v23290_v0 = vld [vmem:[%s24463_s0 + $0xb0] sm:$0xff] }
 0x80b   :  { %9253 = vrot.lane.b32.xlu0 %v22777_v45, %s15544_s6  ;;  %v4956_v45 = vsub.f32 %v23290_v0, %v22759_v6 }
 0x810   :  { %9247 = vrot.lane.b32.xlu1 %v22771_v16, %s15544_s6  ;;  %v5020_v16 = vmul.f32 %v4956_v45, %v4956_v45 }
 0x818   :  { %v23279_v60 = vpop.xlane.xlu0 %5112 }
 0x819   :  { %27537 = vst [vmem:[#allocation182_spill] sm:$0xff] %v23279_v60 }
 0x81c   :  { %v23281_v34 = vpop.permute.xlu0 %9245 }
 0x81d   :  { %v10189_v8 = vsel %vm5062_vm11, %v22748_v2, %v23281_v34  ;;  %v5129_v2 = vsel %vm5062_vm11, %v5020_v16, 0.0 }
 0x81e   :  { %10253 = vst.msk [vmem:[#allocation2 + $0xa8] sm:$0xff] %vm27538_vm10, %v10189_v8  ;;  %v23306_v8 = vld [vmem:[%s24463_s0 + $0xb8] sm:$0xff]  ;;  %vm27601_vm10 = vmmov %vm27514_vm0 }
 0x822   :  { %v23294_v42 = vpop.xlane.xlu1 %5115 }
 0x823   :  { %27539 = vst [vmem:[#allocation171_spill] sm:$0xff] %v23294_v42  ;;  %v4957_v42 = vsub.f32 %v23306_v8, %v22757_v59 }
 0x825   :  { %v5021_v45 = vmul.f32 %v4957_v42, %v4957_v42 }
 0x826   :  { %v23296_v30 = vpop.permute.xlu1 %9239 }
 0x827   :  { %v10186_v1 = vsel %vm5062_vm11, %v22742_v28, %v23296_v30  ;;  %v5132_v60 = vsel %vm5062_vm11, %v5021_v45, 0.0 }
 0x828   :  { %10250 = vst.msk [vmem:[#allocation2 + $0x90] sm:$0xff] %vm27540_vm7, %v10186_v1  ;;  %vm27614_vm7 = vmmov %vm27514_vm0 }
 0x82a   :  { %5130 = vadd.xlane.f32.xlu0 %v5129_v2 }
 0x834   :  { %5133 = vadd.xlane.f32.xlu1 %v5132_v60  ;;  %v23326_v60 = vld [vmem:[%s24463_s0 + $0xc0] sm:$0xff] }
 0x835   :  { %27543 = vst [vmem:[#allocation192_spill] sm:$0xff] %v23326_v60 }
 0x840   :  { %9257 = vrot.lane.b32.xlu0 %v22785_v53, %s15544_s6  ;;  %v4958_v53 = vsub.f32 %v23326_v60, %v22767_v56 }
 0x845   :  { %9251 = vrot.lane.b32.xlu1 %v22779_v63, %s15544_s6  ;;  %v5022_v63 = vmul.f32 %v4958_v53, %v4958_v53 }
 0x84d   :  { %v23315_v28 = vpop.xlane.xlu0 %5118 }
 0x84e   :  { %27541 = vst [vmem:[#allocation159_spill] sm:$0xff] %v23315_v28 }
 0x851   :  { %v23317_v16 = vpop.permute.xlu0 %9249 }
 0x852   :  { %v10191_v1 = vsel %vm5062_vm11, %v22757_v59, %v23317_v16  ;;  %v5135_v59 = vsel %vm5062_vm11, %v5022_v63, 0.0 }
 0x853   :  { %10255 = vst.msk [vmem:[#allocation2 + $0xb8] sm:$0xff] %vm27542_vm3, %v10191_v1  ;;  %v23342_v1 = vld [vmem:[%s24463_s0 + $0xc8] sm:$0xff]  ;;  %vm27617_vm3 = vmmov %vm27514_vm0 }
 0x857   :  { %v23330_v42 = vpop.xlane.xlu1 %5121 }
 0x858   :  { %27544 = vst [vmem:[#allocation185_spill] sm:$0xff] %v23330_v42  ;;  %v4959_v42 = vsub.f32 %v23342_v1, %v22765_v46 }
 0x85a   :  { %v5023_v53 = vmul.f32 %v4959_v42, %v4959_v42 }
 0x85b   :  { %v23332_v2 = vpop.permute.xlu1 %9243 }
 0x85c   :  { %v10188_v45 = vsel %vm5062_vm11, %v22750_v47, %v23332_v2  ;;  %v5138_v28 = vsel %vm5062_vm11, %v5023_v53, 0.0 }
 0x85d   :  { %10252 = vst.msk [vmem:[#allocation2 + $0xa0] sm:$0xff] %vm27514_vm0, %v10188_v45 }
 0x85f   :  { %5136 = vadd.xlane.f32.xlu0 %v5135_v59 }
 0x869   :  { %5139 = vadd.xlane.f32.xlu1 %v5138_v28  ;;  %v23362_v28 = vld [vmem:[%s24463_s0 + $0xd0] sm:$0xff] }
 0x86a   :  { %27547 = vst [vmem:[#allocation207_spill] sm:$0xff] %v23362_v28 }
 0x875   :  { %9261 = vrot.lane.b32.xlu0 %v22795_v29, %s15544_s6  ;;  %v4960_v29 = vsub.f32 %v23362_v28, %v22775_v37 }
 0x87a   :  { %9255 = vrot.lane.b32.xlu1 %v22787_v35, %s15544_s6  ;;  %v5024_v35 = vmul.f32 %v4960_v29, %v4960_v29 }
 0x882   :  { %v23351_v47 = vpop.xlane.xlu0 %5124 }
 0x883   :  { %27545 = vst [vmem:[#allocation196_spill] sm:$0xff] %v23351_v47 }
 0x886   :  { %v23353_v63 = vpop.permute.xlu0 %9253 }
 0x887   :  { %v10193_v45 = vsel %vm5062_vm11, %v22765_v46, %v23353_v63  ;;  %v5141_v46 = vsel %vm5062_vm11, %v5024_v35, 0.0 }
 0x888   :  { %10257 = vst.msk [vmem:[#allocation2 + $0xc8] sm:$0xff] %vm27546_vm15, %v10193_v45  ;;  %v23378_v45 = vld [vmem:[%s24463_s0 + $0xd8] sm:$0xff]  ;;  %vm27629_vm15 = vmmov %vm27514_vm0 }
 0x889   :  { %27550 = vst [vmem:[#allocation261_spill] sm:$0xff] %v23378_v45 }
 0x88c   :  { %v23366_v42 = vpop.xlane.xlu1 %5127 }
 0x88d   :  { %27548 = vst [vmem:[#allocation222_spill] sm:$0xff] %v23366_v42  ;;  %v4961_v42 = vsub.f32 %v23378_v45, %v22773_v26 }
 0x88f   :  { %v5025_v29 = vmul.f32 %v4961_v42, %v4961_v42  ;;  %v27557_v42 = vld [vmem:[#allocation86_spill] sm:$0xff] }
 0x890   :  { %v23368_v59 = vpop.permute.xlu1 %9247 }
 0x891   :  { %v10190_v53 = vsel %vm5062_vm11, %v22759_v6, %v23368_v59  ;;  %v5144_v47 = vsel %vm5062_vm11, %v5025_v29, 0.0  ;;  %v27552_v6 = vld [vmem:[#allocation44_spill] sm:$0xff] }
 0x892   :  { %10254 = vst.msk [vmem:[#allocation2 + $0xb0] sm:$0xff] %vm27549_vm1, %v10190_v53  ;;  %vm27630_vm1 = vmmov %vm27514_vm0 }
 0x894   :  { %5142 = vadd.xlane.f32.xlu0 %v5141_v46 }
 0x89e   :  { %5145 = vadd.xlane.f32.xlu1 %v5144_v47  ;;  %v23398_v47 = vld [vmem:[%s24463_s0 + $0xe0] sm:$0xff] }
 0x89f   :  { %27556 = vst [vmem:[#allocation258_spill] sm:$0xff] %v23398_v47 }
 0x8aa   :  { %9265 = vrot.lane.b32.xlu0 %v27551_v50, %s15544_s6  ;;  %v4962_v50 = vsub.f32 %v23398_v47, %v27557_v42 }
 0x8af   :  { %9259 = vrot.lane.b32.xlu1 %v27552_v6, %s15544_s6  ;;  %v5026_v6 = vmul.f32 %v4962_v50, %v4962_v50 }
 0x8b7   :  { %v23387_v35 = vpop.xlane.xlu0 %5130 }
 0x8b8   :  { %27553 = vst [vmem:[#allocation241_spill] sm:$0xff] %v23387_v35 }
 0x8bb   :  { %v23389_v53 = vpop.permute.xlu0 %9257 }
 0x8bc   :  { %27554 = vst [vmem:[#allocation279_spill] sm:$0xff] %v23389_v53  ;;  %v10195_v46 = vsel %vm5062_vm11, %v22773_v26, %v23389_v53  ;;  %v5147_v26 = vsel %vm5062_vm11, %v5026_v6, 0.0  ;;  %v27592_v53 = vld [vmem:[#allocation116_spill] sm:$0xff] }
 0x8bd   :  { %10259 = vst.msk [vmem:[#allocation2 + $0xd8] sm:$0xff] %vm27555_vm4, %v10195_v46  ;;  %v23414_v46 = vld [vmem:[%s24463_s0 + $0xe8] sm:$0xff]  ;;  %v9396_v60 = vsub.f32 %v27592_v53, %v22935_v22  ;;  %vm27634_vm4 = vmmov %vm27514_vm0 }
 0x8be   :  { %27560 = vst [vmem:[#allocation355_spill] sm:$0xff] %v23414_v46 }
 0x8c1   :  { %v23402_v29 = vpop.xlane.xlu1 %5133 }
 0x8c2   :  { %27558 = vst [vmem:[#allocation330_spill] sm:$0xff] %v23402_v29  ;;  %v4963_v29 = vsub.f32 %v23414_v46, %v27561_v4 }
 0x8c4   :  { %v5027_v50 = vmul.f32 %v4963_v29, %v4963_v29  ;;  %v27568_v29 = vld [vmem:[#allocation141_spill] sm:$0xff] }
 0x8c5   :  { %v23404_v35 = vpop.permute.xlu1 %9251 }
 0x8c6   :  { %v10192_v7 = vsel %vm5062_vm11, %v22767_v56, %v23404_v35  ;;  %v5150_v43 = vsel %vm5062_vm11, %v5027_v50, 0.0  ;;  %v27563_v56 = vld [vmem:[#allocation194_spill] sm:$0xff] }
 0x8c7   :  { %10256 = vst.msk [vmem:[#allocation2 + $0xc0] sm:$0xff] %vm27559_vm8, %v10192_v7  ;;  %vm27635_vm8 = vmmov %vm27514_vm0 }
 0x8c9   :  { %5148 = vadd.xlane.f32.xlu0 %v5147_v26 }
 0x8d3   :  { %5151 = vadd.xlane.f32.xlu1 %v5150_v43  ;;  %v23434_v43 = vld [vmem:[%s24463_s0 + $0xf0] sm:$0xff] }
 0x8d4   :  { %27567 = vst [vmem:[#allocation33_spill] sm:$0xff] %v23434_v43 }
 0x8df   :  { %9269 = vrot.lane.b32.xlu0 %v27562_v12, %s15544_s6  ;;  %v4964_v12 = vsub.f32 %v23434_v43, %v27568_v29  ;;  %v27573_v43 = vld [vmem:[#allocation151_spill] sm:$0xff] }
 0x8e4   :  { %9263 = vrot.lane.b32.xlu1 %v27563_v56, %s15544_s6  ;;  %v5028_v56 = vmul.f32 %v4964_v12, %v4964_v12 }
 0x8ec   :  { %v23423_v7 = vpop.xlane.xlu0 %5136 }
 0x8ed   :  { %27564 = vst [vmem:[#allocation344_spill] sm:$0xff] %v23423_v7 }
 0x8f0   :  { %v23425_v6 = vpop.permute.xlu0 %9261 }
 0x8f1   :  { %27565 = vst [vmem:[#allocation32_spill] sm:$0xff] %v23425_v6  ;;  %v10197_v26 = vsel %vm5062_vm11, %v27561_v4, %v23425_v6  ;;  %v5153_v4 = vsel %vm5062_vm11, %v5028_v56, 0.0  ;;  %v27574_v6 = vld [vmem:[#allocation204_spill] sm:$0xff] }
 0x8f2   :  { %10261 = vst.msk [vmem:[#allocation2 + $0xe8] sm:$0xff] %vm27566_vm6, %v10197_v26  ;;  %v23450_v26 = vld [vmem:[%s24463_s0 + $0xf8] sm:$0xff]  ;;  %vm27640_vm6 = vmmov %vm27514_vm0 }
 0x8f3   :  { %27572 = vst [vmem:[#allocation110_spill] sm:$0xff] %v23450_v26 }
 0x8f6   :  { %v23438_v50 = vpop.xlane.xlu1 %5139 }
 0x8f7   :  { %27569 = vst [vmem:[#allocation143_spill] sm:$0xff] %v23438_v50  ;;  %v4965_v50 = vsub.f32 %v23450_v26, %v27573_v43 }
 0x8f9   :  { %v5029_v12 = vmul.f32 %v4965_v50, %v4965_v50  ;;  %v27580_v50 = vld [vmem:[#allocation87_spill] sm:$0xff] }
 0x8fa   :  { %v23440_v7 = vpop.permute.xlu1 %9255 }
 0x8fb   :  { %27570 = vst [vmem:[#allocation25_spill] sm:$0xff] %v23440_v7  ;;  %v10194_v47 = vsel %vm5062_vm11, %v22775_v37, %v23440_v7  ;;  %v5156_v46 = vsel %vm5062_vm11, %v5029_v12, 0.0  ;;  %v27575_v37 = vld [vmem:[#allocation167_spill] sm:$0xff] }
 0x8fc   :  { %10258 = vst.msk [vmem:[#allocation2 + $0xd0] sm:$0xff] %vm27571_vm13, %v10194_v47  ;;  %vm27642_vm13 = vmmov %vm27514_vm0 }
 0x8fe   :  { %5154 = vadd.xlane.f32.xlu0 %v5153_v4 }
 0x908   :  { %5157 = vadd.xlane.f32.xlu1 %v5156_v46  ;;  %v23470_v46 = vld [vmem:[%s24463_s0 + $0x100] sm:$0xff] }
 0x909   :  { %27579 = vst [vmem:[#allocation179_spill] sm:$0xff] %v23470_v46 }
 0x914   :  { %9273 = vrot.lane.b32.xlu0 %v27574_v6, %s15544_s6  ;;  %v4966_v6 = vsub.f32 %v23470_v46, %v27580_v50  ;;  %v27585_v46 = vld [vmem:[#allocation45_spill] sm:$0xff] }
 0x919   :  { %9267 = vrot.lane.b32.xlu1 %v27575_v37, %s15544_s6  ;;  %v5030_v37 = vmul.f32 %v4966_v6, %v4966_v6 }
 0x921   :  { %v23459_v47 = vpop.xlane.xlu0 %5142 }
 0x922   :  { %27576 = vst [vmem:[#allocation184_spill] sm:$0xff] %v23459_v47 }
 0x925   :  { %v23461_v56 = vpop.permute.xlu0 %9265 }
 0x926   :  { %27577 = vst [vmem:[#allocation131_spill] sm:$0xff] %v23461_v56  ;;  %v10199_v4 = vsel %vm5062_vm11, %v27573_v43, %v23461_v56  ;;  %v5159_v43 = vsel %vm5062_vm11, %v5030_v37, 0.0  ;;  %v23493_v56 = vld [vmem:[%s24463_s0 + $0x118] sm:$0xff]  ;;  %v23500_v37 = vld [vmem:[%s24463_s0 + $0x128] sm:$0xff] }
 0x927   :  { %10263 = vst.msk [vmem:[#allocation2 + $0xf8] sm:$0xff] %vm27578_vm2, %v10199_v4  ;;  %v23486_v4 = vld [vmem:[%s24463_s0 + $0x108] sm:$0xff]  ;;  %27586 = vst [vmem:[#allocation136_spill] sm:$0xff] %v23493_v56 }
 0x928   :  { %27584 = vst [vmem:[#allocation164_spill] sm:$0xff] %v23486_v4  ;;  %27588 = vst [vmem:[#allocation186_spill] sm:$0xff] %v23500_v37 }
 0x929   :  { %vm27646_vm2 = vmmov %vm27514_vm0 }
 0x92b   :  { %v23474_v12 = vpop.xlane.xlu1 %5145 }
 0x92c   :  { %27581 = vst [vmem:[#allocation38_spill] sm:$0xff] %v23474_v12  ;;  %v4967_v12 = vsub.f32 %v23486_v4, %v27585_v46 }
 0x92e   :  { %v5031_v6 = vmul.f32 %v4967_v12, %v4967_v12 }
 0x92f   :  { %v23476_v47 = vpop.permute.xlu1 %9259 }
 0x930   :  { %27582 = vst [vmem:[#allocation39_spill] sm:$0xff] %v23476_v47  ;;  %v10196_v26 = vsel %vm5062_vm11, %v27557_v42, %v23476_v47  ;;  %v27587_v42 = vld [vmem:[#allocation168_spill] sm:$0xff]  ;;  %v5162_v4 = vsel %vm5062_vm11, %v5031_v6, 0.0  ;;  %v27593_v6 = vld [vmem:[#allocation50_spill] sm:$0xff] }
 0x931   :  { %10260 = vst.msk [vmem:[#allocation2 + $0xe0] sm:$0xff] %vm27583_vm14, %v10196_v26  ;;  %v4969_v26 = vsub.f32 %v23493_v56, %v27587_v42  ;;  %v27591_v56 = vld [vmem:[#allocation189_spill] sm:$0xff]  ;;  %vm27650_vm14 = vmmov %vm27514_vm0 }
 0x933   :  { %5160 = vadd.xlane.f32.xlu0 %v5159_v43  ;;  %v5033_v47 = vmul.f32 %v4969_v26, %v4969_v26  ;;  %v27589_v43 = vld [vmem:[#allocation64_spill] sm:$0xff]  ;;  %v27590_v26 = vld [vmem:[#allocation225_spill] sm:$0xff] }
 0x934   :  { %v4971_v28 = vsub.f32 %v23500_v37, %v27589_v43  ;;  %v9460_v37 = vmul.f32 %v9396_v60, %v9396_v60 }
 0x935   :  { %v5168_v7 = vsel %vm5062_vm11, %v5033_v47, 0.0 }
 0x936   :  { %v5035_v12 = vmul.f32 %v4971_v28, %v4971_v28 }
 0x938   :  { %v5174_v45 = vsel %vm5062_vm11, %v5035_v12, 0.0 }
 0x93d   :  { %5163 = vadd.xlane.f32.xlu1 %v5162_v4  ;;  %v9398_v4 = vsub.f32 %v27593_v6, %v23002_v44  ;;  %v9400_v44 = vsub.f32 %v22976_v52, %v22987_v40  ;;  %v9402_v40 = vsub.f32 %v23018_v13, %v23029_v49  ;;  %v9403_v13 = vsub.f32 %v23038_v38, %v23116_v33  ;;  %v27598_v38 = vld [vmem:[#allocation217_spill] sm:$0xff] }
 0x93e   :  { %v9406_v49 = vsub.f32 %v23090_v61, %v23101_v57  ;;  %v9407_v61 = vsub.f32 %v23110_v27, %v23188_v3  ;;  %v27599_v57 = vld [vmem:[#allocation30_spill] sm:$0xff]  ;;  %v9412_v3 = vsub.f32 %v23198_v62, %v23209_v58  ;;  %v9414_v62 = vsub.f32 %v23234_v9, %v23245_v55 }
 0x93f   :  { %v9413_v9 = vsub.f32 %v23218_v23, %v23296_v30  ;;  %v9418_v23 = vsub.f32 %v23306_v8, %v23317_v16  ;;  %v27604_v8 = vld [vmem:[#allocation279_spill] sm:$0xff]  ;;  %v27605_v16 = vld [vmem:[#allocation261_spill] sm:$0xff] }
 0x941   :  { %5169 = vadd.xlane.f32.xlu1 %v5168_v7  ;;  %v9462_v7 = vmul.f32 %v9398_v4, %v9398_v4 }
 0x945   :  { %5175 = vadd.xlane.f32.xlu1 %v5174_v45  ;;  %v27594_v45 = vld [vmem:[#allocation84_spill] sm:$0xff] }
 0x946   :  { %v9397_v47 = vsub.f32 %v27594_v45, %v23008_v51  ;;  %v23537_v51 = vld [vmem:[%s24463_s0 + $0x110] sm:$0xff] }
 0x948   :  { %v9461_v60 = vmul.f32 %v9397_v47, %v9397_v47 }
 0x949   :  { %9271 = vrot.lane.b32.xlu0 %v27590_v26, %s15544_s6  ;;  %v9399_v26 = vsub.f32 %v22968_v36, %v23044_v19  ;;  %v9466_v36 = vmul.f32 %v9402_v40, %v9402_v40  ;;  %v9401_v19 = vsub.f32 %v22998_v54, %v23080_v32  ;;  %v9470_v54 = vmul.f32 %v9406_v49, %v9406_v49  ;;  %v27611_v49 = vld [vmem:[#allocation355_spill] sm:$0xff] }
 0x94a   :  { %v9405_v32 = vsub.f32 %v23074_v41, %v23152_v18  ;;  %v9410_v41 = vsub.f32 %v23162_v15, %v23173_v39  ;;  %v9471_v18 = vmul.f32 %v9407_v61, %v9407_v61  ;;  %v9476_v39 = vmul.f32 %v9412_v3, %v9412_v3 }
 0x94b   :  { %v9463_v4 = vmul.f32 %v9399_v26, %v9399_v26  ;;  %v9465_v45 = vmul.f32 %v9401_v19, %v9401_v19  ;;  %v9478_v26 = vmul.f32 %v9414_v62, %v9414_v62  ;;  %v9415_v40 = vsub.f32 %v23254_v48, %v23332_v2 }
 0x94c   :  { %v9420_v48 = vsub.f32 %v23342_v1, %v23353_v63  ;;  %v27607_v1 = vld [vmem:[#allocation25_spill] sm:$0xff]  ;;  %v27608_v63 = vld [vmem:[#allocation207_spill] sm:$0xff] }
 0x94d   :  { %9277 = vrot.lane.b32.xlu0 %v27591_v56, %s15544_s6  ;;  %v27596_v56 = vld [vmem:[#allocation208_spill] sm:$0xff]  ;;  %v9479_v30 = vmul.f32 %v9415_v40, %v9415_v40 }
 0x94e   :  { %v9484_v2 = vmul.f32 %v9420_v48, %v9420_v48  ;;  %v27625_v48 = vld [vmem:[#allocation186_spill] sm:$0xff] }
 0x956   :  { %v23515_v28 = vpop.xlane.xlu0 %5148  ;;  %9589 = vrot.lane.b32.xlu1 %v9460_v37, %s15545_s27  ;;  %v9464_v37 = vmul.f32 %v9400_v44, %v9400_v44 }
 0x95a   :  { %v23520_v12 = vpop.permute.xlu0 %9269  ;;  %9593 = vrot.lane.b32.xlu1 %v9462_v7, %s15545_s27 }
 0x95b   :  { %v10201_v22 = vsel %vm5062_vm11, %v27585_v46, %v23520_v12  ;;  %v4968_v46 = vsub.f32 %v23537_v51, %v27596_v56 }
 0x95c   :  { %10265 = vst.msk [vmem:[#allocation2 + $0x108] sm:$0xff] %vm27595_vm9, %v10201_v22  ;;  %v9467_v22 = vmul.f32 %v9403_v13, %v9403_v13  ;;  %v27609_v13 = vld [vmem:[#allocation235_spill] sm:$0xff]  ;;  %vm27654_vm9 = vmmov %vm27514_vm0 }
 0x95e   :  { %9591 = vrot.lane.b32.xlu1 %v9461_v60, %s15545_s27  ;;  %v9409_v60 = vsub.f32 %v23146_v10, %v23224_v21  ;;  %v9411_v10 = vsub.f32 %v23182_v24, %v23260_v14  ;;  %v23610_v24 = vld [vmem:[%s24463_s0 + $0x120] sm:$0xff]  ;;  %v27602_v14 = vld [vmem:[#allocation178_spill] sm:$0xff] }
 0x960   :  { %v23530_v53 = vpop.xlane.xlu1 %5151  ;;  %v9473_v44 = vmul.f32 %v9409_v60, %v9409_v60  ;;  %v9475_v58 = vmul.f32 %v9411_v10, %v9411_v10 }
 0x962   :  { %9329 = vrot.lane.b32.xlu1 %v22961_v5, %s15544_s6  ;;  %v5032_v5 = vmul.f32 %v4968_v46, %v4968_v46 }
 0x964   :  { %v23543_v6 = vpop.permute.xlu1 %9263  ;;  %v5165_v7 = vsel %vm5062_vm11, %v5032_v5, 0.0 }
 0x965   :  { %v10198_v52 = vsel %vm5062_vm11, %v27568_v29, %v23543_v6  ;;  %v9404_v29 = vsub.f32 %v23054_v20, %v23065_v11  ;;  %v9408_v20 = vsub.f32 %v23126_v17, %v23137_v31  ;;  %v9469_v11 = vmul.f32 %v9405_v32, %v9405_v32 }
 0x966   :  { %10262 = vst.msk [vmem:[#allocation2 + $0xf0] sm:$0xff] %vm27597_vm12, %v10198_v52  ;;  %9597 = vrot.lane.b32.xlu1 %v9464_v37, %s15545_s27  ;;  %v9474_v31 = vmul.f32 %v9410_v41, %v9410_v41  ;;  %v4970_v37 = vsub.f32 %v23610_v24, %v27602_v14  ;;  %v9477_v52 = vmul.f32 %v9413_v9, %v9413_v9  ;;  %v27615_v41 = vld [vmem:[#allocation131_spill] sm:$0xff]  ;;  %vm27658_vm12 = vmmov %vm27514_vm0 }
 0x967   :  { %v9468_v47 = vmul.f32 %v9404_v29, %v9404_v29  ;;  %v9472_v33 = vmul.f32 %v9408_v20, %v9408_v20  ;;  %v9422_v29 = vsub.f32 %v27605_v16, %v27604_v8 }
 0x968   :  { %v5034_v55 = vmul.f32 %v4970_v37, %v4970_v37 }
 0x96a   :  { %9595 = vrot.lane.b32.xlu1 %v9463_v4, %s15545_s27  ;;  %v5171_v4 = vsel %vm5062_vm11, %v5034_v55, 0.0 }
 0x96c   :  { %5166 = vadd.xlane.f32.xlu0 %v5165_v7  ;;  %v9482_v7 = vmul.f32 %v9418_v23, %v9418_v23  ;;  %v23687_v23 = vld [vmem:[%s24463_s0 + $0x130] sm:$0xff] }
 0x96e   :  { %9601 = vrot.lane.b32.xlu1 %v9466_v36, %s15545_s27  ;;  %v27603_v36 = vld [vmem:[#allocation192_spill] sm:$0xff] }
 0x96f   :  { %v9419_v19 = vsub.f32 %v27603_v36, %v23404_v35  ;;  %v27610_v35 = vld [vmem:[#allocation32_spill] sm:$0xff] }
 0x972   :  { %9599 = vrot.lane.b32.xlu1 %v9465_v45, %s15545_s27  ;;  %v9483_v45 = vmul.f32 %v9419_v19, %v9419_v19 }
 0x976   :  { %9605 = vrot.lane.b32.xlu1 %v9468_v47, %s15545_s27  ;;  %v9421_v47 = vsub.f32 %v27608_v63, %v27607_v1  ;;  %v27628_v1 = vld [vmem:[#allocation214_spill] sm:$0xff] }
 0x97a   :  { %9603 = vrot.lane.b32.xlu1 %v9467_v22, %s15545_s27  ;;  %v9424_v22 = vsub.f32 %v27611_v49, %v27610_v35 }
 0x97c   :  { %v9488_v20 = vmul.f32 %v9424_v22, %v9424_v22 }
 0x97e   :  { %9609 = vrot.lane.b32.xlu1 %v9470_v54, %s15545_s27  ;;  %v9485_v54 = vmul.f32 %v9421_v47, %v9421_v47 }
 0x982   :  { %9275 = vrot.lane.b32.xlu0 %v27598_v38, %s15544_s6  ;;  %9607 = vrot.lane.b32.xlu1 %v9469_v11, %s15545_s27  ;;  %v27612_v11 = vld [vmem:[#allocation39_spill] sm:$0xff]  ;;  %v27613_v38 = vld [vmem:[#allocation258_spill] sm:$0xff] }
 0x986   :  { %9281 = vrot.lane.b32.xlu0 %v27599_v57, %s15544_s6  ;;  %9613 = vrot.lane.b32.xlu1 %v9472_v33, %s15545_s27  ;;  %v9423_v33 = vsub.f32 %v27613_v38, %v27612_v11 }
 0x988   :  { %v9487_v60 = vmul.f32 %v9423_v33, %v9423_v33  ;;  %v27632_v33 = vld [vmem:[#allocation230_spill] sm:$0xff] }
 0x98a   :  { %9611 = vrot.lane.b32.xlu1 %v9471_v18, %s15545_s27  ;;  %v27616_v18 = vld [vmem:[#allocation110_spill] sm:$0xff] }
 0x98b   :  { %v23582_v17 = vpop.xlane.xlu0 %5154 }
 0x98e   :  { %9617 = vrot.lane.b32.xlu1 %v9474_v31, %s15545_s27  ;;  %v9426_v31 = vsub.f32 %v27616_v18, %v27615_v41 }
 0x98f   :  { %v23587_v27 = vpop.permute.xlu0 %9273 }
 0x990   :  { %v10203_v15 = vsel %vm5062_vm11, %v27587_v42, %v23587_v27 }
 0x991   :  { %10267 = vst.msk [vmem:[#allocation2 + $0x118] sm:$0xff] %vm27600_vm5, %v10203_v15  ;;  %vm27662_vm5 = vmmov %vm27514_vm0 }
 0x992   :  { %9615 = vrot.lane.b32.xlu1 %v9473_v44, %s15545_s27 }
 0x995   :  { %v23598_v21 = vpop.xlane.xlu1 %5157 }
 0x996   :  { %9621 = vrot.lane.b32.xlu1 %v9476_v39, %s15545_s27  ;;  %v9490_v39 = vmul.f32 %v9426_v31, %v9426_v31 }
 0x999   :  { %v9268_v46 = vpop.permute.xlu1 %9267 }
 0x99a   :  { %v10200_v42 = vsel %vm5062_vm11, %v27580_v50, %v9268_v46  ;;  %9619 = vrot.lane.b32.xlu1 %v9475_v58, %s15545_s27  ;;  %v9416_v50 = vsub.f32 %v23270_v25, %v23281_v34  ;;  %v9417_v25 = vsub.f32 %v23290_v0, %v23368_v59  ;;  %v27606_v0 = vld [vmem:[#allocation100_spill] sm:$0xff]  ;;  %v9486_v59 = vmul.f32 %v9422_v29, %v9422_v29  ;;  %v27626_v29 = vld [vmem:[#allocation18_spill] sm:$0xff] }
 0x99b   :  { %10264 = vst.msk [vmem:[#allocation2 + $0x100] sm:$0xff] %vm27601_vm10, %v10200_v42  ;;  %v27620_v42 = vld [vmem:[#allocation179_spill] sm:$0xff]  ;;  %vm27666_vm10 = vmmov %vm27514_vm0 }
 0x99c   :  { %v9480_v5 = vmul.f32 %v9416_v50, %v9416_v50  ;;  %v9481_v34 = vmul.f32 %v9417_v25, %v9417_v25  ;;  %v9427_v37 = vsub.f32 %v27620_v42, %v9268_v46  ;;  %v15466_v50 = vld [vmem:[%s24463_s0 + $0x138] sm:$0xff] }
 0x99d   :  { %v27637_v42 = vld [vmem:[#allocation270_spill] sm:$0xff] }
 0x99e   :  { %9625 = vrot.lane.b32.xlu1 %v9478_v26, %s15545_s27  ;;  %v9491_v55 = vmul.f32 %v9427_v37, %v9427_v37 }
 0x9a2   :  { %9623 = vrot.lane.b32.xlu1 %v9477_v52, %s15545_s27 }
 0x9a5   :  { %5172 = vadd.xlane.f32.xlu0 %v5171_v4 }
 0x9a6   :  { %9629 = vrot.lane.b32.xlu1 %v9480_v5, %s15545_s27 }
 0x9aa   :  { %9627 = vrot.lane.b32.xlu1 %v9479_v30, %s15545_s27 }
 0x9ae   :  { %9633 = vrot.lane.b32.xlu1 %v9482_v7, %s15545_s27 }
 0x9b2   :  { %9631 = vrot.lane.b32.xlu1 %v9481_v34, %s15545_s27 }
 0x9b6   :  { %9637 = vrot.lane.b32.xlu1 %v9484_v2, %s15545_s27 }
 0x9ba   :  { %9635 = vrot.lane.b32.xlu1 %v9483_v45, %s15545_s27 }
 0x9bb   :  { %9279 = vrot.lane.b32.xlu0 %v27606_v0, %s15544_s6  ;;  %v27627_v0 = vld [vmem:[#allocation236_spill] sm:$0xff] }
 0x9be   :  { %9641 = vrot.lane.b32.xlu1 %v9486_v59, %s15545_s27 }
 0x9bf   :  { %9285 = vrot.lane.b32.xlu0 %v27609_v13, %s15544_s6 }
 0x9c0   :  { %v23648_v32 = vpop.xlane.xlu0 %5160 }
 0x9c2   :  { %9639 = vrot.lane.b32.xlu1 %v9485_v54, %s15545_s27  ;;  %v15468_v54 = vld [vmem:[%s24463_s0 + $0x148] sm:$0xff] }
 0x9c4   :  { %v9272_v61 = vpop.permute.xlu0 %9271 }
 0x9c5   :  { %v10202_v57 = vsel %vm5062_vm11, %v27596_v56, %v9272_v61  ;;  %v27618_v56 = vld [vmem:[#allocation33_spill] sm:$0xff]  ;;  %v9429_v46 = vsub.f32 %v23537_v51, %v9272_v61 }
 0x9c6   :  { %10266 = vst.msk [vmem:[#allocation2 + $0x110] sm:$0xff] %vm27614_vm7, %v10202_v57  ;;  %9645 = vrot.lane.b32.xlu1 %v9488_v20, %s15545_s27  ;;  %v9425_v10 = vsub.f32 %v27618_v56, %v23543_v6  ;;  %v27623_v6 = vld [vmem:[#allocation95_spill] sm:$0xff]  ;;  %v27631_v20 = vld [vmem:[#allocation244_spill] sm:$0xff]  ;;  %vm27670_vm7 = vmmov %vm27514_vm0 }
 0x9c7   :  { %v4973_v52 = vsub.f32 %v15466_v50, %v27623_v6  ;;  %v9493_v25 = vmul.f32 %v9429_v46, %v9429_v46  ;;  %v4975_v11 = vsub.f32 %v15468_v54, %v27631_v20 }
 0x9c8   :  { %v9278_v3 = vpop.permute.xlu0 %9277  ;;  %v9489_v58 = vmul.f32 %v9425_v10, %v9425_v10 }
 0x9c9   :  { %v10205_v44 = vsel %vm5062_vm11, %v27589_v43, %v9278_v3  ;;  %v27622_v43 = vld [vmem:[#allocation136_spill] sm:$0xff]  ;;  %v5037_v4 = vmul.f32 %v4973_v52, %v4973_v52  ;;  %v9432_v34 = vsub.f32 %v27625_v48, %v9278_v3  ;;  %v5039_v38 = vmul.f32 %v4975_v11, %v4975_v11 }
 0x9ca   :  { %10269 = vst.msk [vmem:[#allocation2 + $0x128] sm:$0xff] %vm27617_vm3, %v10205_v44  ;;  %v23662_v15 = vpop.xlane.xlu1 %5163  ;;  %9643 = vrot.lane.b32.xlu1 %v9487_v60, %s15545_s27  ;;  %v9430_v9 = vsub.f32 %v27622_v43, %v23587_v27  ;;  %v27624_v27 = vld [vmem:[#allocation99_spill] sm:$0xff]  ;;  %v27643_v48 = vld [vmem:[#allocation232_spill] sm:$0xff]  ;;  %vm27675_vm3 = vmmov %vm27514_vm0 }
 0x9cb   :  { %v4972_v30 = vsub.f32 %v23687_v23, %v27624_v27  ;;  %v5180_v36 = vsel %vm5062_vm11, %v5037_v4, 0.0  ;;  %v9496_v19 = vmul.f32 %v9432_v34, %v9432_v34  ;;  %v23745_v44 = vld [vmem:[%s24463_s0 + $0x140] sm:$0xff] }
 0x9cc   :  { %v9494_v40 = vmul.f32 %v9430_v9, %v9430_v9 }
 0x9cd   :  { %v5036_v2 = vmul.f32 %v4972_v30, %v4972_v30 }
 0x9ce   :  { %v23667_v62 = vpop.xlane.xlu1 %5169  ;;  %9649 = vrot.lane.b32.xlu1 %v9490_v39, %s15545_s27  ;;  %v27636_v39 = vld [vmem:[#allocation202_spill] sm:$0xff] }
 0x9cf   :  { %27619 = vst [vmem:[#allocation195_spill] sm:$0xff] %v23667_v62  ;;  %v5177_v8 = vsel %vm5062_vm11, %v5036_v2, 0.0  ;;  %v4974_v56 = vsub.f32 %v23745_v44, %v27636_v39 }
 0x9d1   :  { %v5038_v10 = vmul.f32 %v4974_v56, %v4974_v56 }
 0x9d2   :  { %v23671_v26 = vpop.xlane.xlu1 %5175  ;;  %9647 = vrot.lane.b32.xlu1 %v9489_v58, %s15545_s27 }
 0x9d3   :  { %27621 = vst [vmem:[#allocation153_spill] sm:$0xff] %v23671_v26  ;;  %v5183_v58 = vsel %vm5062_vm11, %v5038_v10, 0.0 }
 0x9d6   :  { %v23680_v5 = vpop.permute.xlu1 %9589  ;;  %9651 = vrot.lane.b32.xlu1 %v9491_v55, %s15545_s27 }
 0x9da   :  { %v23691_v7 = vpop.permute.xlu1 %9593  ;;  %9657 = vrot.lane.b32.xlu1 %v9494_v40, %s15545_s27  ;;  %v27641_v40 = vld [vmem:[#allocation200_spill] sm:$0xff] }
 0x9de   :  { %v23696_v51 = vpop.permute.xlu1 %9591  ;;  %5181 = vadd.xlane.f32.xlu0 %v5180_v36  ;;  %9655 = vrot.lane.b32.xlu1 %v9493_v25, %s15545_s27  ;;  %v27645_v36 = vld [vmem:[#allocation31_spill] sm:$0xff] }
 0x9e2   :  { %5178 = vadd.xlane.f32.xlu0 %v5177_v8  ;;  %9661 = vrot.lane.b32.xlu1 %v9496_v19, %s15545_s27  ;;  %v23701_v16 = vpop.permute.xlu1 %9329  ;;  %v23784_v8 = vld [vmem:[%s24463_s0 + $0x150] sm:$0xff] }
 0x9e3   :  { %v10231_v45 = vsel %vm5062_vm11, %v27626_v29, %v23701_v16 }
 0x9e4   :  { %10295 = vst.msk [vmem:[#allocation2 + $0x1f8] sm:$0xff] %vm27514_vm0, %v10231_v45  ;;  %v4976_v45 = vsub.f32 %v23784_v8, %v27645_v36 }
 0x9f8   :  { %9283 = vrot.lane.b32.xlu0 %v27627_v0, %s15544_s6  ;;  %v5040_v0 = vmul.f32 %v4976_v45, %v4976_v45  ;;  %v27661_v45 = vld [vmem:[#allocation298_spill] sm:$0xff] }
 0x9f9   :  { %v23709_v59 = vpop.xlane.xlu0 %5166 }
 0x9fc   :  { %9289 = vrot.lane.b32.xlu0 %v27628_v1, %s15544_s6  ;;  %v5189_v1 = vsel %vm5062_vm11, %v5040_v0, 0.0 }
 0x9fd   :  { %v23713_v63 = vpop.permute.xlu0 %9275 }
 0x9fe   :  { %v10204_v47 = vsel %vm5062_vm11, %v27602_v14, %v23713_v63  ;;  %v5186_v14 = vsel %vm5062_vm11, %v5039_v38, 0.0 }
 0x9ff   :  { %10268 = vst.msk [vmem:[#allocation2 + $0x120] sm:$0xff] %vm27629_vm15, %v10204_v47  ;;  %v27647_v47 = vld [vmem:[#allocation299_spill] sm:$0xff]  ;;  %vm27691_vm15 = vmmov %vm27514_vm0 }
 0xa01   :  { %v9282_v13 = vpop.permute.xlu0 %9281 }
 0xa02   :  { %v9434_v35 = vsub.f32 %v15466_v50, %v9282_v13  ;;  %v10207_v49 = vsel %vm5062_vm11, %v27623_v6, %v9282_v13  ;;  %v15470_v6 = vld [vmem:[%s24463_s0 + $0x158] sm:$0xff] }
 0xa03   :  { %10271 = vst.msk [vmem:[#allocation2 + $0x138] sm:$0xff] %vm27630_vm1, %v10207_v49  ;;  %v15472_v49 = vld [vmem:[%s24463_s0 + $0x168] sm:$0xff]  ;;  %vm27693_vm1 = vmmov %vm27514_vm0 }
 0xa04   :  { %v9498_v22 = vmul.f32 %v9434_v35, %v9434_v35 }
 0xa06   :  { %9665 = vrot.lane.b32.xlu1 %v9498_v22, %s15545_s27 }
 0xa1b   :  { %5187 = vadd.xlane.f32.xlu0 %v5186_v14 }
 0xa31   :  { %9287 = vrot.lane.b32.xlu0 %v27632_v33, %s15544_s6 }
 0xa32   :  { %v23730_v61 = vpop.xlane.xlu0 %5172 }
 0xa33   :  { %27633 = vst [vmem:[#allocation190_spill] sm:$0xff] %v23730_v61  ;;  %v24104_v61 = vld [vmem:[%s24463_s0 + $0x1f0] sm:$0xff] }
 0xa36   :  { %v23732_v57 = vpop.permute.xlu0 %9279 }
 0xa37   :  { %v10206_v41 = vsel %vm5062_vm11, %v27624_v27, %v23732_v57  ;;  %v4977_v27 = vsub.f32 %v15470_v6, %v27641_v40 }
 0xa38   :  { %10270 = vst.msk [vmem:[#allocation2 + $0x130] sm:$0xff] %vm27634_vm4, %v10206_v41  ;;  %v27651_v41 = vld [vmem:[#allocation271_spill] sm:$0xff]  ;;  %vm27696_vm4 = vmmov %vm27514_vm0 }
 0xa39   :  { %v5041_v30 = vmul.f32 %v4977_v27, %v4977_v27 }
 0xa3a   :  { %v9286_v18 = vpop.permute.xlu0 %9285 }
 0xa3b   :  { %v9436_v31 = vsub.f32 %v15468_v54, %v9286_v18  ;;  %v10209_v60 = vsel %vm5062_vm11, %v27631_v20, %v9286_v18  ;;  %v5192_v25 = vsel %vm5062_vm11, %v5041_v30, 0.0  ;;  %v27649_v54 = vld [vmem:[#allocation83_spill] sm:$0xff] }
 0xa3c   :  { %10273 = vst.msk [vmem:[#allocation2 + $0x148] sm:$0xff] %vm27635_vm8, %v10209_v60  ;;  %v4979_v38 = vsub.f32 %v15472_v49, %v27649_v54  ;;  %v27653_v60 = vld [vmem:[#allocation212_spill] sm:$0xff]  ;;  %vm27698_vm8 = vmmov %vm27514_vm0 }
 0xa3d   :  { %v9500_v3 = vmul.f32 %v9436_v31, %v9436_v31 }
 0xa3e   :  { %v5043_v14 = vmul.f32 %v4979_v38, %v4979_v38 }
 0xa3f   :  { %9669 = vrot.lane.b32.xlu1 %v9500_v3, %s15545_s27 }
 0xa40   :  { %v5198_v33 = vsel %vm5062_vm11, %v5043_v14, 0.0  ;;  %v27665_v14 = vld [vmem:[#allocation275_spill] sm:$0xff] }
 0xa50   :  { %5184 = vadd.xlane.f32.xlu0 %v5183_v58 }
 0xa66   :  { %9293 = vrot.lane.b32.xlu0 %v27637_v42, %s15544_s6  ;;  %v27655_v42 = vld [vmem:[#allocation266_spill] sm:$0xff] }
 0xa6b   :  { %v23752_v37 = vpop.xlane.xlu0 %5181 }
 0xa6c   :  { %27638 = vst [vmem:[#allocation97_spill] sm:$0xff] %v23752_v37 }
 0xa6f   :  { %v23754_v43 = vpop.xlane.xlu0 %5178 }
 0xa70   :  { %27639 = vst [vmem:[#allocation104_spill] sm:$0xff] %v23754_v43 }
 0xa73   :  { %v23756_v9 = vpop.permute.xlu0 %9283 }
 0xa74   :  { %v10208_v55 = vsel %vm5062_vm11, %v27636_v39, %v23756_v9  ;;  %v23815_v39 = vld [vmem:[%s24463_s0 + $0x160] sm:$0xff] }
 0xa75   :  { %10272 = vst.msk [vmem:[#allocation2 + $0x140] sm:$0xff] %vm27640_vm6, %v10208_v55  ;;  %v4978_v56 = vsub.f32 %v23815_v39, %v27653_v60  ;;  %vm27700_vm6 = vmmov %vm27514_vm0 }
 0xa77   :  { %v9290_v50 = vpop.permute.xlu0 %9289  ;;  %v5042_v10 = vmul.f32 %v4978_v56, %v4978_v56 }
 0xa78   :  { %v9438_v52 = vsub.f32 %v15470_v6, %v9290_v50  ;;  %v10211_v46 = vsel %vm5062_vm11, %v27641_v40, %v9290_v50  ;;  %v15474_v6 = vld [vmem:[%s24463_s0 + $0x178] sm:$0xff] }
 0xa79   :  { %10275 = vst.msk [vmem:[#allocation2 + $0x158] sm:$0xff] %vm27642_vm13, %v10211_v46  ;;  %v5195_v58 = vsel %vm5062_vm11, %v5042_v10, 0.0  ;;  %v27657_v40 = vld [vmem:[#allocation51_spill] sm:$0xff]  ;;  %v27667_v10 = vld [vmem:[#allocation37_spill] sm:$0xff]  ;;  %vm27702_vm13 = vmmov %vm27514_vm0 }
 0xa7a   :  { %v9502_v4 = vmul.f32 %v9438_v52, %v9438_v52  ;;  %v4981_v27 = vsub.f32 %v15474_v6, %v27657_v40 }
 0xa7c   :  { %9673 = vrot.lane.b32.xlu1 %v9502_v4, %s15545_s27  ;;  %v5045_v30 = vmul.f32 %v4981_v27, %v4981_v27  ;;  %v27671_v27 = vld [vmem:[#allocation329_spill] sm:$0xff] }
 0xa85   :  { %5193 = vadd.xlane.f32.xlu0 %v5192_v25  ;;  %v5204_v25 = vsel %vm5062_vm11, %v5045_v30, 0.0  ;;  %v27672_v30 = vld [vmem:[#allocation54_spill] sm:$0xff] }
 0xa9b   :  { %9291 = vrot.lane.b32.xlu0 %v27643_v48, %s15544_s6  ;;  %v27659_v48 = vld [vmem:[#allocation251_spill] sm:$0xff] }
 0xaa8   :  { %v23773_v34 = vpop.xlane.xlu0 %5187 }
 0xaa9   :  { %27644 = vst [vmem:[#allocation183_spill] sm:$0xff] %v23773_v34 }
 0xaac   :  { %v23775_v2 = vpop.permute.xlu0 %9287 }
 0xaad   :  { %v10210_v19 = vsel %vm5062_vm11, %v27645_v36, %v23775_v2 }
 0xaae   :  { %10274 = vst.msk [vmem:[#allocation2 + $0x150] sm:$0xff] %vm27646_vm2, %v10210_v19  ;;  %vm27704_vm2 = vmmov %vm27514_vm0 }
 0xaba   :  { %5190 = vadd.xlane.f32.xlu0 %v5189_v1  ;;  %v23846_v1 = vld [vmem:[%s24463_s0 + $0x170] sm:$0xff] }
 0xad0   :  { %9297 = vrot.lane.b32.xlu0 %v27647_v47, %s15544_s6  ;;  %v4980_v47 = vsub.f32 %v23846_v1, %v27661_v45 }
 0xadd   :  { %v23791_v13 = vpop.xlane.xlu0 %5184 }
 0xade   :  { %27648 = vst [vmem:[#allocation130_spill] sm:$0xff] %v23791_v13 }
 0xae1   :  { %v9294_v35 = vpop.permute.xlu0 %9293 }
 0xae2   :  { %v9440_v22 = vsub.f32 %v15472_v49, %v9294_v35  ;;  %v10213_v20 = vsel %vm5062_vm11, %v27649_v54, %v9294_v35  ;;  %v5044_v35 = vmul.f32 %v4980_v47, %v4980_v47  ;;  %v27674_v47 = vld [vmem:[#allocation288_spill] sm:$0xff] }
 0xae3   :  { %10277 = vst.msk [vmem:[#allocation2 + $0x168] sm:$0xff] %vm27650_vm14, %v10213_v20  ;;  %vm27706_vm14 = vmmov %vm27514_vm0 }
 0xae4   :  { %v9504_v11 = vmul.f32 %v9440_v22, %v9440_v22  ;;  %v5201_v49 = vsel %vm5062_vm11, %v5044_v35, 0.0  ;;  %v27663_v22 = vld [vmem:[#allocation284_spill] sm:$0xff] }
 0xae6   :  { %9677 = vrot.lane.b32.xlu1 %v9504_v11, %s15545_s27  ;;  %v15476_v11 = vld [vmem:[%s24463_s0 + $0x188] sm:$0xff] }
 0xaef   :  { %5199 = vadd.xlane.f32.xlu0 %v5198_v33 }
 0xb05   :  { %9295 = vrot.lane.b32.xlu0 %v27651_v41, %s15544_s6 }
 0xb12   :  { %v23804_v18 = vpop.xlane.xlu0 %5193 }
 0xb13   :  { %27652 = vst [vmem:[#allocation169_spill] sm:$0xff] %v23804_v18 }
 0xb16   :  { %v23806_v31 = vpop.permute.xlu0 %9291 }
 0xb17   :  { %v10212_v3 = vsel %vm5062_vm11, %v27653_v60, %v23806_v31  ;;  %v4983_v60 = vsub.f32 %v15476_v11, %v27665_v14 }
 0xb18   :  { %10276 = vst.msk [vmem:[#allocation2 + $0x160] sm:$0xff] %vm27654_vm9, %v10212_v3  ;;  %vm27708_vm9 = vmmov %vm27514_vm0 }
 0xb19   :  { %v5047_v3 = vmul.f32 %v4983_v60, %v4983_v60  ;;  %v27679_v60 = vld [vmem:[#allocation15_spill] sm:$0xff] }
 0xb1b   :  { %v5210_v56 = vsel %vm5062_vm11, %v5047_v3, 0.0 }
 0xb24   :  { %5196 = vadd.xlane.f32.xlu0 %v5195_v58 }
 0xb3a   :  { %9301 = vrot.lane.b32.xlu0 %v27655_v42, %s15544_s6 }
 0xb47   :  { %v23822_v55 = vpop.xlane.xlu0 %5190 }
 0xb48   :  { %27656 = vst [vmem:[#allocation206_spill] sm:$0xff] %v23822_v55 }
 0xb4b   :  { %v9298_v50 = vpop.permute.xlu0 %9297 }
 0xb4c   :  { %v9442_v52 = vsub.f32 %v15474_v6, %v9298_v50  ;;  %v10215_v46 = vsel %vm5062_vm11, %v27657_v40, %v9298_v50  ;;  %v27669_v50 = vld [vmem:[#allocation249_spill] sm:$0xff] }
 0xb4d   :  { %10279 = vst.msk [vmem:[#allocation2 + $0x178] sm:$0xff] %vm27658_vm12, %v10215_v46  ;;  %vm27710_vm12 = vmmov %vm27514_vm0 }
 0xb4e   :  { %v9506_v4 = vmul.f32 %v9442_v52, %v9442_v52  ;;  %v15477_v52 = vld [vmem:[%s24463_s0 + $0x180] sm:$0xff] }
 0xb4f   :  { %v4982_v40 = vsub.f32 %v15477_v52, %v27669_v50 }
 0xb50   :  { %9681 = vrot.lane.b32.xlu1 %v9506_v4, %s15545_s27 }
 0xb51   :  { %v5046_v46 = vmul.f32 %v4982_v40, %v4982_v40  ;;  %v15480_v40 = vld [vmem:[%s24463_s0] sm:$0xff] }
 0xb53   :  { %v5207_v4 = vsel %vm5062_vm11, %v5046_v46, 0.0  ;;  %v27683_v46 = vld [vmem:[#allocation13_spill] sm:$0xff] }
 0xb59   :  { %5205 = vadd.xlane.f32.xlu0 %v5204_v25 }
 0xb6f   :  { %9299 = vrot.lane.b32.xlu0 %v27659_v48, %s15544_s6 }
 0xb7c   :  { %v23835_v36 = vpop.xlane.xlu0 %5199 }
 0xb7d   :  { %27660 = vst [vmem:[#allocation175_spill] sm:$0xff] %v23835_v36 }
 0xb80   :  { %v23837_v19 = vpop.permute.xlu0 %9295 }
 0xb81   :  { %v10214_v0 = vsel %vm5062_vm11, %v27661_v45, %v23837_v19  ;;  %v23885_v45 = vld [vmem:[%s24463_s0 + $0x198] sm:$0xff] }
 0xb82   :  { %10278 = vst.msk [vmem:[#allocation2 + $0x170] sm:$0xff] %vm27662_vm5, %v10214_v0  ;;  %vm27712_vm5 = vmmov %vm27514_vm0 }
 0xb8e   :  { %5202 = vadd.xlane.f32.xlu0 %v5201_v49 }
 0xba4   :  { %9305 = vrot.lane.b32.xlu0 %v27663_v22, %s15544_s6  ;;  %v15479_v22 = vld [vmem:[%s24463_s0 + $0x190] sm:$0xff] }
 0xbb1   :  { %v23853_v54 = vpop.xlane.xlu0 %5196 }
 0xbb2   :  { %27664 = vst [vmem:[#allocation201_spill] sm:$0xff] %v23853_v54 }
 0xbb5   :  { %v9302_v20 = vpop.permute.xlu0 %9301 }
 0xbb6   :  { %v9444_v38 = vsub.f32 %v15476_v11, %v9302_v20  ;;  %v10217_v33 = vsel %vm5062_vm11, %v27665_v14, %v9302_v20  ;;  %v27676_v20 = vld [vmem:[#allocation294_spill] sm:$0xff] }
 0xbb7   :  { %10281 = vst.msk [vmem:[#allocation2 + $0x188] sm:$0xff] %vm27666_vm10, %v10217_v33  ;;  %v4984_v11 = vsub.f32 %v15479_v22, %v27676_v20  ;;  %v27677_v33 = vld [vmem:[#allocation43_spill] sm:$0xff]  ;;  %vm11050_vm10 = vcmask 7168  }
 0xbb8   :  { %v9508_v41 = vmul.f32 %v9444_v38, %v9444_v38 }
 0xbb9   :  { %v5048_v38 = vmul.f32 %v4984_v11, %v4984_v11 }
 0xbba   :  { %9685 = vrot.lane.b32.xlu1 %v9508_v41, %s15545_s27  ;;  %v27678_v41 = vld [vmem:[#allocation48_spill] sm:$0xff] }
 0xbbb   :  { %v5213_v14 = vsel %vm5062_vm11, %v5048_v38, 0.0  ;;  %v9431_v38 = vsub.f32 %v23610_v24, %v23713_v63  ;;  %v9439_v63 = vsub.f32 %v23815_v39, %v23806_v31  ;;  %v23951_v31 = vld [vmem:[%s24463_s0 + $0x1a8] sm:$0xff] }
 0xbc3   :  { %5211 = vadd.xlane.f32.xlu0 %v5210_v56  ;;  %v27681_v56 = vld [vmem:[#allocation9_spill] sm:$0xff] }
 0xbd9   :  { %9303 = vrot.lane.b32.xlu0 %v27667_v10, %s15544_s6 }
 0xbe6   :  { %v23866_v58 = vpop.xlane.xlu0 %5205 }
 0xbe7   :  { %27668 = vst [vmem:[#allocation146_spill] sm:$0xff] %v23866_v58 }
 0xbea   :  { %v9300_v42 = vpop.permute.xlu0 %9299 }
 0xbeb   :  { %v10216_v6 = vsel %vm5062_vm11, %v27669_v50, %v9300_v42 }
 0xbec   :  { %10280 = vst.msk [vmem:[#allocation2 + $0x180] sm:$0xff] %vm27670_vm7, %v10216_v6  ;;  %v27682_v6 = vld [vmem:[#allocation20_spill] sm:$0xff] }
 0xbf8   :  { %5208 = vadd.xlane.f32.xlu0 %v5207_v4  ;;  %v9395_v4 = vsub.f32 %v15480_v40, %v27683_v46  ;;  %v27690_v40 = vld [vmem:[#allocation289_spill] sm:$0xff]  ;;  %v27692_v46 = vld [vmem:[#allocation36_spill] sm:$0xff] }
 0xc0e   :  { %9309 = vrot.lane.b32.xlu0 %v27671_v27, %s15544_s6  ;;  %v27684_v27 = vld [vmem:[#allocation21_spill] sm:$0xff] }
 0xc12   :  { %9307 = vrot.lane.b32.xlu0 %v27672_v30, %s15544_s6  ;;  %v9459_v30 = vmul.f32 %v9395_v4, %v9395_v4 }
 0xc1b   :  { %v23880_v25 = vpop.xlane.xlu0 %5202 }
 0xc1c   :  { %27673 = vst [vmem:[#allocation123_spill] sm:$0xff] %v23880_v25  ;;  %v9785_v25 = vsel %vm5062_vm11, %v23696_v51, 0.0  ;;  %v24074_v51 = vld [vmem:[%s24463_s0 + $0x1f8] sm:$0xff] }
 0xc1f   :  { %v9306_v48 = vpop.permute.xlu0 %9305 }
 0xc20   :  { %v9446_v0 = vsub.f32 %v23885_v45, %v9306_v48  ;;  %v10219_v35 = vsel %vm5062_vm11, %v27674_v47, %v9306_v48  ;;  %v27685_v48 = vld [vmem:[#allocation26_spill] sm:$0xff] }
 0xc21   :  { %10283 = vst.msk [vmem:[#allocation2 + $0x198] sm:$0xff] %vm27675_vm3, %v10219_v35  ;;  %v27687_v35 = vld [vmem:[#allocation164_spill] sm:$0xff] }
 0xc22   :  { %v9510_v49 = vmul.f32 %v9446_v0, %v9446_v0  ;;  %v27686_v0 = vld [vmem:[#allocation27_spill] sm:$0xff] }
 0xc24   :  { %9689 = vrot.lane.b32.xlu1 %v9510_v49, %s15545_s27  ;;  %v9428_v49 = vsub.f32 %v27687_v35, %v23520_v12 }
 0xc26   :  { %v9492_v11 = vmul.f32 %v9428_v49, %v9428_v49  ;;  %v27695_v49 = vld [vmem:[#allocation308_spill] sm:$0xff] }
 0xc31   :  { %5214 = vadd.xlane.f32.xlu0 %v5213_v14  ;;  %v9495_v14 = vmul.f32 %v9431_v38, %v9431_v38 }
 0xc47   :  { %9313 = vrot.lane.b32.xlu0 %v27677_v33, %s15544_s6  ;;  %v9433_v33 = vsub.f32 %v23687_v23, %v23732_v57  ;;  %v9503_v23 = vmul.f32 %v9439_v63, %v9439_v63  ;;  %v9441_v57 = vsub.f32 %v23846_v1, %v23837_v19 }
 0xc4b   :  { %9311 = vrot.lane.b32.xlu0 %v27678_v41, %s15544_s6  ;;  %v9497_v41 = vmul.f32 %v9433_v33, %v9433_v33 }
 0xc4f   :  { %9317 = vrot.lane.b32.xlu0 %v27679_v60, %s15544_s6  ;;  %v9435_v60 = vsub.f32 %v23745_v44, %v23756_v9  ;;  %v9505_v44 = vmul.f32 %v9441_v57, %v9441_v57  ;;  %v9443_v9 = vsub.f32 %v15477_v52, %v9300_v42 }
 0xc50   :  { %v23903_v3 = vpop.xlane.xlu0 %5211 }
 0xc51   :  { %27680 = vst [vmem:[#allocation193_spill] sm:$0xff] %v23903_v3  ;;  %v9499_v12 = vmul.f32 %v9435_v60, %v9435_v60 }
 0xc53   :  { %9315 = vrot.lane.b32.xlu0 %v27681_v56, %s15544_s6  ;;  %v9437_v56 = vsub.f32 %v23784_v8, %v23775_v2  ;;  %v9507_v2 = vmul.f32 %v9443_v9, %v9443_v9 }
 0xc54   :  { %v9304_v10 = vpop.permute.xlu0 %9303 }
 0xc55   :  { %v10218_v50 = vsel %vm5062_vm11, %v27676_v20, %v9304_v10  ;;  %v27688_v20 = vld [vmem:[#allocation105_spill] sm:$0xff]  ;;  %v9501_v24 = vmul.f32 %v9437_v56, %v9437_v56  ;;  %v9445_v8 = vsub.f32 %v15479_v22, %v9304_v10  ;;  %v23961_v22 = vld [vmem:[%s24463_s0 + $0x1a0] sm:$0xff] }
 0xc56   :  { %10282 = vst.msk [vmem:[#allocation2 + $0x190] sm:$0xff] %vm27514_vm0, %v10218_v50 }
 0xc57   :  { %9321 = vrot.lane.b32.xlu0 %v27682_v6, %s15544_s6  ;;  %v9509_v42 = vmul.f32 %v9445_v8, %v9445_v8 }
 0xc5b   :  { %9319 = vrot.lane.b32.xlu0 %v27684_v27, %s15544_s6 }
 0xc5f   :  { %9587 = vrot.lane.b32.xlu0 %v9459_v30, %s15545_s27 }
 0xc63   :  { %9325 = vrot.lane.b32.xlu0 %v27685_v48, %s15544_s6 }
 0xc67   :  { %9323 = vrot.lane.b32.xlu0 %v27686_v0, %s15544_s6  ;;  %v23975_v0 = vld [vmem:[%s24463_s0 + $0x1b8] sm:$0xff] }
 0xc6b   :  { %9327 = vrot.lane.b32.xlu0 %v27688_v20, %s15544_s6 }
 0xc6f   :  { %9653 = vrot.lane.b32.xlu0 %v9492_v11, %s15545_s27 }
 0xc73   :  { %9659 = vrot.lane.b32.xlu0 %v9495_v14, %s15545_s27  ;;  %v23984_v14 = vld [vmem:[%s24463_s0 + $0x1b0] sm:$0xff] }
 0xc77   :  { %9663 = vrot.lane.b32.xlu0 %v9497_v41, %s15545_s27  ;;  %v27697_v41 = vld [vmem:[#allocation285_spill] sm:$0xff] }
 0xc7b   :  { %9667 = vrot.lane.b32.xlu0 %v9499_v12, %s15545_s27 }
 0xc7f   :  { %9671 = vrot.lane.b32.xlu0 %v9501_v24, %s15545_s27  ;;  %v23994_v24 = vld [vmem:[%s24463_s0 + $0x1c8] sm:$0xff] }
 0xc83   :  { %9675 = vrot.lane.b32.xlu0 %v9503_v23, %s15545_s27  ;;  %v27699_v23 = vld [vmem:[#allocation55_spill] sm:$0xff] }
 0xc85   :  { %v23945_v50 = vpop.xlane.xlu0 %5208 }
 0xc86   :  { %27689 = vst [vmem:[#allocation135_spill] sm:$0xff] %v23945_v50 }
 0xc87   :  { %9679 = vrot.lane.b32.xlu0 %v9505_v44, %s15545_s27 }
 0xc89   :  { %v9310_v6 = vpop.permute.xlu0 %9309 }
 0xc8a   :  { %v9448_v39 = vsub.f32 %v23951_v31, %v9310_v6  ;;  %v10221_v19 = vsel %vm5062_vm11, %v27690_v40, %v9310_v6  ;;  %v27701_v6 = vld [vmem:[#allocation42_spill] sm:$0xff] }
 0xc8b   :  { %10285 = vst.msk [vmem:[#allocation2 + $0x1a8] sm:$0xff] %vm27691_vm15, %v10221_v19  ;;  %9683 = vrot.lane.b32.xlu0 %v9507_v2, %s15545_s27  ;;  %v24004_v2 = vld [vmem:[%s24463_s0 + $0x1c0] sm:$0xff] }
 0xc8c   :  { %v9512_v1 = vmul.f32 %v9448_v39, %v9448_v39 }
 0xc8d   :  { %v9308_v52 = vpop.permute.xlu0 %9307 }
 0xc8e   :  { %v9447_v10 = vsub.f32 %v23961_v22, %v9308_v52  ;;  %v10220_v4 = vsel %vm5062_vm11, %v27692_v46, %v9308_v52  ;;  %9693 = vrot.lane.b32.xlu1 %v9512_v1, %s15545_s27 }
 0xc8f   :  { %10284 = vst.msk [vmem:[#allocation2 + $0x1a0] sm:$0xff] %vm27693_vm1, %v10220_v4  ;;  %9687 = vrot.lane.b32.xlu0 %v9509_v42, %s15545_s27  ;;  %v27703_v42 = vld [vmem:[#allocation49_spill] sm:$0xff]  ;;  %v27705_v4 = vld [vmem:[#allocation14_spill] sm:$0xff] }
 0xc90   :  { %v9511_v27 = vmul.f32 %v9447_v10, %v9447_v10 }
 0xc93   :  { %9691 = vrot.lane.b32.xlu0 %v9511_v27, %s15545_s27 }
 0xcbe   :  { %v23970_v30 = vpop.xlane.xlu0 %5214 }
 0xcbf   :  { %27694 = vst [vmem:[#allocation162_spill] sm:$0xff] %v23970_v30 }
 0xcc2   :  { %v9314_v48 = vpop.permute.xlu0 %9313 }
 0xcc3   :  { %v9450_v35 = vsub.f32 %v23975_v0, %v9314_v48  ;;  %v10223_v20 = vsel %vm5062_vm11, %v27695_v49, %v9314_v48 }
 0xcc4   :  { %10287 = vst.msk [vmem:[#allocation2 + $0x1b8] sm:$0xff] %vm27696_vm4, %v10223_v20 }
 0xcc5   :  { %v9514_v11 = vmul.f32 %v9450_v35, %v9450_v35  ;;  %v9598_v35 = vpop.permute.xlu1 %9597 }
 0xcc6   :  { %v9312_v38 = vpop.permute.xlu0 %9311  ;;  %v9794_v26 = vsel %vm5062_vm11, %v9598_v35, 0.0 }
 0xcc7   :  { %v9449_v33 = vsub.f32 %v23984_v14, %v9312_v38  ;;  %v10222_v60 = vsel %vm5062_vm11, %v27697_v41, %v9312_v38  ;;  %9697 = vrot.lane.b32.xlu1 %v9514_v11, %s15545_s27  ;;  %v27707_v11 = vld [vmem:[#allocation10_spill] sm:$0xff] }
 0xcc8   :  { %10286 = vst.msk [vmem:[#allocation2 + $0x1b0] sm:$0xff] %vm27698_vm8, %v10222_v60 }
 0xcc9   :  { %v9513_v12 = vmul.f32 %v9449_v33, %v9449_v33  ;;  %v9596_v33 = vpop.permute.xlu1 %9595 }
 0xcca   :  { %v9318_v56 = vpop.permute.xlu0 %9317 }
 0xccb   :  { %v9452_v63 = vsub.f32 %v23994_v24, %v9318_v56  ;;  %v10225_v57 = vsel %vm5062_vm11, %v27699_v23, %v9318_v56  ;;  %9695 = vrot.lane.b32.xlu0 %v9513_v12, %s15545_s27  ;;  %v27709_v12 = vld [vmem:[#allocation12_spill] sm:$0xff] }
 0xccc   :  { %10289 = vst.msk [vmem:[#allocation2 + $0x1c8] sm:$0xff] %vm27700_vm6, %v10225_v57 }
 0xccd   :  { %v9516_v44 = vmul.f32 %v9452_v63, %v9452_v63  ;;  %v24026_v57 = vpop.permute.xlu1 %9601 }
 0xcce   :  { %v9316_v9 = vpop.permute.xlu0 %9315 }
 0xccf   :  { %v9451_v8 = vsub.f32 %v24004_v2, %v9316_v9  ;;  %v10224_v39 = vsel %vm5062_vm11, %v27701_v6, %v9316_v9  ;;  %9701 = vrot.lane.b32.xlu1 %v9516_v44, %s15545_s27  ;;  %v27711_v44 = vld [vmem:[#allocation19_spill] sm:$0xff] }
 0xcd0   :  { %10288 = vst.msk [vmem:[#allocation2 + $0x1c0] sm:$0xff] %vm27702_vm13, %v10224_v39 }
 0xcd1   :  { %v9515_v19 = vmul.f32 %v9451_v8, %v9451_v8  ;;  %v9600_v8 = vpop.permute.xlu1 %9599 }
 0xcd2   :  { %v9322_v1 = vpop.permute.xlu0 %9321 }
 0xcd3   :  { %v10227_v52 = vsel %vm5062_vm11, %v27703_v42, %v9322_v1  ;;  %9699 = vrot.lane.b32.xlu0 %v9515_v19, %s15545_s27  ;;  %v9782_v19 = vsel %vm5062_vm11, %v23680_v5, 0.0 }
 0xcd4   :  { %10291 = vst.msk [vmem:[#allocation2 + $0x1d8] sm:$0xff] %vm27704_vm2, %v10227_v52 }
 0xcd5   :  { %v24035_v52 = vpop.permute.xlu1 %9605 }
 0xcd6   :  { %v9320_v10 = vpop.permute.xlu0 %9319 }
 0xcd7   :  { %v10226_v27 = vsel %vm5062_vm11, %v27705_v4, %v9320_v10 }
 0xcd8   :  { %10290 = vst.msk [vmem:[#allocation2 + $0x1d0] sm:$0xff] %vm27706_vm14, %v10226_v27 }
 0xcd9   :  { %v9604_v27 = vpop.permute.xlu1 %9603 }
 0xcda   :  { %v9588_v48 = vpop.permute.xlu0 %9587 }
 0xcdb   :  { %v9779_v39 = vsel %vm5062_vm11, %v9588_v48, 0.0  ;;  %v24048_v48 = vld [vmem:[%s24463_s0 + $0x1d0] sm:$0xff] }
 0xcdc   :  { %v9453_v5 = vsub.f32 %v24048_v48, %v9320_v10  ;;  %v9788_v10 = vsel %vm5062_vm11, %v23691_v7, 0.0  ;;  %v9458_v7 = vsub.f32 %v24074_v51, %v23701_v16 }
 0xcdd   :  { %v24043_v30 = vpop.permute.xlu1 %9609 }
 0xcde   :  { %v9326_v20 = vpop.permute.xlu0 %9325 }
 0xcdf   :  { %v10229_v38 = vsel %vm5062_vm11, %v27707_v11, %v9326_v20 }
 0xce0   :  { %10293 = vst.msk [vmem:[#allocation2 + $0x1e8] sm:$0xff] %vm27708_vm9, %v10229_v38  ;;  %v24040_v38 = vld [vmem:[%s24463_s0 + $0x1d8] sm:$0xff] }
 0xce2   :  { %v9324_v60 = vpop.permute.xlu0 %9323 }
 0xce3   :  { %v10228_v56 = vsel %vm5062_vm11, %v27709_v12, %v9324_v60 }
 0xce4   :  { %10292 = vst.msk [vmem:[#allocation2 + $0x1e0] sm:$0xff] %vm27710_vm12, %v10228_v56  ;;  %v9454_v56 = vsub.f32 %v24040_v38, %v9322_v1 }
 0xce6   :  { %v24024_v63 = vpop.permute.xlu0 %9327 }
 0xce7   :  { %v10230_v9 = vsel %vm5062_vm11, %v27711_v44, %v24024_v63 }
 0xce8   :  { %10294 = vst.msk [vmem:[#allocation2 + $0x1f0] sm:$0xff] %vm27712_vm5, %v10230_v9  ;;  %v9518_v9 = vmul.f32 %v9454_v56, %v9454_v56 }
 0xcf2   :  { %9780 = vadd.xlane.f32.xlu0 %v9779_v39  ;;  %v9608_v39 = vpop.permute.xlu1 %9607 }
 0xcf3   :  { %9783 = vadd.xlane.f32.xlu1 %v9782_v19  ;;  %v9517_v19 = vmul.f32 %v9453_v5, %v9453_v5  ;;  %v9809_v35 = vsel %vm5062_vm11, %v9608_v39, 0.0 }
 0xcf6   :  { %v24053_v3 = vpop.permute.xlu1 %9613 }
 0xcfa   :  { %v9612_v50 = vpop.permute.xlu1 %9611 }
 0xcfe   :  { %v24055_v1 = vpop.permute.xlu1 %9617 }
 0xd02   :  { %v9616_v58 = vpop.permute.xlu1 %9615 }
 0xd04   :  { %9705 = vrot.lane.b32.xlu1 %v9518_v9, %s15545_s27 }
 0xd06   :  { %v24057_v56 = vpop.permute.xlu1 %9621 }
 0xd08   :  { %9703 = vrot.lane.b32.xlu0 %v9517_v19, %s15545_s27  ;;  %v24068_v19 = vld [vmem:[%s24463_s0 + $0x1e8] sm:$0xff] }
 0xd09   :  { %v9456_v36 = vsub.f32 %v24068_v19, %v9326_v20  ;;  %v9522_v20 = vmul.f32 %v9458_v7, %v9458_v7  ;;  %v9791_v7 = vsel %vm5062_vm11, %v9596_v33, 0.0 }
 0xd0a   :  { %v9620_v9 = vpop.permute.xlu1 %9619 }
 0xd0e   :  { %v24063_v5 = vpop.permute.xlu1 %9625 }
 0xd12   :  { %v9624_v54 = vpop.permute.xlu1 %9623 }
 0xd16   :  { %v24085_v55 = vpop.permute.xlu1 %9629 }
 0xd1a   :  { %v9628_v13 = vpop.permute.xlu1 %9627 }
 0xd1b   :  { %v9839_v39 = vsel %vm5062_vm11, %v9628_v13, 0.0  ;;  %v9800_v13 = vsel %vm5062_vm11, %v24026_v57, 0.0 }
 0xd1e   :  { %v24089_v16 = vpop.permute.xlu1 %9633 }
 0xd27   :  { %9786 = vadd.xlane.f32.xlu0 %v9785_v25  ;;  %v9520_v25 = vmul.f32 %v9456_v36, %v9456_v36  ;;  %v9632_v36 = vpop.permute.xlu1 %9631 }
 0xd28   :  { %9789 = vadd.xlane.f32.xlu1 %v9788_v10  ;;  %v24081_v10 = vld [vmem:[%s24463_s0 + $0x1e0] sm:$0xff]  ;;  %s15546_s0 = smov [#allocation2]  }
 0xd29   :  { %v9455_v18 = vsub.f32 %v24081_v10, %v9324_v60 }
 0xd2b   :  { %v9519_v34 = vmul.f32 %v9455_v18, %v9455_v18  ;;  %v24091_v43 = vpop.permute.xlu1 %9637  ;;  %v9797_v18 = vsel %vm5062_vm11, %v9600_v8, 0.0  ;;  %v9815_v8 = vsel %vm5062_vm11, %v9612_v50, 0.0 }
 0xd2f   :  { %v9636_v37 = vpop.permute.xlu1 %9635 }
 0xd33   :  { %v24094_v60 = vpop.permute.xlu1 %9641 }
 0xd39   :  { %9709 = vrot.lane.b32.xlu1 %v9520_v25, %s15545_s27  ;;  %v9640_v25 = vpop.permute.xlu1 %9639 }
 0xd3d   :  { %9713 = vrot.lane.b32.xlu1 %v9522_v20, %s15545_s27  ;;  %9707 = vrot.lane.b32.xlu0 %v9519_v34, %s15545_s27  ;;  %v9803_v34 = vsel %vm5062_vm11, %v9604_v27, 0.0  ;;  %v24099_v20 = vpop.permute.xlu1 %9645  ;;  %v9821_v27 = vsel %vm5062_vm11, %v9616_v58, 0.0 }
 0xd5c   :  { %9795 = vadd.xlane.f32.xlu0 %v9794_v26  ;;  %v9457_v26 = vsub.f32 %v24104_v61, %v24024_v63  ;;  %v9833_v63 = vsel %vm5062_vm11, %v9624_v54, 0.0 }
 0xd5e   :  { %v9521_v33 = vmul.f32 %v9457_v26, %v9457_v26  ;;  %v9845_v26 = vsel %vm5062_vm11, %v9632_v36, 0.0 }
 0xd61   :  { %9792 = vadd.xlane.f32.xlu1 %v9791_v7  ;;  %v9644_v7 = vpop.permute.xlu1 %9643 }
 0xd62   :  { %v9863_v54 = vsel %vm5062_vm11, %v9644_v7, 0.0  ;;  %v9812_v7 = vsel %vm5062_vm11, %v24043_v30, 0.0 }
 0xd65   :  { %9798 = vadd.xlane.f32.xlu1 %v9797_v18  ;;  %v24112_v18 = vpop.permute.xlu1 %9649 }
 0xd69   :  { %9804 = vadd.xlane.f32.xlu1 %v9803_v34  ;;  %v9827_v34 = vsel %vm5062_vm11, %v9620_v9, 0.0  ;;  %v9648_v62 = vpop.permute.xlu1 %9647 }
 0xd6a   :  { %v9869_v36 = vsel %vm5062_vm11, %v9648_v62, 0.0 }
 0xd6d   :  { %9810 = vadd.xlane.f32.xlu1 %v9809_v35  ;;  %v9652_v50 = vpop.permute.xlu1 %9651  ;;  %v9851_v35 = vsel %vm5062_vm11, %v9636_v37, 0.0  ;;  %v9806_v37 = vsel %vm5062_vm11, %v24035_v52, 0.0  ;;  %v9818_v52 = vsel %vm5062_vm11, %v24053_v3, 0.0  ;;  %v9836_v3 = vsel %vm5062_vm11, %v24063_v5, 0.0 }
 0xd71   :  { %9816 = vadd.xlane.f32.xlu1 %v9815_v8  ;;  %v24119_v58 = vpop.permute.xlu1 %9657  ;;  %v24122_v8 = vpop.permute.xlu0 %9653 }
 0xd72   :  { %9711 = vrot.lane.b32.xlu0 %v9521_v33, %s15545_s27  ;;  %v9857_v33 = vsel %vm5062_vm11, %v9640_v25, 0.0  ;;  %v9875_v25 = vsel %vm5062_vm11, %v9652_v50, 0.0  ;;  %v9824_v50 = vsel %vm5062_vm11, %v24055_v1, 0.0  ;;  %s11206_s27 = sshll.u32 %s15546_s0, 4  ;;  %s11207_s27 = int_to_ptr.vmem [resolvable:$true] %s11206_s27 }
 0xd73   :  { %s15493_s30 = scalar_lea.vmem %s11207_s27, 8192  ;;  %p15498_p1 = scmp.lt.s32.totalorder %s11207_s27, %s11207_s27 }
 0xd74   :  { %p15494_p0 = scmp.ne.s32.totalorder %s11207_s27, %s15493_s30  ;;  %p15499_p2 = scmp.lt.s32.totalorder %s15493_s30, %s15493_s30 }
 0xd75   :  { %9822 = vadd.xlane.f32.xlu1 %v9821_v27  ;;  %v9656_v9 = vpop.permute.xlu1 %9655 }
 0xd76   :  { %v9881_v62 = vsel %vm5062_vm11, %v9656_v9, 0.0  ;;  %p15500_p3 = por %p15499_p2, %p15498_p1 }
 0xd78   :  { %p15501_p4 = pnand %p15500_p3, %p15494_p0 }
 0xd79   :  { %9828 = vadd.xlane.f32.xlu1 %v9827_v34  ;;  %v24130_v27 = vpop.permute.xlu1 %9661  ;;  %v24132_v34 = vpop.permute.xlu0 %9659 }
 0xd7d   :  { %9834 = vadd.xlane.f32.xlu1 %v9833_v63  ;;  %v24137_v63 = vpop.permute.xlu1 %9665  ;;  %v24139_v57 = vpop.permute.xlu0 %9663 }
 0xd81   :  { %9840 = vadd.xlane.f32.xlu1 %v9839_v39  ;;  %v9670_v39 = vpop.permute.xlu1 %9669  ;;  %v9668_v30 = vpop.permute.xlu0 %9667 }
 0xd85   :  { %9846 = vadd.xlane.f32.xlu1 %v9845_v26  ;;  %v9902_v26 = vsel %vm5062_vm11, %v9670_v39, 0.0  ;;  %v9674_v9 = vpop.permute.xlu1 %9673 }
 0xd89   :  { %9852 = vadd.xlane.f32.xlu1 %v9851_v35  ;;  %v9899_v35 = vsel %vm5062_vm11, %v9668_v30, 0.0 }
 0xd8d   :  { %9858 = vadd.xlane.f32.xlu1 %v9857_v33  ;;  %v9830_v33 = vsel %vm5062_vm11, %v24057_v56, 0.0  ;;  %v9848_v56 = vsel %vm5062_vm11, %v24089_v16, 0.0 }
 0xd91   :  { %9864 = vadd.xlane.f32.xlu1 %v9863_v54  ;;  %9801 = vadd.xlane.f32.xlu0 %v9800_v13  ;;  %v9908_v54 = vsel %vm5062_vm11, %v9674_v9, 0.0  ;;  %v9672_v13 = vpop.permute.xlu0 %9671 }
 0xd92   :  { %v9905_v1 = vsel %vm5062_vm11, %v9672_v13, 0.0  ;;  %v9884_v13 = vsel %vm5062_vm11, %v24119_v58, 0.0 }
 0xd95   :  { %9870 = vadd.xlane.f32.xlu1 %v9869_v36  ;;  %9807 = vadd.xlane.f32.xlu0 %v9806_v37  ;;  %v9842_v36 = vsel %vm5062_vm11, %v24085_v55, 0.0  ;;  %v9678_v37 = vpop.permute.xlu1 %9677  ;;  %v9860_v55 = vsel %vm5062_vm11, %v24094_v60, 0.0 }
 0xd99   :  { %9876 = vadd.xlane.f32.xlu1 %v9875_v25  ;;  %9813 = vadd.xlane.f32.xlu0 %v9812_v7  ;;  %v9914_v25 = vsel %vm5062_vm11, %v9678_v37, 0.0  ;;  %v9676_v7 = vpop.permute.xlu0 %9675  ;;  %v9890_v37 = vsel %vm5062_vm11, %v24130_v27, 0.0  ;;  %v9896_v27 = vsel %vm5062_vm11, %v24137_v63, 0.0  ;;  %v4987_v63 = vsub.f32 %v23951_v31, %v27690_v40 }
 0xd9a   :  { %v9911_v5 = vsel %vm5062_vm11, %v9676_v7, 0.0  ;;  %v9887_v7 = vsel %vm5062_vm11, %v24132_v34, 0.0  ;;  %v4986_v34 = vsub.f32 %v23961_v22, %v27692_v46  ;;  %v4989_v31 = vsub.f32 %v23975_v0, %v27695_v49 }
 0xd9b   :  { %v5051_v46 = vmul.f32 %v4987_v63, %v4987_v63 }
 0xd9d   :  { %9882 = vadd.xlane.f32.xlu1 %v9881_v62  ;;  %9819 = vadd.xlane.f32.xlu0 %v9818_v52  ;;  %v9854_v62 = vsel %vm5062_vm11, %v24091_v43, 0.0  ;;  %v9682_v52 = vpop.permute.xlu1 %9681  ;;  %v9872_v43 = vsel %vm5062_vm11, %v24112_v18, 0.0 }
 0xd9e   :  { %v9920_v39 = vsel %vm5062_vm11, %v9682_v52, 0.0 }
 0xda1   :  { %9903 = vadd.xlane.f32.xlu1 %v9902_v26  ;;  %9825 = vadd.xlane.f32.xlu0 %v9824_v50  ;;  %v9680_v26 = vpop.permute.xlu0 %9679  ;;  %v9866_v50 = vsel %vm5062_vm11, %v24099_v20, 0.0  ;;  %v9686_v30 = vpop.permute.xlu1 %9685 }
 0xda2   :  { %v9917_v16 = vsel %vm5062_vm11, %v9680_v26, 0.0  ;;  %v9893_v26 = vsel %vm5062_vm11, %v24139_v57, 0.0  ;;  %v4988_v57 = vsub.f32 %v23984_v14, %v27697_v41  ;;  %v5053_v14 = vmul.f32 %v4989_v31, %v4989_v31 }
 0xda3   :  { %v4990_v41 = vsub.f32 %v24004_v2, %v27701_v6 }
 0xda4   :  { %v5052_v40 = vmul.f32 %v4988_v57, %v4988_v57 }
 0xda5   :  { %9831 = vadd.xlane.f32.xlu0 %v9830_v33  ;;  %9900 = vadd.xlane.f32.xlu1 %v9899_v35  ;;  %v9926_v35 = vsel %vm5062_vm11, %v9686_v30, 0.0  ;;  %v9684_v33 = vpop.permute.xlu0 %9683  ;;  %v9690_v60 = vpop.permute.xlu1 %9689 }
 0xda6   :  { %v9923_v9 = vsel %vm5062_vm11, %v9684_v33, 0.0  ;;  %v9932_v20 = vsel %vm5062_vm11, %v9690_v60, 0.0 }
 0xda9   :  { %9837 = vadd.xlane.f32.xlu0 %v9836_v3  ;;  %9909 = vadd.xlane.f32.xlu1 %v9908_v54  ;;  %v9878_v3 = vsel %vm5062_vm11, %v24122_v8, 0.0  ;;  %v9694_v54 = vpop.permute.xlu1 %9693  ;;  %v9688_v18 = vpop.permute.xlu0 %9687 }
 0xdad   :  { %9843 = vadd.xlane.f32.xlu0 %v9842_v36  ;;  %9906 = vadd.xlane.f32.xlu1 %v9905_v1  ;;  %v9929_v1 = vsel %vm5062_vm11, %v9688_v18, 0.0  ;;  %v9698_v36 = vpop.permute.xlu1 %9697  ;;  %v9692_v8 = vpop.permute.xlu0 %9691  ;;  %v5225_v18 = vsel %vm5062_vm11, %v5052_v40, 0.0 }
 0xdb1   :  { %9849 = vadd.xlane.f32.xlu0 %v9848_v56  ;;  %9915 = vadd.xlane.f32.xlu1 %v9914_v25  ;;  %v9938_v56 = vsel %vm5062_vm11, %v9694_v54, 0.0  ;;  %v9702_v25 = vpop.permute.xlu1 %9701  ;;  %v9696_v58 = vpop.permute.xlu0 %9695 }
 0xdb2   :  { %v9941_v30 = vsel %vm5062_vm11, %v9696_v58, 0.0 }
 0xdb5   :  { %9855 = vadd.xlane.f32.xlu0 %v9854_v62  ;;  %9912 = vadd.xlane.f32.xlu1 %v9911_v5  ;;  %v4985_v5 = vsub.f32 %v23885_v45, %v27674_v47  ;;  %v9935_v62 = vsel %vm5062_vm11, %v9692_v8, 0.0  ;;  %v24186_v52 = vpop.xlane.xlu1 %9783  ;;  %v5228_v8 = vsel %vm5062_vm11, %v5053_v14, 0.0 }
 0xdb9   :  { %9861 = vadd.xlane.f32.xlu0 %v9860_v55  ;;  %9921 = vadd.xlane.f32.xlu1 %v9920_v39  ;;  %v9700_v55 = vpop.permute.xlu0 %9699  ;;  %v5049_v39 = vmul.f32 %v4985_v5, %v4985_v5  ;;  %v9706_v45 = vpop.permute.xlu1 %9705 }
 0xdbd   :  { %9867 = vadd.xlane.f32.xlu0 %v9866_v50  ;;  %9918 = vadd.xlane.f32.xlu1 %v9917_v16  ;;  %v9944_v16 = vsel %vm5062_vm11, %v9698_v36, 0.0  ;;  %v24195_v47 = vpop.xlane.xlu0 %9780  ;;  %v5050_v50 = vmul.f32 %v4986_v34, %v4986_v34  ;;  %v24201_v22 = vpop.xlane.xlu1 %9789  ;;  %v5054_v36 = vmul.f32 %v4990_v41, %v4990_v41  ;;  %v27716_v41 = vld [vmem:[#allocation98_spill] sm:$0xff] }
 0xdbf   :  { %v5219_v33 = vsel %vm5062_vm11, %v5050_v50, 0.0  ;;  %v5231_v58 = vsel %vm5062_vm11, %v5054_v36, 0.0 }
 0xdc1   :  { %9873 = vadd.xlane.f32.xlu0 %v9872_v43  ;;  %9927 = vadd.xlane.f32.xlu1 %v9926_v35  ;;  %v5216_v43 = vsel %vm5062_vm11, %v5049_v39, 0.0  ;;  %v9950_v35 = vsel %vm5062_vm11, %v9702_v25, 0.0  ;;  %v9704_v60 = vpop.permute.xlu0 %9703  ;;  %v4992_v25 = vsub.f32 %v24048_v48, %v27705_v4  ;;  %v4994_v48 = vsub.f32 %v24081_v10, %v27709_v12 }
 0xdc2   :  { %v4996_v12 = vsub.f32 %v24104_v61, %v27711_v44  ;;  %v27714_v61 = vld [vmem:[#allocation112_spill] sm:$0xff] }
 0xdc3   :  { %v5056_v5 = vmul.f32 %v4992_v25, %v4992_v25  ;;  %v9972_v44 = vadd.f32 %v24186_v52, %v27714_v61  ;;  %v9974_v52 = vadd.f32 %v24201_v22, %v27716_v41  ;;  %v27726_v41 = vld [vmem:[#allocation210_spill] sm:$0xff] }
 0xdc5   :  { %9879 = vadd.xlane.f32.xlu0 %v9878_v3  ;;  %9924 = vadd.xlane.f32.xlu1 %v9923_v9  ;;  %v9947_v9 = vsel %vm5062_vm11, %v9700_v55, 0.0  ;;  %v9710_v3 = vpop.permute.xlu1 %9709  ;;  %v24211_v54 = vpop.xlane.xlu0 %9786 }
 0xdc9   :  { %9885 = vadd.xlane.f32.xlu0 %v9884_v13  ;;  %9933 = vadd.xlane.f32.xlu1 %v9932_v20  ;;  %v5222_v20 = vsel %vm5062_vm11, %v5051_v46, 0.0  ;;  %v9956_v13 = vsel %vm5062_vm11, %v9706_v45, 0.0  ;;  %v9714_v0 = vpop.permute.xlu1 %9713  ;;  %v9708_v49 = vpop.permute.xlu0 %9707  ;;  %v4997_v46 = vsub.f32 %v24074_v51, %v27626_v29  ;;  %v27715_v29 = vld [vmem:[#allocation122_spill] sm:$0xff] }
 0xdca   :  { %v9968_v45 = vsel %vm5062_vm11, %v9714_v0, 0.0  ;;  %v9973_v51 = vadd.f32 %v24211_v54, %v27715_v29  ;;  %v11056_v54 = vsel %vm11050_vm10, %v9974_v52, 0.0 }
 0xdcd   :  { %9891 = vadd.xlane.f32.xlu0 %v9890_v37  ;;  %9930 = vadd.xlane.f32.xlu1 %v9929_v1  ;;  %v4991_v1 = vsub.f32 %v23994_v24, %v27699_v23  ;;  %v9953_v37 = vsel %vm5062_vm11, %v9704_v60, 0.0  ;;  %v4993_v23 = vsub.f32 %v24040_v38, %v27703_v42  ;;  %v4995_v38 = vsub.f32 %v24068_v19, %v27707_v11  ;;  %v27713_v60 = vld [vmem:[#allocation88_spill] sm:$0xff] }
 0xdce   :  { %v5060_v11 = vmul.f32 %v4996_v12, %v4996_v12  ;;  %v9971_v31 = vadd.f32 %v24195_v47, %v27713_v60  ;;  %v11054_v47 = vsel %vm11050_vm10, %v9973_v51, 0.0 }
 0xdcf   :  { %v5055_v6 = vmul.f32 %v4991_v1, %v4991_v1  ;;  %v5057_v4 = vmul.f32 %v4993_v23, %v4993_v23 }
 0xdd1   :  { %9888 = vadd.xlane.f32.xlu0 %v9887_v7  ;;  %9939 = vadd.xlane.f32.xlu1 %v9938_v56  ;;  %v9962_v7 = vsel %vm5062_vm11, %v9710_v3, 0.0  ;;  %v5240_v63 = vsel %vm5062_vm11, %v5057_v4, 0.0  ;;  %v11051_v3 = vsel %vm11050_vm10, %v9971_v31, 0.0  ;;  %v27720_v4 = vld [vmem:[#allocation163_spill] sm:$0xff]  ;;  %v27724_v31 = vld [vmem:[#allocation218_spill] sm:$0xff] }
 0xdd5   :  { %9897 = vadd.xlane.f32.xlu0 %v9896_v27  ;;  %9936 = vadd.xlane.f32.xlu1 %v9935_v62  ;;  %v9959_v62 = vsel %vm5062_vm11, %v9708_v49, 0.0  ;;  %v5234_v27 = vsel %vm5062_vm11, %v5055_v6, 0.0  ;;  %v27718_v6 = vld [vmem:[#allocation142_spill] sm:$0xff] }
 0xdd9   :  { %9894 = vadd.xlane.f32.xlu0 %v9893_v26  ;;  %9945 = vadd.xlane.f32.xlu1 %v9944_v16  ;;  %v5237_v26 = vsel %vm5062_vm11, %v5056_v5, 0.0  ;;  %v5058_v16 = vmul.f32 %v4994_v48, %v4994_v48 }
 0xddb   :  { %v5243_v10 = vsel %vm5062_vm11, %v5058_v16, 0.0 }
 0xddd   :  { %5217 = vadd.xlane.f32.xlu0 %v5216_v43  ;;  %9942 = vadd.xlane.f32.xlu1 %v9941_v30  ;;  %v5059_v30 = vmul.f32 %v4995_v38, %v4995_v38 }
 0xddf   :  { %v5246_v19 = vsel %vm5062_vm11, %v5059_v30, 0.0  ;;  %v27722_v30 = vld [vmem:[#allocation118_spill] sm:$0xff] }
 0xde1   :  { %5220 = vadd.xlane.f32.xlu0 %v5219_v33  ;;  %9951 = vadd.xlane.f32.xlu1 %v9950_v35  ;;  %v5061_v35 = vmul.f32 %v4997_v46, %v4997_v46  ;;  %v5249_v33 = vsel %vm5062_vm11, %v5060_v11, 0.0 }
 0xde5   :  { %5223 = vadd.xlane.f32.xlu0 %v5222_v20  ;;  %9948 = vadd.xlane.f32.xlu1 %v9947_v9  ;;  %v5252_v9 = vsel %vm5062_vm11, %v5061_v35, 0.0  ;;  %v11052_v20 = vsel %vm11050_vm10, %v9972_v44, 0.0  ;;  %v27725_v44 = vld [vmem:[#allocation152_spill] sm:$0xff] }
 0xde9   :  { %5226 = vadd.xlane.f32.xlu0 %v5225_v18  ;;  %9957 = vadd.xlane.f32.xlu1 %v9956_v13  ;;  %v24221_v2 = vpop.xlane.xlu0 %9795  ;;  %v11053_v13 = vadd.f32 %v11052_v20, %v11051_v3  ;;  %v27717_v18 = vld [vmem:[#allocation137_spill] sm:$0xff] }
 0xdea   :  { %v9976_v25 = vadd.f32 %v24221_v2, %v27718_v6  ;;  %v27728_v6 = vld [vmem:[#allocation182_spill] sm:$0xff] }
 0xdeb   :  { %v11055_v49 = vadd.f32 %v11054_v47, %v11053_v13  ;;  %v27727_v13 = vld [vmem:[#allocation257_spill] sm:$0xff] }
 0xded   :  { %5229 = vadd.xlane.f32.xlu0 %v5228_v8  ;;  %9954 = vadd.xlane.f32.xlu1 %v9953_v37  ;;  %v9712_v55 = vpop.permute.xlu0 %9711  ;;  %v11057_v37 = vadd.f32 %v11056_v54, %v11055_v49 }
 0xdee   :  { %v9793_v56 = vpop.xlane.xlu1 %9792  ;;  %v9965_v34 = vsel %vm5062_vm11, %v9712_v55, 0.0  ;;  %vm66_vm11 = vcmask 0  }
 0xdef   :  { %v9975_v0 = vadd.f32 %v9793_v56, %v27717_v18  ;;  %v11060_v56 = vsel %vm11050_vm10, %v9976_v25, 0.0 }
 0xdf1   :  { %5232 = vadd.xlane.f32.xlu0 %v5231_v58  ;;  %9963 = vadd.xlane.f32.xlu1 %v9962_v7  ;;  %v11058_v36 = vsel %vm11050_vm10, %v9975_v0, 0.0  ;;  %v27719_v58 = vld [vmem:[#allocation117_spill] sm:$0xff] }
 0xdf2   :  { %v9799_v24 = vpop.xlane.xlu1 %9798  ;;  %v11059_v7 = vadd.f32 %v11058_v36, %v11057_v37 }
 0xdf3   :  { %v9977_v23 = vadd.f32 %v9799_v24, %v27719_v58 }
 0xdf4   :  { %v11061_v5 = vadd.f32 %v11060_v56, %v11059_v7  ;;  %v27729_v7 = vld [vmem:[#allocation148_spill] sm:$0xff] }
 0xdf5   :  { %5235 = vadd.xlane.f32.xlu0 %v5234_v27  ;;  %9960 = vadd.xlane.f32.xlu1 %v9959_v62  ;;  %v11062_v62 = vsel %vm11050_vm10, %v9977_v23, 0.0 }
 0xdf6   :  { %v9805_v39 = vpop.xlane.xlu1 %9804  ;;  %v11063_v38 = vadd.f32 %v11062_v62, %v11061_v5 }
 0xdf7   :  { %v9979_v48 = vadd.f32 %v9805_v39, %v27720_v4  ;;  %v27730_v4 = vld [vmem:[#allocation159_spill] sm:$0xff] }
 0xdf9   :  { %5238 = vadd.xlane.f32.xlu0 %v5237_v26  ;;  %9966 = vadd.xlane.f32.xlu1 %v9965_v34  ;;  %v27721_v34 = vld [vmem:[#allocation106_spill] sm:$0xff] }
 0xdfa   :  { %v9811_v42 = vpop.xlane.xlu1 %9810 }
 0xdfb   :  { %v9981_v12 = vadd.f32 %v9811_v42, %v27722_v30  ;;  %v27732_v30 = vld [vmem:[#allocation196_spill] sm:$0xff] }
 0xdfd   :  { %5241 = vadd.xlane.f32.xlu0 %v5240_v63  ;;  %9969 = vadd.xlane.f32.xlu1 %v9968_v45  ;;  %v11066_v63 = vsel %vm11050_vm10, %v9979_v48, 0.0  ;;  %v11070_v60 = vsel %vm11050_vm10, %v9981_v12, 0.0 }
 0xdfe   :  { %v9817_v50 = vpop.xlane.xlu1 %9816 }
 0xdff   :  { %v9983_v61 = vadd.f32 %v9817_v50, %v27724_v31  ;;  %v27734_v31 = vld [vmem:[#allocation241_spill] sm:$0xff] }
 0xe01   :  { %5244 = vadd.xlane.f32.xlu0 %v5243_v10  ;;  %v27723_v10 = vld [vmem:[#allocation170_spill] sm:$0xff]  ;;  %v11074_v47 = vsel %vm11050_vm10, %v9983_v61, 0.0 }
 0xe02   :  { %v9823_v43 = vpop.xlane.xlu1 %9822 }
 0xe03   :  { %v9985_v52 = vadd.f32 %v9823_v43, %v27726_v41  ;;  %v27736_v41 = vld [vmem:[#allocation344_spill] sm:$0xff] }
 0xe05   :  { %5247 = vadd.xlane.f32.xlu0 %v5246_v19  ;;  %v11078_v37 = vsel %vm11050_vm10, %v9985_v52, 0.0 }
 0xe06   :  { %v24245_v57 = vpop.xlane.xlu1 %9828 }
 0xe07   :  { %v9987_v25 = vadd.f32 %v24245_v57, %v27728_v6  ;;  %v27738_v6 = vld [vmem:[#allocation184_spill] sm:$0xff] }
 0xe09   :  { %5250 = vadd.xlane.f32.xlu0 %v5249_v33 }
 0xe0a   :  { %v24252_v40 = vpop.xlane.xlu1 %9834 }
 0xe0b   :  { %v9989_v48 = vadd.f32 %v24252_v40, %v27730_v4 }
 0xe0d   :  { %5253 = vadd.xlane.f32.xlu0 %v5252_v9 }
 0xe0e   :  { %v24259_v14 = vpop.xlane.xlu1 %9840 }
 0xe0f   :  { %v9991_v12 = vadd.f32 %v24259_v14, %v27732_v30 }
 0xe12   :  { %v24265_v1 = vpop.xlane.xlu1 %9846 }
 0xe13   :  { %v9993_v61 = vadd.f32 %v24265_v1, %v27734_v31 }
 0xe16   :  { %v24269_v8 = vpop.xlane.xlu1 %9852 }
 0xe17   :  { %v9995_v52 = vadd.f32 %v24269_v8, %v27736_v41 }
 0xe1a   :  { %v24274_v22 = vpop.xlane.xlu1 %9858 }
 0xe1e   :  { %v24278_v27 = vpop.xlane.xlu1 %9864  ;;  %v9802_v55 = vpop.xlane.xlu0 %9801 }
 0xe1f   :  { %v9978_v26 = vadd.f32 %v9802_v55, %v27721_v34  ;;  %v11082_v55 = vsel %vm11050_vm10, %v9987_v25, 0.0  ;;  %v27731_v34 = vld [vmem:[#allocation171_spill] sm:$0xff]  ;;  %v9997_v25 = vadd.f32 %v24274_v22, %v27738_v6  ;;  %v9999_v4 = vadd.f32 %v24278_v27, %v23515_v28 }
 0xe21   :  { %v11064_v2 = vsel %vm11050_vm10, %v9978_v26, 0.0 }
 0xe22   :  { %v11065_v16 = vadd.f32 %v11064_v2, %v11063_v38  ;;  %v24283_v45 = vpop.xlane.xlu1 %9870  ;;  %v9808_v24 = vpop.xlane.xlu0 %9807 }
 0xe23   :  { %v9980_v46 = vadd.f32 %v9808_v24, %v27723_v10  ;;  %v27733_v10 = vld [vmem:[#allocation185_spill] sm:$0xff] }
 0xe24   :  { %v11067_v11 = vadd.f32 %v11066_v63, %v11065_v16  ;;  %v11086_v63 = vsel %vm11050_vm10, %v9989_v48, 0.0  ;;  %v27740_v48 = vld [vmem:[#allocation38_spill] sm:$0xff] }
 0xe25   :  { %v11068_v19 = vsel %vm11050_vm10, %v9980_v46, 0.0 }
 0xe26   :  { %v11069_v35 = vadd.f32 %v11068_v19, %v11067_v11  ;;  %v24289_v39 = vpop.xlane.xlu1 %9876  ;;  %v9814_v33 = vpop.xlane.xlu0 %9813 }
 0xe27   :  { %v9982_v29 = vadd.f32 %v9814_v33, %v27725_v44  ;;  %v27735_v44 = vld [vmem:[#allocation222_spill] sm:$0xff] }
 0xe28   :  { %v11071_v51 = vadd.f32 %v11070_v60, %v11069_v35  ;;  %v11090_v60 = vsel %vm11050_vm10, %v9991_v12, 0.0 }
 0xe29   :  { %v11072_v9 = vsel %vm11050_vm10, %v9982_v29, 0.0 }
 0xe2a   :  { %v11073_v3 = vadd.f32 %v11072_v9, %v11071_v51  ;;  %v24295_v42 = vpop.xlane.xlu1 %9882  ;;  %v9820_v20 = vpop.xlane.xlu0 %9819 }
 0xe2b   :  { %v9984_v18 = vadd.f32 %v9820_v20, %v27727_v13  ;;  %v27737_v13 = vld [vmem:[#allocation330_spill] sm:$0xff] }
 0xe2c   :  { %v11075_v0 = vadd.f32 %v11074_v47, %v11073_v3  ;;  %v11094_v47 = vsel %vm11050_vm10, %v9993_v61, 0.0 }
 0xe2d   :  { %v11076_v49 = vsel %vm11050_vm10, %v9984_v18, 0.0 }
 0xe2e   :  { %v11077_v54 = vadd.f32 %v11076_v49, %v11075_v0  ;;  %v24301_v50 = vpop.xlane.xlu1 %9903  ;;  %v9826_v36 = vpop.xlane.xlu0 %9825 }
 0xe2f   :  { %v9986_v58 = vadd.f32 %v9826_v36, %v27729_v7  ;;  %v27739_v7 = vld [vmem:[#allocation143_spill] sm:$0xff] }
 0xe30   :  { %v11079_v23 = vadd.f32 %v11078_v37, %v11077_v54  ;;  %v11098_v37 = vsel %vm11050_vm10, %v9995_v52, 0.0 }
 0xe31   :  { %v11080_v56 = vsel %vm11050_vm10, %v9986_v58, 0.0 }
 0xe32   :  { %v11081_v43 = vadd.f32 %v11080_v56, %v11079_v23  ;;  %v24308_v5 = vpop.xlane.xlu1 %9900  ;;  %v9832_v62 = vpop.xlane.xlu0 %9831 }
 0xe33   :  { %v9988_v26 = vadd.f32 %v9832_v62, %v27731_v34 }
 0xe34   :  { %v11083_v38 = vadd.f32 %v11082_v55, %v11081_v43  ;;  %v11102_v55 = vsel %vm11050_vm10, %v9997_v25, 0.0 }
 0xe35   :  { %v11084_v2 = vsel %vm11050_vm10, %v9988_v26, 0.0 }
 0xe36   :  { %v11085_v57 = vadd.f32 %v11084_v2, %v11083_v38  ;;  %v24315_v16 = vpop.xlane.xlu1 %9909  ;;  %v9838_v24 = vpop.xlane.xlu0 %9837 }
 0xe37   :  { %v9990_v46 = vadd.f32 %v9838_v24, %v27733_v10  ;;  %v11106_v24 = vsel %vm11050_vm10, %v9999_v4, 0.0 }
 0xe38   :  { %v11087_v11 = vadd.f32 %v11086_v63, %v11085_v57  ;;  %v10001_v63 = vadd.f32 %v24283_v45, %v23582_v17 }
 0xe39   :  { %v11088_v19 = vsel %vm11050_vm10, %v9990_v46, 0.0 }
 0xe3a   :  { %v11089_v40 = vadd.f32 %v11088_v19, %v11087_v11  ;;  %v24322_v35 = vpop.xlane.xlu1 %9906  ;;  %v9844_v33 = vpop.xlane.xlu0 %9843  ;;  %v11110_v11 = vsel %vm11050_vm10, %v10001_v63, 0.0 }
 0xe3b   :  { %v9992_v29 = vadd.f32 %v9844_v33, %v27735_v44  ;;  %v10003_v33 = vadd.f32 %v24289_v39, %v23648_v32 }
 0xe3c   :  { %v11091_v51 = vadd.f32 %v11090_v60, %v11089_v40 }
 0xe3d   :  { %v11092_v9 = vsel %vm11050_vm10, %v9992_v29, 0.0  ;;  %v11114_v61 = vsel %vm11050_vm10, %v10003_v33, 0.0 }
 0xe3e   :  { %v11093_v14 = vadd.f32 %v11092_v9, %v11091_v51  ;;  %v24329_v3 = vpop.xlane.xlu1 %9915  ;;  %v9850_v20 = vpop.xlane.xlu0 %9849  ;;  %v10005_v9 = vadd.f32 %v24295_v42, %v23709_v59  ;;  %v27743_v42 = vld [vmem:[#allocation153_spill] sm:$0xff] }
 0xe3f   :  { %v9994_v18 = vadd.f32 %v9850_v20, %v27737_v13  ;;  %v27741_v20 = vld [vmem:[#allocation195_spill] sm:$0xff] }
 0xe40   :  { %v11095_v0 = vadd.f32 %v11094_v47, %v11093_v14  ;;  %v11118_v41 = vsel %vm11050_vm10, %v10005_v9, 0.0 }
 0xe41   :  { %v11096_v49 = vsel %vm11050_vm10, %v9994_v18, 0.0 }
 0xe42   :  { %v11097_v1 = vadd.f32 %v11096_v49, %v11095_v0  ;;  %v24336_v54 = vpop.xlane.xlu1 %9912  ;;  %v9856_v36 = vpop.xlane.xlu0 %9855  ;;  %v27742_v0 = vld [vmem:[#allocation190_spill] sm:$0xff] }
 0xe43   :  { %v9996_v58 = vadd.f32 %v9856_v36, %v27739_v7 }
 0xe44   :  { %v11099_v23 = vadd.f32 %v11098_v37, %v11097_v1 }
 0xe45   :  { %v11100_v56 = vsel %vm11050_vm10, %v9996_v58, 0.0 }
 0xe46   :  { %v11101_v8 = vadd.f32 %v11100_v56, %v11099_v23  ;;  %v24343_v43 = vpop.xlane.xlu1 %9921  ;;  %v9862_v62 = vpop.xlane.xlu0 %9861  ;;  %v27744_v56 = vld [vmem:[#allocation97_spill] sm:$0xff] }
 0xe47   :  { %v9998_v34 = vadd.f32 %v9862_v62, %v27740_v48  ;;  %v27745_v62 = vld [vmem:[#allocation104_spill] sm:$0xff]  ;;  %v27746_v48 = vld [vmem:[#allocation130_spill] sm:$0xff] }
 0xe48   :  { %v11103_v26 = vadd.f32 %v11102_v55, %v11101_v8 }
 0xe49   :  { %v11104_v38 = vsel %vm11050_vm10, %v9998_v34, 0.0  ;;  %v10011_v34 = vadd.f32 %v24308_v5, %v27746_v48 }
 0xe4a   :  { %v11105_v22 = vadd.f32 %v11104_v38, %v11103_v26  ;;  %v24350_v2 = vpop.xlane.xlu1 %9918  ;;  %v9868_v57 = vpop.xlane.xlu0 %9867 }
 0xe4b   :  { %v10000_v30 = vadd.f32 %v9868_v57, %v23530_v53 }
 0xe4c   :  { %v11107_v12 = vadd.f32 %v11106_v24, %v11105_v22  ;;  %v27747_v24 = vld [vmem:[#allocation183_spill] sm:$0xff] }
 0xe4d   :  { %v11108_v10 = vsel %vm11050_vm10, %v10000_v30, 0.0  ;;  %v10012_v63 = vadd.f32 %v24301_v50, %v27747_v24  ;;  %v27750_v50 = vld [vmem:[#allocation201_spill] sm:$0xff] }
 0xe4e   :  { %v11109_v28 = vadd.f32 %v11108_v10, %v11107_v12  ;;  %v24357_v27 = vpop.xlane.xlu1 %9927  ;;  %v9874_v46 = vpop.xlane.xlu0 %9873  ;;  %v11130_v10 = vsel %vm11050_vm10, %v10011_v34, 0.0 }
 0xe4f   :  { %v10002_v19 = vadd.f32 %v9874_v46, %v23598_v21  ;;  %v11132_v5 = vsel %vm11050_vm10, %v10012_v63, 0.0 }
 0xe50   :  { %v11111_v40 = vadd.f32 %v11110_v11, %v11109_v28  ;;  %v27748_v28 = vld [vmem:[#allocation206_spill] sm:$0xff] }
 0xe51   :  { %v11112_v60 = vsel %vm11050_vm10, %v10002_v19, 0.0  ;;  %v10013_v46 = vadd.f32 %v24322_v35, %v27748_v28 }
 0xe52   :  { %v11113_v17 = vadd.f32 %v11112_v60, %v11111_v40  ;;  %v24364_v45 = vpop.xlane.xlu1 %9924  ;;  %v9880_v53 = vpop.xlane.xlu0 %9879  ;;  %v27749_v40 = vld [vmem:[#allocation169_spill] sm:$0xff] }
 0xe53   :  { %v10004_v31 = vadd.f32 %v9880_v53, %v23662_v15  ;;  %v10014_v33 = vadd.f32 %v24315_v16, %v27749_v40  ;;  %v11134_v53 = vsel %vm11050_vm10, %v10013_v46, 0.0 }
 0xe54   :  { %v11115_v44 = vadd.f32 %v11114_v61, %v11113_v17 }
 0xe55   :  { %v11116_v21 = vsel %vm11050_vm10, %v10004_v31, 0.0  ;;  %v10015_v31 = vadd.f32 %v24336_v54, %v27750_v50 }
 0xe56   :  { %v24368_v29 = vpop.xlane.xlu1 %9933  ;;  %v9886_v51 = vpop.xlane.xlu0 %9885  ;;  %v11117_v32 = vadd.f32 %v11116_v21, %v11115_v44  ;;  %v27751_v21 = vld [vmem:[#allocation175_spill] sm:$0xff] }
 0xe57   :  { %v10006_v47 = vadd.f32 %v9886_v51, %v27741_v20  ;;  %v11136_v51 = vsel %vm11050_vm10, %v10014_v33, 0.0  ;;  %v10016_v35 = vadd.f32 %v24329_v3, %v27751_v21 }
 0xe58   :  { %v11119_v52 = vadd.f32 %v11118_v41, %v11117_v32  ;;  %v11138_v32 = vsel %vm11050_vm10, %v10015_v31, 0.0 }
 0xe59   :  { %v11120_v18 = vsel %vm11050_vm10, %v10006_v47, 0.0 }
 0xe5a   :  { %v9931_v39 = vpop.xlane.xlu1 %9930  ;;  %v9892_v14 = vpop.xlane.xlu0 %9891  ;;  %v11121_v36 = vadd.f32 %v11120_v18, %v11119_v52  ;;  %v11140_v52 = vsel %vm11050_vm10, %v10016_v35, 0.0 }
 0xe5b   :  { %v10008_v6 = vadd.f32 %v9892_v14, %v27743_v42  ;;  %v27752_v14 = vld [vmem:[#allocation123_spill] sm:$0xff]  ;;  %v27755_v42 = vld [vmem:[#allocation193_spill] sm:$0xff] }
 0xe5c   :  { %v10017_v16 = vadd.f32 %v24350_v2, %v27752_v14  ;;  %v10020_v2 = vadd.f32 %v24357_v27, %v27755_v42  ;;  %v27757_v42 = vmov 0.0  }
 0xe5d   :  { %v11124_v23 = vsel %vm11050_vm10, %v10008_v6, 0.0  ;;  %67 = vst.msk [vmem:[#allocation4] sm:$0x1] %vm66_vm11, %v27757_v42 }
 0xe5e   :  { %v24375_v15 = vpop.xlane.xlu1 %9939  ;;  %v9889_v13 = vpop.xlane.xlu0 %9888 }
 0xe5f   :  { %v10007_v49 = vadd.f32 %v9889_v13, %v27742_v0  ;;  %v27753_v13 = vld [vmem:[#allocation146_spill] sm:$0xff]  ;;  %v11142_v0 = vsel %vm11050_vm10, %v10017_v16, 0.0 }
 0xe60   :  { %v10018_v54 = vadd.f32 %v24343_v43, %v27753_v13 }
 0xe61   :  { %v11122_v1 = vsel %vm11050_vm10, %v10007_v49, 0.0  ;;  %v27754_v49 = vld [vmem:[#allocation135_spill] sm:$0xff] }
 0xe62   :  { %v9937_v37 = vpop.xlane.xlu1 %9936  ;;  %v9898_v59 = vpop.xlane.xlu0 %9897  ;;  %v11123_v25 = vadd.f32 %v11122_v1, %v11121_v36  ;;  %v10019_v3 = vadd.f32 %v24364_v45, %v27754_v49 }
 0xe63   :  { %v10010_v8 = vadd.f32 %v9898_v59, %v27744_v56  ;;  %v11144_v59 = vsel %vm11050_vm10, %v10018_v54, 0.0 }
 0xe64   :  { %v11125_v4 = vadd.f32 %v11124_v23, %v11123_v25  ;;  %v27756_v23 = vld [vmem:[#allocation162_spill] sm:$0xff] }
 0xe65   :  { %v11128_v30 = vsel %vm11050_vm10, %v10010_v8, 0.0  ;;  %v10021_v56 = vadd.f32 %v9931_v39, %v27756_v23 }
 0xe66   :  { %v24381_v7 = vpop.xlane.xlu1 %9945  ;;  %v9895_v58 = vpop.xlane.xlu0 %9894 }
 0xe67   :  { %v10009_v55 = vadd.f32 %v9895_v58, %v27745_v62  ;;  %v11146_v58 = vsel %vm11050_vm10, %v10019_v3, 0.0  ;;  %v11148_v62 = vsel %vm11050_vm10, %v10020_v2, 0.0 }
 0xe69   :  { %v11126_v26 = vsel %vm11050_vm10, %v10009_v55, 0.0 }
 0xe6a   :  { %v11127_v38 = vadd.f32 %v11126_v26, %v11125_v4  ;;  %v9943_v22 = vpop.xlane.xlu1 %9942  ;;  %v5218_v57 = vpop.xlane.xlu0 %5217  ;;  %v11150_v4 = vsel %vm11050_vm10, %v10021_v56, 0.0 }
 0xe6b   :  { %v10022_v55 = vadd.f32 %v24368_v29, %v5218_v57 }
 0xe6c   :  { %v11129_v12 = vadd.f32 %v11128_v30, %v11127_v38 }
 0xe6d   :  { %v11152_v27 = vsel %vm11050_vm10, %v10022_v55, 0.0 }
 0xe6e   :  { %v11131_v11 = vadd.f32 %v11130_v10, %v11129_v12  ;;  %v5221_v19 = vpop.xlane.xlu0 %5220  ;;  %v9952_v17 = vpop.xlane.xlu1 %9951 }
 0xe6f   :  { %v10023_v48 = vadd.f32 %v9937_v37, %v5221_v19 }
 0xe70   :  { %v11133_v60 = vadd.f32 %v11132_v5, %v11131_v11 }
 0xe71   :  { %v11154_v39 = vsel %vm11050_vm10, %v10023_v48, 0.0 }
 0xe72   :  { %v11135_v61 = vadd.f32 %v11134_v53, %v11133_v60  ;;  %v5224_v44 = vpop.xlane.xlu0 %5223  ;;  %v9949_v47 = vpop.xlane.xlu1 %9948 }
 0xe73   :  { %v10024_v24 = vadd.f32 %v24375_v15, %v5224_v44 }
 0xe74   :  { %v11137_v9 = vadd.f32 %v11136_v51, %v11135_v61 }
 0xe75   :  { %v11156_v28 = vsel %vm11050_vm10, %v10024_v24, 0.0 }
 0xe76   :  { %v11139_v20 = vadd.f32 %v11138_v32, %v11137_v9  ;;  %v5227_v41 = vpop.xlane.xlu0 %5226  ;;  %v9958_v25 = vpop.xlane.xlu1 %9957 }
 0xe77   :  { %v10025_v30 = vadd.f32 %v9943_v22, %v5227_v41 }
 0xe78   :  { %v11141_v18 = vadd.f32 %v11140_v52, %v11139_v20 }
 0xe79   :  { %v11158_v37 = vsel %vm11050_vm10, %v10025_v30, 0.0 }
 0xe7a   :  { %v11143_v1 = vadd.f32 %v11142_v0, %v11141_v18  ;;  %v5230_v36 = vpop.xlane.xlu0 %5229  ;;  %v9955_v26 = vpop.xlane.xlu1 %9954 }
 0xe7b   :  { %v10026_v29 = vadd.f32 %v24381_v7, %v5230_v36 }
 0xe7c   :  { %v11145_v6 = vadd.f32 %v11144_v59, %v11143_v1 }
 0xe7d   :  { %v11160_v40 = vsel %vm11050_vm10, %v10026_v29, 0.0 }
 0xe7e   :  { %v11147_v43 = vadd.f32 %v11146_v58, %v11145_v6  ;;  %v5233_v8 = vpop.xlane.xlu0 %5232  ;;  %v9964_v46 = vpop.xlane.xlu1 %9963 }
 0xe7f   :  { %v10027_v11 = vadd.f32 %v9949_v47, %v5233_v8 }
 0xe80   :  { %v11149_v45 = vadd.f32 %v11148_v62, %v11147_v43 }
 0xe81   :  { %v11162_v60 = vsel %vm11050_vm10, %v10027_v11, 0.0 }
 0xe82   :  { %v11151_v34 = vadd.f32 %v11150_v4, %v11149_v45  ;;  %v5236_v38 = vpop.xlane.xlu0 %5235  ;;  %v9961_v50 = vpop.xlane.xlu1 %9960 }
 0xe83   :  { %v10028_v15 = vadd.f32 %v9952_v17, %v5236_v38 }
 0xe84   :  { %v11153_v63 = vadd.f32 %v11152_v27, %v11151_v34 }
 0xe85   :  { %v11164_v61 = vsel %vm11050_vm10, %v10028_v15, 0.0 }
 0xe86   :  { %v11155_v12 = vadd.f32 %v11154_v39, %v11153_v63  ;;  %v5239_v10 = vpop.xlane.xlu0 %5238  ;;  %v9967_v17 = vpop.xlane.xlu1 %9966 }
 0xe87   :  { %v10029_v22 = vadd.f32 %v9955_v26, %v5239_v10 }
 0xe88   :  { %v11157_v57 = vadd.f32 %v11156_v28, %v11155_v12 }
 0xe89   :  { %v11166_v51 = vsel %vm11050_vm10, %v10029_v22, 0.0 }
 0xe8a   :  { %v11159_v19 = vadd.f32 %v11158_v37, %v11157_v57  ;;  %v5242_v5 = vpop.xlane.xlu0 %5241  ;;  %v9970_v0 = vpop.xlane.xlu1 %9969 }
 0xe8b   :  { %v10030_v7 = vadd.f32 %v9958_v25, %v5242_v5 }
 0xe8c   :  { %v11161_v33 = vadd.f32 %v11160_v40, %v11159_v19 }
 0xe8d   :  { %v11168_v32 = vsel %vm11050_vm10, %v10030_v7, 0.0 }
 0xe8e   :  { %v11163_v53 = vadd.f32 %v11162_v60, %v11161_v33  ;;  %v5245_v31 = vpop.xlane.xlu0 %5244 }
 0xe8f   :  { %v10031_v21 = vadd.f32 %v9961_v50, %v5245_v31 }
 0xe90   :  { %v11165_v44 = vadd.f32 %v11164_v61, %v11163_v53 }
 0xe91   :  { %v11170_v20 = vsel %vm11050_vm10, %v10031_v21, 0.0 }
 0xe92   :  { %v11167_v35 = vadd.f32 %v11166_v51, %v11165_v44  ;;  %v5248_v9 = vpop.xlane.xlu0 %5247 }
 0xe93   :  { %v10032_v14 = vadd.f32 %v9964_v46, %v5248_v9 }
 0xe94   :  { %v11169_v16 = vadd.f32 %v11168_v32, %v11167_v35 }
 0xe95   :  { %v11172_v52 = vsel %vm11050_vm10, %v10032_v14, 0.0 }
 0xe96   :  { %v11171_v47 = vadd.f32 %v11170_v20, %v11169_v16  ;;  %v5251_v41 = vpop.xlane.xlu0 %5250 }
 0xe97   :  { %v10033_v13 = vadd.f32 %v9967_v17, %v5251_v41 }
 0xe98   :  { %v11173_v54 = vadd.f32 %v11172_v52, %v11171_v47 }
 0xe99   :  { %v11174_v18 = vsel %vm11050_vm10, %v10033_v13, 0.0 }
 0xe9a   :  { %v5254_v49 = vpop.xlane.xlu0 %5253  ;;  %v11175_v1 = vadd.f32 %v11174_v18, %v11173_v54 }
 0xe9b   :  { %v10034_v3 = vadd.f32 %v9970_v0, %v5254_v49 }
 0xe9d   :  { %v11176_v36 = vsel %vm11050_vm10, %v10034_v3, 0.0 }
 0xe9e   :  { %v11177_v59 = vadd.f32 %v11176_v36, %v11175_v1 }
 0xea0   :  { %11178 = vadd.xlane.f32.xlu0 %v11177_v59 }
 0xea1   :  { %15504 = shalt.err (!%p15501_p4)
}
 0xea2   :  { %s15505_s6 = scalar_lea.hbm %s24467_s4, 8192 }
 0xea3   :  { %p15506_p5 = scmp.ne.s32.totalorder %s24467_s4, %s15505_s6  ;;  %p15509_p6 = scmp.lt.u32.totalorder %s15505_s6, %s24467_s4 }
 0xea5   :  { %p15511_p7 = pnand %p15509_p6, %p15506_p5 }
 0xea7   :  { %15514 = shalt.err (!%p15511_p7)
}
 0xea8   :  { %s15547_s14 = smov 128   ;;  %s15548_s15 = smov 8   ;;  %v10985_v8 = vld [vmem:[#allocation4] sm:$0x1] }
 0xea9   :  { %11212 = dma.vmem_to_hbm [thread:$0]  %s11207_s27, 8192, %s24467_s4, [#allocation3], %s15547_s14, %s15547_s14, %s15548_s15  }
 0xeaa   :  { %s15549_s18 = smov [#allocation4]  }
 0xeab   :  { %s11225_s19 = sshll.u32 %s15549_s18, 4  ;;  %s11226_s19 = int_to_ptr.vmem [resolvable:$true] %s11225_s19 }
 0xeac   :  { %s15515_s21 = scalar_lea.vmem %s11226_s19, 16  ;;  %s15519_s4 = scalar_lea.vmem %s11226_s19, 32 }
 0xead   :  { %p15516_p8 = scmp.ne.s32.totalorder %s11226_s19, %s15515_s21  ;;  %p15520_p9 = scmp.lt.s32.totalorder %s11226_s19, %s11226_s19 }
 0xeae   :  { %p15521_p10 = scmp.lt.s32.totalorder %s15519_s4, %s15515_s21 }
 0xeb0   :  { %p15522_p11 = por %p15521_p10, %p15520_p9 }
 0xeb2   :  { %p15523_p12 = pnand %p15522_p11, %p15516_p8 }
 0xf2d   :  { %v11179_v2 = vpop.xlane.xlu0 %11178 }
 0xf2e   :  { %v11180_v6 = vrot.slane %v11179_v2, 4 }
 0xf30   :  { %v11181_v25 = vadd.f32 %v11180_v6, %v11179_v2 }
 0xf32   :  { %v11182_v58 = vrot.slane %v11181_v25, 2 }
 0xf34   :  { %v11183_v23 = vadd.f32 %v11182_v58, %v11181_v25 }
 0xf36   :  { %v11184_v56 = vrot.slane %v11183_v23, 1 }
 0xf38   :  { %v11185_v43 = vadd.f32 %v11184_v56, %v11183_v23 }
 0xf3a   :  { %15385 = vpush %v11185_v43 }
 0xf6b   :  { %s15386_s20 = spop %15385 }
 0xf6c   :  { %v11187_v62 = vstv %s15386_s20 }
 0xf6d   :  { %v11188_v55 = vadd.f32 %v11187_v62, %v10985_v8 }
 0xf6f   :  { %11190 = vst.msk [vmem:[#allocation4] sm:$0x1] %vm66_vm11, %v11188_v55 }
 0xf70   :  { %15526 = shalt.err (!%p15523_p12)
}
 0xf71   :  { %s15527_s23 = scalar_lea.hbm %s24470_s7, 16 }
 0xf72   :  { %p15528_p13 = scmp.ne.s32.totalorder %s24470_s7, %s15527_s23  ;;  %p15531_p0 = scmp.lt.u32.totalorder %s15527_s23, %s24470_s7 }
 0xf74   :  { %p15533_p1 = pnand %p15531_p0, %p15528_p13 }
 0xf76   :  { %15536 = shalt.err (!%p15533_p1)
}
 0xf77   :  { %11228 = dma.vmem_to_hbm [thread:$0]  %s11226_s19, 16, %s24470_s7, [#allocation5]  }
 0xf78   :  { %15537 = dma.done.wait [#allocation3], 8192  }
 0xf79   :  { %15538 = vsyncadd [#allocation3], 4294959104 }
 0xf7a   :  { %15539 = dma.done.wait [#allocation5], 16  }
 0xf7b   :  { %15540 = vsyncadd [#allocation5], 4294967280 }
 0xf7c   :  { %11245 = vsyncpa [#allocation3], 1 }
 0xf7d   :  { %11246 = vsyncpa [#allocation5], 1 }

</bundles_post_ra>
